<compile_context>
chip_gen: v6e
topology: v6e:2x2x1
jax: 0.10.0
libtpu: 0.0.40
codegen_flags: <defaults>
</compile_context>

<pallas_src>
import math
import jax
import jax.numpy as jnp
from jax import lax
from jax.experimental import pallas as pl
from jax.experimental.pallas import tpu as pltpu


def _mlp_kernel(x_ref, w1_ref, b1_ref, w2_ref, b2_ref, w3_ref, b3_ref, o_ref):
    # fc1: [TB,30] @ [30,256] (bf16 MXU, f32 acc) + b1, relu.
    x = x_ref[...].astype(jnp.bfloat16)
    h = jnp.dot(x, w1_ref[...], preferred_element_type=jnp.float32) + b1_ref[...]
    h = jnp.maximum(h, 0.0)
    # (BN1 + secondarydrop are folded into W2/b2 / identity in eval mode.)

    # fc2: [TB,256] @ [256,512] (bf16 MXU, f32 acc) + b2', relu, cast to bf16
    # once for the fc3 matmul.
    h = jnp.dot(h.astype(jnp.bfloat16), w2_ref[...],
                preferred_element_type=jnp.float32) + b2_ref[...]
    h = jnp.maximum(h, 0.0).astype(jnp.bfloat16)
    # (BN2 folded into w3/b3.)

    # fc3 as a lane-dense [1, TB] row: contract w3_row (1,512) with h (TB,512)
    # on the otherwise-idle MXU (A @ B^T form).  Avoids both the degenerate
    # N=1 matmul and a [TB,1] column output.
    z = lax.dot_general(
        w3_ref[...].astype(jnp.bfloat16), h,
        dimension_numbers=(((1,), (1,)), ((), ())),
        preferred_element_type=jnp.float32) + b3_ref[...]

    # Sigmoid: exp on the EUP + approximate reciprocal on the EUP
    # (keeps the divide off the VALU).
    o_ref[...] = pl.reciprocal(1.0 + jnp.exp(-z), approx=True)


def net_256_512_forward(x, params, *, tb=1024):
    """x: [B, 30] float32 (or bfloat16). Returns [B, 1] float32 (eval mode)."""
    B = x.shape[0]
    TB = B if B <= tb else tb          # full-array block for small B, else tile
    num_tiles = pl.cdiv(B, TB)
    Bp = num_tiles * TB                # padded batch (lane-dense output slab)

    if Bp != B:
        # Zero-pad the ragged tail: zero rows flow through relu/sigmoid to a
        # finite constant and are sliced off below (no inf/garbage).
        x = jnp.pad(x, ((0, Bp - B), (0, 0)))

    args = (x, params["w1"], params["b1"], params["w2"], params["b2"],
            params["w3"], params["b3"])

    const = lambda i: (0, 0)           # weights/biases: resident, one DMA total
    in_specs = [
        pl.BlockSpec((TB, 30), lambda i: (i, 0)),    # x batch tiles
        pl.BlockSpec((30, 256), const),              # w1 (bf16)
        pl.BlockSpec((1, 256), const),               # b1
        pl.BlockSpec((256, 512), const),             # w2 (bf16, BN1 folded)
        pl.BlockSpec((1, 512), const),               # b2 (BN1 folded)
        pl.BlockSpec((1, 512), const),               # w3 row (BN2 folded)
        pl.BlockSpec((1, 1), const),                 # b3 (BN2 folded)
    ]
    # Lane-dense output: a (1, Bp) slab, each grid step writes a (1, TB) block.
    out_specs = pl.BlockSpec((1, TB), lambda i: (0, i))

    cost = pl.CostEstimate(
        flops=2 * Bp * (30 * 256 + 256 * 512 + 512),
        transcendentals=2 * Bp,
        bytes_accessed=Bp * 30 * 4 + Bp * 4
        + (30 * 256 + 256 * 512) * 2
        + (256 + 512 + 512 + 1) * 4,
    )

    out_row = pl.pallas_call(
        _mlp_kernel,
        out_shape=jax.ShapeDtypeStruct((1, Bp), jnp.float32),
        grid=(num_tiles,),
        in_specs=in_specs,
        out_specs=out_specs,
        compiler_params=pltpu.CompilerParams(
            dimension_semantics=("parallel",),      # v7x: shard tiles over 2 TCs
            vmem_limit_bytes=32 * 1024 * 1024),     # explicit; safe on v5e/v6e/v7x
        cost_estimate=cost,
    )(*args)

    # Back to the module's (B, 1) column in the wrapper (cheap XLA reshape).
    return out_row.reshape(Bp, 1)[:B]


def _linear_params(key, fan_in, fan_out):
    """Deterministic nn.Linear-style init: U(-1/sqrt(fan_in), 1/sqrt(fan_in))."""
    kw, kb = jax.random.split(key)
    bound = 1.0 / math.sqrt(fan_in)
    w = jax.random.uniform(kw, (fan_in, fan_out), jnp.float32, -bound, bound)
    b = jax.random.uniform(kb, (1, fan_out), jnp.float32, -bound, bound)
    return w, b


def make_params(key):
    k1, k2, k3 = jax.random.split(key, 3)
    w1, b1 = _linear_params(k1, 30, 256)
    w2, b2 = _linear_params(k2, 256, 512)
    w3, b3 = _linear_params(k3, 512, 1)

    eps = 1e-5

    def bn_fold(c):
        # Fresh BatchNorm1d params: gamma=1, beta=0, running_mean=0, running_var=1.
        gamma = jnp.ones((c,), jnp.float32)
        beta = jnp.zeros((c,), jnp.float32)
        mean = jnp.zeros((c,), jnp.float32)
        var = jnp.ones((c,), jnp.float32)
        scale = gamma / jnp.sqrt(var + eps)
        shift = beta - mean * scale
        return scale, shift

    s1, t1 = bn_fold(256)
    s2, t2 = bn_fold(512)

    # Fold BN1 into fc2 (exact: BN sits after the ReLU, purely linear compose):
    #   (relu_out * s1 + t1) @ W2 + b2 == relu_out @ (s1[:,None]*W2) + (t1 @ W2 + b2)
    # NOTE: the t1 @ W2 term must use the *unfolded* W2.
    w2_folded = w2 * s1[:, None]
    b2_folded = b2 + t1[None, :] @ w2

    # Fold BN2 into fc3 and store w3 as a (1, 512) row for the fc3 matmul.
    w3_row = (w3[:, 0] * s2)[None, :]                    # (1, 512)
    b3_folded = (b3 + t2 @ w3).reshape(1, 1)             # (1, 1)

    # b1 cannot be folded across the ReLU and stays as-is.
    # TODO(synk): training-mode BatchNorm (batch statistics) and stochastic
    # dropout are intentionally not reproduced; eval-mode semantics only.
    return dict(
        w1=w1.astype(jnp.bfloat16), b1=b1,
        w2=w2_folded.astype(jnp.bfloat16), b2=b2_folded,
        w3=w3_row, b3=b3_folded,
    )


def ref_forward(x, params):
    """Pure-JAX reference with the same folded params (f32 everywhere)."""
    h = jnp.maximum(x @ params["w1"].astype(jnp.float32) + params["b1"], 0.0)
    h = jnp.maximum(h @ params["w2"].astype(jnp.float32) + params["b2"], 0.0)
    z = jnp.sum(h * params["w3"], axis=-1, keepdims=True) + params["b3"]
    return jax.nn.sigmoid(z)


if __name__ == "__main__":
    key = jax.random.PRNGKey(0)
    kx, kp = jax.random.split(key)

    B = 2048                      # exercises the batch grid (2 tiles of 1024,
                                  # an even tile count so v7x uses both TCs)
    x = jax.random.normal(kx, (B, 30), jnp.float32)
    params = make_params(kp)

    y = net_256_512_forward(x, params, tb=1024)
    y = jax.block_until_ready(y)

    assert y.shape == (B, 1) and y.dtype == jnp.float32
    assert bool(jnp.all(jnp.isfinite(y)))
    # approx reciprocal can overshoot 1.0 by ~1e-4; allow a tiny slack.
    assert bool(jnp.all((y >= -1e-3) & (y <= 1.0 + 1e-3)))

    y_ref = ref_forward(x, params)
    max_err = float(jnp.max(jnp.abs(y - y_ref)))
    assert max_err < 5e-2, f"mismatch vs reference: {max_err}"

    print("KERNEL_OK")
</pallas_src>

<mosaic_0001>
module attributes {stable_mosaic.version = 11 : i64} {
  func.func @_mlp_kernel(%arg0: i32, %arg1: memref<1024x30xf32, #tpu.memory_space<vmem>>, %arg2: memref<30x256xbf16, #tpu.memory_space<vmem>>, %arg3: memref<1x256xf32, #tpu.memory_space<vmem>>, %arg4: memref<256x512xbf16, #tpu.memory_space<vmem>>, %arg5: memref<1x512xf32, #tpu.memory_space<vmem>>, %arg6: memref<1x512xf32, #tpu.memory_space<vmem>>, %arg7: memref<1x1xf32, #tpu.memory_space<vmem>>, %arg8: memref<1x1024xf32, #tpu.memory_space<vmem>>) attributes {dimension_semantics = [#tpu.dimension_semantics<parallel>], iteration_bounds = array<i64: 2>, scalar_prefetch = 0 : i64, scratch_operands = 0 : i64, tpu.core_type = #tpu.core_type<tc>, window_params = [{transform_indices = @transform_0, window_bounds = array<i64: 1024, 30>}, {pipeline_mode = #tpu.pipeline_mode<synchronous>, transform_indices = @transform_1, window_bounds = array<i64: 30, 256>}, {pipeline_mode = #tpu.pipeline_mode<synchronous>, transform_indices = @transform_2, window_bounds = array<i64: 1, 256>}, {pipeline_mode = #tpu.pipeline_mode<synchronous>, transform_indices = @transform_3, window_bounds = array<i64: 256, 512>}, {pipeline_mode = #tpu.pipeline_mode<synchronous>, transform_indices = @transform_4, window_bounds = array<i64: 1, 512>}, {pipeline_mode = #tpu.pipeline_mode<synchronous>, transform_indices = @transform_5, window_bounds = array<i64: 1, 512>}, {pipeline_mode = #tpu.pipeline_mode<synchronous>, transform_indices = @transform_6, window_bounds = array<i64: 1, 1>}, {transform_indices = @transform_7, window_bounds = array<i64: 1, 1024>}]} {
    %c0 = arith.constant 0 : index
    %c0_0 = arith.constant 0 : index
    %0 = vector.load %arg1[%c0, %c0_0] : memref<1024x30xf32, #tpu.memory_space<vmem>>, vector<1024x30xf32>
    %1 = arith.truncf %0 : vector<1024x30xf32> to vector<1024x30xbf16>
    %c0_1 = arith.constant 0 : index
    %c0_2 = arith.constant 0 : index
    %2 = vector.load %arg2[%c0_1, %c0_2] : memref<30x256xbf16, #tpu.memory_space<vmem>>, vector<30x256xbf16>
    %cst = arith.constant dense<0.000000e+00> : vector<1024x256xf32>
    %3 = tpu.matmul %1, %2, %cst {dimension_numbers = #tpu.dot_dimension_numbers<[1], [0], [0], [1], [0, 0, 1, 1], [], []>} : vector<1024x30xbf16>, vector<30x256xbf16>, vector<1024x256xf32> -> vector<1024x256xf32>
    %c0_3 = arith.constant 0 : index
    %c0_4 = arith.constant 0 : index
    %4 = vector.load %arg3[%c0_3, %c0_4] : memref<1x256xf32, #tpu.memory_space<vmem>>, vector<1x256xf32>
    %5 = vector.broadcast %4 : vector<1x256xf32> to vector<1024x256xf32>
    %6 = arith.addf %3, %5 : vector<1024x256xf32>
    %cst_5 = arith.constant 0.000000e+00 : f32
    %7 = vector.broadcast %cst_5 : f32 to vector<1024x256xf32>
    %8 = arith.maximumf %6, %7 : vector<1024x256xf32>
    %9 = arith.truncf %8 : vector<1024x256xf32> to vector<1024x256xbf16>
    %c0_6 = arith.constant 0 : index
    %c0_7 = arith.constant 0 : index
    %10 = vector.load %arg4[%c0_6, %c0_7] : memref<256x512xbf16, #tpu.memory_space<vmem>>, vector<256x512xbf16>
    %cst_8 = arith.constant dense<0.000000e+00> : vector<1024x512xf32>
    %11 = tpu.matmul %9, %10, %cst_8 {dimension_numbers = #tpu.dot_dimension_numbers<[1], [0], [0], [1], [0, 0, 1, 1], [], []>} : vector<1024x256xbf16>, vector<256x512xbf16>, vector<1024x512xf32> -> vector<1024x512xf32>
    %c0_9 = arith.constant 0 : index
    %c0_10 = arith.constant 0 : index
    %12 = vector.load %arg5[%c0_9, %c0_10] : memref<1x512xf32, #tpu.memory_space<vmem>>, vector<1x512xf32>
    %13 = vector.broadcast %12 : vector<1x512xf32> to vector<1024x512xf32>
    %14 = arith.addf %11, %13 : vector<1024x512xf32>
    %cst_11 = arith.constant 0.000000e+00 : f32
    %15 = vector.broadcast %cst_11 : f32 to vector<1024x512xf32>
    %16 = arith.maximumf %14, %15 : vector<1024x512xf32>
    %17 = arith.truncf %16 : vector<1024x512xf32> to vector<1024x512xbf16>
    %c0_12 = arith.constant 0 : index
    %c0_13 = arith.constant 0 : index
    %18 = vector.load %arg6[%c0_12, %c0_13] : memref<1x512xf32, #tpu.memory_space<vmem>>, vector<1x512xf32>
    %19 = arith.truncf %18 : vector<1x512xf32> to vector<1x512xbf16>
    %cst_14 = arith.constant dense<0.000000e+00> : vector<1x1024xf32>
    %20 = tpu.matmul %19, %17, %cst_14 {dimension_numbers = #tpu.dot_dimension_numbers<[1], [1], [0], [0], [0, 0, 1, 0], [], []>} : vector<1x512xbf16>, vector<1024x512xbf16>, vector<1x1024xf32> -> vector<1x1024xf32>
    %c0_15 = arith.constant 0 : index
    %c0_16 = arith.constant 0 : index
    %21 = vector.load %arg7[%c0_15, %c0_16] : memref<1x1xf32, #tpu.memory_space<vmem>>, vector<1x1xf32>
    %22 = vector.broadcast %21 : vector<1x1xf32> to vector<1x1024xf32>
    %23 = arith.addf %20, %22 : vector<1x1024xf32>
    %cst_17 = arith.constant 0.000000e+00 : f32
    %24 = vector.broadcast %cst_17 : f32 to vector<1x1024xf32>
    %25 = arith.subf %24, %23 : vector<1x1024xf32>
    %26 = math.exp %25 : vector<1x1024xf32>
    %cst_18 = arith.constant 1.000000e+00 : f32
    %27 = vector.broadcast %cst_18 : f32 to vector<1x1024xf32>
    %28 = arith.addf %27, %26 : vector<1x1024xf32>
    %29 = tpu.reciprocal %28 {approx = true} : vector<1x1024xf32> -> vector<1x1024xf32>
    %c0_19 = arith.constant 0 : index
    %c0_20 = arith.constant 0 : index
    %30 = vector.load %arg8[%c0_19, %c0_20] : memref<1x1024xf32, #tpu.memory_space<vmem>>, vector<1x1024xf32>
    tpu.vector_store %arg8[%c0_19, %c0_20], %29 {strides = array<i32>} : memref<1x1024xf32, #tpu.memory_space<vmem>>, vector<1x1024xf32>,
    return
  }
  func.func @transform_0(%arg0: i32) -> (i32, i32) {
    %c0_i32 = arith.constant 0 : i32
    %c0_i32_0 = arith.constant 0 : i32
    return %arg0, %c0_i32 : i32, i32
  }
  func.func @transform_1(%arg0: i32) -> (i32, i32) {
    %c0_i32 = arith.constant 0 : i32
    %c0_i32_0 = arith.constant 0 : i32
    %c0_i32_1 = arith.constant 0 : i32
    return %c0_i32, %c0_i32_0 : i32, i32
  }
  func.func @transform_2(%arg0: i32) -> (i32, i32) {
    %c0_i32 = arith.constant 0 : i32
    %c0_i32_0 = arith.constant 0 : i32
    %c0_i32_1 = arith.constant 0 : i32
    return %c0_i32, %c0_i32_0 : i32, i32
  }
  func.func @transform_3(%arg0: i32) -> (i32, i32) {
    %c0_i32 = arith.constant 0 : i32
    %c0_i32_0 = arith.constant 0 : i32
    %c0_i32_1 = arith.constant 0 : i32
    return %c0_i32, %c0_i32_0 : i32, i32
  }
  func.func @transform_4(%arg0: i32) -> (i32, i32) {
    %c0_i32 = arith.constant 0 : i32
    %c0_i32_0 = arith.constant 0 : i32
    %c0_i32_1 = arith.constant 0 : i32
    return %c0_i32, %c0_i32_0 : i32, i32
  }
  func.func @transform_5(%arg0: i32) -> (i32, i32) {
    %c0_i32 = arith.constant 0 : i32
    %c0_i32_0 = arith.constant 0 : i32
    %c0_i32_1 = arith.constant 0 : i32
    return %c0_i32, %c0_i32_0 : i32, i32
  }
  func.func @transform_6(%arg0: i32) -> (i32, i32) {
    %c0_i32 = arith.constant 0 : i32
    %c0_i32_0 = arith.constant 0 : i32
    %c0_i32_1 = arith.constant 0 : i32
    return %c0_i32, %c0_i32_0 : i32, i32
  }
  func.func @transform_7(%arg0: i32) -> (i32, i32) {
    %c0_i32 = arith.constant 0 : i32
    %c0_i32_0 = arith.constant 0 : i32
    return %c0_i32, %arg0 : i32, i32
  }
}

</mosaic_0001>

<bundles_post_ra>
// kernel: tpu_custom_call.1
= control target key start
LH: loop header
LB: loop body
LE: loop exit
PB: predicated region body
PF: predicated region fallthrough
CT: control target
= control target key end

     0   :  { %s8097_s0 = inlined_call_operand.vmem [shape: f32[2048,30], index: 0, kind: input, shape index: {}]   ;;  %s8098_s1 = inlined_call_operand.vmem [shape: bf16[30,256], index: 1, kind: input, shape index: {}]   ;;  %s8099_s2 = inlined_call_operand.vmem [shape: f32[1,256], index: 2, kind: input, shape index: {}]   ;;  %s8100_s3 = inlined_call_operand.vmem [shape: bf16[256,512], index: 3, kind: input, shape index: {}]   ;;  %s8101_s4 = inlined_call_operand.vmem [shape: f32[1,512], index: 4, kind: input, shape index: {}]   ;;  %s8102_s5 = inlined_call_operand.vmem [shape: f32[1,512], index: 5, kind: input, shape index: {}]   ;;  %s8103_s6 = inlined_call_operand.<no memory space> [shape: f32[1,1], index: 6, kind: input, shape index: {}]   ;;  %s8104_s7 = inlined_call_operand.hbm [shape: f32[1,2048], index: 7, kind: output, shape index: {}]  }
   0x1   :  { %v12_v0 = vstv %s8103_s6 }
   0x2   :  { %13 = vst [vmem:[#allocation2] sm:$0x1] %v12_v0 }
   0x3   :  { %14 = vsyncpa [#allocation4], 0 }
   0x4   :  { %16 = vsyncpa [#allocation4 + $0x1], 0  ;;  %s5255_s26 = smov 0   ;;  %s5257_s27 = smov 0  }
   0x5   :  { %s5259_s28 = smov 0   ;;  %s5261_s29 = smov 0  }
   0x6 LB: > { %s4822_s6 = sadd.s32 4294967295, %s5207_s29   ;;  %s4823_s30 = sadd.s32 4294967294, %s5207_s29   ;;  %s5207_s29 = sphi %s5261_s29, %s8642_s29   ;;  %s5203_s28 = sphi %s5259_s28, %s8641_s28   ;;  %s5199_s27 = sphi %s5257_s27, %s8640_s27   ;;  %s5195_s26 = sphi %s5255_s26, %s8639_s26  }
   0x7   : > { %s5278_s8 = sadd.s32 1, %s5207_s29   ;;  %s181_s9 = sadd.s32 1, %s5203_s28 }
   0x8   : > { %s178_s10 = ssub.s32 %s5207_s29, %s5278_s8  ;;  %p191_p0 = scmp.ne.s32.totalorder %s5203_s28, %s5199_s27 }
   0x9   : > { %p179_p1 = scmp.eq.s32.totalorder %s178_s10, 0  ;;  %p192_p2 = scmp.eq.s32.totalorder %s4822_s6, 1 }
   0xa   : > { %p197_p3 = scmp.ne.s32.totalorder %s5199_s27, %s5195_s26  ;;  %p198_p4 = scmp.eq.s32.totalorder %s4823_s30, 1 }
   0xb   : > { %s5288_s11 = scalar_select %p179_p1, %s5203_s28, %s181_s9  }
   0xc   : > { %p5290_p5 = por %p192_p2, %p191_p0  ;;  %p5294_p6 = por %p198_p4, %p197_p3 }
   0xd   : > { %p4826_p7 = scmp.ge.s32.totalorder %s5207_s29, 1  ;;  %p243_p8 = scmp.lt.s32.totalorder %s5207_s29, 3 }
   0xf   : > { %p244_p9 = pnand %p4826_p7, %p243_p8 }
  0x11   : > { %247 = sbr.rel (%p244_p9) target bundleno = 1700 (0x6a4), region = 48 }
  0x16   : > { %v5011_v1 = vld [vmem:[%s8098_s1 + $0x14] ss:$8 sps:$4 sm:$0x7f]   ;;  %vm702_vm0 = vcmask 1046528   ;;  %v5014_v3 = vld [vmem:[%s8098_s1 + $0x4] ss:$8 sps:$4 sm:$0xff]  }
  0x17   : > { %v5013_v2 = vld [vmem:[%s8098_s1 + $0x10] ss:$8 sps:$4 sm:$0x7f]   ;;  %4834 = vmatprep.subr.msk.bf16.mxu0 %vm702_vm0, %v5011_v1  ;;  %v5016_v4 = vld [vmem:[%s8098_s1] ss:$8 sps:$4 sm:$0xff]   ;;  %s5312_s22 = sshll.u32 %s4822_s6, 7 }
  0x18   : > { %v704_v5 = vsel %vm702_vm0, %v5013_v2, 0  ;;  %v8113_v6 = vmov 0   ;;  %p276_p10 = scmp.lt.s32.totalorder %s5312_s22, 255  ;;  %vm509_vm1 = vcmask 244736   ;;  %v5017_v15 = vld [vmem:[%s8100_s3 + $0xe4] ss:$16 sps:$4 sm:$0xff]   ;;  %s4762_s15 = scalar_lea.hbm %s8104_s7, %s5312_s22 }
  0x19   : > { %741 = vmatprep.mubr.bf16.mxu0 %v8113_v6  ;;  %5010 = vset.pattern.permute.xlu0 %v8113_v6  ;;  %v5019_v16 = vld [vmem:[%s8100_s3 + $0xe0] ss:$16 sps:$4 sm:$0xff]   ;;  %v5020_v18 = vld [vmem:[%s8100_s3 + $0xc4] ss:$16 sps:$4 sm:$0xff]  }
  0x1a   : > { %722 = vmatpush1.bf16.msra.mxu0 %v704_v5  ;;  %s277_s23 = scalar_select %p276_p10, %s5312_s22, 255  ;;  %2172 = vmatprep.subr.bf16.mxu1 %v5017_v15  ;;  %v5022_v19 = vld [vmem:[%s8100_s3 + $0xc0] ss:$16 sps:$4 sm:$0xff]   ;;  %v5023_v20 = vld [vmem:[%s8100_s3 + $0xa4] ss:$16 sps:$4 sm:$0xff]  }
  0x1b   : > { %723 = vmatprep.subr.bf16.mxu0 %v5014_v3  ;;  %2173 = vmatpush1.bf16.msra.mxu1 %v5019_v16  ;;  %v5025_v23 = vld [vmem:[%s8100_s3 + $0xa0] ss:$16 sps:$4 sm:$0xff]   ;;  %v5026_v25 = vld [vmem:[%s8100_s3 + $0x84] ss:$16 sps:$4 sm:$0xff]  }
  0x1c   : > { %s4829_s24 = sshll.u32 %s277_s23, 3  ;;  %2174 = vmatprep.subr.bf16.mxu1 %v5020_v18  ;;  %v5028_v26 = vld [vmem:[%s8100_s3 + $0x80] ss:$16 sps:$4 sm:$0xff]   ;;  %v5029_v27 = vld [vmem:[%s8100_s3 + $0x64] ss:$16 sps:$4 sm:$0xff]  }
  0x1d   : > { %s5321_s9 = scalar_lea.vmem %s8097_s0, %s4829_s24  ;;  %v5031_v30 = vld [vmem:[%s8100_s3 + $0x60] ss:$16 sps:$4 sm:$0xff]   ;;  %v5032_v32 = vld [vmem:[%s8100_s3 + $0x44] ss:$16 sps:$4 sm:$0xff]   ;;  %s272_s24 = sand.u32 1, %s5199_s27  }
  0x1e   : > { %724 = vmatpush1.bf16.msra.mxu0 %v5016_v4  ;;  %v283_v7 = vld [vmem:[%s5321_s9] sm:$0xff]  ;;  %v284_v8 = vld [vmem:[%s5321_s9 + $0x8] sm:$0xff]  ;;  %v285_v10 = vld [vmem:[%s5321_s9 + $0x10] sm:$0xff]  ;;  %s4827_s25 = sshll.u32 %s272_s24, 3  ;;  %s4750_s16 = scalar_lea.sflag [#allocation4], %s272_s24 }
  0x1f   : > { %v411_v9 = vpack.c.bf16 %v284_v8, %v283_v7  ;;  %v286_v11 = vld [vmem:[%s5321_s9 + $0x18] sm:$0xff]  ;;  %v287_v13 = vld [vmem:[%s5321_s9 + $0x20] sm:$0xff]  ;;  %v288_v14 = vld [vmem:[%s5321_s9 + $0x28] sm:$0xff]  ;;  %2175 = vmatpush1.bf16.msra.mxu1 %v5022_v19  ;;  %s274_s30 = scalar_lea.vmem [#allocation3], %s4827_s25 }
  0x20   : > { %v412_v12 = vpack.c.bf16 %v286_v11, %v285_v10  ;;  %v413_v17 = vpack.c.bf16 %v288_v14, %v287_v13  ;;  %v289_v21 = vld [vmem:[%s5321_s9 + $0x30] sm:$0xff]  ;;  %v290_v22 = vld [vmem:[%s5321_s9 + $0x38] sm:$0xff]  ;;  %2176 = vmatprep.subr.bf16.mxu1 %v5023_v20  ;;  %v291_v28 = vld [vmem:[%s5321_s9 + $0x40] sm:$0xff]  ;;  %s4764_s6 = sshll.u32 %s274_s30, 4  ;;  %s4765_s6 = int_to_ptr.vmem [resolvable:$true] %s4764_s6 }
  0x21   : > { %4835 = vmatmul.mubr.msk.bf16.vlgmr.msra.gmra.mxu0 %vm509_vm1, %v411_v9  ;;  %v414_v24 = vpack.c.bf16 %v290_v22, %v289_v21  ;;  %v292_v29 = vld [vmem:[%s5321_s9 + $0x48] sm:$0xff]  ;;  %v5034_v33 = vld [vmem:[%s8100_s3 + $0x40] ss:$16 sps:$4 sm:$0xff]   ;;  %v5035_v34 = vld [vmem:[%s8100_s3 + $0x24] ss:$16 sps:$4 sm:$0xff]   ;;  %s5147_s17 = scalar_lea.vmem %s4765_s6, 128 }
  0x22   : > { %751 = vmatprep.mubr.bf16.mxu0 %v8113_v6  ;;  %v415_v31 = vpack.c.bf16 %v292_v29, %v291_v28  ;;  %v293_v35 = vld [vmem:[%s5321_s9 + $0x50] sm:$0xff]  ;;  %v294_v36 = vld [vmem:[%s5321_s9 + $0x58] sm:$0xff]  ;;  %v295_v42 = vld [vmem:[%s5321_s9 + $0x60] sm:$0xff]  ;;  %p5148_p11 = scmp.ne.s32.totalorder %s4765_s6, %s5147_s17 }
  0x23   : > { %2177 = vmatpush1.bf16.msra.mxu1 %v5025_v23  ;;  %v5037_v37 = vld [vmem:[%s8100_s3 + $0x20] ss:$16 sps:$4 sm:$0xff]   ;;  %v416_v38 = vpack.c.bf16 %v294_v36, %v293_v35  ;;  %v5038_v39 = vld [vmem:[%s8100_s3 + $0x4] ss:$16 sps:$4 sm:$0xff]   ;;  %v296_v43 = vld [vmem:[%s5321_s9 + $0x68] sm:$0xff] }
  0x24   : > { %2178 = vmatprep.subr.bf16.mxu1 %v5026_v25  ;;  %v5040_v40 = vld [vmem:[%s8100_s3] ss:$16 sps:$4 sm:$0xff]   ;;  %v5041_v41 = vld [vmem:[%s8100_s3 + $0x1e4] ss:$16 sps:$4 sm:$0xff]   ;;  %v417_v45 = vpack.c.bf16 %v296_v43, %v295_v42  ;;  %v298_v50 = vld [vmem:[%s5321_s9 + $0x78] sm:$0xff]  ;;  %p5149_p12 = pnand %p5148_p11, %p5290_p5 }
  0x25   : > { %v5043_v44 = vld [vmem:[%s8100_s3 + $0x1e0] ss:$16 sps:$4 sm:$0xff]   ;;  %v5044_v46 = vld [vmem:[%s8100_s3 + $0x1c4] ss:$16 sps:$4 sm:$0xff]   ;;  %v300_v57 = vld [vmem:[%s5321_s9 + $0x88] sm:$0xff] }
  0x26   : > { %v5046_v47 = vld [vmem:[%s8100_s3 + $0x1c0] ss:$16 sps:$4 sm:$0xff]   ;;  %v5047_v48 = vld [vmem:[%s8100_s3 + $0x1a4] ss:$16 sps:$4 sm:$0xff]   ;;  %v302_v62 = vld [vmem:[%s5321_s9 + $0x98] sm:$0xff]  ;;  %p5150_p13 = pneg %p5149_p12 }
  0x27   : > { %2179 = vmatpush1.bf16.msra.mxu1 %v5028_v26  ;;  %v297_v49 = vld [vmem:[%s5321_s9 + $0x70] sm:$0xff]  ;;  %v299_v56 = vld [vmem:[%s5321_s9 + $0x80] sm:$0xff]  ;;  %v304_v5 = vld [vmem:[%s5321_s9 + $0xa8] sm:$0xff] }
  0x28   : > { %2180 = vmatprep.subr.bf16.mxu1 %v5029_v27  ;;  %v5049_v51 = vld [vmem:[%s8100_s3 + $0x1a0] ss:$16 sps:$4 sm:$0xff]   ;;  %v418_v52 = vpack.c.bf16 %v298_v50, %v297_v49  ;;  %v5050_v53 = vld [vmem:[%s8100_s3 + $0x184] ss:$16 sps:$4 sm:$0xff]   ;;  %v419_v59 = vpack.c.bf16 %v300_v57, %v299_v56  ;;  %v306_v10 = vld [vmem:[%s5321_s9 + $0xb8] sm:$0xff]  ;;  %v481_v56 = vlaneseq }
  0x29   : > { %4836 = vmatmul.mubr.msk.bf16.gmra.mxu0 %vm509_vm1, %v412_v12  ;;  %v5052_v54 = vld [vmem:[%s8100_s3 + $0x180] ss:$16 sps:$4 sm:$0xff]   ;;  %v5053_v55 = vld [vmem:[%s8100_s3 + $0x164] ss:$16 sps:$4 sm:$0xff]   ;;  %v5065_v11 = vld [vmem:[%s8100_s3 + $0xe8] ss:$16 sps:$4 sm:$0xff]  }
  0x2a   : > { %761 = vmatprep.mubr.bf16.mxu0 %v8113_v6  ;;  %v5055_v58 = vld [vmem:[%s8100_s3 + $0x160] ss:$16 sps:$4 sm:$0xff]   ;;  %v5056_v60 = vld [vmem:[%s8100_s3 + $0x144] ss:$16 sps:$4 sm:$0xff]   ;;  %v5067_v12 = vld [vmem:[%s8100_s3 + $0xec] ss:$16 sps:$4 sm:$0xff]  }
  0x2b   : > { %2181 = vmatpush1.bf16.msra.mxu1 %v5031_v30  ;;  %v301_v61 = vld [vmem:[%s5321_s9 + $0x90] sm:$0xff]  ;;  %v303_v4 = vld [vmem:[%s5321_s9 + $0xa0] sm:$0xff]  ;;  %2845 = vmatprep.subr.bf16.mxu0 %v5067_v12  ;;  %v308_v15 = vld [vmem:[%s5321_s9 + $0xc8] sm:$0xff] }
  0x2c   : > { %2182 = vmatprep.subr.bf16.mxu1 %v5032_v32  ;;  %v5058_v63 = vld [vmem:[%s8100_s3 + $0x140] ss:$16 sps:$4 sm:$0xff]   ;;  %v420_v0 = vpack.c.bf16 %v302_v62, %v301_v61  ;;  %v5059_v1 = vld [vmem:[%s8100_s3 + $0x124] ss:$16 sps:$4 sm:$0xff]   ;;  %v421_v8 = vpack.c.bf16 %v304_v5, %v303_v4  ;;  %2846 = vmatpush1.bf16.msra.mxu0 %v5065_v11  ;;  %v310_v18 = vld [vmem:[%s5321_s9 + $0xd8] sm:$0xff] }
  0x2d   : > { %v5061_v2 = vld [vmem:[%s8100_s3 + $0x120] ss:$16 sps:$4 sm:$0xff]   ;;  %v5062_v3 = vld [vmem:[%s8100_s3 + $0x104] ss:$16 sps:$4 sm:$0xff]   ;;  %v312_v21 = vld [vmem:[%s5321_s9 + $0xe8] sm:$0xff] }
  0x2e   : > { %v5064_v7 = vld [vmem:[%s8100_s3 + $0x100] ss:$16 sps:$4 sm:$0xff]   ;;  %v5068_v25 = vld [vmem:[%s8100_s3 + $0xc8] ss:$16 sps:$4 sm:$0xff]   ;;  %v5070_v26 = vld [vmem:[%s8100_s3 + $0xcc] ss:$16 sps:$4 sm:$0xff]  }
  0x2f   : > { %2183 = vmatpush1.bf16.msra.mxu1 %v5034_v33  ;;  %v305_v9 = vld [vmem:[%s5321_s9 + $0xb0] sm:$0xff]  ;;  %v307_v14 = vld [vmem:[%s5321_s9 + $0xc0] sm:$0xff]  ;;  %2847 = vmatprep.subr.bf16.mxu0 %v5070_v26  ;;  %v316_v29 = vld [vmem:[%s5321_s9 + $0x108] sm:$0xff] }
  0x30   : > { %2184 = vmatprep.subr.bf16.mxu1 %v5035_v34  ;;  %v422_v13 = vpack.c.bf16 %v306_v10, %v305_v9  ;;  %v423_v16 = vpack.c.bf16 %v308_v15, %v307_v14  ;;  %v311_v20 = vld [vmem:[%s5321_s9 + $0xe0] sm:$0xff]  ;;  %v313_v23 = vld [vmem:[%s5321_s9 + $0xf0] sm:$0xff]  ;;  %2848 = vmatpush1.bf16.msra.mxu0 %v5068_v25  ;;  %v318_v32 = vld [vmem:[%s5321_s9 + $0x118] sm:$0xff] }
  0x31   : > { %4837 = vmatmul.mubr.msk.bf16.gmra.mxu0 %vm509_vm1, %v413_v17  ;;  %v309_v17 = vld [vmem:[%s5321_s9 + $0xd0] sm:$0xff]  ;;  %v425_v22 = vpack.c.bf16 %v312_v21, %v311_v20  ;;  %v315_v28 = vld [vmem:[%s5321_s9 + $0x100] sm:$0xff]  ;;  %v320_v35 = vld [vmem:[%s5321_s9 + $0x128] sm:$0xff] }
  0x32   : > { %771 = vmatprep.mubr.bf16.mxu0 %v8113_v6  ;;  %v424_v19 = vpack.c.bf16 %v310_v18, %v309_v17  ;;  %v427_v30 = vpack.c.bf16 %v316_v29, %v315_v28  ;;  %v319_v34 = vld [vmem:[%s5321_s9 + $0x120] sm:$0xff]  ;;  %v324_v43 = vld [vmem:[%s5321_s9 + $0x148] sm:$0xff] }
  0x33   : > { %2185 = vmatpush1.bf16.msra.mxu1 %v5037_v37  ;;  %v429_v36 = vpack.c.bf16 %v320_v35, %v319_v34  ;;  %v321_v37 = vld [vmem:[%s5321_s9 + $0x130] sm:$0xff]  ;;  %v323_v42 = vld [vmem:[%s5321_s9 + $0x140] sm:$0xff]  ;;  %v328_v49 = vld [vmem:[%s5321_s9 + $0x168] sm:$0xff] }
  0x34   : > { %2186 = vmatprep.subr.bf16.mxu1 %v5038_v39  ;;  %v5071_v39 = vld [vmem:[%s8100_s3 + $0xa8] ss:$16 sps:$4 sm:$0xff]   ;;  %v331_v57 = vld [vmem:[%s5321_s9 + $0x180] sm:$0xff] }
  0x35   : > { %v335_v18 = vld [vmem:[%s5321_s9 + $0x1a0] sm:$0xff]  ;;  %v338_v34 = vld [vmem:[%s5321_s9 + $0x1b8] sm:$0xff] }
  0x37   : > { %2187 = vmatpush1.bf16.msra.mxu1 %v5040_v40  ;;  %v5073_v40 = vld [vmem:[%s8100_s3 + $0xac] ss:$16 sps:$4 sm:$0xff]  }
  0x38   : > { %2188 = vmatprep.subr.bf16.mxu1 %v5041_v41  ;;  %2849 = vmatprep.subr.bf16.mxu0 %v5073_v40 }
  0x39   : > { %4838 = vmatmul.mubr.msk.bf16.gmra.mxu0 %vm509_vm1, %v414_v24  ;;  %v314_v24 = vld [vmem:[%s5321_s9 + $0xf8] sm:$0xff] }
  0x3a   : > { %781 = vmatprep.mubr.bf16.mxu0 %v8113_v6  ;;  %v426_v27 = vpack.c.bf16 %v314_v24, %v313_v23  ;;  %2850 = vmatpush1.bf16.msra.mxu0 %v5071_v39 }
  0x3b   : > { %2189 = vmatpush2.bf16.msra.mxu1 %v5043_v44  ;;  %v431_v44 = vpack.c.bf16 %v324_v43, %v323_v42 }
  0x3c   : > { %2190 = vmatprep.subr.bf16.mxu1 %v5044_v46  ;;  %v326_v46 = vld [vmem:[%s5321_s9 + $0x158] sm:$0xff] }
  0x3f   : > { %2191 = vmatpush2.bf16.msra.mxu1 %v5046_v47 }
  0x40   : > { %2192 = vmatprep.subr.bf16.mxu1 %v5047_v48  ;;  %v327_v48 = vld [vmem:[%s5321_s9 + $0x160] sm:$0xff] }
  0x41   : > { %4839 = vmatmul.mubr.msk.bf16.gmra.mxu0 %vm509_vm1, %v415_v31  ;;  %v317_v31 = vld [vmem:[%s5321_s9 + $0x110] sm:$0xff]  ;;  %v433_v50 = vpack.c.bf16 %v328_v49, %v327_v48 }
  0x42   : > { %791 = vmatprep.mubr.bf16.mxu0 %v8113_v6  ;;  %v428_v33 = vpack.c.bf16 %v318_v32, %v317_v31 }
  0x43   : > { %2193 = vmatpush2.bf16.msra.mxu1 %v5049_v51  ;;  %v329_v51 = vld [vmem:[%s5321_s9 + $0x170] sm:$0xff] }
  0x44   : > { %2194 = vmatprep.subr.bf16.mxu1 %v5050_v53  ;;  %v5074_v53 = vld [vmem:[%s8100_s3 + $0x88] ss:$16 sps:$4 sm:$0xff]  }
  0x47   : > { %2195 = vmatpush2.bf16.msra.mxu1 %v5052_v54  ;;  %v5076_v54 = vld [vmem:[%s8100_s3 + $0x8c] ss:$16 sps:$4 sm:$0xff]  }
  0x48   : > { %2196 = vmatprep.subr.bf16.mxu1 %v5053_v55  ;;  %2851 = vmatprep.subr.bf16.mxu0 %v5076_v54  ;;  %v339_v54 = vld [vmem:[%s5321_s9 + $0x1c0] sm:$0xff] }
  0x49   : > { %4840 = vmatmul.mubr.msk.bf16.gmra.mxu0 %vm509_vm1, %v416_v38  ;;  %v322_v38 = vld [vmem:[%s5321_s9 + $0x138] sm:$0xff] }
  0x4a   : > { %801 = vmatprep.mubr.bf16.mxu0 %v8113_v6  ;;  %v430_v41 = vpack.c.bf16 %v322_v38, %v321_v37  ;;  %2852 = vmatpush1.bf16.msra.mxu0 %v5074_v53  ;;  %v5077_v37 = vld [vmem:[%s8100_s3 + $0x68] ss:$16 sps:$4 sm:$0xff]   ;;  %v5079_v38 = vld [vmem:[%s8100_s3 + $0x6c] ss:$16 sps:$4 sm:$0xff]  }
  0x4b   : > { %2197 = vmatpush2.bf16.msra.mxu1 %v5055_v58  ;;  %v332_v58 = vld [vmem:[%s5321_s9 + $0x188] sm:$0xff]  ;;  %2853 = vmatprep.subr.bf16.mxu0 %v5079_v38 }
  0x4c   : > { %2198 = vmatprep.subr.bf16.mxu1 %v5056_v60  ;;  %v435_v60 = vpack.c.bf16 %v332_v58, %v331_v57 }
  0x4e   : > { %2854 = vmatpush1.bf16.msra.mxu0 %v5077_v37 }
  0x4f   : > { %2199 = vmatpush2.bf16.msra.mxu1 %v5058_v63  ;;  %v479_v63 = vld [vmem:[%s8099_s2] sm:$0x3] }
  0x50   : > { %2200 = vmatprep.subr.bf16.mxu1 %v5059_v1 }
  0x51   : > { %4841 = vmatmul.mubr.msk.bf16.gmra.mxu0 %vm509_vm1, %v417_v45  ;;  %v325_v45 = vld [vmem:[%s5321_s9 + $0x150] sm:$0xff] }
  0x52   : > { %811 = vmatprep.mubr.bf16.mxu0 %v8113_v6  ;;  %v432_v47 = vpack.c.bf16 %v326_v46, %v325_v45 }
  0x53   : > { %2201 = vmatpush2.bf16.msra.mxu1 %v5061_v2  ;;  %v333_v2 = vld [vmem:[%s5321_s9 + $0x190] sm:$0xff] }
  0x54   : > { %2202 = vmatprep.subr.bf16.mxu1 %v5062_v3  ;;  %v334_v3 = vld [vmem:[%s5321_s9 + $0x198] sm:$0xff] }
  0x57   : > { %2203 = vmatpush2.bf16.msra.mxu1 %v5064_v7 }
  0x59   : > { %4842 = vmatmul.mubr.msk.bf16.gmra.mxu0 %vm509_vm1, %v418_v52  ;;  %v330_v52 = vld [vmem:[%s5321_s9 + $0x178] sm:$0xff] }
  0x5a   : > { %821 = vmatprep.mubr.bf16.mxu0 %v8113_v6  ;;  %v434_v55 = vpack.c.bf16 %v330_v52, %v329_v51 }
  0x61   : > { %4843 = vmatmul.mubr.msk.bf16.gmra.mxu0 %vm509_vm1, %v419_v59  ;;  %v5541_v59 = vshrl.u32 %v481_v56, 7 }
  0x62   : > { %831 = vmatprep.mubr.bf16.mxu0 %v8113_v6 }
  0x63   : > { %8231 = vst [vmem:[#allocation6_spill] sm:$0xff] %v5541_v59  ;;  %v5544_v61 = vsub.s32 1, %v5541_v59  ;;  %v5547_v62 = vsub.s32 0, %v5541_v59 }
  0x65   : > { %8232 = vst [vmem:[#allocation7_spill] sm:$0xff] %v5544_v61  ;;  %8233 = vst [vmem:[#allocation8_spill] sm:$0xff] %v5547_v62  ;;  %v5554_v1 = vrot.slane %v479_v63, %v5544_v61  ;;  %v5560_v4 = vrot.slane %v479_v63, %v5547_v62 }
  0x69   : > { %4844 = vmatmul.mubr.msk.bf16.gmra.mxu0 %vm509_vm1, %v420_v0 }
  0x6a   : > { %841 = vmatprep.mubr.bf16.mxu0 %v8113_v6 }
  0x71   : > { %4845 = vmatmul.mubr.msk.bf16.gmra.mxu0 %vm509_vm1, %v421_v8  ;;  %v436_v8 = vpack.c.bf16 %v334_v3, %v333_v2 }
  0x72   : > { %851 = vmatprep.mubr.bf16.mxu0 %v8113_v6 }
  0x79   : > { %4846 = vmatmul.mubr.msk.bf16.gmra.mxu0 %vm509_vm1, %v422_v13 }
  0x7a   : > { %861 = vmatprep.mubr.bf16.mxu0 %v8113_v6 }
  0x81   : > { %4847 = vmatmul.mubr.msk.bf16.gmra.mxu0 %vm509_vm1, %v423_v16 }
  0x82   : > { %871 = vmatprep.mubr.bf16.mxu0 %v8113_v6 }
  0x89   : > { %4848 = vmatmul.mubr.msk.bf16.gmra.mxu0 %vm509_vm1, %v424_v19  ;;  %v336_v19 = vld [vmem:[%s5321_s9 + $0x1a8] sm:$0xff] }
  0x8a   : > { %881 = vmatprep.mubr.bf16.mxu0 %v8113_v6  ;;  %v437_v25 = vpack.c.bf16 %v336_v19, %v335_v18 }
  0x91   : > { %4849 = vmatmul.mubr.msk.bf16.gmra.mxu0 %vm509_vm1, %v425_v22 }
  0x92   : > { %891 = vmatprep.mubr.bf16.mxu0 %v8113_v6 }
  0x99   : > { %4850 = vmatmul.mubr.msk.bf16.gmra.mxu0 %vm509_vm1, %v426_v27 }
  0x9a   : > { %901 = vmatprep.mubr.bf16.mxu0 %v8113_v6 }
  0xa1   : > { %4851 = vmatmul.mubr.msk.bf16.gmra.mxu0 %vm509_vm1, %v427_v30 }
  0xa2   : > { %911 = vmatprep.mubr.bf16.mxu0 %v8113_v6 }
  0xa9   : > { %4852 = vmatmul.mubr.msk.bf16.gmra.mxu0 %vm509_vm1, %v428_v33  ;;  %v337_v33 = vld [vmem:[%s5321_s9 + $0x1b0] sm:$0xff] }
  0xaa   : > { %921 = vmatprep.mubr.bf16.mxu0 %v8113_v6 }
  0xb1   : > { %4853 = vmatmul.mubr.msk.bf16.gmra.mxu0 %vm509_vm1, %v429_v36 }
  0xb2   : > { %931 = vmatprep.mubr.bf16.mxu0 %v8113_v6 }
  0xb9   : > { %4854 = vmatmul.mubr.msk.bf16.gmra.mxu0 %vm509_vm1, %v430_v41 }
  0xba   : > { %941 = vmatprep.mubr.bf16.mxu0 %v8113_v6 }
  0xc1   : > { %4855 = vmatmul.mubr.msk.bf16.gmra.mxu0 %vm509_vm1, %v431_v44  ;;  %v438_v44 = vpack.c.bf16 %v338_v34, %v337_v33  ;;  %v344_v33 = vld [vmem:[%s5321_s9 + $0x1e8] sm:$0xff] }
  0xc2   : > { %951 = vmatprep.mubr.bf16.mxu0 %v8113_v6 }
  0xc9   : > { %4856 = vmatmul.mubr.msk.bf16.gmra.mxu0 %vm509_vm1, %v432_v47 }
  0xca   : > { %961 = vmatprep.mubr.bf16.mxu0 %v8113_v6 }
  0xd1   : > { %4857 = vmatmul.mubr.msk.bf16.gmra.mxu0 %vm509_vm1, %v433_v50 }
  0xd2   : > { %971 = vmatprep.mubr.bf16.mxu0 %v8113_v6 }
  0xd9   : > { %4858 = vmatmul.mubr.msk.bf16.gmra.mxu0 %vm509_vm1, %v434_v55  ;;  %v340_v55 = vld [vmem:[%s5321_s9 + $0x1c8] sm:$0xff] }
  0xda   : > { %981 = vmatprep.mubr.bf16.mxu0 %v8113_v6 }
  0xe1   : > { %v743_v0 = vpop.f32.mrf.mxu0  ;;  %4859 = vmatmul.mubr.msk.bf16.gmra.mxu0 %vm509_vm1, %v435_v60 }
  0xe2   : > { %991 = vmatprep.mubr.bf16.mxu0 %v8113_v6  ;;  %v744_v11 = vadd.f32 %v743_v0, %v5560_v4  ;;  %v439_v0 = vpack.c.bf16 %v340_v55, %v339_v54  ;;  %v5082_v54 = vld [vmem:[%s8100_s3 + $0x4c] ss:$16 sps:$4 sm:$0xff]  }
  0xe3   : > { %v745_v5 = vpop.f32.mrf.mxu0  ;;  %2855 = vmatprep.subr.bf16.mxu0 %v5082_v54 }
  0xe4   : > { %v746_v9 = vadd.f32 %v745_v5, %v5554_v1  ;;  %v1382_v20 = vmax.f32 %v744_v11, 0.0 }
  0xe5   : > { %v747_v7 = vpop.f32.mrf.mxu0 }
  0xe6   : > { %v748_v10 = vadd.f32 %v747_v7, %v5560_v4  ;;  %v1383_v16 = vmax.f32 %v746_v9, 0.0 }
  0xe7   : > { %v749_v12 = vpop.f32.mrf.mxu0 }
  0xe8   : > { %v750_v13 = vadd.f32 %v749_v12, %v5554_v1  ;;  %v1384_v14 = vmax.f32 %v748_v10, 0.0 }
  0xe9   : > { %v753_v15 = vpop.f32.mrf.mxu0  ;;  %4860 = vmatmul.mubr.msk.bf16.gmra.mxu0 %vm509_vm1, %v436_v8 }
  0xea   : > { %v1385_v17 = vmax.f32 %v750_v13, 0.0  ;;  %1001 = vmatprep.mubr.bf16.mxu0 %v8113_v6  ;;  %v5572_v23 = vpack.c.bf16 %v1384_v14, %v1382_v20  ;;  %v754_v28 = vadd.f32 %v753_v15, %v5560_v4  ;;  %v341_v13 = vld [vmem:[%s5321_s9 + $0x1d0] sm:$0xff]  ;;  %v342_v14 = vld [vmem:[%s5321_s9 + $0x1d8] sm:$0xff] }
  0xeb   : > { %v755_v21 = vpop.f32.mrf.mxu0  ;;  %v440_v20 = vpack.c.bf16 %v342_v14, %v341_v13  ;;  %v347_v14 = vld [vmem:[%s5321_s9 + $0x200] sm:$0xff] }
  0xec   : > { %v5570_v22 = vpack.c.bf16 %v1385_v17, %v1383_v16  ;;  %v756_v26 = vadd.f32 %v755_v21, %v5554_v1  ;;  %v1386_v39 = vmax.f32 %v754_v28, 0.0 }
  0xed   : > { %v757_v24 = vpop.f32.mrf.mxu0 }
  0xee   : > { %v758_v27 = vadd.f32 %v757_v24, %v5560_v4  ;;  %2204 = vmatprep.mubr.bf16.mxu1 %v5570_v22  ;;  %v1387_v35 = vmax.f32 %v756_v26, 0.0 }
  0xef   : > { %v759_v29 = vpop.f32.mrf.mxu0  ;;  %2205 = vmatmul.mubr.bf16.vlgmr.msra.gmra.mxu1 %v5572_v23 }
  0xf0   : > { %v760_v30 = vadd.f32 %v759_v29, %v5554_v1  ;;  %v1388_v31 = vmax.f32 %v758_v27, 0.0 }
  0xf1   : > { %v763_v32 = vpop.f32.mrf.mxu0  ;;  %4861 = vmatmul.mubr.msk.bf16.gmra.mxu0 %vm509_vm1, %v437_v25 }
  0xf2   : > { %v1389_v36 = vmax.f32 %v760_v30, 0.0  ;;  %1011 = vmatprep.mubr.bf16.mxu0 %v8113_v6  ;;  %v5592_v42 = vpack.c.bf16 %v1388_v31, %v1386_v39  ;;  %v764_v47 = vadd.f32 %v763_v32, %v5560_v4  ;;  %v343_v32 = vld [vmem:[%s5321_s9 + $0x1e0] sm:$0xff] }
  0xf3   : > { %v765_v40 = vpop.f32.mrf.mxu0  ;;  %v441_v39 = vpack.c.bf16 %v344_v33, %v343_v32 }
  0xf4   : > { %v5590_v41 = vpack.c.bf16 %v1389_v36, %v1387_v35  ;;  %v766_v45 = vadd.f32 %v765_v40, %v5554_v1  ;;  %v1390_v56 = vmax.f32 %v764_v47, 0.0 }
  0xf5   : > { %v767_v43 = vpop.f32.mrf.mxu0 }
  0xf6   : > { %v768_v46 = vadd.f32 %v767_v43, %v5560_v4  ;;  %2214 = vmatprep.mubr.bf16.mxu1 %v5590_v41  ;;  %v1391_v52 = vmax.f32 %v766_v45, 0.0 }
  0xf7   : > { %v769_v48 = vpop.f32.mrf.mxu0  ;;  %2215 = vmatmul.mubr.bf16.gmra.mxu1 %v5592_v42 }
  0xf8   : > { %v770_v49 = vadd.f32 %v769_v48, %v5554_v1  ;;  %v1392_v50 = vmax.f32 %v768_v46, 0.0 }
  0xf9   : > { %v773_v51 = vpop.f32.mrf.mxu0  ;;  %4862 = vmatmul.mubr.msk.bf16.gmra.mxu0 %vm509_vm1, %v438_v44 }
  0xfa   : > { %v1393_v53 = vmax.f32 %v770_v49, 0.0  ;;  %1021 = vmatprep.mubr.bf16.mxu0 %v8113_v6  ;;  %v5606_v60 = vpack.c.bf16 %v1392_v50, %v1390_v56  ;;  %v774_v5 = vadd.f32 %v773_v51, %v5560_v4  ;;  %v345_v49 = vld [vmem:[%s5321_s9 + $0x1f0] sm:$0xff]  ;;  %v346_v50 = vld [vmem:[%s5321_s9 + $0x1f8] sm:$0xff] }
  0xfb   : > { %v775_v57 = vpop.f32.mrf.mxu0 }
  0xfc   : > { %v5604_v58 = vpack.c.bf16 %v1393_v53, %v1391_v52  ;;  %v776_v2 = vadd.f32 %v775_v57, %v5554_v1  ;;  %v1394_v15 = vmax.f32 %v774_v5, 0.0  ;;  %v5080_v53 = vld [vmem:[%s8100_s3 + $0x48] ss:$16 sps:$4 sm:$0xff]  }
  0xfd   : > { %v777_v63 = vpop.f32.mrf.mxu0  ;;  %2856 = vmatpush1.bf16.msra.mxu0 %v5080_v53 }
  0xfe   : > { %v778_v3 = vadd.f32 %v777_v63, %v5560_v4  ;;  %2224 = vmatprep.mubr.bf16.mxu1 %v5604_v58  ;;  %v1395_v11 = vmax.f32 %v776_v2, 0.0  ;;  %v442_v2 = vpack.c.bf16 %v346_v50, %v345_v49 }
  0xff   : > { %v779_v7 = vpop.f32.mrf.mxu0  ;;  %2225 = vmatmul.mubr.bf16.gmra.mxu1 %v5606_v60 }
 0x100   : > { %v780_v8 = vadd.f32 %v779_v7, %v5554_v1  ;;  %v1396_v9 = vmax.f32 %v778_v3, 0.0 }
 0x101   : > { %v783_v10 = vpop.f32.mrf.mxu0  ;;  %4863 = vmatmul.mubr.msk.bf16.gmra.mxu0 %vm509_vm1, %v439_v0 }
 0x102   : > { %v1397_v12 = vmax.f32 %v780_v8, 0.0  ;;  %1031 = vmatprep.mubr.bf16.mxu0 %v8113_v6  ;;  %v5620_v18 = vpack.c.bf16 %v1396_v9, %v1394_v15  ;;  %v784_v25 = vadd.f32 %v783_v10, %v5560_v4  ;;  %v348_v15 = vld [vmem:[%s5321_s9 + $0x208] sm:$0xff] }
 0x103   : > { %v785_v16 = vpop.f32.mrf.mxu0 }
 0x104   : > { %v5618_v17 = vpack.c.bf16 %v1397_v12, %v1395_v11  ;;  %v786_v21 = vadd.f32 %v785_v16, %v5554_v1  ;;  %v1398_v34 = vmax.f32 %v784_v25, 0.0  ;;  %v443_v25 = vpack.c.bf16 %v348_v15, %v347_v14 }
 0x105   : > { %v787_v19 = vpop.f32.mrf.mxu0 }
 0x106   : > { %v788_v24 = vadd.f32 %v787_v19, %v5560_v4  ;;  %2234 = vmatprep.mubr.bf16.mxu1 %v5618_v17  ;;  %v1399_v30 = vmax.f32 %v786_v21, 0.0 }
 0x107   : > { %v789_v26 = vpop.f32.mrf.mxu0  ;;  %2235 = vmatmul.mubr.bf16.gmra.mxu1 %v5620_v18 }
 0x108   : > { %v790_v27 = vadd.f32 %v789_v26, %v5554_v1  ;;  %v1400_v28 = vmax.f32 %v788_v24, 0.0 }
 0x109   : > { %v793_v29 = vpop.f32.mrf.mxu0  ;;  %4864 = vmatmul.mubr.msk.bf16.gmra.mxu0 %vm509_vm1, %v440_v20 }
 0x10a   : > { %v1401_v31 = vmax.f32 %v790_v27, 0.0  ;;  %1041 = vmatprep.mubr.bf16.mxu0 %v8113_v6  ;;  %v5634_v37 = vpack.c.bf16 %v1400_v28, %v1398_v34  ;;  %v794_v44 = vadd.f32 %v793_v29, %v5560_v4 }
 0x10b   : > { %v795_v35 = vpop.f32.mrf.mxu0 }
 0x10c   : > { %v5632_v36 = vpack.c.bf16 %v1401_v31, %v1399_v30  ;;  %v796_v40 = vadd.f32 %v795_v35, %v5554_v1  ;;  %v1402_v55 = vmax.f32 %v794_v44, 0.0  ;;  %v349_v35 = vld [vmem:[%s5321_s9 + $0x210] sm:$0xff] }
 0x10d   : > { %v797_v38 = vpop.f32.mrf.mxu0 }
 0x10e   : > { %v798_v43 = vadd.f32 %v797_v38, %v5560_v4  ;;  %2244 = vmatprep.mubr.bf16.mxu1 %v5632_v36  ;;  %v1403_v51 = vmax.f32 %v796_v40, 0.0  ;;  %v350_v38 = vld [vmem:[%s5321_s9 + $0x218] sm:$0xff] }
 0x10f   : > { %v799_v45 = vpop.f32.mrf.mxu0  ;;  %2245 = vmatmul.mubr.bf16.gmra.mxu1 %v5634_v37 }
 0x110   : > { %v800_v46 = vadd.f32 %v799_v45, %v5554_v1  ;;  %v1404_v47 = vmax.f32 %v798_v43, 0.0 }
 0x111   : > { %v803_v48 = vpop.f32.mrf.mxu0  ;;  %4865 = vmatmul.mubr.msk.bf16.gmra.mxu0 %vm509_vm1, %v441_v39 }
 0x112   : > { %v1405_v52 = vmax.f32 %v800_v46, 0.0  ;;  %1051 = vmatprep.mubr.bf16.mxu0 %v8113_v6  ;;  %v5654_v63 = vpack.c.bf16 %v1404_v47, %v1402_v55  ;;  %v804_v7 = vadd.f32 %v803_v48, %v5560_v4  ;;  %v444_v46 = vpack.c.bf16 %v350_v38, %v349_v35 }
 0x113   : > { %v805_v56 = vpop.f32.mrf.mxu0 }
 0x114   : > { %v5652_v57 = vpack.c.bf16 %v1405_v52, %v1403_v51  ;;  %v806_v3 = vadd.f32 %v805_v56, %v5554_v1  ;;  %v1406_v16 = vmax.f32 %v804_v7, 0.0  ;;  %v351_v56 = vld [vmem:[%s5321_s9 + $0x220] sm:$0xff] }
 0x115   : > { %v807_v0 = vpop.f32.mrf.mxu0 }
 0x116   : > { %v808_v5 = vadd.f32 %v807_v0, %v5560_v4  ;;  %2254 = vmatprep.mubr.bf16.mxu1 %v5652_v57  ;;  %v1407_v12 = vmax.f32 %v806_v3, 0.0  ;;  %v352_v0 = vld [vmem:[%s5321_s9 + $0x228] sm:$0xff] }
 0x117   : > { %v809_v8 = vpop.f32.mrf.mxu0  ;;  %2255 = vmatmul.mubr.bf16.gmra.mxu1 %v5654_v63 }
 0x118   : > { %v810_v9 = vadd.f32 %v809_v8, %v5554_v1  ;;  %v1408_v10 = vmax.f32 %v808_v5, 0.0 }
 0x119   : > { %v813_v11 = vpop.f32.mrf.mxu0  ;;  %4866 = vmatmul.mubr.msk.bf16.gmra.mxu0 %vm509_vm1, %v442_v2 }
 0x11a   : > { %v1409_v13 = vmax.f32 %v810_v9, 0.0  ;;  %1061 = vmatprep.mubr.bf16.mxu0 %v8113_v6  ;;  %v5668_v21 = vpack.c.bf16 %v1408_v10, %v1406_v16  ;;  %v814_v28 = vadd.f32 %v813_v11, %v5560_v4  ;;  %v445_v9 = vpack.c.bf16 %v352_v0, %v351_v56 }
 0x11b   : > { %v815_v19 = vpop.f32.mrf.mxu0 }
 0x11c   : > { %v5666_v20 = vpack.c.bf16 %v1409_v13, %v1407_v12  ;;  %v816_v26 = vadd.f32 %v815_v19, %v5554_v1  ;;  %v1410_v39 = vmax.f32 %v814_v28, 0.0  ;;  %v353_v19 = vld [vmem:[%s5321_s9 + $0x230] sm:$0xff]  ;;  %v5085_v28 = vld [vmem:[%s8100_s3 + $0x2c] ss:$16 sps:$4 sm:$0xff]  }
 0x11d   : > { %v817_v24 = vpop.f32.mrf.mxu0  ;;  %2857 = vmatprep.subr.bf16.mxu0 %v5085_v28 }
 0x11e   : > { %v818_v27 = vadd.f32 %v817_v24, %v5560_v4  ;;  %2264 = vmatprep.mubr.bf16.mxu1 %v5666_v20  ;;  %v1411_v33 = vmax.f32 %v816_v26, 0.0  ;;  %v354_v24 = vld [vmem:[%s5321_s9 + $0x238] sm:$0xff] }
 0x11f   : > { %v819_v29 = vpop.f32.mrf.mxu0  ;;  %2265 = vmatmul.mubr.bf16.gmra.mxu1 %v5668_v21 }
 0x120   : > { %v820_v30 = vadd.f32 %v819_v29, %v5554_v1  ;;  %v1412_v31 = vmax.f32 %v818_v27, 0.0  ;;  %v5083_v27 = vld [vmem:[%s8100_s3 + $0x28] ss:$16 sps:$4 sm:$0xff]  }
 0x121   : > { %v823_v32 = vpop.f32.mrf.mxu0  ;;  %4867 = vmatmul.mubr.msk.bf16.gmra.mxu0 %vm509_vm1, %v443_v25 }
 0x122   : > { %v1413_v34 = vmax.f32 %v820_v30, 0.0  ;;  %1071 = vmatprep.mubr.bf16.mxu0 %v8113_v6  ;;  %v5682_v44 = vpack.c.bf16 %v1412_v31, %v1410_v39  ;;  %v824_v49 = vadd.f32 %v823_v32, %v5560_v4  ;;  %2858 = vmatpush1.bf16.msra.mxu0 %v5083_v27 }
 0x123   : > { %v825_v40 = vpop.f32.mrf.mxu0 }
 0x124   : > { %v5680_v43 = vpack.c.bf16 %v1413_v34, %v1411_v33  ;;  %8235 = vst [vmem:[#allocation10_spill] sm:$0xff] %v5682_v44  ;;  %v826_v47 = vadd.f32 %v825_v40, %v5554_v1  ;;  %v1414_v2 = vmax.f32 %v824_v49, 0.0  ;;  %v446_v34 = vpack.c.bf16 %v354_v24, %v353_v19 }
 0x125   : > { %v827_v45 = vpop.f32.mrf.mxu0 }
 0x126   : > { %8234 = vst [vmem:[#allocation9_spill] sm:$0xff] %v5680_v43  ;;  %v828_v48 = vadd.f32 %v827_v45, %v5560_v4  ;;  %2274 = vmatprep.mubr.bf16.mxu1 %v5680_v43  ;;  %v1415_v54 = vmax.f32 %v826_v47, 0.0 }
 0x127   : > { %v829_v50 = vpop.f32.mrf.mxu0  ;;  %2275 = vmatmul.mubr.bf16.gmra.mxu1 %v5682_v44 }
 0x128   : > { %v830_v51 = vadd.f32 %v829_v50, %v5554_v1  ;;  %v1416_v52 = vmax.f32 %v828_v48, 0.0  ;;  %v355_v50 = vld [vmem:[%s5321_s9 + $0x240] sm:$0xff] }
 0x129   : > { %v833_v53 = vpop.f32.mrf.mxu0  ;;  %4868 = vmatmul.mubr.msk.bf16.gmra.mxu0 %vm509_vm1, %v444_v46 }
 0x12a   : > { %v1417_v55 = vmax.f32 %v830_v51, 0.0  ;;  %1081 = vmatprep.mubr.bf16.mxu0 %v8113_v6  ;;  %v5696_v7 = vpack.c.bf16 %v1416_v52, %v1414_v2  ;;  %v834_v12 = vadd.f32 %v833_v53, %v5560_v4  ;;  %v356_v51 = vld [vmem:[%s5321_s9 + $0x248] sm:$0xff] }
 0x12b   : > { %v835_v3 = vpop.f32.mrf.mxu0  ;;  %v447_v0 = vpack.c.bf16 %v356_v51, %v355_v50 }
 0x12c   : > { %v5694_v5 = vpack.c.bf16 %v1417_v55, %v1415_v54  ;;  %8237 = vst [vmem:[#allocation12_spill] sm:$0xff] %v5696_v7  ;;  %v836_v10 = vadd.f32 %v835_v3, %v5554_v1  ;;  %v1418_v29 = vmax.f32 %v834_v12, 0.0 }
 0x12d   : > { %v837_v8 = vpop.f32.mrf.mxu0 }
 0x12e   : > { %8236 = vst [vmem:[#allocation11_spill] sm:$0xff] %v5694_v5  ;;  %v838_v11 = vadd.f32 %v837_v8, %v5560_v4  ;;  %2284 = vmatprep.mubr.bf16.mxu1 %v5694_v5  ;;  %v1419_v25 = vmax.f32 %v836_v10, 0.0 }
 0x12f   : > { %v839_v13 = vpop.f32.mrf.mxu0  ;;  %2285 = vmatmul.mubr.bf16.gmra.mxu1 %v5696_v7 }
 0x130   : > { %v840_v14 = vadd.f32 %v839_v13, %v5554_v1  ;;  %v1420_v15 = vmax.f32 %v838_v11, 0.0 }
 0x131   : > { %v843_v16 = vpop.f32.mrf.mxu0  ;;  %4869 = vmatmul.mubr.msk.bf16.gmra.mxu0 %vm509_vm1, %v445_v9 }
 0x132   : > { %v1421_v26 = vmax.f32 %v840_v14, 0.0  ;;  %1091 = vmatprep.mubr.bf16.mxu0 %v8113_v6  ;;  %v5716_v32 = vpack.c.bf16 %v1420_v15, %v1418_v29  ;;  %v844_v39 = vadd.f32 %v843_v16, %v5560_v4  ;;  %v357_v15 = vld [vmem:[%s5321_s9 + $0x250] sm:$0xff]  ;;  %v358_v16 = vld [vmem:[%s5321_s9 + $0x258] sm:$0xff] }
 0x133   : > { %v845_v30 = vpop.f32.mrf.mxu0  ;;  %v448_v28 = vpack.c.bf16 %v358_v16, %v357_v15  ;;  %v5086_v15 = vld [vmem:[%s8100_s3 + $0x8] ss:$16 sps:$4 sm:$0xff]   ;;  %v5088_v16 = vld [vmem:[%s8100_s3 + $0xc] ss:$16 sps:$4 sm:$0xff]  }
 0x134   : > { %v5714_v31 = vpack.c.bf16 %v1421_v26, %v1419_v25  ;;  %8239 = vst [vmem:[#allocation14_spill] sm:$0xff] %v5716_v32  ;;  %v846_v35 = vadd.f32 %v845_v30, %v5554_v1  ;;  %v1422_v52 = vmax.f32 %v844_v39, 0.0  ;;  %2859 = vmatprep.subr.bf16.mxu0 %v5088_v16 }
 0x135   : > { %v847_v33 = vpop.f32.mrf.mxu0  ;;  %2860 = vmatpush1.bf16.msra.mxu0 %v5086_v15 }
 0x136   : > { %8238 = vst [vmem:[#allocation13_spill] sm:$0xff] %v5714_v31  ;;  %v848_v38 = vadd.f32 %v847_v33, %v5560_v4  ;;  %2294 = vmatprep.mubr.bf16.mxu1 %v5714_v31  ;;  %v1423_v48 = vmax.f32 %v846_v35, 0.0 }
 0x137   : > { %v849_v40 = vpop.f32.mrf.mxu0  ;;  %2295 = vmatmul.mubr.bf16.gmra.mxu1 %v5716_v32 }
 0x138   : > { %v850_v45 = vadd.f32 %v849_v40, %v5554_v1  ;;  %v1424_v46 = vmax.f32 %v848_v38, 0.0 }
 0x139   : > { %v853_v47 = vpop.f32.mrf.mxu0  ;;  %4870 = vmatmul.mubr.msk.bf16.gmra.mxu0 %vm509_vm1, %v446_v34 }
 0x13a   : > { %v1425_v49 = vmax.f32 %v850_v45, 0.0  ;;  %1101 = vmatprep.mubr.bf16.mxu0 %v8113_v6  ;;  %v5730_v55 = vpack.c.bf16 %v1424_v46, %v1422_v52  ;;  %v854_v8 = vadd.f32 %v853_v47, %v5560_v4  ;;  %v359_v46 = vld [vmem:[%s5321_s9 + $0x260] sm:$0xff]  ;;  %v360_v47 = vld [vmem:[%s5321_s9 + $0x268] sm:$0xff] }
 0x13b   : > { %v855_v53 = vpop.f32.mrf.mxu0 }
 0x13c   : > { %v5728_v54 = vpack.c.bf16 %v1425_v49, %v1423_v48  ;;  %8241 = vst [vmem:[#allocation16_spill] sm:$0xff] %v5730_v55  ;;  %v856_v2 = vadd.f32 %v855_v53, %v5554_v1  ;;  %v1426_v19 = vmax.f32 %v854_v8, 0.0  ;;  %v449_v53 = vpack.c.bf16 %v360_v47, %v359_v46 }
 0x13d   : > { %v857_v56 = vpop.f32.mrf.mxu0 }
 0x13e   : > { %8240 = vst [vmem:[#allocation15_spill] sm:$0xff] %v5728_v54  ;;  %v858_v3 = vadd.f32 %v857_v56, %v5560_v4  ;;  %2304 = vmatprep.mubr.bf16.mxu1 %v5728_v54  ;;  %v1427_v13 = vmax.f32 %v856_v2, 0.0 }
 0x13f   : > { %v859_v9 = vpop.f32.mrf.mxu0  ;;  %2305 = vmatmul.mubr.bf16.gmra.mxu1 %v5730_v55 }
 0x140   : > { %v860_v10 = vadd.f32 %v859_v9, %v5554_v1  ;;  %v1428_v11 = vmax.f32 %v858_v3, 0.0 }
 0x141   : > { %v863_v12 = vpop.f32.mrf.mxu0  ;;  %4871 = vmatmul.mubr.msk.bf16.gmra.mxu0 %vm509_vm1, %v447_v0 }
 0x142   : > { %v1429_v14 = vmax.f32 %v860_v10, 0.0  ;;  %1111 = vmatprep.mubr.bf16.mxu0 %v8113_v6  ;;  %v5744_v26 = vpack.c.bf16 %v1428_v11, %v1426_v19  ;;  %v864_v33 = vadd.f32 %v863_v12, %v5560_v4  ;;  %v361_v11 = vld [vmem:[%s5321_s9 + $0x270] sm:$0xff]  ;;  %v362_v12 = vld [vmem:[%s5321_s9 + $0x278] sm:$0xff] }
 0x143   : > { %v865_v24 = vpop.f32.mrf.mxu0 }
 0x144   : > { %v5742_v25 = vpack.c.bf16 %v1429_v14, %v1427_v13  ;;  %8243 = vst [vmem:[#allocation18_spill] sm:$0xff] %v5744_v26  ;;  %v866_v29 = vadd.f32 %v865_v24, %v5554_v1  ;;  %v1430_v48 = vmax.f32 %v864_v33, 0.0 }
 0x145   : > { %v867_v27 = vpop.f32.mrf.mxu0 }
 0x146   : > { %8242 = vst [vmem:[#allocation17_spill] sm:$0xff] %v5742_v25  ;;  %v868_v30 = vadd.f32 %v867_v27, %v5560_v4  ;;  %2314 = vmatprep.mubr.bf16.mxu1 %v5742_v25  ;;  %v1431_v40 = vmax.f32 %v866_v29, 0.0 }
 0x147   : > { %v869_v34 = vpop.f32.mrf.mxu0  ;;  %2315 = vmatmul.mubr.bf16.gmra.mxu1 %v5744_v26 }
 0x148   : > { %v870_v35 = vadd.f32 %v869_v34, %v5554_v1  ;;  %v1432_v38 = vmax.f32 %v868_v30, 0.0  ;;  %v450_v30 = vpack.c.bf16 %v362_v12, %v361_v11 }
 0x149   : > { %v873_v39 = vpop.f32.mrf.mxu0  ;;  %4872 = vmatmul.mubr.msk.bf16.gmra.mxu0 %vm509_vm1, %v448_v28 }
 0x14a   : > { %v1433_v45 = vmax.f32 %v870_v35, 0.0  ;;  %1121 = vmatprep.mubr.bf16.mxu0 %v8113_v6  ;;  %v5758_v51 = vpack.c.bf16 %v1432_v38, %v1430_v48  ;;  %v874_v2 = vadd.f32 %v873_v39, %v5560_v4  ;;  %v363_v48 = vld [vmem:[%s5321_s9 + $0x280] sm:$0xff] }
 0x14b   : > { %v875_v49 = vpop.f32.mrf.mxu0 }
 0x14c   : > { %v5756_v50 = vpack.c.bf16 %v1433_v45, %v1431_v40  ;;  %8245 = vst [vmem:[#allocation20_spill] sm:$0xff] %v5758_v51  ;;  %v876_v56 = vadd.f32 %v875_v49, %v5554_v1  ;;  %v1434_v19 = vmax.f32 %v874_v2, 0.0  ;;  %v364_v49 = vld [vmem:[%s5321_s9 + $0x288] sm:$0xff] }
 0x14d   : > { %v877_v52 = vpop.f32.mrf.mxu0 }
 0x14e   : > { %8244 = vst [vmem:[#allocation19_spill] sm:$0xff] %v5756_v50  ;;  %v878_v0 = vadd.f32 %v877_v52, %v5560_v4  ;;  %2324 = vmatprep.mubr.bf16.mxu1 %v5756_v50  ;;  %v1435_v13 = vmax.f32 %v876_v56, 0.0 }
 0x14f   : > { %v879_v3 = vpop.f32.mrf.mxu0  ;;  %2325 = vmatmul.mubr.bf16.gmra.mxu1 %v5758_v51 }
 0x150   : > { %v880_v8 = vadd.f32 %v879_v3, %v5554_v1  ;;  %v1436_v9 = vmax.f32 %v878_v0, 0.0  ;;  %v451_v3 = vpack.c.bf16 %v364_v49, %v363_v48 }
 0x151   : > { %v883_v10 = vpop.f32.mrf.mxu0  ;;  %4873 = vmatmul.mubr.msk.bf16.gmra.mxu0 %vm509_vm1, %v449_v53 }
 0x152   : > { %v1437_v14 = vmax.f32 %v880_v8, 0.0  ;;  %1131 = vmatprep.mubr.bf16.mxu0 %v8113_v6  ;;  %v5778_v28 = vpack.c.bf16 %v1436_v9, %v1434_v19  ;;  %v884_v35 = vadd.f32 %v883_v10, %v5560_v4  ;;  %v365_v19 = vld [vmem:[%s5321_s9 + $0x290] sm:$0xff] }
 0x153   : > { %v885_v24 = vpop.f32.mrf.mxu0 }
 0x154   : > { %v5776_v27 = vpack.c.bf16 %v1437_v14, %v1435_v13  ;;  %8247 = vst [vmem:[#allocation22_spill] sm:$0xff] %v5778_v28  ;;  %v886_v33 = vadd.f32 %v885_v24, %v5554_v1  ;;  %v1438_v52 = vmax.f32 %v884_v35, 0.0  ;;  %v366_v24 = vld [vmem:[%s5321_s9 + $0x298] sm:$0xff] }
 0x155   : > { %v887_v29 = vpop.f32.mrf.mxu0 }
 0x156   : > { %8246 = vst [vmem:[#allocation21_spill] sm:$0xff] %v5776_v27  ;;  %v888_v34 = vadd.f32 %v887_v29, %v5560_v4  ;;  %2334 = vmatprep.mubr.bf16.mxu1 %v5776_v27  ;;  %v1439_v46 = vmax.f32 %v886_v33, 0.0 }
 0x157   : > { %v889_v38 = vpop.f32.mrf.mxu0  ;;  %2335 = vmatmul.mubr.bf16.gmra.mxu1 %v5778_v28 }
 0x158   : > { %v890_v39 = vadd.f32 %v889_v38, %v5554_v1  ;;  %v1440_v40 = vmax.f32 %v888_v34, 0.0  ;;  %v452_v38 = vpack.c.bf16 %v366_v24, %v365_v19 }
 0x159   : > { %v893_v45 = vpop.f32.mrf.mxu0  ;;  %4874 = vmatmul.mubr.msk.bf16.gmra.mxu0 %vm509_vm1, %v450_v30 }
 0x15a   : > { %v1441_v47 = vmax.f32 %v890_v39, 0.0  ;;  %1141 = vmatprep.mubr.bf16.mxu0 %v8113_v6  ;;  %v5792_v0 = vpack.c.bf16 %v1440_v40, %v1438_v52  ;;  %v894_v10 = vadd.f32 %v893_v45, %v5560_v4 }
 0x15b   : > { %v895_v53 = vpop.f32.mrf.mxu0 }
 0x15c   : > { %v5790_v56 = vpack.c.bf16 %v1441_v47, %v1439_v46  ;;  %8249 = vst [vmem:[#allocation24_spill] sm:$0xff] %v5792_v0  ;;  %v896_v8 = vadd.f32 %v895_v53, %v5554_v1  ;;  %v1442_v29 = vmax.f32 %v894_v10, 0.0 }
 0x15d   : > { %v897_v2 = vpop.f32.mrf.mxu0 }
 0x15e   : > { %8248 = vst [vmem:[#allocation23_spill] sm:$0xff] %v5790_v56  ;;  %v898_v9 = vadd.f32 %v897_v2, %v5560_v4  ;;  %2344 = vmatprep.mubr.bf16.mxu1 %v5790_v56  ;;  %v1443_v15 = vmax.f32 %v896_v8, 0.0  ;;  %v367_v2 = vld [vmem:[%s5321_s9 + $0x2a0] sm:$0xff] }
 0x15f   : > { %v899_v11 = vpop.f32.mrf.mxu0  ;;  %2345 = vmatmul.mubr.bf16.gmra.mxu1 %v5792_v0 }
 0x160   : > { %v900_v12 = vadd.f32 %v899_v11, %v5554_v1  ;;  %v1444_v13 = vmax.f32 %v898_v9, 0.0 }
 0x161   : > { %v903_v14 = vpop.f32.mrf.mxu0  ;;  %4875 = vmatmul.mubr.msk.bf16.gmra.mxu0 %vm509_vm1, %v451_v3  ;;  %v368_v3 = vld [vmem:[%s5321_s9 + $0x2a8] sm:$0xff] }
 0x162   : > { %v1445_v16 = vmax.f32 %v900_v12, 0.0  ;;  %1151 = vmatprep.mubr.bf16.mxu0 %v8113_v6  ;;  %v5806_v34 = vpack.c.bf16 %v1444_v13, %v1442_v29  ;;  %v904_v45 = vadd.f32 %v903_v14, %v5560_v4  ;;  %v453_v13 = vpack.c.bf16 %v368_v3, %v367_v2 }
 0x163   : > { %v905_v30 = vpop.f32.mrf.mxu0 }
 0x164   : > { %v5804_v33 = vpack.c.bf16 %v1445_v16, %v1443_v15  ;;  %8251 = vst [vmem:[#allocation26_spill] sm:$0xff] %v5806_v34  ;;  %v906_v39 = vadd.f32 %v905_v30, %v5554_v1  ;;  %v1446_v8 = vmax.f32 %v904_v45, 0.0  ;;  %v5089_v45 = vld [vmem:[%s8100_s3 + $0x1e8] ss:$16 sps:$4 sm:$0xff]  }
 0x165   : > { %v907_v35 = vpop.f32.mrf.mxu0 }
 0x166   : > { %8250 = vst [vmem:[#allocation25_spill] sm:$0xff] %v5804_v33  ;;  %v908_v40 = vadd.f32 %v907_v35, %v5560_v4  ;;  %2354 = vmatprep.mubr.bf16.mxu1 %v5804_v33  ;;  %v1447_v52 = vmax.f32 %v906_v39, 0.0  ;;  %v369_v35 = vld [vmem:[%s5321_s9 + $0x2b0] sm:$0xff] }
 0x167   : > { %v909_v46 = vpop.f32.mrf.mxu0  ;;  %2355 = vmatmul.mubr.bf16.gmra.mxu1 %v5806_v34 }
 0x168   : > { %v910_v47 = vadd.f32 %v909_v46, %v5554_v1  ;;  %v1448_v48 = vmax.f32 %v908_v40, 0.0  ;;  %v5091_v46 = vld [vmem:[%s8100_s3 + $0x1ec] ss:$16 sps:$4 sm:$0xff]  }
 0x169   : > { %v913_v49 = vpop.f32.mrf.mxu0  ;;  %4876 = vmatmul.mubr.msk.bf16.gmra.mxu0 %vm509_vm1, %v452_v38  ;;  %v370_v38 = vld [vmem:[%s5321_s9 + $0x2b8] sm:$0xff]  ;;  %2861 = vmatprep.subr.bf16.mxu0 %v5091_v46 }
 0x16a   : > { %v1449_v53 = vmax.f32 %v910_v47, 0.0  ;;  %1161 = vmatprep.mubr.bf16.mxu0 %v8113_v6  ;;  %v5820_v11 = vpack.c.bf16 %v1448_v48, %v1446_v8  ;;  %v914_v16 = vadd.f32 %v913_v49, %v5560_v4  ;;  %v454_v2 = vpack.c.bf16 %v370_v38, %v369_v35  ;;  %2862 = vmatpush2.bf16.msra.mxu0 %v5089_v45 }
 0x16b   : > { %v915_v9 = vpop.f32.mrf.mxu0 }
 0x16c   : > { %v5818_v10 = vpack.c.bf16 %v1449_v53, %v1447_v52  ;;  %8253 = vst [vmem:[#allocation28_spill] sm:$0xff] %v5820_v11  ;;  %v916_v14 = vadd.f32 %v915_v9, %v5554_v1  ;;  %v1450_v47 = vmax.f32 %v914_v16, 0.0 }
 0x16d   : > { %v917_v12 = vpop.f32.mrf.mxu0 }
 0x16e   : > { %8252 = vst [vmem:[#allocation27_spill] sm:$0xff] %v5818_v10  ;;  %v918_v15 = vadd.f32 %v917_v12, %v5560_v4  ;;  %2364 = vmatprep.mubr.bf16.mxu1 %v5818_v10  ;;  %v1451_v39 = vmax.f32 %v916_v14, 0.0 }
 0x16f   : > { %v919_v19 = vpop.f32.mrf.mxu0  ;;  %2365 = vmatmul.mubr.bf16.gmra.mxu1 %v5820_v11 }
 0x170   : > { %v920_v24 = vadd.f32 %v919_v19, %v5554_v1  ;;  %v1452_v29 = vmax.f32 %v918_v15, 0.0 }
 0x171   : > { %v923_v30 = vpop.f32.mrf.mxu0  ;;  %4877 = vmatmul.mubr.msk.bf16.gmra.mxu0 %vm509_vm1, %v453_v13 }
 0x172   : > { %v1453_v40 = vmax.f32 %v920_v24, 0.0  ;;  %1171 = vmatprep.mubr.bf16.mxu0 %v8113_v6  ;;  %v5840_v52 = vpack.c.bf16 %v1452_v29, %v1450_v47  ;;  %v924_v9 = vadd.f32 %v923_v30, %v5560_v4  ;;  %v371_v24 = vld [vmem:[%s5321_s9 + $0x2c0] sm:$0xff]  ;;  %v372_v29 = vld [vmem:[%s5321_s9 + $0x2c8] sm:$0xff] }
 0x173   : > { %v925_v48 = vpop.f32.mrf.mxu0  ;;  %v455_v45 = vpack.c.bf16 %v372_v29, %v371_v24 }
 0x174   : > { %v5838_v49 = vpack.c.bf16 %v1453_v40, %v1451_v39  ;;  %8255 = vst [vmem:[#allocation30_spill] sm:$0xff] %v5840_v52  ;;  %v926_v3 = vadd.f32 %v925_v48, %v5554_v1  ;;  %v1454_v35 = vmax.f32 %v924_v9, 0.0 }
 0x175   : > { %v927_v53 = vpop.f32.mrf.mxu0 }
 0x176   : > { %8254 = vst [vmem:[#allocation29_spill] sm:$0xff] %v5838_v49  ;;  %v928_v8 = vadd.f32 %v927_v53, %v5560_v4  ;;  %2374 = vmatprep.mubr.bf16.mxu1 %v5838_v49  ;;  %v1455_v16 = vmax.f32 %v926_v3, 0.0 }
 0x177   : > { %v929_v12 = vpop.f32.mrf.mxu0  ;;  %2375 = vmatmul.mubr.bf16.gmra.mxu1 %v5840_v52 }
 0x178   : > { %v930_v13 = vadd.f32 %v929_v12, %v5554_v1  ;;  %v1456_v14 = vmax.f32 %v928_v8, 0.0 }
 0x179   : > { %v933_v15 = vpop.f32.mrf.mxu0  ;;  %4878 = vmatmul.mubr.msk.bf16.gmra.mxu0 %vm509_vm1, %v454_v2 }
 0x17a   : > { %v1457_v19 = vmax.f32 %v930_v13, 0.0  ;;  %1181 = vmatprep.mubr.bf16.mxu0 %v8113_v6  ;;  %v5854_v30 = vpack.c.bf16 %v1456_v14, %v1454_v35  ;;  %v934_v48 = vadd.f32 %v933_v15, %v5560_v4  ;;  %v373_v13 = vld [vmem:[%s5321_s9 + $0x2d0] sm:$0xff]  ;;  %v374_v14 = vld [vmem:[%s5321_s9 + $0x2d8] sm:$0xff] }
 0x17b   : > { %v935_v38 = vpop.f32.mrf.mxu0  ;;  %v5094_v15 = vld [vmem:[%s8100_s3 + $0x1cc] ss:$16 sps:$4 sm:$0xff]  }
 0x17c   : > { %v5852_v39 = vpack.c.bf16 %v1457_v19, %v1455_v16  ;;  %8257 = vst [vmem:[#allocation32_spill] sm:$0xff] %v5854_v30  ;;  %v936_v46 = vadd.f32 %v935_v38, %v5554_v1  ;;  %v1458_v16 = vmax.f32 %v934_v48, 0.0  ;;  %v456_v38 = vpack.c.bf16 %v374_v14, %v373_v13  ;;  %2863 = vmatprep.subr.bf16.mxu0 %v5094_v15  ;;  %v375_v14 = vld [vmem:[%s5321_s9 + $0x2e0] sm:$0xff] }
 0x17d   : > { %v937_v40 = vpop.f32.mrf.mxu0 }
 0x17e   : > { %8256 = vst [vmem:[#allocation31_spill] sm:$0xff] %v5852_v39  ;;  %v938_v47 = vadd.f32 %v937_v40, %v5560_v4  ;;  %2384 = vmatprep.mubr.bf16.mxu1 %v5852_v39  ;;  %v1459_v9 = vmax.f32 %v936_v46, 0.0  ;;  %v5092_v40 = vld [vmem:[%s8100_s3 + $0x1c8] ss:$16 sps:$4 sm:$0xff]  }
 0x17f   : > { %v939_v53 = vpop.f32.mrf.mxu0  ;;  %2385 = vmatmul.mubr.bf16.gmra.mxu1 %v5854_v30  ;;  %2864 = vmatpush2.bf16.msra.mxu0 %v5092_v40 }
 0x180   : > { %v940_v2 = vadd.f32 %v939_v53, %v5554_v1  ;;  %v1460_v3 = vmax.f32 %v938_v47, 0.0 }
 0x181   : > { %v943_v8 = vpop.f32.mrf.mxu0  ;;  %4879 = vmatmul.mubr.msk.bf16.gmra.mxu0 %vm509_vm1, %v455_v45 }
 0x182   : > { %v1461_v12 = vmax.f32 %v940_v2, 0.0  ;;  %1191 = vmatprep.mubr.bf16.mxu0 %v8113_v6  ;;  %v5871_v29 = vpack.c.bf16 %v1460_v3, %v1458_v16  ;;  %v944_v47 = vadd.f32 %v943_v8, %v5560_v4  ;;  %v5097_v2 = vld [vmem:[%s8100_s3 + $0x1ac] ss:$16 sps:$4 sm:$0xff]  }
 0x183   : > { %v945_v19 = vpop.f32.mrf.mxu0  ;;  %v376_v16 = vld [vmem:[%s5321_s9 + $0x2e8] sm:$0xff]  ;;  %2865 = vmatprep.subr.bf16.mxu0 %v5097_v2 }
 0x184   : > { %v5866_v24 = vpack.c.bf16 %v1461_v12, %v1459_v9  ;;  %8259 = vst [vmem:[#allocation34_spill] sm:$0xff] %v5871_v29  ;;  %v946_v45 = vadd.f32 %v945_v19, %v5554_v1  ;;  %v5095_v12 = vld [vmem:[%s8100_s3 + $0x1a8] ss:$16 sps:$4 sm:$0xff]   ;;  %v1462_v19 = vmax.f32 %v944_v47, 0.0 }
 0x185   : > { %v947_v35 = vpop.f32.mrf.mxu0  ;;  %2866 = vmatpush2.bf16.msra.mxu0 %v5095_v12 }
 0x186   : > { %8258 = vst [vmem:[#allocation33_spill] sm:$0xff] %v5866_v24  ;;  %v948_v46 = vadd.f32 %v947_v35, %v5560_v4  ;;  %2394 = vmatprep.mubr.bf16.mxu1 %v5866_v24  ;;  %v1463_v13 = vmax.f32 %v946_v45, 0.0  ;;  %v5098_v45 = vld [vmem:[%s8100_s3 + $0x188] ss:$16 sps:$4 sm:$0xff]  }
 0x187   : > { %v949_v48 = vpop.f32.mrf.mxu0  ;;  %2395 = vmatmul.mubr.bf16.gmra.mxu1 %v5871_v29 }
 0x188   : > { %v950_v53 = vadd.f32 %v949_v48, %v5554_v1  ;;  %v1464_v3 = vmax.f32 %v948_v46, 0.0  ;;  %v457_v48 = vpack.c.bf16 %v376_v16, %v375_v14  ;;  %v5101_v16 = vld [vmem:[%s8100_s3 + $0x168] ss:$16 sps:$4 sm:$0xff]  }
 0x189   : > { %v953_v9 = vpop.f32.mrf.mxu0  ;;  %4880 = vmatmul.mubr.msk.bf16.gmra.mxu0 %vm509_vm1, %v456_v38  ;;  %v5100_v38 = vld [vmem:[%s8100_s3 + $0x18c] ss:$16 sps:$4 sm:$0xff]  }
 0x18a   : > { %v1465_v8 = vmax.f32 %v950_v53, 0.0  ;;  %1201 = vmatprep.mubr.bf16.mxu0 %v8113_v6  ;;  %v5897_v40 = vpack.c.bf16 %v1464_v3, %v1462_v19  ;;  %2867 = vmatprep.subr.bf16.mxu0 %v5100_v38  ;;  %v954_v2 = vadd.f32 %v953_v9, %v5560_v4  ;;  %v378_v38 = vld [vmem:[%s5321_s9 + $0x2f8] sm:$0xff] }
 0x18b   : > { %v955_v15 = vpop.f32.mrf.mxu0  ;;  %2868 = vmatpush2.bf16.msra.mxu0 %v5098_v45 }
 0x18c   : > { %v5892_v35 = vpack.c.bf16 %v1465_v8, %v1463_v13  ;;  %8261 = vst [vmem:[#allocation36_spill] sm:$0xff] %v5897_v40  ;;  %v956_v53 = vadd.f32 %v955_v15, %v5554_v1  ;;  %v5103_v13 = vld [vmem:[%s8100_s3 + $0x16c] ss:$16 sps:$4 sm:$0xff]   ;;  %v377_v15 = vld [vmem:[%s5321_s9 + $0x2f0] sm:$0xff] }
 0x18d   : > { %v957_v46 = vpop.f32.mrf.mxu0  ;;  %2869 = vmatprep.subr.bf16.mxu0 %v5103_v13 }
 0x18e   : > { %8260 = vst [vmem:[#allocation35_spill] sm:$0xff] %v5892_v35  ;;  %v958_v47 = vadd.f32 %v957_v46, %v5560_v4  ;;  %2404 = vmatprep.mubr.bf16.mxu1 %v5892_v35  ;;  %v1467_v19 = vmax.f32 %v956_v53, 0.0  ;;  %v1466_v46 = vmax.f32 %v954_v2, 0.0  ;;  %v5104_v53 = vld [vmem:[%s8100_s3 + $0x148] ss:$16 sps:$4 sm:$0xff]  }
 0x18f   : > { %v959_v12 = vpop.f32.mrf.mxu0  ;;  %2405 = vmatmul.mubr.bf16.gmra.mxu1 %v5897_v40  ;;  %2870 = vmatpush2.bf16.msra.mxu0 %v5101_v16  ;;  %v458_v40 = vpack.c.bf16 %v378_v38, %v377_v15 }
 0x190   : > { %v960_v3 = vadd.f32 %v959_v12, %v5554_v1  ;;  %v1468_v8 = vmax.f32 %v958_v47, 0.0 }
 0x191   : > { %v963_v14 = vpop.f32.mrf.mxu0  ;;  %4881 = vmatmul.mubr.msk.bf16.gmra.mxu0 %vm509_vm1, %v457_v48  ;;  %v5106_v48 = vld [vmem:[%s8100_s3 + $0x14c] ss:$16 sps:$4 sm:$0xff]  }
 0x192   : > { %v1469_v9 = vmax.f32 %v960_v3, 0.0  ;;  %1211 = vmatprep.mubr.bf16.mxu0 %v8113_v6  ;;  %v5923_v47 = vpack.c.bf16 %v1468_v8, %v1466_v46  ;;  %2871 = vmatprep.subr.bf16.mxu0 %v5106_v48  ;;  %v964_v13 = vadd.f32 %v963_v14, %v5560_v4  ;;  %v379_v46 = vld [vmem:[%s5321_s9 + $0x300] sm:$0xff] }
 0x193   : > { %v965_v45 = vpop.f32.mrf.mxu0  ;;  %2872 = vmatpush2.bf16.msra.mxu0 %v5104_v53 }
 0x194   : > { %v5918_v12 = vpack.c.bf16 %v1469_v9, %v1467_v19  ;;  %8263 = vst [vmem:[#allocation38_spill] sm:$0xff] %v5923_v47  ;;  %v966_v3 = vadd.f32 %v965_v45, %v5554_v1  ;;  %v5109_v19 = vld [vmem:[%s8100_s3 + $0x12c] ss:$16 sps:$4 sm:$0xff]   ;;  %v1470_v48 = vmax.f32 %v964_v13, 0.0 }
 0x195   : > { %v967_v59 = vpop.f32.mrf.mxu0  ;;  %v380_v45 = vld [vmem:[%s5321_s9 + $0x308] sm:$0xff]  ;;  %2873 = vmatprep.subr.bf16.mxu0 %v5109_v19 }
 0x196   : > { %8262 = vst [vmem:[#allocation37_spill] sm:$0xff] %v5918_v12  ;;  %v968_v2 = vadd.f32 %v967_v59, %v5560_v4  ;;  %2414 = vmatprep.mubr.bf16.mxu1 %v5918_v12  ;;  %v5107_v59 = vld [vmem:[%s8100_s3 + $0x128] ss:$16 sps:$4 sm:$0xff]   ;;  %v1471_v38 = vmax.f32 %v966_v3, 0.0  ;;  %v459_v12 = vpack.c.bf16 %v380_v45, %v379_v46 }
 0x197   : > { %v969_v16 = vpop.f32.mrf.mxu0  ;;  %2415 = vmatmul.mubr.bf16.gmra.mxu1 %v5923_v47  ;;  %2874 = vmatpush2.bf16.msra.mxu0 %v5107_v59  ;;  %v5110_v3 = vld [vmem:[%s8100_s3 + $0x108] ss:$16 sps:$4 sm:$0xff]  }
 0x198   : > { %v970_v8 = vadd.f32 %v969_v16, %v5554_v1  ;;  %v1472_v9 = vmax.f32 %v968_v2, 0.0 }
 0x199   : > { %v973_v15 = vpop.f32.mrf.mxu0  ;;  %4882 = vmatmul.mubr.msk.bf16.gmra.mxu0 %vm509_vm1, %v458_v40  ;;  %v5112_v40 = vld [vmem:[%s8100_s3 + $0x10c] ss:$16 sps:$4 sm:$0xff]  }
 0x19a   : > { %v1473_v14 = vmax.f32 %v970_v8, 0.0  ;;  %1221 = vmatprep.mubr.bf16.mxu0 %v8113_v6  ;;  %v5949_v2 = vpack.c.bf16 %v1472_v9, %v1470_v48  ;;  %2875 = vmatprep.subr.bf16.mxu0 %v5112_v40  ;;  %v974_v19 = vadd.f32 %v973_v15, %v5560_v4  ;;  %v382_v48 = vld [vmem:[%s5321_s9 + $0x318] sm:$0xff] }
 0x19b   : > { %v975_v53 = vpop.f32.mrf.mxu0  ;;  %2876 = vmatpush2.bf16.msra.mxu0 %v5110_v3 }
 0x19c   : > { %v5944_v16 = vpack.c.bf16 %v1473_v14, %v1471_v38  ;;  %8265 = vst [vmem:[#allocation40_spill] sm:$0xff] %v5949_v2  ;;  %v976_v8 = vadd.f32 %v975_v53, %v5554_v1  ;;  %v1474_v53 = vmax.f32 %v974_v19, 0.0 }
 0x19d   : > { %v977_v47 = vpop.f32.mrf.mxu0 }
 0x19e   : > { %8264 = vst [vmem:[#allocation39_spill] sm:$0xff] %v5944_v16  ;;  %v978_v13 = vadd.f32 %v977_v47, %v5560_v4  ;;  %2424 = vmatprep.mubr.bf16.mxu1 %v5944_v16  ;;  %v1475_v46 = vmax.f32 %v976_v8, 0.0  ;;  %v381_v47 = vld [vmem:[%s5321_s9 + $0x310] sm:$0xff] }
 0x19f   : > { %v979_v59 = vpop.f32.mrf.mxu0  ;;  %2425 = vmatmul.mubr.bf16.gmra.mxu1 %v5949_v2  ;;  %v386_v2 = vld [vmem:[%s5321_s9 + $0x338] sm:$0xff] }
 0x1a0   : > { %v980_v9 = vadd.f32 %v979_v59, %v5554_v1  ;;  %v1476_v38 = vmax.f32 %v978_v13, 0.0  ;;  %v460_v59 = vpack.c.bf16 %v382_v48, %v381_v47  ;;  %v383_v47 = vld [vmem:[%s5321_s9 + $0x320] sm:$0xff]  ;;  %v384_v48 = vld [vmem:[%s5321_s9 + $0x328] sm:$0xff] }
 0x1a1   : > { %v983_v14 = vpop.f32.mrf.mxu0  ;;  %4883 = vmatmul.mubr.msk.bf16.gmra.mxu0 %vm509_vm1, %v459_v12 }
 0x1a2   : > { %v1477_v45 = vmax.f32 %v980_v9, 0.0  ;;  %1231 = vmatprep.mubr.bf16.mxu0 %v8113_v6  ;;  %v5966_v15 = vpack.c.bf16 %v1476_v38, %v1474_v53  ;;  %v984_v8 = vadd.f32 %v983_v14, %v5560_v4  ;;  %v1830_v14 = vld [vmem:[%s8101_s4] sm:$0xf] }
 0x1a3   : > { %v985_v40 = vpop.f32.mrf.mxu0 }
 0x1a4   : > { %v5964_v16 = vpack.c.bf16 %v1477_v45, %v1475_v46  ;;  %8267 = vst [vmem:[#allocation42_spill] sm:$0xff] %v5966_v15  ;;  %v986_v13 = vadd.f32 %v985_v40, %v5554_v1  ;;  %v1478_v40 = vmax.f32 %v984_v8, 0.0 }
 0x1a5   : > { %v987_v3 = vpop.f32.mrf.mxu0 }
 0x1a6   : > { %8266 = vst [vmem:[#allocation41_spill] sm:$0xff] %v5964_v16  ;;  %v988_v12 = vadd.f32 %v987_v3, %v5560_v4  ;;  %2434 = vmatprep.mubr.bf16.mxu1 %v5964_v16  ;;  %v1479_v45 = vmax.f32 %v986_v13, 0.0 }
 0x1a7   : > { %v989_v9 = vpop.f32.mrf.mxu0  ;;  %2435 = vmatmul.mubr.bf16.gmra.mxu1 %v5966_v15 }
 0x1a8   : > { %v990_v19 = vadd.f32 %v989_v9, %v5554_v1  ;;  %v1480_v46 = vmax.f32 %v988_v12, 0.0  ;;  %v461_v9 = vpack.c.bf16 %v384_v48, %v383_v47  ;;  %v5996_v48 = vrot.slane %v1830_v14, %v5544_v61 }
 0x1a9   : > { %v993_v38 = vpop.f32.mrf.mxu0  ;;  %4884 = vmatmul.mubr.msk.bf16.gmra.mxu0 %vm509_vm1, %v460_v59 }
 0x1aa   : > { %v1481_v53 = vmax.f32 %v990_v19, 0.0  ;;  %1241 = vmatprep.mubr.bf16.mxu0 %v8113_v6  ;;  %v5983_v15 = vpack.c.bf16 %v1480_v46, %v1478_v40  ;;  %v5988_v19 = vrot.slane %v1830_v14, %v5547_v62  ;;  %v994_v8 = vadd.f32 %v993_v38, %v5560_v4  ;;  %v385_v38 = vld [vmem:[%s5321_s9 + $0x330] sm:$0xff] }
 0x1ab   : > { %v995_v3 = vpop.f32.mrf.mxu0 }
 0x1ac   : > { %v5981_v16 = vpack.c.bf16 %v1481_v53, %v1479_v45  ;;  %8269 = vst [vmem:[#allocation44_spill] sm:$0xff] %v5983_v15  ;;  %v996_v59 = vadd.f32 %v995_v3, %v5554_v1  ;;  %v1482_v35 = vmax.f32 %v994_v8, 0.0 }
 0x1ad   : > { %v997_v12 = vpop.f32.mrf.mxu0 }
 0x1ae   : > { %8268 = vst [vmem:[#allocation43_spill] sm:$0xff] %v5981_v16  ;;  %v998_v13 = vadd.f32 %v997_v12, %v5560_v4  ;;  %2444 = vmatprep.mubr.bf16.mxu1 %v5981_v16  ;;  %v1483_v3 = vmax.f32 %v996_v59, 0.0  ;;  %v8270_v16 = vmov 0  }
 0x1af   : > { %v999_v6 = vpop.f32.mrf.mxu0  ;;  %v2206_v45 = vpop.f32.mrf.mxu1  ;;  %2445 = vmatmul.mubr.bf16.gmra.mxu1 %v5983_v15 }
 0x1b0   : > { %v1000_v46 = vadd.f32 %v999_v6, %v5554_v1  ;;  %v1484_v53 = vmax.f32 %v998_v13, 0.0  ;;  %v2207_v62 = vadd.f32 %v2206_v45, %v5988_v19 }
 0x1b1   : > { %v1003_v47 = vpop.f32.mrf.mxu0  ;;  %4885 = vmatmul.mubr.msk.bf16.gmra.mxu0 %vm509_vm1, %v461_v9  ;;  %v2208_v40 = vpop.f32.mrf.mxu1 }
 0x1b2   : > { %v1485_v12 = vmax.f32 %v1000_v46, 0.0  ;;  %1251 = vmatprep.mubr.bf16.mxu0 %v8270_v16  ;;  %v6005_v9 = vpack.c.bf16 %v1484_v53, %v1482_v35  ;;  %v2209_v14 = vadd.f32 %v2208_v40, %v5996_v48  ;;  %v462_v46 = vpack.c.bf16 %v386_v2, %v385_v38 }
 0x1b3   : > { %v1005_v15 = vpop.f32.mrf.mxu0  ;;  %v2210_v29 = vpop.f32.mrf.mxu1  ;;  %v3518_v24 = vmax.f32 %v2207_v62, 0.0  ;;  %v1004_v8 = vadd.f32 %v1003_v47, %v5560_v4 }
 0x1b4   : > { %v2211_v6 = vadd.f32 %v2210_v29, %v5988_v19  ;;  %v6003_v13 = vpack.c.bf16 %v1485_v12, %v1483_v3  ;;  %8272 = vst [vmem:[#allocation46_spill] sm:$0xff] %v6005_v9  ;;  %v1006_v29 = vadd.f32 %v1005_v15, %v5554_v1  ;;  %v387_v15 = vld [vmem:[%s5321_s9 + $0x340] sm:$0xff] }
 0x1b5   : > { %v1007_v61 = vpop.f32.mrf.mxu0  ;;  %v2212_v59 = vpop.f32.mrf.mxu1 }
 0x1b6   : > { %8271 = vst [vmem:[#allocation45_spill] sm:$0xff] %v6003_v13  ;;  %v3522_v45 = vmax.f32 %v2211_v6, 0.0  ;;  %v1008_v30 = vadd.f32 %v1007_v61, %v5560_v4  ;;  %v2213_v39 = vadd.f32 %v2212_v59, %v5996_v48  ;;  %2454 = vmatprep.mubr.bf16.mxu1 %v6003_v13  ;;  %v3519_v61 = vmax.f32 %v2209_v14, 0.0  ;;  %v388_v59 = vld [vmem:[%s5321_s9 + $0x348] sm:$0xff] }
 0x1b7   : > { %v1009_v35 = vpop.f32.mrf.mxu0  ;;  %v2216_v53 = vpop.f32.mrf.mxu1  ;;  %2455 = vmatmul.mubr.bf16.gmra.mxu1 %v6005_v9  ;;  %v1486_v13 = vmax.f32 %v1004_v8, 0.0  ;;  %v1487_v9 = vmax.f32 %v1006_v29, 0.0  ;;  %v463_v52 = vpack.c.bf16 %v388_v59, %v387_v15 }
 0x1b8   : > { %v6014_v40 = vpack.c.bf16 %v3522_v45, %v3518_v24  ;;  %v3523_v62 = vmax.f32 %v2213_v39, 0.0  ;;  %v1010_v2 = vadd.f32 %v1009_v35, %v5554_v1  ;;  %v1488_v3 = vmax.f32 %v1008_v30, 0.0 }
 0x1b9   : > { %v1013_v12 = vpop.f32.mrf.mxu0  ;;  %4886 = vmatmul.mubr.msk.bf16.gmra.mxu0 %vm509_vm1, %v462_v46  ;;  %v2218_v38 = vpop.f32.mrf.mxu1  ;;  %v2217_v6 = vadd.f32 %v2216_v53, %v5988_v19 }
 0x1ba   : > { %v1489_v47 = vmax.f32 %v1010_v2, 0.0  ;;  %1261 = vmatprep.mubr.bf16.mxu0 %v8270_v16  ;;  %v6022_v39 = vpack.c.bf16 %v3523_v62, %v3519_v61  ;;  %v6025_v30 = vpack.c.bf16 %v1488_v3, %v1486_v13  ;;  %v2219_v46 = vadd.f32 %v2218_v38, %v5996_v48 }
 0x1bb   : > { %v1015_v24 = vpop.f32.mrf.mxu0  ;;  %v2220_v45 = vpop.f32.mrf.mxu1  ;;  %v3526_v49 = vmax.f32 %v2217_v6, 0.0  ;;  %v1014_v62 = vadd.f32 %v1013_v12, %v5560_v4 }
 0x1bc   : > { %v2221_v14 = vadd.f32 %v2220_v45, %v5988_v19  ;;  %8273 = vst [vmem:[#allocation47_spill] sm:$0xff] %v6025_v30  ;;  %v6028_v53 = vpack.c.bf16 %v1489_v47, %v1487_v9  ;;  %v1016_v61 = vadd.f32 %v1015_v24, %v5554_v1  ;;  %v3527_v6 = vmax.f32 %v2219_v46, 0.0 }
 0x1bd   : > { %v1017_v35 = vpop.f32.mrf.mxu0  ;;  %v2222_v2 = vpop.f32.mrf.mxu1 }
 0x1be   : > { %8274 = vst [vmem:[#allocation48_spill] sm:$0xff] %v6028_v53  ;;  %v3530_v11 = vmax.f32 %v2221_v14, 0.0  ;;  %v1018_v8 = vadd.f32 %v1017_v35, %v5560_v4  ;;  %v2223_v29 = vadd.f32 %v2222_v2, %v5996_v48  ;;  %2464 = vmatprep.mubr.bf16.mxu1 %v6028_v53  ;;  %v389_v14 = vld [vmem:[%s5321_s9 + $0x350] sm:$0xff]  ;;  %v390_v35 = vld [vmem:[%s5321_s9 + $0x358] sm:$0xff] }
 0x1bf   : > { %v1019_v13 = vpop.f32.mrf.mxu0  ;;  %v2226_v3 = vpop.f32.mrf.mxu1  ;;  %2465 = vmatmul.mubr.bf16.gmra.mxu1 %v6025_v30  ;;  %v464_v53 = vpack.c.bf16 %v390_v35, %v389_v14 }
 0x1c0   : > { %v6035_v38 = vpack.c.bf16 %v3530_v11, %v3526_v49  ;;  %v3531_v9 = vmax.f32 %v2223_v29, 0.0  ;;  %v1020_v47 = vadd.f32 %v1019_v13, %v5554_v1  ;;  %v1492_v15 = vmax.f32 %v1018_v8, 0.0 }
 0x1c1   : > { %v1023_v59 = vpop.f32.mrf.mxu0  ;;  %4887 = vmatmul.mubr.msk.bf16.gmra.mxu0 %vm509_vm1, %v463_v52  ;;  %v2228_v12 = vpop.f32.mrf.mxu1  ;;  %v2227_v45 = vadd.f32 %v2226_v3, %v5988_v19  ;;  %v1490_v11 = vmax.f32 %v1014_v62, 0.0  ;;  %v1491_v49 = vmax.f32 %v1016_v61, 0.0 }
 0x1c2   : > { %v1493_v24 = vmax.f32 %v1020_v47, 0.0  ;;  %1271 = vmatprep.mubr.bf16.mxu0 %v8270_v16  ;;  %v6044_v13 = vpack.c.bf16 %v3531_v9, %v3527_v6  ;;  %v2229_v52 = vadd.f32 %v2228_v12, %v5996_v48 }
 0x1c3   : > { %v1025_v2 = vpop.f32.mrf.mxu0  ;;  %v2230_v29 = vpop.f32.mrf.mxu1  ;;  %v6047_v8 = vpack.c.bf16 %v1492_v15, %v1490_v11  ;;  %v3534_v10 = vmax.f32 %v2227_v45, 0.0  ;;  %v1024_v15 = vadd.f32 %v1023_v59, %v5560_v4  ;;  %v391_v59 = vld [vmem:[%s5321_s9 + $0x360] sm:$0xff] }
 0x1c4   : > { %v2231_v46 = vadd.f32 %v2230_v29, %v5988_v19  ;;  %v6050_v3 = vpack.c.bf16 %v1493_v24, %v1491_v49  ;;  %v1026_v9 = vadd.f32 %v1025_v2, %v5554_v1 }
 0x1c5   : > { %8275 = vst [vmem:[#allocation49_spill] sm:$0xff] %v6047_v8  ;;  %v1027_v30 = vpop.f32.mrf.mxu0  ;;  %v2232_v47 = vpop.f32.mrf.mxu1 }
 0x1c6   : > { %8276 = vst [vmem:[#allocation50_spill] sm:$0xff] %v6050_v3  ;;  %v3538_v34 = vmax.f32 %v2231_v46, 0.0  ;;  %v1028_v62 = vadd.f32 %v1027_v30, %v5560_v4  ;;  %v2233_v61 = vadd.f32 %v2232_v47, %v5996_v48  ;;  %2474 = vmatprep.mubr.bf16.mxu1 %v6050_v3  ;;  %v3535_v30 = vmax.f32 %v2229_v52, 0.0 }
 0x1c7   : > { %v1029_v6 = vpop.f32.mrf.mxu0  ;;  %v2236_v29 = vpop.f32.mrf.mxu1  ;;  %2475 = vmatmul.mubr.bf16.gmra.mxu1 %v6047_v8 }
 0x1c8   : > { %v6057_v12 = vpack.c.bf16 %v3538_v34, %v3534_v10  ;;  %v3539_v24 = vmax.f32 %v2233_v61, 0.0  ;;  %v1030_v45 = vadd.f32 %v1029_v6, %v5554_v1  ;;  %v1496_v11 = vmax.f32 %v1028_v62, 0.0  ;;  %v392_v34 = vld [vmem:[%s5321_s9 + $0x368] sm:$0xff] }
 0x1c9   : > { %v1033_v14 = vpop.f32.mrf.mxu0  ;;  %4888 = vmatmul.mubr.msk.bf16.gmra.mxu0 %vm509_vm1, %v464_v53  ;;  %v6062_v35 = vpop.f32.mrf.mxu1  ;;  %v2237_v2 = vadd.f32 %v2236_v29, %v5988_v19  ;;  %v1495_v10 = vmax.f32 %v1026_v9, 0.0  ;;  %v1494_v6 = vmax.f32 %v1024_v15, 0.0  ;;  %v465_v3 = vpack.c.bf16 %v392_v34, %v391_v59 }
 0x1ca   : > { %v1497_v49 = vmax.f32 %v1030_v45, 0.0  ;;  %1281 = vmatprep.mubr.bf16.mxu0 %v8270_v16  ;;  %v6068_v61 = vpack.c.bf16 %v3539_v24, %v3535_v30 }
 0x1cb   : > { %v1035_v46 = vpop.f32.mrf.mxu0  ;;  %v2240_v47 = vpop.f32.mrf.mxu1  ;;  %v6075_v45 = vpack.c.bf16 %v1496_v11, %v1494_v6  ;;  %v3542_v29 = vmax.f32 %v2237_v2, 0.0 }
 0x1cc   : > { %v2241_v52 = vadd.f32 %v2240_v47, %v5988_v19  ;;  %v6073_v62 = vpack.c.bf16 %v1497_v49, %v1495_v10  ;;  %v1036_v24 = vadd.f32 %v1035_v46, %v5554_v1  ;;  %v1034_v47 = vadd.f32 %v1033_v14, %v5560_v4  ;;  %v393_v10 = vld [vmem:[%s5321_s9 + $0x370] sm:$0xff]  ;;  %v394_v46 = vld [vmem:[%s5321_s9 + $0x378] sm:$0xff] }
 0x1cd   : > { %v1037_v8 = vpop.f32.mrf.mxu0  ;;  %v6071_v53 = vpop.f32.mrf.mxu1  ;;  %8278 = vst [vmem:[#allocation52_spill] sm:$0xff] %v6075_v45 }
 0x1ce   : > { %8277 = vst [vmem:[#allocation51_spill] sm:$0xff] %v6073_v62  ;;  %v3546_v33 = vmax.f32 %v2241_v52, 0.0  ;;  %v1038_v9 = vadd.f32 %v1037_v8, %v5560_v4  ;;  %2484 = vmatprep.mubr.bf16.mxu1 %v6073_v62  ;;  %v1499_v6 = vmax.f32 %v1036_v24, 0.0 }
 0x1cf   : > { %v1039_v30 = vpop.f32.mrf.mxu0  ;;  %v6079_v15 = vpop.f32.mrf.mxu1  ;;  %2485 = vmatmul.mubr.bf16.gmra.mxu1 %v6075_v45  ;;  %v466_v45 = vpack.c.bf16 %v394_v46, %v393_v10 }
 0x1d0   : > { %v6083_v59 = vpack.c.bf16 %v3546_v33, %v3542_v29  ;;  %v1040_v11 = vadd.f32 %v1039_v30, %v5554_v1  ;;  %v1500_v2 = vmax.f32 %v1038_v9, 0.0  ;;  %v1498_v33 = vmax.f32 %v1034_v47, 0.0 }
 0x1d1   : > { %v1043_v49 = vpop.f32.mrf.mxu0  ;;  %4889 = vmatmul.mubr.msk.bf16.gmra.mxu0 %vm509_vm1, %v465_v3  ;;  %v6088_v8 = vpop.f32.mrf.mxu1 }
 0x1d2   : > { %v1501_v34 = vmax.f32 %v1040_v11, 0.0  ;;  %1291 = vmatprep.mubr.bf16.mxu0 %v8270_v16  ;;  %v6099_v3 = vpack.c.bf16 %v1500_v2, %v1498_v33  ;;  %v1044_v47 = vadd.f32 %v1043_v49, %v5560_v4 }
 0x1d3   : > { %v1045_v52 = vpop.f32.mrf.mxu0  ;;  %v6093_v14 = vpop.f32.mrf.mxu1 }
 0x1d4   : > { %v6097_v62 = vpack.c.bf16 %v1501_v34, %v1499_v6  ;;  %8280 = vst [vmem:[#allocation54_spill] sm:$0xff] %v6099_v3  ;;  %v1046_v11 = vadd.f32 %v1045_v52, %v5554_v1  ;;  %v395_v6 = vld [vmem:[%s5321_s9 + $0x380] sm:$0xff]  ;;  %v396_v52 = vld [vmem:[%s5321_s9 + $0x388] sm:$0xff]  ;;  %v1502_v49 = vmax.f32 %v1044_v47, 0.0 }
 0x1d5   : > { %v1047_v29 = vpop.f32.mrf.mxu0  ;;  %v6095_v30 = vpop.f32.mrf.mxu1 }
 0x1d6   : > { %8279 = vst [vmem:[#allocation53_spill] sm:$0xff] %v6097_v62  ;;  %v1048_v9 = vadd.f32 %v1047_v29, %v5560_v4  ;;  %2494 = vmatprep.mubr.bf16.mxu1 %v6097_v62  ;;  %v1503_v33 = vmax.f32 %v1046_v11, 0.0 }
 0x1d7   : > { %v1049_v0 = vpop.f32.mrf.mxu0  ;;  %v6103_v24 = vpop.f32.mrf.mxu1  ;;  %2495 = vmatmul.mubr.bf16.gmra.mxu1 %v6099_v3  ;;  %v467_v3 = vpack.c.bf16 %v396_v52, %v395_v6 }
 0x1d8   : > { %v1050_v56 = vadd.f32 %v1049_v0, %v5554_v1  ;;  %v1504_v10 = vmax.f32 %v1048_v9, 0.0 }
 0x1d9   : > { %v1053_v34 = vpop.f32.mrf.mxu0  ;;  %4890 = vmatmul.mubr.msk.bf16.gmra.mxu0 %vm509_vm1, %v466_v45  ;;  %v6110_v2 = vpop.f32.mrf.mxu1 }
 0x1da   : > { %v1505_v46 = vmax.f32 %v1050_v56, 0.0  ;;  %1301 = vmatprep.mubr.bf16.mxu0 %v8270_v16  ;;  %v6121_v45 = vpack.c.bf16 %v1504_v10, %v1502_v49  ;;  %v1054_v47 = vadd.f32 %v1053_v34, %v5560_v4 }
 0x1db   : > { %v1055_v29 = vpop.f32.mrf.mxu0  ;;  %v6115_v62 = vpop.f32.mrf.mxu1 }
 0x1dc   : > { %v6119_v27 = vpack.c.bf16 %v1505_v46, %v1503_v33  ;;  %8282 = vst [vmem:[#allocation56_spill] sm:$0xff] %v6121_v45  ;;  %v1056_v9 = vadd.f32 %v1055_v29, %v5554_v1  ;;  %v398_v33 = vld [vmem:[%s5321_s9 + $0x398] sm:$0xff] }
 0x1dd   : > { %v1057_v28 = vpop.f32.mrf.mxu0  ;;  %v6117_v0 = vpop.f32.mrf.mxu1 }
 0x1de   : > { %8281 = vst [vmem:[#allocation55_spill] sm:$0xff] %v6119_v27  ;;  %v1058_v56 = vadd.f32 %v1057_v28, %v5560_v4  ;;  %2504 = vmatprep.mubr.bf16.mxu1 %v6119_v27  ;;  %v397_v28 = vld [vmem:[%s5321_s9 + $0x390] sm:$0xff]  ;;  %v1507_v29 = vmax.f32 %v1056_v9, 0.0  ;;  %v1506_v27 = vmax.f32 %v1054_v47, 0.0 }
 0x1df   : > { %v1059_v51 = vpop.f32.mrf.mxu0  ;;  %v6125_v11 = vpop.f32.mrf.mxu1  ;;  %2505 = vmatmul.mubr.bf16.gmra.mxu1 %v6121_v45 }
 0x1e0   : > { %v1060_v50 = vadd.f32 %v1059_v51, %v5554_v1  ;;  %v1508_v6 = vmax.f32 %v1058_v56, 0.0  ;;  %v468_v51 = vpack.c.bf16 %v398_v33, %v397_v28  ;;  %v399_v33 = vld [vmem:[%s5321_s9 + $0x3a0] sm:$0xff] }
 0x1e1   : > { %v1063_v46 = vpop.f32.mrf.mxu0  ;;  %4891 = vmatmul.mubr.msk.bf16.gmra.mxu0 %vm509_vm1, %v467_v3  ;;  %v2268_v10 = vpop.f32.mrf.mxu1 }
 0x1e2   : > { %v1509_v52 = vmax.f32 %v1060_v50, 0.0  ;;  %1311 = vmatprep.mubr.bf16.mxu0 %v8270_v16  ;;  %v6139_v45 = vpack.c.bf16 %v1508_v6, %v1506_v27  ;;  %v1064_v9 = vadd.f32 %v1063_v46, %v5560_v4 }
 0x1e3   : > { %v1065_v49 = vpop.f32.mrf.mxu0  ;;  %v6135_v26 = vpop.f32.mrf.mxu1 }
 0x1e4   : > { %v6137_v55 = vpack.c.bf16 %v1509_v52, %v1507_v29  ;;  %8284 = vst [vmem:[#allocation58_spill] sm:$0xff] %v6139_v45  ;;  %v1066_v3 = vadd.f32 %v1065_v49, %v5554_v1  ;;  %v400_v29 = vld [vmem:[%s5321_s9 + $0x3a8] sm:$0xff]  ;;  %v1510_v46 = vmax.f32 %v1064_v9, 0.0 }
 0x1e5   : > { %v1067_v34 = vpop.f32.mrf.mxu0  ;;  %v2272_v25 = vpop.f32.mrf.mxu1  ;;  %v469_v7 = vpack.c.bf16 %v400_v29, %v399_v33 }
 0x1e6   : > { %8283 = vst [vmem:[#allocation57_spill] sm:$0xff] %v6137_v55  ;;  %v1068_v50 = vadd.f32 %v1067_v34, %v5560_v4  ;;  %2514 = vmatprep.mubr.bf16.mxu1 %v6137_v55  ;;  %v1511_v49 = vmax.f32 %v1066_v3, 0.0 }
 0x1e7   : > { %v1069_v56 = vpop.f32.mrf.mxu0  ;;  %v2276_v54 = vpop.f32.mrf.mxu1  ;;  %2515 = vmatmul.mubr.bf16.gmra.mxu1 %v6139_v45 }
 0x1e8   : > { %v1070_v47 = vadd.f32 %v1069_v56, %v5554_v1  ;;  %v1512_v6 = vmax.f32 %v1068_v50, 0.0  ;;  %v2273_v56 = vadd.f32 %v2272_v25, %v5996_v48  ;;  %v2277_v50 = vadd.f32 %v2276_v54, %v5988_v19 }
 0x1e9   : > { %v1073_v52 = vpop.f32.mrf.mxu0  ;;  %4892 = vmatmul.mubr.msk.bf16.gmra.mxu0 %vm509_vm1, %v468_v51  ;;  %v2278_v27 = vpop.f32.mrf.mxu1  ;;  %v2269_v51 = vadd.f32 %v2268_v10, %v5996_v48 }
 0x1ea   : > { %v1513_v28 = vmax.f32 %v1070_v47, 0.0  ;;  %1321 = vmatprep.mubr.bf16.mxu0 %v8270_v16  ;;  %v2279_v45 = vadd.f32 %v2278_v27, %v5996_v48  ;;  %v6158_v3 = vpack.c.bf16 %v1512_v6, %v1510_v46  ;;  %v6164_v27 = vld [vmem:[%s5321_s9 + $0x3b0] sm:$0xff]  ;;  %v1074_v10 = vadd.f32 %v1073_v52, %v5560_v4 }
 0x1eb   : > { %v1075_v34 = vpop.f32.mrf.mxu0  ;;  %v2280_v55 = vpop.f32.mrf.mxu1  ;;  %v3571_v33 = vmax.f32 %v2273_v56, 0.0  ;;  %v3567_v56 = vmax.f32 %v2269_v51, 0.0  ;;  %v6185_v51 = vld [vmem:[%s5321_s9 + $0x3c0] sm:$0xff] }
 0x1ec   : > { %v2281_v32 = vadd.f32 %v2280_v55, %v5988_v19  ;;  %v6156_v5 = vpack.c.bf16 %v1513_v28, %v1511_v49  ;;  %8286 = vst [vmem:[#allocation60_spill] sm:$0xff] %v6158_v3  ;;  %v1076_v44 = vadd.f32 %v1075_v34, %v5554_v1  ;;  %v6167_v55 = vld [vmem:[%s5321_s9 + $0x3b8] sm:$0xff]  ;;  %v3575_v6 = vmax.f32 %v2279_v45, 0.0 }
 0x1ed   : > { %v1077_v47 = vpop.f32.mrf.mxu0  ;;  %v2282_v31 = vpop.f32.mrf.mxu1  ;;  %v3574_v34 = vmax.f32 %v2277_v50, 0.0  ;;  %v470_v52 = vpack.c.bf16 %v6167_v55, %v6164_v27  ;;  %v1514_v50 = vmax.f32 %v1074_v10, 0.0 }
 0x1ee   : > { %8285 = vst [vmem:[#allocation59_spill] sm:$0xff] %v6156_v5  ;;  %v1078_v9 = vadd.f32 %v1077_v47, %v5560_v4  ;;  %v2283_v25 = vadd.f32 %v2282_v31, %v5996_v48  ;;  %v3578_v54 = vmax.f32 %v2281_v32, 0.0  ;;  %2524 = vmatprep.mubr.bf16.mxu1 %v6156_v5  ;;  %v1515_v45 = vmax.f32 %v1076_v44, 0.0 }
 0x1ef   : > { %v1079_v43 = vpop.f32.mrf.mxu0  ;;  %v2286_v28 = vpop.f32.mrf.mxu1  ;;  %2525 = vmatmul.mubr.bf16.gmra.mxu1 %v6158_v3  ;;  %v4055_v44 = vpack.c.bf16 %v3571_v33, %v3567_v56  ;;  %v6201_v56 = vld [vmem:[%s5321_s9 + $0x3d0] sm:$0xff] }
 0x1f0   : > { %v3579_v29 = vmax.f32 %v2283_v25, 0.0  ;;  %v1080_v49 = vadd.f32 %v1079_v43, %v5554_v1  ;;  %v1516_v31 = vmax.f32 %v1078_v9, 0.0  ;;  %v2287_v32 = vadd.f32 %v2286_v28, %v5988_v19 }
 0x1f1   : > { %v1083_v46 = vpop.f32.mrf.mxu0  ;;  %4893 = vmatmul.mubr.msk.bf16.gmra.mxu0 %vm509_vm1, %v469_v7  ;;  %v2288_v47 = vpop.f32.mrf.mxu1  ;;  %v2259_v43 = vadd.f32 %v6110_v2, %v5996_v48  ;;  %v2271_v7 = vadd.f32 %v6135_v26, %v5988_v19  ;;  %v4058_v9 = vpack.c.bf16 %v3578_v54, %v3574_v34  ;;  %v2263_v28 = vadd.f32 %v6117_v0, %v5996_v48 }
 0x1f2   : > { %v1517_v25 = vmax.f32 %v1080_v49, 0.0  ;;  %v4059_v5 = vpack.c.bf16 %v3579_v29, %v3575_v6  ;;  %1331 = vmatprep.mubr.bf16.mxu0 %v8270_v16  ;;  %v6188_v6 = vld [vmem:[%s5321_s9 + $0x3c8] sm:$0xff]  ;;  %v2267_v26 = vadd.f32 %v6125_v11, %v5988_v19  ;;  %v6195_v10 = vpack.c.bf16 %v1516_v31, %v1514_v50 }
 0x1f3   : > { %v1085_v27 = vpop.f32.mrf.mxu0  ;;  %v2290_v55 = vpop.f32.mrf.mxu1  ;;  %v3582_v0 = vmax.f32 %v2287_v32, 0.0  ;;  %v1084_v32 = vadd.f32 %v1083_v46, %v5560_v4 }
 0x1f4   : > { %4322 = vmatprep.subr.bf16.mxu1 %v4059_v5  ;;  %v6190_v29 = vpack.c.bf16 %v1517_v25, %v1515_v45  ;;  %v2291_v2 = vadd.f32 %v2290_v55, %v5988_v19  ;;  %v2289_v5 = vadd.f32 %v2288_v47, %v5996_v48  ;;  %v1086_v49 = vadd.f32 %v1085_v27, %v5554_v1  ;;  %v6204_v45 = vld [vmem:[%s5321_s9 + $0x3d8] sm:$0xff] }
 0x1f5   : > { %v1087_v54 = vpop.f32.mrf.mxu0  ;;  %4323 = vmatpush1.bf16.xpose.msra.mxu1 %v4058_v9  ;;  %v2292_v33 = vpop.f32.mrf.mxu1  ;;  %v3570_v25 = vmax.f32 %v2271_v7, 0.0  ;;  %v471_v47 = vpack.c.bf16 %v6188_v6, %v6185_v51  ;;  %v3563_v27 = vmax.f32 %v2263_v28, 0.0  ;;  %v3559_v51 = vmax.f32 %v2259_v43, 0.0 }
 0x1f6   : > { %8287 = vst [vmem:[#allocation61_spill] sm:$0xff] %v6190_v29  ;;  %v1088_v34 = vadd.f32 %v1087_v54, %v5560_v4  ;;  %4324 = vmatprep.subr.bf16.mxu1 %v4055_v44  ;;  %2534 = vmatprep.mubr.bf16.mxu1 %v6190_v29  ;;  %v3586_v11 = vmax.f32 %v2291_v2, 0.0  ;;  %v2293_v31 = vadd.f32 %v2292_v33, %v5996_v48  ;;  %v3566_v29 = vmax.f32 %v2267_v26, 0.0 }
 0x1f7   : > { %v1089_v50 = vpop.f32.mrf.mxu0  ;;  %v2296_v9 = vpop.f32.mrf.mxu1  ;;  %2535 = vmatmul.mubr.bf16.gmra.mxu1 %v6195_v10  ;;  %v3583_v7 = vmax.f32 %v2289_v5, 0.0  ;;  %v2261_v28 = vadd.f32 %v6115_v62, %v5988_v19  ;;  %v1519_v6 = vmax.f32 %v1086_v49, 0.0  ;;  %v2253_v5 = vadd.f32 %v6095_v30, %v5996_v48 }
 0x1f8   : > { %v1090_v55 = vadd.f32 %v1089_v50, %v5554_v1  ;;  %v6213_v44 = vpack.c.bf16 %v3586_v11, %v3582_v0  ;;  %v3587_v54 = vmax.f32 %v2293_v31, 0.0  ;;  %v1520_v2 = vmax.f32 %v1088_v34, 0.0 }
 0x1f9   : > { %v1093_v3 = vpop.f32.mrf.mxu0  ;;  %4894 = vmatmul.mubr.msk.bf16.gmra.mxu0 %vm509_vm1, %v470_v52  ;;  %v2298_v33 = vpop.f32.mrf.mxu1  ;;  %v4054_v0 = vpack.c.bf16 %v3570_v25, %v3566_v29  ;;  %v1518_v11 = vmax.f32 %v1084_v32, 0.0  ;;  %v2297_v34 = vadd.f32 %v2296_v9, %v5988_v19  ;;  %v2257_v43 = vadd.f32 %v6103_v24, %v5988_v19 }
 0x1fa   : > { %v1521_v50 = vmax.f32 %v1090_v55, 0.0  ;;  %1341 = vmatprep.mubr.bf16.mxu0 %v8270_v16  ;;  %v6222_v52 = vpack.c.bf16 %v3587_v54, %v3583_v7  ;;  %v4051_v46 = vpack.c.bf16 %v3563_v27, %v3559_v51  ;;  %v2249_v49 = vadd.f32 %v6088_v8, %v5996_v48 }
 0x1fb   : > { %v1095_v26 = vpop.f32.mrf.mxu0  ;;  %v2300_v31 = vpop.f32.mrf.mxu1  ;;  %v6232_v29 = vpack.c.bf16 %v1520_v2, %v1518_v11  ;;  %v2299_v32 = vadd.f32 %v2298_v33, %v5996_v48  ;;  %v3562_v27 = vmax.f32 %v2261_v28, 0.0  ;;  %v1094_v8 = vadd.f32 %v1093_v3, %v5560_v4 }
 0x1fc   : > { %v6228_v62 = vpack.c.bf16 %v1521_v50, %v1519_v6  ;;  %v2301_v9 = vadd.f32 %v2300_v31, %v5988_v19  ;;  %v1096_v30 = vadd.f32 %v1095_v26, %v5554_v1  ;;  %v3590_v7 = vmax.f32 %v2297_v34, 0.0 }
 0x1fd   : > { %v1097_v25 = vpop.f32.mrf.mxu0  ;;  %4325 = vmatpush1.bf16.xpose.msra.mxu1 %v4054_v0  ;;  %v2302_v55 = vpop.f32.mrf.mxu1  ;;  %v3555_v33 = vmax.f32 %v2253_v5, 0.0  ;;  %v3558_v50 = vmax.f32 %v2257_v43, 0.0  ;;  %v3591_v31 = vmax.f32 %v2299_v32, 0.0  ;;  %v2243_v34 = vadd.f32 %v6071_v53, %v5996_v48 }
 0x1fe   : > { %v1098_v54 = vadd.f32 %v1097_v25, %v5560_v4  ;;  %4326 = vmatprep.subr.bf16.mxu1 %v4051_v46  ;;  %2544 = vmatprep.mubr.bf16.mxu1 %v6228_v62  ;;  %v2303_v24 = vadd.f32 %v2302_v55, %v5996_v48  ;;  %v3594_v51 = vmax.f32 %v2301_v9, 0.0  ;;  %v3551_v5 = vmax.f32 %v2249_v49, 0.0 }
 0x1ff   : > { %v1099_v2 = vpop.f32.mrf.mxu0  ;;  %v2306_v6 = vpop.f32.mrf.mxu1  ;;  %2545 = vmatmul.mubr.bf16.gmra.mxu1 %v6232_v29  ;;  %v1523_v43 = vmax.f32 %v1096_v30, 0.0  ;;  %v2251_v55 = vadd.f32 %v6093_v14, %v5988_v19  ;;  %v2247_v49 = vadd.f32 %v6079_v15, %v5988_v19 }
 0x200   : > { %v1100_v0 = vadd.f32 %v1099_v2, %v5554_v1  ;;  %v3595_v11 = vmax.f32 %v2303_v24, 0.0  ;;  %v1524_v26 = vmax.f32 %v1098_v54, 0.0  ;;  %v6244_v25 = vpack.c.bf16 %v3594_v51, %v3590_v7 }
 0x201   : > { %v1103_v46 = vpop.f32.mrf.mxu0  ;;  %4895 = vmatmul.mubr.msk.bf16.gmra.mxu0 %vm509_vm1, %v471_v47  ;;  %v2307_v3 = vadd.f32 %v2306_v6, %v5988_v19  ;;  %v2308_v28 = vpop.f32.mrf.mxu1  ;;  %v4050_v54 = vpack.c.bf16 %v3562_v27, %v3558_v50  ;;  %v1522_v24 = vmax.f32 %v1094_v8, 0.0  ;;  %v2239_v7 = vadd.f32 %v6062_v35, %v5996_v48 }
 0x202   : > { %v1525_v9 = vmax.f32 %v1100_v0, 0.0  ;;  %1351 = vmatprep.mubr.bf16.mxu0 %v8270_v16  ;;  %v6252_v2 = vpack.c.bf16 %v3595_v11, %v3591_v31  ;;  %v4047_v51 = vpack.c.bf16 %v3555_v33, %v3551_v5  ;;  %v2309_v8 = vadd.f32 %v2308_v28, %v5996_v48 }
 0x203   : > { %v1105_v47 = vpop.f32.mrf.mxu0  ;;  %v2310_v32 = vpop.f32.mrf.mxu1  ;;  %v6261_v30 = vpack.c.bf16 %v1524_v26, %v1522_v24  ;;  %v3598_v27 = vmax.f32 %v2307_v3, 0.0  ;;  %v3547_v31 = vmax.f32 %v2243_v34, 0.0  ;;  %v3554_v15 = vmax.f32 %v2251_v55, 0.0 }
 0x204   : > { %v6256_v6 = vpack.c.bf16 %v1525_v9, %v1523_v43  ;;  %v2311_v53 = vadd.f32 %v2310_v32, %v5988_v19  ;;  %v1106_v0 = vadd.f32 %v1105_v47, %v5554_v1  ;;  %v1104_v3 = vadd.f32 %v1103_v46, %v5560_v4 }
 0x205   : > { %v1107_v14 = vpop.f32.mrf.mxu0  ;;  %4327 = vmatpush1.bf16.xpose.msra.mxu1 %v4050_v54  ;;  %v2312_v50 = vpop.f32.mrf.mxu1  ;;  %v3550_v54 = vmax.f32 %v2247_v49, 0.0  ;;  %v8288_v47 = vpack.c.bf16 %v6204_v45, %v6201_v56  ;;  %v3599_v34 = vmax.f32 %v2309_v8, 0.0  ;;  %v3543_v32 = vmax.f32 %v2239_v7, 0.0 }
 0x206   : > { %v1108_v35 = vadd.f32 %v1107_v14, %v5560_v4  ;;  %4328 = vmatprep.subr.bf16.mxu1 %v4047_v51  ;;  %2554 = vmatprep.mubr.bf16.mxu1 %v6256_v6  ;;  %v3602_v33 = vmax.f32 %v2311_v53, 0.0  ;;  %v2313_v11 = vadd.f32 %v2312_v50, %v5996_v48  ;;  %v1527_v46 = vmax.f32 %v1106_v0, 0.0  ;;  %v407_v14 = vld [vmem:[%s5321_s9 + $0x3e0] sm:$0xff] }
 0x207   : > { %v1109_v26 = vpop.f32.mrf.mxu0  ;;  %v2316_v5 = vpop.f32.mrf.mxu1  ;;  %2555 = vmatmul.mubr.bf16.gmra.mxu1 %v6261_v30  ;;  %v4046_v50 = vpack.c.bf16 %v3554_v15, %v3550_v54  ;;  %v1526_v56 = vmax.f32 %v1104_v3, 0.0  ;;  %v4043_v45 = vpack.c.bf16 %v3547_v31, %v3543_v32 }
 0x208   : > { %v1110_v28 = vadd.f32 %v1109_v26, %v5554_v1  ;;  %v6271_v43 = vpack.c.bf16 %v3602_v33, %v3598_v27  ;;  %v3603_v9 = vmax.f32 %v2313_v11, 0.0  ;;  %v1528_v51 = vmax.f32 %v1108_v35, 0.0  ;;  %v408_v27 = vld [vmem:[%s5321_s9 + $0x3e8] sm:$0xff] }
 0x209   : > { %v1113_v24 = vpop.f32.mrf.mxu0  ;;  %4896 = vmatmul.mubr.msk.bf16.gmra.mxu0 %vm509_vm1, %v8288_v47  ;;  %v6277_v55 = vpop.f32.mrf.mxu1  ;;  %v2317_v49 = vadd.f32 %v2316_v5, %v5988_v19  ;;  %v473_v7 = vpack.c.bf16 %v408_v27, %v407_v14 }
 0x20a   : > { %v1529_v53 = vmax.f32 %v1110_v28, 0.0  ;;  %1361 = vmatprep.mubr.bf16.mxu0 %v8270_v16  ;;  %v6283_v26 = vpack.c.bf16 %v3603_v9, %v3599_v34  ;;  %v6290_v28 = vpack.c.bf16 %v1528_v51, %v1526_v56  ;;  %v1114_v34 = vadd.f32 %v1113_v24, %v5560_v4 }
 0x20b   : > { %v1115_v33 = vpop.f32.mrf.mxu0  ;;  %v2320_v11 = vpop.f32.mrf.mxu1  ;;  %v3606_v3 = vmax.f32 %v2317_v49, 0.0  ;;  %v410_v49 = vld [vmem:[%s5321_s9 + $0x3f8] sm:$0xff] }
 0x20c   : > { %v6285_v8 = vpack.c.bf16 %v1529_v53, %v1527_v46  ;;  %v2321_v0 = vadd.f32 %v2320_v11, %v5988_v19  ;;  %v1116_v15 = vadd.f32 %v1115_v33, %v5554_v1  ;;  %v409_v33 = vld [vmem:[%s5321_s9 + $0x3f0] sm:$0xff]  ;;  %v1530_v56 = vmax.f32 %v1114_v34, 0.0  ;;  %s5211_s9 = smov [#allocation3]  }
 0x20d   : > { %v1117_v47 = vpop.f32.mrf.mxu0  ;;  %4329 = vmatpush1.bf16.xpose.msra.mxu1 %v4046_v50  ;;  %v6288_v35 = vpop.f32.mrf.mxu1  ;;  %s5151_s18 = sshll.u32 %s5211_s9, 4  ;;  %s5152_s18 = int_to_ptr.vmem [resolvable:$false] %s5151_s18 }
 0x20e   : > { %v1118_v5 = vadd.f32 %v1117_v47, %v5560_v4  ;;  %4330 = vmatprep.subr.bf16.mxu1 %v4043_v45  ;;  %2564 = vmatprep.mubr.bf16.mxu1 %v6285_v8  ;;  %v3610_v9 = vmax.f32 %v2321_v0, 0.0  ;;  %v1531_v14 = vmax.f32 %v1116_v15, 0.0  ;;  %s5153_s19 = scalar_lea.vmem %s5152_s18, 256  ;;  %p5154_p0 = scmp.lt.s32.totalorder %s4765_s6, %s5152_s18 }
 0x20f   : > { %v1119_v31 = vpop.f32.mrf.mxu0  ;;  %v6295_v54 = vpop.f32.mrf.mxu1  ;;  %2565 = vmatmul.mubr.bf16.gmra.mxu1 %v6290_v28  ;;  %p5155_p1 = scmp.lt.s32.totalorder %s5153_s19, %s5147_s17 }
 0x210   : > { %v1120_v32 = vadd.f32 %v1119_v31, %v5554_v1  ;;  %v6301_v51 = vpack.c.bf16 %v3610_v9, %v3606_v3  ;;  %v1532_v27 = vmax.f32 %v1118_v5, 0.0 }
 0x211   : > { %v1123_v46 = vpop.f32.mrf.mxu0  ;;  %4897 = vmatmul.mubr.msk.bf16.gmra.mxu0 %vm509_vm1, %v473_v7  ;;  %v6303_v53 = vpop.f32.mrf.mxu1  ;;  %v474_v7 = vpack.c.bf16 %v410_v49, %v409_v33  ;;  %p5156_p2 = por %p5155_p1, %p5154_p0 }
 0x212   : > { %v1533_v50 = vmax.f32 %v1120_v32, 0.0  ;;  %1371 = vmatprep.mubr.bf16.mxu0 %v8270_v16  ;;  %v6315_v31 = vpack.c.bf16 %v1532_v27, %v1530_v56  ;;  %v1124_v9 = vadd.f32 %v1123_v46, %v5560_v4 }
 0x213   : > { %v1125_v11 = vpop.f32.mrf.mxu0  ;;  %v6308_v24 = vpop.f32.mrf.mxu1  ;;  %p5157_p3 = pnand %p5156_p2, %p5150_p13 }
 0x214   : > { %v6310_v45 = vpack.c.bf16 %v1533_v50, %v1531_v14  ;;  %8290 = vst [vmem:[#allocation63_spill] sm:$0xff] %v6315_v31  ;;  %v1126_v15 = vadd.f32 %v1125_v11, %v5554_v1  ;;  %v1534_v49 = vmax.f32 %v1124_v9, 0.0 }
 0x215   : > { %v1127_v47 = vpop.f32.mrf.mxu0  ;;  %4331 = vmatpush1.bf16.xpose.msra.mxu1 %v6083_v59  ;;  %v6313_v0 = vpop.f32.mrf.mxu1 }
 0x216   : > { %8289 = vst [vmem:[#allocation62_spill] sm:$0xff] %v6310_v45  ;;  %v1128_v16 = vadd.f32 %v1127_v47, %v5560_v4  ;;  %4332 = vmatprep.subr.bf16.mxu1 %v6068_v61  ;;  %2574 = vmatprep.mubr.bf16.mxu1 %v6310_v45  ;;  %v1535_v14 = vmax.f32 %v1126_v15, 0.0 }
 0x217   : > { %v1129_v5 = vpop.f32.mrf.mxu0  ;;  %v6321_v3 = vpop.f32.mrf.mxu1  ;;  %2575 = vmatmul.mubr.bf16.gmra.mxu1 %v6315_v31 }
 0x218   : > { %v1130_v59 = vadd.f32 %v1129_v5, %v5554_v1  ;;  %v1536_v27 = vmax.f32 %v1128_v16, 0.0 }
 0x219   : > { %v1133_v34 = vpop.f32.mrf.mxu0  ;;  %4898 = vmatmul.mubr.msk.bf16.gmra.mxu0 %vm509_vm1, %v474_v7  ;;  %v6327_v32 = vpop.f32.mrf.mxu1 }
 0x21a   : > { %v1537_v50 = vmax.f32 %v1130_v59, 0.0  ;;  %2877 = vmatprep.mubr.bf16.mxu0 %v5570_v22  ;;  %v6337_v47 = vpack.c.bf16 %v1536_v27, %v1534_v49  ;;  %v1134_v5 = vadd.f32 %v1133_v34, %v5560_v4 }
 0x21b   : > { %v1135_v61 = vpop.f32.mrf.mxu0  ;;  %v6330_v33 = vpop.f32.mrf.mxu1 }
 0x21c   : > { %v6332_v11 = vpack.c.bf16 %v1537_v50, %v1535_v14  ;;  %8292 = vst [vmem:[#allocation65_spill] sm:$0xff] %v6337_v47  ;;  %v1136_v7 = vadd.f32 %v1135_v61, %v5554_v1  ;;  %v1538_v49 = vmax.f32 %v1134_v5, 0.0 }
 0x21d   : > { %v1137_v46 = vpop.f32.mrf.mxu0  ;;  %4333 = vmatpush1.bf16.xpose.msra.mxu1 %v6057_v12  ;;  %v6335_v56 = vpop.f32.mrf.mxu1 }
 0x21e   : > { %8291 = vst [vmem:[#allocation64_spill] sm:$0xff] %v6332_v11  ;;  %v1138_v15 = vadd.f32 %v1137_v46, %v5560_v4  ;;  %4334 = vmatprep.subr.bf16.mxu1 %v6044_v13  ;;  %2584 = vmatprep.mubr.bf16.mxu1 %v6332_v11  ;;  %v1539_v14 = vmax.f32 %v1136_v7, 0.0 }
 0x21f   : > { %v1139_v22 = vpop.f32.mrf.mxu0  ;;  %v6343_v16 = vpop.f32.mrf.mxu1  ;;  %2585 = vmatmul.mubr.bf16.gmra.mxu1 %v6337_v47 }
 0x220   : > { %v1140_v9 = vadd.f32 %v1139_v22, %v5554_v1  ;;  %v1540_v27 = vmax.f32 %v1138_v15, 0.0 }
 0x221   : > { %v1143_v12 = vpop.f32.mrf.mxu0  ;;  %2878 = vmatmul.mubr.bf16.vlgmr.msra.gmra.mxu0 %v5572_v23  ;;  %v2348_v59 = vpop.f32.mrf.mxu1 }
 0x222   : > { %v1541_v50 = vmax.f32 %v1140_v9, 0.0  ;;  %2887 = vmatprep.mubr.bf16.mxu0 %v5590_v41  ;;  %v6355_v47 = vpack.c.bf16 %v1540_v27, %v1538_v49  ;;  %v1144_v5 = vadd.f32 %v1143_v12, %v5560_v4 }
 0x223   : > { %v1145_v13 = vpop.f32.mrf.mxu0  ;;  %v6350_v61 = vpop.f32.mrf.mxu1 }
 0x224   : > { %v6352_v46 = vpack.c.bf16 %v1541_v50, %v1539_v14  ;;  %8294 = vst [vmem:[#allocation67_spill] sm:$0xff] %v6355_v47  ;;  %v1146_v23 = vadd.f32 %v1145_v13, %v5554_v1 }
 0x225   : > { %v1147_v34 = vpop.f32.mrf.mxu0  ;;  %4335 = vmatpush1.bf16.xpose.msra.mxu1 %v6035_v38  ;;  %v2352_v22 = vpop.f32.mrf.mxu1 }
 0x226   : > { %8293 = vst [vmem:[#allocation66_spill] sm:$0xff] %v6352_v46  ;;  %v1148_v7 = vadd.f32 %v1147_v34, %v5560_v4  ;;  %4336 = vmatprep.subr.bf16.mxu1 %v6022_v39  ;;  %2594 = vmatprep.mubr.bf16.mxu1 %v6352_v46  ;;  %v1543_v27 = vmax.f32 %v1146_v23, 0.0  ;;  %v1542_v34 = vmax.f32 %v1144_v5, 0.0  ;;  %v2353_v12 = vadd.f32 %v2352_v22, %v5996_v48 }
 0x227   : > { %v1149_v41 = vpop.f32.mrf.mxu0  ;;  %v2356_v15 = vpop.f32.mrf.mxu1  ;;  %2595 = vmatmul.mubr.bf16.gmra.mxu1 %v6355_v47 }
 0x228   : > { %v1150_v9 = vadd.f32 %v1149_v41, %v5554_v1  ;;  %v1544_v50 = vmax.f32 %v1148_v7, 0.0  ;;  %v2357_v23 = vadd.f32 %v2356_v15, %v5988_v19  ;;  %v3635_v47 = vmax.f32 %v2353_v12, 0.0 }
 0x229   : > { %v1153_v38 = vpop.f32.mrf.mxu0  ;;  %2888 = vmatmul.mubr.bf16.gmra.mxu0 %v5592_v42  ;;  %v2358_v14 = vpop.f32.mrf.mxu1  ;;  %v2349_v42 = vadd.f32 %v2348_v59, %v5996_v48 }
 0x22a   : > { %v1545_v13 = vmax.f32 %v1150_v9, 0.0  ;;  %2897 = vmatprep.mubr.bf16.mxu0 %v5604_v58  ;;  %v2359_v41 = vadd.f32 %v2358_v14, %v5996_v48  ;;  %v6374_v58 = vpack.c.bf16 %v1544_v50, %v1542_v34  ;;  %v1154_v14 = vadd.f32 %v1153_v38, %v5560_v4 }
 0x22b   : > { %v1155_v39 = vpop.f32.mrf.mxu0  ;;  %v2360_v49 = vpop.f32.mrf.mxu1 }
 0x22c   : > { %v6366_v46 = vpack.c.bf16 %v1545_v13, %v1543_v27  ;;  %v2361_v7 = vadd.f32 %v2360_v49, %v5988_v19  ;;  %8296 = vst [vmem:[#allocation69_spill] sm:$0xff] %v6374_v58  ;;  %v1156_v5 = vadd.f32 %v1155_v39, %v5554_v1  ;;  %v3639_v50 = vmax.f32 %v2359_v41, 0.0 }
 0x22d   : > { %v1157_v11 = vpop.f32.mrf.mxu0  ;;  %4337 = vmatpush1.bf16.xpose.msra.mxu1 %v6014_v40  ;;  %v2362_v9 = vpop.f32.mrf.mxu1  ;;  %v2339_v41 = vadd.f32 %v6327_v32, %v5996_v48  ;;  %v2347_v32 = vadd.f32 %v6343_v16, %v5988_v19 }
 0x22e   : > { %8295 = vst [vmem:[#allocation68_spill] sm:$0xff] %v6366_v46  ;;  %v1158_v27 = vadd.f32 %v1157_v11, %v5560_v4  ;;  %2604 = vmatprep.mubr.bf16.mxu1 %v6366_v46  ;;  %v2363_v22 = vadd.f32 %v2362_v9, %v5996_v48  ;;  %v3642_v13 = vmax.f32 %v2361_v7, 0.0  ;;  %v3638_v11 = vmax.f32 %v2357_v23, 0.0 }
 0x22f   : > { %v1159_v40 = vpop.f32.mrf.mxu0  ;;  %v2366_v59 = vpop.f32.mrf.mxu1  ;;  %2605 = vmatmul.mubr.bf16.gmra.mxu1 %v6374_v58  ;;  %v1547_v31 = vmax.f32 %v1156_v5, 0.0  ;;  %v3631_v7 = vmax.f32 %v2349_v42, 0.0  ;;  %v2343_v23 = vadd.f32 %v6335_v56, %v5996_v48 }
 0x230   : > { %v1160_v15 = vadd.f32 %v1159_v40, %v5554_v1  ;;  %v3643_v49 = vmax.f32 %v2363_v22, 0.0  ;;  %v1548_v34 = vmax.f32 %v1158_v27, 0.0  ;;  %v2367_v46 = vadd.f32 %v2366_v59, %v5988_v19 }
 0x231   : > { %v1163_v39 = vpop.f32.mrf.mxu0  ;;  %2898 = vmatmul.mubr.bf16.gmra.mxu0 %v5606_v60  ;;  %v2368_v9 = vpop.f32.mrf.mxu1  ;;  %v1546_v40 = vmax.f32 %v1154_v14, 0.0  ;;  %v2351_v27 = vadd.f32 %v6350_v61, %v5988_v19  ;;  %v4090_v22 = vpack.c.bf16 %v3642_v13, %v3638_v11  ;;  %v4087_v5 = vpack.c.bf16 %v3635_v47, %v3631_v7 }
 0x232   : > { %v1549_v38 = vmax.f32 %v1160_v15, 0.0  ;;  %2907 = vmatprep.mubr.bf16.mxu0 %v5618_v17  ;;  %v4091_v45 = vpack.c.bf16 %v3643_v49, %v3639_v50  ;;  %v3646_v15 = vmax.f32 %v2367_v46, 0.0  ;;  %v2369_v61 = vadd.f32 %v2368_v9, %v5996_v48 }
 0x233   : > { %v1165_v12 = vpop.f32.mrf.mxu0  ;;  %v2370_v60 = vpop.f32.mrf.mxu1  ;;  %v6395_v42 = vpack.c.bf16 %v1548_v34, %v1546_v40  ;;  %v1164_v47 = vadd.f32 %v1163_v39, %v5560_v4  ;;  %v3634_v34 = vmax.f32 %v2351_v27, 0.0  ;;  %v3627_v11 = vmax.f32 %v2343_v23, 0.0 }
 0x234   : > { %v6392_v59 = vpack.c.bf16 %v1549_v38, %v1547_v31  ;;  %4338 = vmatprep.subr.bf16.mxu1 %v4091_v45  ;;  %v2371_v17 = vadd.f32 %v2370_v60, %v5988_v19  ;;  %v1166_v50 = vadd.f32 %v1165_v12, %v5554_v1  ;;  %v3630_v12 = vmax.f32 %v2347_v32, 0.0 }
 0x235   : > { %8298 = vst [vmem:[#allocation71_spill] sm:$0xff] %v6395_v42  ;;  %v1167_v14 = vpop.f32.mrf.mxu0  ;;  %4339 = vmatpush2.bf16.xpose.msra.mxu1 %v4090_v22  ;;  %v2372_v13 = vpop.f32.mrf.mxu1  ;;  %v3647_v22 = vmax.f32 %v2369_v61, 0.0  ;;  %v3623_v27 = vmax.f32 %v2339_v41, 0.0  ;;  %v2341_v23 = vadd.f32 %v6330_v33, %v5988_v19  ;;  %v2337_v32 = vadd.f32 %v6321_v3, %v5988_v19 }
 0x236   : > { %8297 = vst [vmem:[#allocation70_spill] sm:$0xff] %v6392_v59  ;;  %v1168_v31 = vadd.f32 %v1167_v14, %v5560_v4  ;;  %2614 = vmatprep.mubr.bf16.mxu1 %v6392_v59  ;;  %4340 = vmatprep.subr.bf16.mxu1 %v4087_v5  ;;  %v3650_v45 = vmax.f32 %v2371_v17, 0.0  ;;  %v2373_v56 = vadd.f32 %v2372_v13, %v5996_v48  ;;  %v1551_v5 = vmax.f32 %v1166_v50, 0.0 }
 0x237   : > { %v1169_v49 = vpop.f32.mrf.mxu0  ;;  %v2376_v16 = vpop.f32.mrf.mxu1  ;;  %2615 = vmatmul.mubr.bf16.gmra.mxu1 %v6395_v42  ;;  %v1550_v17 = vmax.f32 %v1164_v47, 0.0  ;;  %v2329_v50 = vadd.f32 %v6303_v53, %v5996_v48 }
 0x238   : > { %v1170_v46 = vadd.f32 %v1169_v49, %v5554_v1  ;;  %v6407_v9 = vpack.c.bf16 %v3650_v45, %v3646_v15  ;;  %v3651_v38 = vmax.f32 %v2373_v56, 0.0  ;;  %v1552_v7 = vmax.f32 %v1168_v31, 0.0 }
 0x239   : > { %v1173_v40 = vpop.f32.mrf.mxu0  ;;  %2908 = vmatmul.mubr.bf16.gmra.mxu0 %v5620_v18  ;;  %v2378_v60 = vpop.f32.mrf.mxu1  ;;  %v4086_v15 = vpack.c.bf16 %v3634_v34, %v3630_v12  ;;  %v2377_v13 = vadd.f32 %v2376_v16, %v5988_v19  ;;  %v2333_v18 = vadd.f32 %v6313_v0, %v5996_v48 }
 0x23a   : > { %8299 = vst [vmem:[#allocation72_spill] sm:$0xff] %v6407_v9  ;;  %v1553_v39 = vmax.f32 %v1170_v46, 0.0  ;;  %2917 = vmatprep.mubr.bf16.mxu0 %v5632_v36  ;;  %v6414_v45 = vpack.c.bf16 %v3651_v38, %v3647_v22  ;;  %v4083_v36 = vpack.c.bf16 %v3627_v11, %v3623_v27  ;;  %v6422_v41 = vpack.c.bf16 %v1552_v7, %v1550_v17 }
 0x23b   : > { %v1175_v14 = vpop.f32.mrf.mxu0  ;;  %v2380_v31 = vpop.f32.mrf.mxu1  ;;  %v2379_v56 = vadd.f32 %v2378_v60, %v5996_v48  ;;  %v1174_v16 = vadd.f32 %v1173_v40, %v5560_v4  ;;  %v3626_v11 = vmax.f32 %v2341_v23, 0.0  ;;  %v3654_v53 = vmax.f32 %v2377_v13, 0.0 }
 0x23c   : > { %8300 = vst [vmem:[#allocation73_spill] sm:$0xff] %v6414_v45  ;;  %v6420_v61 = vpack.c.bf16 %v1553_v39, %v1551_v5  ;;  %8302 = vst [vmem:[#allocation75_spill] sm:$0xff] %v6422_v41  ;;  %v2381_v47 = vadd.f32 %v2380_v31, %v5988_v19  ;;  %v1176_v0 = vadd.f32 %v1175_v14, %v5554_v1  ;;  %v3619_v22 = vmax.f32 %v2333_v18, 0.0 }
 0x23d   : > { %v1177_v33 = vpop.f32.mrf.mxu0  ;;  %4341 = vmatpush2.bf16.xpose.msra.mxu1 %v4086_v15  ;;  %v2382_v49 = vpop.f32.mrf.mxu1  ;;  %v3622_v60 = vmax.f32 %v2337_v32, 0.0  ;;  %v3655_v17 = vmax.f32 %v2379_v56, 0.0  ;;  %v2319_v31 = vadd.f32 %v6277_v55, %v5996_v48  ;;  %v3615_v18 = vmax.f32 %v2329_v50, 0.0 }
 0x23e   : > { %8301 = vst [vmem:[#allocation74_spill] sm:$0xff] %v6420_v61  ;;  %v1178_v34 = vadd.f32 %v1177_v33, %v5560_v4  ;;  %2624 = vmatprep.mubr.bf16.mxu1 %v6420_v61  ;;  %4342 = vmatprep.subr.bf16.mxu1 %v4083_v36  ;;  %v2383_v3 = vadd.f32 %v2382_v49, %v5996_v48  ;;  %v3658_v38 = vmax.f32 %v2381_v47, 0.0  ;;  %v1555_v15 = vmax.f32 %v1176_v0, 0.0 }
 0x23f   : > { %v1179_v46 = vpop.f32.mrf.mxu0  ;;  %v2386_v7 = vpop.f32.mrf.mxu1  ;;  %2625 = vmatmul.mubr.bf16.gmra.mxu1 %v6422_v41  ;;  %v1554_v32 = vmax.f32 %v1174_v16, 0.0  ;;  %v2331_v33 = vadd.f32 %v6308_v24, %v5988_v19  ;;  %v2323_v49 = vadd.f32 %v6288_v35, %v5996_v48  ;;  %v2327_v50 = vadd.f32 %v6295_v54, %v5988_v19  ;;  %v8424_v41 = vld [vmem:[#allocation50_spill] sm:$0xff] }
 0x240   : > { %v1180_v12 = vadd.f32 %v1179_v46, %v5554_v1  ;;  %v3659_v5 = vmax.f32 %v2383_v3, 0.0  ;;  %v1556_v39 = vmax.f32 %v1178_v34, 0.0  ;;  %v6436_v14 = vpack.c.bf16 %v3658_v38, %v3654_v53 }
 0x241   : > { %v1183_v27 = vpop.f32.mrf.mxu0  ;;  %2918 = vmatmul.mubr.bf16.gmra.mxu0 %v5634_v37  ;;  %v2387_v40 = vadd.f32 %v2386_v7, %v5988_v19  ;;  %v2388_v23 = vpop.f32.mrf.mxu1  ;;  %v4082_v37 = vpack.c.bf16 %v3626_v11, %v3622_v60  ;;  %v4079_v34 = vpack.c.bf16 %v3619_v22, %v3615_v18  ;;  %v3618_v22 = vmax.f32 %v2331_v33, 0.0 }
 0x242   : > { %8303 = vst [vmem:[#allocation76_spill] sm:$0xff] %v6436_v14  ;;  %v1557_v13 = vmax.f32 %v1180_v12, 0.0  ;;  %2927 = vmatprep.mubr.bf16.mxu0 %v5652_v57  ;;  %v6444_v47 = vpack.c.bf16 %v3659_v5, %v3655_v17  ;;  %v6451_v3 = vpack.c.bf16 %v1556_v39, %v1554_v32  ;;  %v2389_v16 = vadd.f32 %v2388_v23, %v5996_v48 }
 0x243   : > { %v1185_v36 = vpop.f32.mrf.mxu0  ;;  %v2390_v56 = vpop.f32.mrf.mxu1  ;;  %v3662_v24 = vmax.f32 %v2387_v40, 0.0  ;;  %v1184_v7 = vadd.f32 %v1183_v27, %v5560_v4  ;;  %v3611_v5 = vmax.f32 %v2323_v49, 0.0 }
 0x244   : > { %8304 = vst [vmem:[#allocation77_spill] sm:$0xff] %v6444_v47  ;;  %v6448_v0 = vpack.c.bf16 %v1557_v13, %v1555_v15  ;;  %v2391_v57 = vadd.f32 %v2390_v56, %v5988_v19  ;;  %8306 = vst [vmem:[#allocation79_spill] sm:$0xff] %v6451_v3  ;;  %v1186_v11 = vadd.f32 %v1185_v36, %v5554_v1  ;;  %v3614_v15 = vmax.f32 %v2327_v50, 0.0 }
 0x245   : > { %v1187_v55 = vpop.f32.mrf.mxu0  ;;  %4343 = vmatpush2.bf16.xpose.msra.mxu1 %v4082_v37  ;;  %v2392_v46 = vpop.f32.mrf.mxu1  ;;  %v3663_v13 = vmax.f32 %v2389_v16, 0.0  ;;  %v3607_v36 = vmax.f32 %v2319_v31, 0.0  ;;  %v1558_v33 = vmax.f32 %v1184_v7, 0.0 }
 0x246   : > { %8305 = vst [vmem:[#allocation78_spill] sm:$0xff] %v6448_v0  ;;  %v1188_v35 = vadd.f32 %v1187_v55, %v5560_v4  ;;  %2634 = vmatprep.mubr.bf16.mxu1 %v6448_v0  ;;  %4344 = vmatprep.subr.bf16.mxu1 %v4079_v34  ;;  %v3666_v53 = vmax.f32 %v2391_v57, 0.0  ;;  %v2393_v38 = vadd.f32 %v2392_v46, %v5996_v48  ;;  %v1559_v32 = vmax.f32 %v1186_v11, 0.0 }
 0x247   : > { %v1189_v12 = vpop.f32.mrf.mxu0  ;;  %v2396_v54 = vpop.f32.mrf.mxu1  ;;  %2635 = vmatmul.mubr.bf16.gmra.mxu1 %v6451_v3  ;;  %v4078_v56 = vpack.c.bf16 %v3618_v22, %v3614_v15 }
 0x248   : > { %v1190_v60 = vadd.f32 %v1189_v12, %v5554_v1  ;;  %v6463_v39 = vpack.c.bf16 %v3666_v53, %v3662_v24  ;;  %v3667_v17 = vmax.f32 %v2393_v38, 0.0  ;;  %v1560_v40 = vmax.f32 %v1188_v35, 0.0 }
 0x249   : > { %v1193_v23 = vpop.f32.mrf.mxu0  ;;  %2928 = vmatmul.mubr.bf16.gmra.mxu0 %v5654_v63  ;;  %v2398_v18 = vpop.f32.mrf.mxu1  ;;  %v2397_v49 = vadd.f32 %v2396_v54, %v5988_v19  ;;  %v4075_v24 = vpack.c.bf16 %v3611_v5, %v3607_v36 }
 0x24a   : > { %8307 = vst [vmem:[#allocation80_spill] sm:$0xff] %v6463_v39  ;;  %v1561_v27 = vmax.f32 %v1190_v60, 0.0  ;;  %2937 = vmatprep.mubr.bf16.mxu0 %v5666_v20  ;;  %v6468_v57 = vpack.c.bf16 %v3667_v17, %v3663_v13  ;;  %v6472_v63 = vpack.c.bf16 %v1560_v40, %v1558_v33  ;;  %v2399_v16 = vadd.f32 %v2398_v18, %v5996_v48 }
 0x24b   : > { %v1195_v37 = vpop.f32.mrf.mxu0  ;;  %v2400_v34 = vpop.f32.mrf.mxu1  ;;  %v1194_v53 = vadd.f32 %v1193_v23, %v5560_v4  ;;  %v3670_v7 = vmax.f32 %v2397_v49, 0.0 }
 0x24c   : > { %8308 = vst [vmem:[#allocation81_spill] sm:$0xff] %v6468_v57  ;;  %v6470_v55 = vpack.c.bf16 %v1561_v27, %v1559_v32  ;;  %8310 = vst [vmem:[#allocation83_spill] sm:$0xff] %v6472_v63  ;;  %v2401_v20 = vadd.f32 %v2400_v34, %v5988_v19  ;;  %v1196_v46 = vadd.f32 %v1195_v37, %v5554_v1  ;;  %v3671_v40 = vmax.f32 %v2399_v16, 0.0  ;;  %v8312_v27 = vld [vmem:[#allocation9_spill] sm:$0xff] }
 0x24d   : > { %v1197_v50 = vpop.f32.mrf.mxu0  ;;  %4345 = vmatpush2.bf16.xpose.msra.mxu1 %v4078_v56  ;;  %v2402_v31 = vpop.f32.mrf.mxu1  ;;  %v1562_v36 = vmax.f32 %v1194_v53, 0.0 }
 0x24e   : > { %8309 = vst [vmem:[#allocation82_spill] sm:$0xff] %v6470_v55  ;;  %v1198_v11 = vadd.f32 %v1197_v50, %v5560_v4  ;;  %2644 = vmatprep.mubr.bf16.mxu1 %v6470_v55  ;;  %4346 = vmatprep.subr.bf16.mxu1 %v4075_v24  ;;  %v2403_v35 = vadd.f32 %v2402_v31, %v5996_v48  ;;  %v3674_v12 = vmax.f32 %v2401_v20, 0.0  ;;  %v1563_v23 = vmax.f32 %v1196_v46, 0.0 }
 0x24f   : > { %v1199_v38 = vpop.f32.mrf.mxu0  ;;  %v2406_v22 = vpop.f32.mrf.mxu1  ;;  %2645 = vmatmul.mubr.bf16.gmra.mxu1 %v6472_v63 }
 0x250   : > { %v1200_v54 = vadd.f32 %v1199_v38, %v5554_v1  ;;  %v3675_v60 = vmax.f32 %v2403_v35, 0.0  ;;  %v1564_v5 = vmax.f32 %v1198_v11, 0.0  ;;  %v6484_v15 = vpack.c.bf16 %v3674_v12, %v3670_v7 }
 0x251   : > { %v1203_v17 = vpop.f32.mrf.mxu0  ;;  %2938 = vmatmul.mubr.bf16.gmra.mxu0 %v5668_v21  ;;  %v2407_v13 = vadd.f32 %v2406_v22, %v5988_v19  ;;  %v2408_v18 = vpop.f32.mrf.mxu1 }
 0x252   : > { %8311 = vst [vmem:[#allocation84_spill] sm:$0xff] %v6484_v15  ;;  %v1565_v32 = vmax.f32 %v1200_v54, 0.0  ;;  %2947 = vmatprep.mubr.bf16.mxu0 %v8312_v27  ;;  %v6488_v56 = vpack.c.bf16 %v3675_v60, %v3671_v40  ;;  %v6493_v21 = vpack.c.bf16 %v1564_v5, %v1562_v36  ;;  %v2409_v16 = vadd.f32 %v2408_v18, %v5996_v48  ;;  %v8317_v5 = vld [vmem:[#allocation10_spill] sm:$0xff] }
 0x253   : > { %v1205_v33 = vpop.f32.mrf.mxu0  ;;  %v2410_v37 = vpop.f32.mrf.mxu1  ;;  %v3678_v50 = vmax.f32 %v2407_v13, 0.0  ;;  %v1204_v53 = vadd.f32 %v1203_v17, %v5560_v4 }
 0x254   : > { %8313 = vst [vmem:[#allocation9_spill] sm:$0xff] %v6488_v56  ;;  %v6490_v49 = vpack.c.bf16 %v1565_v32, %v1563_v23  ;;  %v2411_v34 = vadd.f32 %v2410_v37, %v5988_v19  ;;  %8315 = vst [vmem:[#allocation86_spill] sm:$0xff] %v6493_v21  ;;  %v1206_v31 = vadd.f32 %v1205_v33, %v5554_v1  ;;  %v3679_v40 = vmax.f32 %v2409_v16, 0.0  ;;  %v8318_v23 = vld [vmem:[#allocation11_spill] sm:$0xff] }
 0x255   : > { %v1207_v24 = vpop.f32.mrf.mxu0  ;;  %4347 = vmatpush2.bf16.xpose.msra.mxu1 %v6301_v51  ;;  %v2412_v20 = vpop.f32.mrf.mxu1  ;;  %v1566_v17 = vmax.f32 %v1204_v53, 0.0 }
 0x256   : > { %8314 = vst [vmem:[#allocation85_spill] sm:$0xff] %v6490_v49  ;;  %v1208_v46 = vadd.f32 %v1207_v24, %v5560_v4  ;;  %2654 = vmatprep.mubr.bf16.mxu1 %v6490_v49  ;;  %4348 = vmatprep.subr.bf16.mxu1 %v6283_v26  ;;  %v3682_v11 = vmax.f32 %v2411_v34, 0.0  ;;  %v2413_v35 = vadd.f32 %v2412_v20, %v5996_v48  ;;  %v1567_v13 = vmax.f32 %v1206_v31, 0.0 }
 0x257   : > { %v1209_v38 = vpop.f32.mrf.mxu0  ;;  %v2416_v7 = vpop.f32.mrf.mxu1  ;;  %2655 = vmatmul.mubr.bf16.gmra.mxu1 %v6493_v21 }
 0x258   : > { %v1210_v51 = vadd.f32 %v1209_v38, %v5554_v1  ;;  %v6505_v12 = vpack.c.bf16 %v3682_v11, %v3678_v50  ;;  %v3683_v22 = vmax.f32 %v2413_v35, 0.0  ;;  %v1568_v54 = vmax.f32 %v1208_v46, 0.0 }
 0x259   : > { %v1213_v60 = vpop.f32.mrf.mxu0  ;;  %2948 = vmatmul.mubr.bf16.gmra.mxu0 %v8317_v5  ;;  %v2418_v26 = vpop.f32.mrf.mxu1  ;;  %v2417_v27 = vadd.f32 %v2416_v7, %v5988_v19 }
 0x25a   : > { %8316 = vst [vmem:[#allocation87_spill] sm:$0xff] %v6505_v12  ;;  %v1569_v18 = vmax.f32 %v1210_v51, 0.0  ;;  %2957 = vmatprep.mubr.bf16.mxu0 %v8318_v23  ;;  %v6510_v33 = vpack.c.bf16 %v3683_v22, %v3679_v40  ;;  %v6514_v34 = vpack.c.bf16 %v1568_v54, %v1566_v17  ;;  %v2419_v50 = vadd.f32 %v2418_v26, %v5996_v48  ;;  %v8322_v40 = vld [vmem:[#allocation12_spill] sm:$0xff]  ;;  %v8324_v17 = vld [vmem:[#allocation13_spill] sm:$0xff] }
 0x25b   : > { %v1215_v32 = vpop.f32.mrf.mxu0  ;;  %v2420_v36 = vpop.f32.mrf.mxu1  ;;  %v1214_v35 = vadd.f32 %v1213_v60, %v5560_v4  ;;  %v3686_v38 = vmax.f32 %v2417_v27, 0.0 }
 0x25c   : > { %8319 = vst [vmem:[#allocation10_spill] sm:$0xff] %v6510_v33  ;;  %v6512_v37 = vpack.c.bf16 %v1569_v18, %v1567_v13  ;;  %8321 = vst [vmem:[#allocation88_spill] sm:$0xff] %v6514_v34  ;;  %v2421_v16 = vadd.f32 %v2420_v36, %v5988_v19  ;;  %v1216_v31 = vadd.f32 %v1215_v32, %v5554_v1  ;;  %v3687_v26 = vmax.f32 %v2419_v50, 0.0 }
 0x25d   : > { %v1217_v24 = vpop.f32.mrf.mxu0  ;;  %4349 = vmatpush2.bf16.xpose.msra.mxu1 %v6271_v43  ;;  %v2422_v20 = vpop.f32.mrf.mxu1  ;;  %v1570_v32 = vmax.f32 %v1214_v35, 0.0 }
 0x25e   : > { %8320 = vst [vmem:[#allocation11_spill] sm:$0xff] %v6512_v37  ;;  %v1218_v46 = vadd.f32 %v1217_v24, %v5560_v4  ;;  %2664 = vmatprep.mubr.bf16.mxu1 %v6512_v37  ;;  %4350 = vmatprep.subr.bf16.mxu1 %v6252_v2  ;;  %v2423_v11 = vadd.f32 %v2422_v20, %v5996_v48  ;;  %v3690_v43 = vmax.f32 %v2421_v16, 0.0  ;;  %v1571_v60 = vmax.f32 %v1216_v31, 0.0 }
 0x25f   : > { %v1219_v53 = vpop.f32.mrf.mxu0  ;;  %v2426_v7 = vpop.f32.mrf.mxu1  ;;  %2665 = vmatmul.mubr.bf16.gmra.mxu1 %v6514_v34  ;;  %v8419_v34 = vld [vmem:[#allocation48_spill] sm:$0xff] }
 0x260   : > { %v1220_v51 = vadd.f32 %v1219_v53, %v5554_v1  ;;  %v3691_v22 = vmax.f32 %v2423_v11, 0.0  ;;  %v1572_v54 = vmax.f32 %v1218_v46, 0.0  ;;  %v6528_v13 = vpack.c.bf16 %v3690_v43, %v3686_v38 }
 0x261   : > { %v1223_v5 = vpop.f32.mrf.mxu0  ;;  %2958 = vmatmul.mubr.bf16.gmra.mxu0 %v8322_v40  ;;  %v2427_v2 = vadd.f32 %v2426_v7, %v5988_v19  ;;  %v2428_v18 = vpop.f32.mrf.mxu1 }
 0x262   : > { %8323 = vst [vmem:[#allocation12_spill] sm:$0xff] %v6528_v13  ;;  %v1573_v23 = vmax.f32 %v1220_v51, 0.0  ;;  %2967 = vmatprep.mubr.bf16.mxu0 %v8324_v17  ;;  %v6532_v24 = vpack.c.bf16 %v3691_v22, %v3687_v26  ;;  %v6537_v46 = vpack.c.bf16 %v1572_v54, %v1570_v32  ;;  %v2429_v31 = vadd.f32 %v2428_v18, %v5996_v48  ;;  %v8329_v18 = vld [vmem:[#allocation14_spill] sm:$0xff] }
 0x263   : > { %v1225_v27 = vpop.f32.mrf.mxu0  ;;  %v2430_v36 = vpop.f32.mrf.mxu1  ;;  %v3694_v11 = vmax.f32 %v2427_v2, 0.0  ;;  %v1224_v54 = vadd.f32 %v1223_v5, %v5560_v4 }
 0x264   : > { %8325 = vst [vmem:[#allocation13_spill] sm:$0xff] %v6532_v24  ;;  %v6534_v16 = vpack.c.bf16 %v1573_v23, %v1571_v60  ;;  %v2431_v20 = vadd.f32 %v2430_v36, %v5988_v19  ;;  %8327 = vst [vmem:[#allocation90_spill] sm:$0xff] %v6537_v46  ;;  %v1226_v38 = vadd.f32 %v1225_v27, %v5554_v1  ;;  %v3695_v60 = vmax.f32 %v2429_v31, 0.0  ;;  %v8330_v27 = vld [vmem:[#allocation15_spill] sm:$0xff] }
 0x265   : > { %v1227_v50 = vpop.f32.mrf.mxu0  ;;  %4351 = vmatpush2.bf16.xpose.msra.mxu1 %v6244_v25  ;;  %v2432_v53 = vpop.f32.mrf.mxu1 }
 0x266   : > { %8326 = vst [vmem:[#allocation89_spill] sm:$0xff] %v6534_v16  ;;  %v1228_v35 = vadd.f32 %v1227_v50, %v5560_v4  ;;  %2674 = vmatprep.mubr.bf16.mxu1 %v6534_v16  ;;  %4352 = vmatprep.subr.bf16.mxu1 %v6222_v52  ;;  %v3698_v43 = vmax.f32 %v2431_v20, 0.0  ;;  %v2433_v7 = vadd.f32 %v2432_v53, %v5996_v48  ;;  %v1575_v52 = vmax.f32 %v1226_v38, 0.0 }
 0x267   : > { %v1229_v51 = vpop.f32.mrf.mxu0  ;;  %v2436_v22 = vpop.f32.mrf.mxu1  ;;  %2675 = vmatmul.mubr.bf16.gmra.mxu1 %v6537_v46  ;;  %v1574_v53 = vmax.f32 %v1224_v54, 0.0 }
 0x268   : > { %v1230_v25 = vadd.f32 %v1229_v51, %v5554_v1  ;;  %v6549_v40 = vpack.c.bf16 %v3698_v43, %v3694_v11  ;;  %v3699_v26 = vmax.f32 %v2433_v7, 0.0  ;;  %v1576_v17 = vmax.f32 %v1228_v35, 0.0 }
 0x269   : > { %v1233_v2 = vpop.f32.mrf.mxu0  ;;  %2968 = vmatmul.mubr.bf16.gmra.mxu0 %v8329_v18  ;;  %v2438_v23 = vpop.f32.mrf.mxu1  ;;  %v2437_v5 = vadd.f32 %v2436_v22, %v5988_v19 }
 0x26a   : > { %8328 = vst [vmem:[#allocation91_spill] sm:$0xff] %v6549_v40  ;;  %v1577_v32 = vmax.f32 %v1230_v25, 0.0  ;;  %2977 = vmatprep.mubr.bf16.mxu0 %v8330_v27  ;;  %v6554_v50 = vpack.c.bf16 %v3699_v26, %v3695_v60  ;;  %v2439_v31 = vadd.f32 %v2438_v23, %v5996_v48  ;;  %v6561_v7 = vpack.c.bf16 %v1576_v17, %v1574_v53  ;;  %v8334_v27 = vld [vmem:[#allocation16_spill] sm:$0xff] }
 0x26b   : > { %v1235_v36 = vpop.f32.mrf.mxu0  ;;  %v2440_v20 = vpop.f32.mrf.mxu1  ;;  %v1234_v25 = vadd.f32 %v1233_v2, %v5560_v4  ;;  %v3702_v18 = vmax.f32 %v2437_v5, 0.0  ;;  %v8336_v5 = vld [vmem:[#allocation17_spill] sm:$0xff] }
 0x26c   : > { %8331 = vst [vmem:[#allocation14_spill] sm:$0xff] %v6554_v50  ;;  %v6556_v11 = vpack.c.bf16 %v1577_v32, %v1575_v52  ;;  %v2441_v38 = vadd.f32 %v2440_v20, %v5988_v19  ;;  %8333 = vst [vmem:[#allocation92_spill] sm:$0xff] %v6561_v7  ;;  %v1236_v51 = vadd.f32 %v1235_v36, %v5554_v1  ;;  %v3703_v36 = vmax.f32 %v2439_v31, 0.0 }
 0x26d   : > { %v1237_v43 = vpop.f32.mrf.mxu0  ;;  %4353 = vmatpush2.bf16.xpose.msra.mxu1 %v6213_v44  ;;  %v2442_v35 = vpop.f32.mrf.mxu1 }
 0x26e   : > { %8332 = vst [vmem:[#allocation15_spill] sm:$0xff] %v6556_v11  ;;  %v1238_v22 = vadd.f32 %v1237_v43, %v5560_v4  ;;  %2684 = vmatprep.mubr.bf16.mxu1 %v6556_v11  ;;  %v2443_v54 = vadd.f32 %v2442_v35, %v5996_v48  ;;  %v3706_v44 = vmax.f32 %v2441_v38, 0.0  ;;  %v1579_v2 = vmax.f32 %v1236_v51, 0.0 }
 0x26f   : > { %v1239_v26 = vpop.f32.mrf.mxu0  ;;  %v2446_v60 = vpop.f32.mrf.mxu1  ;;  %2685 = vmatmul.mubr.bf16.gmra.mxu1 %v6561_v7  ;;  %v1578_v38 = vmax.f32 %v1234_v25, 0.0 }
 0x270   : > { %v1240_v23 = vadd.f32 %v1239_v26, %v5554_v1  ;;  %v3707_v52 = vmax.f32 %v2443_v54, 0.0  ;;  %v1580_v17 = vmax.f32 %v1238_v22, 0.0  ;;  %v6571_v20 = vpack.c.bf16 %v3706_v44, %v3702_v18 }
 0x271   : > { %v1243_v32 = vpop.f32.mrf.mxu0  ;;  %2978 = vmatmul.mubr.bf16.gmra.mxu0 %v8334_v27  ;;  %v2447_v53 = vadd.f32 %v2446_v60, %v5988_v19  ;;  %v2448_v43 = vpop.f32.mrf.mxu1 }
 0x272   : > { %8335 = vst [vmem:[#allocation16_spill] sm:$0xff] %v6571_v20  ;;  %v1581_v35 = vmax.f32 %v1240_v23, 0.0  ;;  %2987 = vmatprep.mubr.bf16.mxu0 %v8336_v5  ;;  %v6575_v45 = vpack.c.bf16 %v3707_v52, %v3703_v36  ;;  %v6580_v27 = vpack.c.bf16 %v1580_v17, %v1578_v38  ;;  %v2449_v44 = vadd.f32 %v2448_v43, %v5996_v48  ;;  %v8411_v20 = vld [vmem:[#allocation45_spill] sm:$0xff] }
 0x273   : > { %v1245_v9 = vpop.f32.mrf.mxu0  ;;  %v2450_v26 = vpop.f32.mrf.mxu1  ;;  %v3710_v18 = vmax.f32 %v2447_v53, 0.0 }
 0x274   : > { %8337 = vst [vmem:[#allocation17_spill] sm:$0xff] %v6575_v45  ;;  %v6577_v54 = vpack.c.bf16 %v1581_v35, %v1579_v2  ;;  %v2451_v22 = vadd.f32 %v2450_v26, %v5988_v19  ;;  %8339 = vst [vmem:[#allocation94_spill] sm:$0xff] %v6580_v27  ;;  %v1246_v51 = vadd.f32 %v1245_v9, %v5554_v1  ;;  %v8341_v9 = vld [vmem:[#allocation18_spill] sm:$0xff]  ;;  %v3711_v38 = vmax.f32 %v2449_v44, 0.0 }
 0x275   : > { %v1247_v31 = vpop.f32.mrf.mxu0  ;;  %v2452_v60 = vpop.f32.mrf.mxu1  ;;  %v1244_v35 = vadd.f32 %v1243_v32, %v5560_v4 }
 0x276   : > { %8338 = vst [vmem:[#allocation93_spill] sm:$0xff] %v6577_v54  ;;  %v1248_v23 = vadd.f32 %v1247_v31, %v5560_v4  ;;  %2694 = vmatprep.mubr.bf16.mxu1 %v6577_v54  ;;  %v3714_v25 = vmax.f32 %v2451_v22, 0.0  ;;  %v2453_v52 = vadd.f32 %v2452_v60, %v5996_v48  ;;  %v1583_v31 = vmax.f32 %v1246_v51, 0.0  ;;  %v8342_v60 = vld [vmem:[#allocation19_spill] sm:$0xff] }
 0x277   : > { %v1249_v36 = vpop.f32.mrf.mxu0  ;;  %v2456_v2 = vpop.f32.mrf.mxu1  ;;  %2695 = vmatmul.mubr.bf16.gmra.mxu1 %v6580_v27  ;;  %v1582_v57 = vmax.f32 %v1244_v35, 0.0 }
 0x278   : > { %v1250_v17 = vadd.f32 %v1249_v36, %v5554_v1  ;;  %v6590_v53 = vpack.c.bf16 %v3714_v25, %v3710_v18  ;;  %v3715_v43 = vmax.f32 %v2453_v52, 0.0  ;;  %v1584_v22 = vmax.f32 %v1248_v23, 0.0 }
 0x279   : > { %v1253_v5 = vpop.f32.mrf.mxu0  ;;  %2988 = vmatmul.mubr.bf16.gmra.mxu0 %v8341_v9  ;;  %v2458_v26 = vpop.f32.mrf.mxu1  ;;  %v2457_v32 = vadd.f32 %v2456_v2, %v5988_v19 }
 0x27a   : > { %8340 = vst [vmem:[#allocation95_spill] sm:$0xff] %v6590_v53  ;;  %v1585_v14 = vmax.f32 %v1250_v17, 0.0  ;;  %2997 = vmatprep.mubr.bf16.mxu0 %v8342_v60  ;;  %v6595_v36 = vpack.c.bf16 %v3715_v43, %v3711_v38  ;;  %v2459_v25 = vadd.f32 %v2458_v26, %v5996_v48  ;;  %v6601_v51 = vpack.c.bf16 %v1584_v22, %v1582_v57 }
 0x27b   : > { %v1255_v47 = vpop.f32.mrf.mxu0  ;;  %v2460_v39 = vpop.f32.mrf.mxu1  ;;  %v3718_v35 = vmax.f32 %v2457_v32, 0.0  ;;  %v1254_v38 = vadd.f32 %v1253_v5, %v5560_v4 }
 0x27c   : > { %8343 = vst [vmem:[#allocation18_spill] sm:$0xff] %v6595_v36  ;;  %v6597_v18 = vpack.c.bf16 %v1585_v14, %v1583_v31  ;;  %v2461_v44 = vadd.f32 %v2460_v39, %v5988_v19  ;;  %8345 = vst [vmem:[#allocation96_spill] sm:$0xff] %v6601_v51  ;;  %v1256_v23 = vadd.f32 %v1255_v47, %v5554_v1  ;;  %v3719_v39 = vmax.f32 %v2459_v25, 0.0  ;;  %v8346_v47 = vld [vmem:[#allocation20_spill] sm:$0xff]  ;;  %v8348_v36 = vld [vmem:[#allocation21_spill] sm:$0xff] }
 0x27d   : > { %v1257_v52 = vpop.f32.mrf.mxu0  ;;  %v2462_v9 = vpop.f32.mrf.mxu1  ;;  %v1586_v15 = vmax.f32 %v1254_v38, 0.0 }
 0x27e   : > { %8344 = vst [vmem:[#allocation19_spill] sm:$0xff] %v6597_v18  ;;  %v1258_v17 = vadd.f32 %v1257_v52, %v5560_v4  ;;  %2704 = vmatprep.mubr.bf16.mxu1 %v6597_v18  ;;  %v2463_v2 = vadd.f32 %v2462_v9, %v5996_v48  ;;  %v3722_v14 = vmax.f32 %v2461_v44, 0.0  ;;  %v1587_v52 = vmax.f32 %v1256_v23, 0.0  ;;  %v8406_v18 = vld [vmem:[#allocation6_spill] sm:$0xff] }
 0x27f   : > { %v1259_v43 = vpop.f32.mrf.mxu0  ;;  %2705 = vmatmul.mubr.bf16.gmra.mxu1 %v6601_v51  ;;  %v2466_v31 = vpop.f32.mrf.mxu1  ;;  %v8412_v54 = vsub.s32 3, %v8406_v18 }
 0x280   : > { %v1260_v26 = vadd.f32 %v1259_v43, %v5554_v1  ;;  %v3723_v57 = vmax.f32 %v2463_v2, 0.0  ;;  %v6611_v60 = vpack.c.bf16 %v3722_v14, %v3718_v35  ;;  %v1588_v53 = vmax.f32 %v1258_v17, 0.0 }
 0x281   : > { %v1263_v22 = vpop.f32.mrf.mxu0  ;;  %2998 = vmatmul.mubr.bf16.gmra.mxu0 %v8346_v47  ;;  %v2468_v32 = vpop.f32.mrf.mxu1  ;;  %v2467_v43 = vadd.f32 %v2466_v31, %v5988_v19 }
 0x282   : > { %8347 = vst [vmem:[#allocation20_spill] sm:$0xff] %v6611_v60  ;;  %v1589_v9 = vmax.f32 %v1260_v26, 0.0  ;;  %3007 = vmatprep.mubr.bf16.mxu0 %v8348_v36  ;;  %v6614_v44 = vpack.c.bf16 %v3723_v57, %v3719_v39  ;;  %v2469_v47 = vadd.f32 %v2468_v32, %v5996_v48  ;;  %v6621_v23 = vpack.c.bf16 %v1588_v53, %v1586_v15 }
 0x283   : > { %v1265_v5 = vpop.f32.mrf.mxu0  ;;  %v2470_v2 = vpop.f32.mrf.mxu1  ;;  %v3726_v39 = vmax.f32 %v2467_v43, 0.0  ;;  %v1264_v31 = vadd.f32 %v1263_v22, %v5560_v4 }
 0x284   : > { %8349 = vst [vmem:[#allocation21_spill] sm:$0xff] %v6614_v44  ;;  %v6617_v25 = vpack.c.bf16 %v1589_v9, %v1587_v52  ;;  %v2471_v35 = vadd.f32 %v2470_v2, %v5988_v19  ;;  %8351 = vst [vmem:[#allocation98_spill] sm:$0xff] %v6621_v23  ;;  %v1266_v17 = vadd.f32 %v1265_v5, %v5554_v1  ;;  %v8352_v9 = vld [vmem:[#allocation22_spill] sm:$0xff]  ;;  %v3727_v32 = vmax.f32 %v2469_v47, 0.0 }
 0x285   : > { %v1267_v56 = vpop.f32.mrf.mxu0  ;;  %v2472_v14 = vpop.f32.mrf.mxu1  ;;  %v1590_v12 = vmax.f32 %v1264_v31, 0.0 }
 0x286   : > { %8350 = vst [vmem:[#allocation97_spill] sm:$0xff] %v6617_v25  ;;  %v1268_v36 = vadd.f32 %v1267_v56, %v5560_v4  ;;  %2714 = vmatprep.mubr.bf16.mxu1 %v6617_v25  ;;  %v3730_v38 = vmax.f32 %v2471_v35, 0.0  ;;  %v2473_v57 = vadd.f32 %v2472_v14, %v5996_v48  ;;  %v1591_v2 = vmax.f32 %v1266_v17, 0.0  ;;  %v8354_v35 = vld [vmem:[#allocation23_spill] sm:$0xff] }
 0x287   : > { %v1269_v26 = vpop.f32.mrf.mxu0  ;;  %2715 = vmatmul.mubr.bf16.gmra.mxu1 %v6621_v23  ;;  %v2476_v15 = vpop.f32.mrf.mxu1 }
 0x288   : > { %v1270_v52 = vadd.f32 %v1269_v26, %v5554_v1  ;;  %v6631_v56 = vpack.c.bf16 %v3730_v38, %v3726_v39  ;;  %v3731_v5 = vmax.f32 %v2473_v57, 0.0  ;;  %v1592_v60 = vmax.f32 %v1268_v36, 0.0 }
 0x289   : > { %v1273_v53 = vpop.f32.mrf.mxu0  ;;  %3008 = vmatmul.mubr.bf16.gmra.mxu0 %v8352_v9  ;;  %v2478_v14 = vpop.f32.mrf.mxu1  ;;  %v2477_v22 = vadd.f32 %v2476_v15, %v5988_v19 }
 0x28a   : > { %8353 = vst [vmem:[#allocation22_spill] sm:$0xff] %v6631_v56  ;;  %v1593_v43 = vmax.f32 %v1270_v52, 0.0  ;;  %3017 = vmatprep.mubr.bf16.mxu0 %v8354_v35  ;;  %v6635_v26 = vpack.c.bf16 %v3731_v5, %v3727_v32  ;;  %v2479_v47 = vadd.f32 %v2478_v14, %v5996_v48  ;;  %v6641_v17 = vpack.c.bf16 %v1592_v60, %v1590_v12  ;;  %v8358_v60 = vld [vmem:[#allocation24_spill] sm:$0xff] }
 0x28b   : > { %v1275_v44 = vpop.f32.mrf.mxu0  ;;  %v2480_v33 = vpop.f32.mrf.mxu1  ;;  %v3734_v15 = vmax.f32 %v2477_v22, 0.0  ;;  %v1274_v5 = vadd.f32 %v1273_v53, %v5560_v4 }
 0x28c   : > { %8355 = vst [vmem:[#allocation23_spill] sm:$0xff] %v6635_v26  ;;  %v6637_v23 = vpack.c.bf16 %v1593_v43, %v1591_v2  ;;  %v2481_v39 = vadd.f32 %v2480_v33, %v5988_v19  ;;  %8357 = vst [vmem:[#allocation100_spill] sm:$0xff] %v6641_v17  ;;  %v1276_v36 = vadd.f32 %v1275_v44, %v5554_v1  ;;  %v3735_v44 = vmax.f32 %v2479_v47, 0.0 }
 0x28d   : > { %v1277_v9 = vpop.f32.mrf.mxu0  ;;  %v2482_v57 = vpop.f32.mrf.mxu1  ;;  %v1594_v26 = vmax.f32 %v1274_v5, 0.0 }
 0x28e   : > { %8356 = vst [vmem:[#allocation99_spill] sm:$0xff] %v6637_v23  ;;  %v1278_v38 = vadd.f32 %v1277_v9, %v5560_v4  ;;  %2724 = vmatprep.mubr.bf16.mxu1 %v6637_v23  ;;  %v3738_v31 = vmax.f32 %v2481_v39, 0.0  ;;  %v2483_v32 = vadd.f32 %v2482_v57, %v5996_v48  ;;  %v1595_v14 = vmax.f32 %v1276_v36, 0.0  ;;  %v8360_v39 = vld [vmem:[#allocation25_spill] sm:$0xff] }
 0x28f   : > { %v1279_v52 = vpop.f32.mrf.mxu0  ;;  %2725 = vmatmul.mubr.bf16.gmra.mxu1 %v6641_v17  ;;  %v2486_v12 = vpop.f32.mrf.mxu1 }
 0x290   : > { %v1280_v2 = vadd.f32 %v1279_v52, %v5554_v1  ;;  %v6651_v43 = vpack.c.bf16 %v3738_v31, %v3734_v15  ;;  %v3739_v35 = vmax.f32 %v2483_v32, 0.0  ;;  %v1596_v9 = vmax.f32 %v1278_v38, 0.0 }
 0x291   : > { %v1283_v33 = vpop.f32.mrf.mxu0  ;;  %3018 = vmatmul.mubr.bf16.gmra.mxu0 %v8358_v60  ;;  %v2488_v57 = vpop.f32.mrf.mxu1  ;;  %v2487_v53 = vadd.f32 %v2486_v12, %v5988_v19 }
 0x292   : > { %8359 = vst [vmem:[#allocation24_spill] sm:$0xff] %v6651_v43  ;;  %v1597_v22 = vmax.f32 %v1280_v2, 0.0  ;;  %3027 = vmatprep.mubr.bf16.mxu0 %v8360_v39  ;;  %v6655_v52 = vpack.c.bf16 %v3739_v35, %v3735_v44  ;;  %v2489_v47 = vadd.f32 %v2488_v57, %v5996_v48  ;;  %v6661_v36 = vpack.c.bf16 %v1596_v9, %v1594_v26  ;;  %v8364_v9 = vld [vmem:[#allocation26_spill] sm:$0xff] }
 0x293   : > { %v1285_v56 = vpop.f32.mrf.mxu0  ;;  %v2490_v23 = vpop.f32.mrf.mxu1  ;;  %v3742_v12 = vmax.f32 %v2487_v53, 0.0  ;;  %v1284_v35 = vadd.f32 %v1283_v33, %v5560_v4 }
 0x294   : > { %8361 = vst [vmem:[#allocation25_spill] sm:$0xff] %v6655_v52  ;;  %v6657_v17 = vpack.c.bf16 %v1597_v22, %v1595_v14  ;;  %v2491_v15 = vadd.f32 %v2490_v23, %v5988_v19  ;;  %8363 = vst [vmem:[#allocation102_spill] sm:$0xff] %v6661_v36  ;;  %v1286_v38 = vadd.f32 %v1285_v56, %v5554_v1  ;;  %v3743_v56 = vmax.f32 %v2489_v47, 0.0 }
 0x295   : > { %v1287_v60 = vpop.f32.mrf.mxu0  ;;  %v2492_v32 = vpop.f32.mrf.mxu1  ;;  %v1598_v52 = vmax.f32 %v1284_v35, 0.0 }
 0x296   : > { %8362 = vst [vmem:[#allocation101_spill] sm:$0xff] %v6657_v17  ;;  %v1288_v31 = vadd.f32 %v1287_v60, %v5560_v4  ;;  %2734 = vmatprep.mubr.bf16.mxu1 %v6657_v17  ;;  %v3746_v5 = vmax.f32 %v2491_v15, 0.0  ;;  %v2493_v44 = vadd.f32 %v2492_v32, %v5996_v48  ;;  %v1599_v57 = vmax.f32 %v1286_v38, 0.0  ;;  %v8366_v15 = vld [vmem:[#allocation27_spill] sm:$0xff] }
 0x297   : > { %v1289_v2 = vpop.f32.mrf.mxu0  ;;  %2735 = vmatmul.mubr.bf16.gmra.mxu1 %v6661_v36  ;;  %v2496_v23 = vpop.f32.mrf.mxu1 }
 0x298   : > { %v1290_v14 = vadd.f32 %v1289_v2, %v5554_v1  ;;  %v6671_v22 = vpack.c.bf16 %v3746_v5, %v3742_v12  ;;  %v3747_v39 = vmax.f32 %v2493_v44, 0.0  ;;  %v1600_v60 = vmax.f32 %v1288_v31, 0.0 }
 0x299   : > { %v1293_v26 = vpop.f32.mrf.mxu0  ;;  %3028 = vmatmul.mubr.bf16.gmra.mxu0 %v8364_v9  ;;  %v2498_v32 = vpop.f32.mrf.mxu1  ;;  %v2497_v33 = vadd.f32 %v2496_v23, %v5988_v19 }
 0x29a   : > { %8365 = vst [vmem:[#allocation26_spill] sm:$0xff] %v6671_v22  ;;  %v1601_v53 = vmax.f32 %v1290_v14, 0.0  ;;  %3037 = vmatprep.mubr.bf16.mxu0 %v8366_v15  ;;  %v6675_v2 = vpack.c.bf16 %v3747_v39, %v3743_v56  ;;  %v2499_v47 = vadd.f32 %v2498_v32, %v5996_v48  ;;  %v6681_v38 = vpack.c.bf16 %v1600_v60, %v1598_v52  ;;  %v8370_v60 = vld [vmem:[#allocation28_spill] sm:$0xff] }
 0x29b   : > { %v1295_v43 = vpop.f32.mrf.mxu0  ;;  %v2500_v17 = vpop.f32.mrf.mxu1  ;;  %v3750_v23 = vmax.f32 %v2497_v33, 0.0  ;;  %v1294_v39 = vadd.f32 %v1293_v26, %v5560_v4 }
 0x29c   : > { %8367 = vst [vmem:[#allocation27_spill] sm:$0xff] %v6675_v2  ;;  %v6677_v36 = vpack.c.bf16 %v1601_v53, %v1599_v57  ;;  %v2501_v12 = vadd.f32 %v2500_v17, %v5988_v19  ;;  %8369 = vst [vmem:[#allocation104_spill] sm:$0xff] %v6681_v38  ;;  %v1296_v31 = vadd.f32 %v1295_v43, %v5554_v1  ;;  %v3751_v43 = vmax.f32 %v2499_v47, 0.0 }
 0x29d   : > { %v1297_v9 = vpop.f32.mrf.mxu0  ;;  %v2502_v44 = vpop.f32.mrf.mxu1  ;;  %v1602_v2 = vmax.f32 %v1294_v39, 0.0 }
 0x29e   : > { %8368 = vst [vmem:[#allocation103_spill] sm:$0xff] %v6677_v36  ;;  %v1298_v5 = vadd.f32 %v1297_v9, %v5560_v4  ;;  %2744 = vmatprep.mubr.bf16.mxu1 %v6677_v36  ;;  %v3754_v35 = vmax.f32 %v2501_v12, 0.0  ;;  %v2503_v56 = vadd.f32 %v2502_v44, %v5996_v48  ;;  %v1603_v32 = vmax.f32 %v1296_v31, 0.0  ;;  %v8372_v12 = vld [vmem:[#allocation29_spill] sm:$0xff] }
 0x29f   : > { %v1299_v14 = vpop.f32.mrf.mxu0  ;;  %2745 = vmatmul.mubr.bf16.gmra.mxu1 %v6681_v38  ;;  %v2506_v17 = vpop.f32.mrf.mxu1 }
 0x2a0   : > { %v1300_v57 = vadd.f32 %v1299_v14, %v5554_v1  ;;  %v6691_v53 = vpack.c.bf16 %v3754_v35, %v3750_v23  ;;  %v3755_v15 = vmax.f32 %v2503_v56, 0.0  ;;  %v1604_v9 = vmax.f32 %v1298_v5, 0.0 }
 0x2a1   : > { %v1303_v52 = vpop.f32.mrf.mxu0  ;;  %3038 = vmatmul.mubr.bf16.gmra.mxu0 %v8370_v60  ;;  %v2508_v44 = vpop.f32.mrf.mxu1  ;;  %v2507_v26 = vadd.f32 %v2506_v17, %v5988_v19 }
 0x2a2   : > { %8371 = vst [vmem:[#allocation28_spill] sm:$0xff] %v6691_v53  ;;  %v1605_v33 = vmax.f32 %v1300_v57, 0.0  ;;  %3047 = vmatprep.mubr.bf16.mxu0 %v8372_v12  ;;  %v6695_v14 = vpack.c.bf16 %v3755_v15, %v3751_v43  ;;  %v2509_v47 = vadd.f32 %v2508_v44, %v5996_v48  ;;  %v6701_v31 = vpack.c.bf16 %v1604_v9, %v1602_v2  ;;  %v8376_v9 = vld [vmem:[#allocation30_spill] sm:$0xff] }
 0x2a3   : > { %v1305_v22 = vpop.f32.mrf.mxu0  ;;  %v2510_v36 = vpop.f32.mrf.mxu1  ;;  %v3758_v17 = vmax.f32 %v2507_v26, 0.0  ;;  %v1304_v15 = vadd.f32 %v1303_v52, %v5560_v4 }
 0x2a4   : > { %8373 = vst [vmem:[#allocation29_spill] sm:$0xff] %v6695_v14  ;;  %v6697_v38 = vpack.c.bf16 %v1605_v33, %v1603_v32  ;;  %v2511_v23 = vadd.f32 %v2510_v36, %v5988_v19  ;;  %8375 = vst [vmem:[#allocation106_spill] sm:$0xff] %v6701_v31  ;;  %v1306_v5 = vadd.f32 %v1305_v22, %v5554_v1  ;;  %v3759_v22 = vmax.f32 %v2509_v47, 0.0 }
 0x2a5   : > { %v1307_v60 = vpop.f32.mrf.mxu0  ;;  %v2512_v56 = vpop.f32.mrf.mxu1  ;;  %v1606_v14 = vmax.f32 %v1304_v15, 0.0 }
 0x2a6   : > { %8374 = vst [vmem:[#allocation105_spill] sm:$0xff] %v6697_v38  ;;  %v1308_v35 = vadd.f32 %v1307_v60, %v5560_v4  ;;  %2754 = vmatprep.mubr.bf16.mxu1 %v6697_v38  ;;  %v3762_v39 = vmax.f32 %v2511_v23, 0.0  ;;  %v2513_v43 = vadd.f32 %v2512_v56, %v5996_v48  ;;  %v1607_v44 = vmax.f32 %v1306_v5, 0.0  ;;  %v8378_v23 = vld [vmem:[#allocation31_spill] sm:$0xff] }
 0x2a7   : > { %v1309_v57 = vpop.f32.mrf.mxu0  ;;  %2755 = vmatmul.mubr.bf16.gmra.mxu1 %v6701_v31  ;;  %v2516_v36 = vpop.f32.mrf.mxu1 }
 0x2a8   : > { %v1310_v32 = vadd.f32 %v1309_v57, %v5554_v1  ;;  %v6711_v33 = vpack.c.bf16 %v3762_v39, %v3758_v17  ;;  %v3763_v12 = vmax.f32 %v2513_v43, 0.0  ;;  %v1608_v60 = vmax.f32 %v1308_v35, 0.0 }
 0x2a9   : > { %v1313_v2 = vpop.f32.mrf.mxu0  ;;  %3048 = vmatmul.mubr.bf16.gmra.mxu0 %v8376_v9  ;;  %v2518_v56 = vpop.f32.mrf.mxu1  ;;  %v2517_v52 = vadd.f32 %v2516_v36, %v5988_v19 }
 0x2aa   : > { %8377 = vst [vmem:[#allocation30_spill] sm:$0xff] %v6711_v33  ;;  %v1609_v26 = vmax.f32 %v1310_v32, 0.0  ;;  %3057 = vmatprep.mubr.bf16.mxu0 %v8378_v23  ;;  %v6715_v57 = vpack.c.bf16 %v3763_v12, %v3759_v22  ;;  %v2519_v47 = vadd.f32 %v2518_v56, %v5996_v48  ;;  %v6721_v5 = vpack.c.bf16 %v1608_v60, %v1606_v14  ;;  %v8382_v60 = vld [vmem:[#allocation32_spill] sm:$0xff] }
 0x2ab   : > { %v1315_v53 = vpop.f32.mrf.mxu0  ;;  %v2520_v38 = vpop.f32.mrf.mxu1  ;;  %v3766_v36 = vmax.f32 %v2517_v52, 0.0  ;;  %v1314_v12 = vadd.f32 %v1313_v2, %v5560_v4 }
 0x2ac   : > { %8379 = vst [vmem:[#allocation31_spill] sm:$0xff] %v6715_v57  ;;  %v6717_v31 = vpack.c.bf16 %v1609_v26, %v1607_v44  ;;  %v2521_v17 = vadd.f32 %v2520_v38, %v5988_v19  ;;  %8381 = vst [vmem:[#allocation108_spill] sm:$0xff] %v6721_v5  ;;  %v1316_v35 = vadd.f32 %v1315_v53, %v5554_v1  ;;  %v3767_v53 = vmax.f32 %v2519_v47, 0.0 }
 0x2ad   : > { %v1317_v9 = vpop.f32.mrf.mxu0  ;;  %v2522_v43 = vpop.f32.mrf.mxu1  ;;  %v1610_v57 = vmax.f32 %v1314_v12, 0.0 }
 0x2ae   : > { %8380 = vst [vmem:[#allocation107_spill] sm:$0xff] %v6717_v31  ;;  %v1318_v39 = vadd.f32 %v1317_v9, %v5560_v4  ;;  %2764 = vmatprep.mubr.bf16.mxu1 %v6717_v31  ;;  %v3770_v15 = vmax.f32 %v2521_v17, 0.0  ;;  %v2523_v22 = vadd.f32 %v2522_v43, %v5996_v48  ;;  %v1611_v56 = vmax.f32 %v1316_v35, 0.0  ;;  %v8384_v17 = vld [vmem:[#allocation33_spill] sm:$0xff] }
 0x2af   : > { %v1319_v32 = vpop.f32.mrf.mxu0  ;;  %2765 = vmatmul.mubr.bf16.gmra.mxu1 %v6721_v5  ;;  %v2526_v38 = vpop.f32.mrf.mxu1 }
 0x2b0   : > { %v1320_v44 = vadd.f32 %v1319_v32, %v5554_v1  ;;  %v6731_v26 = vpack.c.bf16 %v3770_v15, %v3766_v36  ;;  %v3771_v23 = vmax.f32 %v2523_v22, 0.0  ;;  %v1612_v9 = vmax.f32 %v1318_v39, 0.0 }
 0x2b1   : > { %v1323_v14 = vpop.f32.mrf.mxu0  ;;  %3058 = vmatmul.mubr.bf16.gmra.mxu0 %v8382_v60  ;;  %v2528_v43 = vpop.f32.mrf.mxu1  ;;  %v2527_v2 = vadd.f32 %v2526_v38, %v5988_v19 }
 0x2b2   : > { %8383 = vst [vmem:[#allocation32_spill] sm:$0xff] %v6731_v26  ;;  %v1613_v52 = vmax.f32 %v1320_v44, 0.0  ;;  %3067 = vmatprep.mubr.bf16.mxu0 %v8384_v17  ;;  %v6735_v32 = vpack.c.bf16 %v3771_v23, %v3767_v53  ;;  %v2529_v47 = vadd.f32 %v2528_v43, %v5996_v48  ;;  %v6741_v35 = vpack.c.bf16 %v1612_v9, %v1610_v57  ;;  %v8388_v9 = vld [vmem:[#allocation34_spill] sm:$0xff] }
 0x2b3   : > { %v1325_v33 = vpop.f32.mrf.mxu0  ;;  %v2530_v31 = vpop.f32.mrf.mxu1  ;;  %v3774_v38 = vmax.f32 %v2527_v2, 0.0  ;;  %v1324_v23 = vadd.f32 %v1323_v14, %v5560_v4 }
 0x2b4   : > { %8385 = vst [vmem:[#allocation33_spill] sm:$0xff] %v6735_v32  ;;  %v6737_v5 = vpack.c.bf16 %v1613_v52, %v1611_v56  ;;  %v2531_v36 = vadd.f32 %v2530_v31, %v5988_v19  ;;  %8387 = vst [vmem:[#allocation110_spill] sm:$0xff] %v6741_v35  ;;  %v1326_v39 = vadd.f32 %v1325_v33, %v5554_v1  ;;  %v3775_v33 = vmax.f32 %v2529_v47, 0.0 }
 0x2b5   : > { %v1327_v60 = vpop.f32.mrf.mxu0  ;;  %v2532_v22 = vpop.f32.mrf.mxu1 }
 0x2b6   : > { %8386 = vst [vmem:[#allocation109_spill] sm:$0xff] %v6737_v5  ;;  %v1328_v15 = vadd.f32 %v1327_v60, %v5560_v4  ;;  %2774 = vmatprep.mubr.bf16.mxu1 %v6737_v5  ;;  %v3778_v12 = vmax.f32 %v2531_v36, 0.0  ;;  %v2533_v53 = vadd.f32 %v2532_v22, %v5996_v48  ;;  %v1615_v43 = vmax.f32 %v1326_v39, 0.0  ;;  %v8389_v36 = vld [vmem:[#allocation35_spill] sm:$0xff] }
 0x2b7   : > { %v1329_v44 = vpop.f32.mrf.mxu0  ;;  %2775 = vmatmul.mubr.bf16.gmra.mxu1 %v6741_v35  ;;  %v2536_v31 = vpop.f32.mrf.mxu1  ;;  %v1614_v35 = vmax.f32 %v1324_v23, 0.0 }
 0x2b8   : > { %v1330_v56 = vadd.f32 %v1329_v44, %v5554_v1  ;;  %v6751_v52 = vpack.c.bf16 %v3778_v12, %v3774_v38  ;;  %v3779_v17 = vmax.f32 %v2533_v53, 0.0  ;;  %v1616_v60 = vmax.f32 %v1328_v15, 0.0 }
 0x2b9   : > { %v1333_v57 = vpop.f32.mrf.mxu0  ;;  %3068 = vmatmul.mubr.bf16.gmra.mxu0 %v8388_v9  ;;  %v2538_v22 = vpop.f32.mrf.mxu1  ;;  %v2537_v14 = vadd.f32 %v2536_v31, %v5988_v19 }
 0x2ba   : > { %v1617_v2 = vmax.f32 %v1330_v56, 0.0  ;;  %3077 = vmatprep.mubr.bf16.mxu0 %v8389_v36  ;;  %v6755_v44 = vpack.c.bf16 %v3779_v17, %v3775_v33  ;;  %v2539_v47 = vadd.f32 %v2538_v22, %v5996_v48  ;;  %v6761_v39 = vpack.c.bf16 %v1616_v60, %v1614_v35  ;;  %v8392_v60 = vld [vmem:[#allocation36_spill] sm:$0xff] }
 0x2bb   : > { %v1335_v26 = vpop.f32.mrf.mxu0  ;;  %v2540_v32 = vpop.f32.mrf.mxu1  ;;  %v3782_v31 = vmax.f32 %v2537_v14, 0.0  ;;  %v1334_v17 = vadd.f32 %v1333_v57, %v5560_v4 }
 0x2bc   : > { %v6757_v5 = vpack.c.bf16 %v1617_v2, %v1615_v43  ;;  %v2541_v38 = vadd.f32 %v2540_v32, %v5988_v19  ;;  %8391 = vst [vmem:[#allocation35_spill] sm:$0xff] %v6761_v39  ;;  %v1336_v15 = vadd.f32 %v1335_v26, %v5554_v1  ;;  %v3783_v26 = vmax.f32 %v2539_v47, 0.0 }
 0x2bd   : > { %v1337_v9 = vpop.f32.mrf.mxu0  ;;  %v2542_v53 = vpop.f32.mrf.mxu1 }
 0x2be   : > { %8390 = vst [vmem:[#allocation34_spill] sm:$0xff] %v6757_v5  ;;  %v1338_v12 = vadd.f32 %v1337_v9, %v5560_v4  ;;  %2784 = vmatprep.mubr.bf16.mxu1 %v6757_v5  ;;  %v3786_v23 = vmax.f32 %v2541_v38, 0.0  ;;  %v2543_v33 = vadd.f32 %v2542_v53, %v5996_v48  ;;  %v1619_v22 = vmax.f32 %v1336_v15, 0.0  ;;  %v8393_v38 = vld [vmem:[#allocation37_spill] sm:$0xff] }
 0x2bf   : > { %v1339_v56 = vpop.f32.mrf.mxu0  ;;  %2785 = vmatmul.mubr.bf16.gmra.mxu1 %v6761_v39  ;;  %v2546_v32 = vpop.f32.mrf.mxu1  ;;  %v1618_v39 = vmax.f32 %v1334_v17, 0.0 }
 0x2c0   : > { %v1340_v43 = vadd.f32 %v1339_v56, %v5554_v1  ;;  %v6771_v2 = vpack.c.bf16 %v3786_v23, %v3782_v31  ;;  %v3787_v36 = vmax.f32 %v2543_v33, 0.0  ;;  %v1620_v9 = vmax.f32 %v1338_v12, 0.0 }
 0x2c1   : > { %v1343_v35 = vpop.f32.mrf.mxu0  ;;  %3078 = vmatmul.mubr.bf16.gmra.mxu0 %v8392_v60  ;;  %v2548_v53 = vpop.f32.mrf.mxu1  ;;  %v2547_v57 = vadd.f32 %v2546_v32, %v5988_v19 }
 0x2c2   : > { %v1621_v14 = vmax.f32 %v1340_v43, 0.0  ;;  %3087 = vmatprep.mubr.bf16.mxu0 %v8393_v38  ;;  %v6775_v56 = vpack.c.bf16 %v3787_v36, %v3783_v26  ;;  %v2549_v47 = vadd.f32 %v2548_v53, %v5996_v48  ;;  %v6781_v15 = vpack.c.bf16 %v1620_v9, %v1618_v39  ;;  %v8396_v9 = vld [vmem:[#allocation38_spill] sm:$0xff] }
 0x2c3   : > { %v1345_v5 = vpop.f32.mrf.mxu0  ;;  %v2550_v25 = vpop.f32.mrf.mxu1  ;;  %v3790_v32 = vmax.f32 %v2547_v57, 0.0  ;;  %v1344_v36 = vadd.f32 %v1343_v35, %v5560_v4 }
 0x2c4   : > { %v6777_v13 = vpack.c.bf16 %v1621_v14, %v1619_v22  ;;  %v2551_v31 = vadd.f32 %v2550_v25, %v5988_v19  ;;  %8395 = vst [vmem:[#allocation37_spill] sm:$0xff] %v6781_v15  ;;  %v1346_v12 = vadd.f32 %v1345_v5, %v5554_v1  ;;  %v3791_v5 = vmax.f32 %v2549_v47, 0.0 }
 0x2c5   : > { %v1347_v60 = vpop.f32.mrf.mxu0  ;;  %v2552_v33 = vpop.f32.mrf.mxu1 }
 0x2c6   : > { %8394 = vst [vmem:[#allocation36_spill] sm:$0xff] %v6777_v13  ;;  %v1348_v23 = vadd.f32 %v1347_v60, %v5560_v4  ;;  %2794 = vmatprep.mubr.bf16.mxu1 %v6777_v13  ;;  %v3794_v17 = vmax.f32 %v2551_v31, 0.0  ;;  %v2553_v26 = vadd.f32 %v2552_v33, %v5996_v48  ;;  %v1623_v53 = vmax.f32 %v1346_v12, 0.0  ;;  %v8397_v31 = vld [vmem:[#allocation39_spill] sm:$0xff] }
 0x2c7   : > { %v1349_v43 = vpop.f32.mrf.mxu0  ;;  %2795 = vmatmul.mubr.bf16.gmra.mxu1 %v6781_v15  ;;  %v2556_v25 = vpop.f32.mrf.mxu1  ;;  %v1622_v15 = vmax.f32 %v1344_v36, 0.0 }
 0x2c8   : > { %v1350_v22 = vadd.f32 %v1349_v43, %v5554_v1  ;;  %v6791_v14 = vpack.c.bf16 %v3794_v17, %v3790_v32  ;;  %v3795_v38 = vmax.f32 %v2553_v26, 0.0  ;;  %v1624_v60 = vmax.f32 %v1348_v23, 0.0 }
 0x2c9   : > { %v1353_v39 = vpop.f32.mrf.mxu0  ;;  %3088 = vmatmul.mubr.bf16.gmra.mxu0 %v8396_v9  ;;  %v6794_v33 = vpop.f32.mrf.mxu1  ;;  %v2557_v43 = vadd.f32 %v2556_v25, %v5988_v19 }
 0x2ca   : > { %v1625_v57 = vmax.f32 %v1350_v22, 0.0  ;;  %3097 = vmatprep.mubr.bf16.mxu0 %v8397_v31  ;;  %v6797_v13 = vpack.c.bf16 %v3795_v38, %v3791_v5  ;;  %v6802_v17 = vpack.c.bf16 %v1624_v60, %v1622_v15  ;;  %v1354_v36 = vadd.f32 %v1353_v39, %v5560_v4  ;;  %v8400_v60 = vld [vmem:[#allocation40_spill] sm:$0xff] }
 0x2cb   : > { %v1355_v35 = vpop.f32.mrf.mxu0  ;;  %v2560_v9 = vpop.f32.mrf.mxu1  ;;  %v3798_v25 = vmax.f32 %v2557_v43, 0.0 }
 0x2cc   : > { %v6799_v51 = vpack.c.bf16 %v1625_v57, %v1623_v53  ;;  %v2561_v32 = vadd.f32 %v2560_v9, %v5988_v19  ;;  %8399 = vst [vmem:[#allocation39_spill] sm:$0xff] %v6802_v17  ;;  %v1356_v12 = vadd.f32 %v1355_v35, %v5554_v1  ;;  %v1626_v39 = vmax.f32 %v1354_v36, 0.0 }
 0x2cd   : > { %v1357_v47 = vpop.f32.mrf.mxu0  ;;  %v6807_v26 = vpop.f32.mrf.mxu1 }
 0x2ce   : > { %8398 = vst [vmem:[#allocation38_spill] sm:$0xff] %v6799_v51  ;;  %v1358_v23 = vadd.f32 %v1357_v47, %v5560_v4  ;;  %2804 = vmatprep.mubr.bf16.mxu1 %v6799_v51  ;;  %v3802_v5 = vmax.f32 %v2561_v32, 0.0  ;;  %v1627_v31 = vmax.f32 %v1356_v12, 0.0  ;;  %v8401_v47 = vld [vmem:[#allocation41_spill] sm:$0xff] }
 0x2cf   : > { %v1359_v22 = vpop.f32.mrf.mxu0  ;;  %2805 = vmatmul.mubr.bf16.gmra.mxu1 %v6802_v17  ;;  %v6812_v53 = vpop.f32.mrf.mxu1 }
 0x2d0   : > { %v1360_v38 = vadd.f32 %v1359_v22, %v5554_v1  ;;  %v6815_v57 = vpack.c.bf16 %v3802_v5, %v3798_v25  ;;  %v1628_v35 = vmax.f32 %v1358_v23, 0.0 }
 0x2d1   : > { %v1363_v15 = vpop.f32.mrf.mxu0  ;;  %3098 = vmatmul.mubr.bf16.gmra.mxu0 %v8400_v60  ;;  %v6818_v43 = vpop.f32.mrf.mxu1 }
 0x2d2   : > { %v1629_v9 = vmax.f32 %v1360_v38, 0.0  ;;  %3107 = vmatprep.mubr.bf16.mxu0 %v8401_v47  ;;  %v6824_v24 = vpack.c.bf16 %v1628_v35, %v1626_v39  ;;  %v1364_v5 = vadd.f32 %v1363_v15, %v5560_v4  ;;  %v8404_v35 = vld [vmem:[#allocation42_spill] sm:$0xff]  ;;  %v8200_v15 = vsub.s32 2, %v8406_v18 }
 0x2d3   : > { %v1365_v32 = vpop.f32.mrf.mxu0  ;;  %v6822_v22 = vpop.f32.mrf.mxu1 }
 0x2d4   : > { %v6820_v51 = vpack.c.bf16 %v1629_v9, %v1627_v31  ;;  %8403 = vst [vmem:[#allocation41_spill] sm:$0xff] %v6824_v24  ;;  %v1366_v60 = vadd.f32 %v1365_v32, %v5554_v1  ;;  %v1630_v40 = vmax.f32 %v1364_v5, 0.0  ;;  %v6854_v5 = vld [vmem:[%s8102_s5] sm:$0xf] }
 0x2d5   : > { %v1367_v17 = vpop.f32.mrf.mxu0  ;;  %v6829_v12 = vpop.f32.mrf.mxu1 }
 0x2d6   : > { %8402 = vst [vmem:[#allocation40_spill] sm:$0xff] %v6820_v51  ;;  %v1368_v25 = vadd.f32 %v1367_v17, %v5560_v4  ;;  %2814 = vmatprep.mubr.bf16.mxu1 %v6820_v51  ;;  %v1631_v9 = vmax.f32 %v1366_v60, 0.0  ;;  %v8405_v17 = vld [vmem:[#allocation43_spill] sm:$0xff] }
 0x2d7   : > { %v1369_v23 = vpop.f32.mrf.mxu0  ;;  %2815 = vmatmul.mubr.bf16.gmra.mxu1 %v6824_v24  ;;  %v6834_v38 = vpop.f32.mrf.mxu1 }
 0x2d8   : > { %v1370_v36 = vadd.f32 %v1369_v23, %v5554_v1  ;;  %v1632_v47 = vmax.f32 %v1368_v25, 0.0  ;;  %v8409_v25 = vld [vmem:[#allocation44_spill] sm:$0xff] }
 0x2d9   : > { %v1373_v31 = vpop.f32.mrf.mxu0  ;;  %3108 = vmatmul.mubr.bf16.gmra.mxu0 %v8404_v35  ;;  %v6838_v39 = vpop.f32.mrf.mxu1 }
 0x2da   : > { %v1633_v32 = vmax.f32 %v1370_v36, 0.0  ;;  %3117 = vmatprep.mubr.bf16.mxu0 %v8405_v17  ;;  %v6845_v50 = vpack.c.bf16 %v1632_v47, %v1630_v40 }
 0x2db   : > { %v1375_v51 = vpop.f32.mrf.mxu0  ;;  %v6843_v23 = vpop.f32.mrf.mxu1 }
 0x2dc   : > { %v6841_v27 = vpack.c.bf16 %v1633_v32, %v1631_v9  ;;  %8408 = vst [vmem:[#allocation43_spill] sm:$0xff] %v6845_v50  ;;  %v1376_v35 = vadd.f32 %v1375_v51, %v5554_v1  ;;  %v1374_v32 = vadd.f32 %v1373_v31, %v5560_v4 }
 0x2dd   : > { %v1377_v24 = vpop.f32.mrf.mxu0  ;;  %v6856_v36 = vpop.f32.mrf.mxu1 }
 0x2de   : > { %8407 = vst [vmem:[#allocation42_spill] sm:$0xff] %v6841_v27  ;;  %v1378_v60 = vadd.f32 %v1377_v24, %v5560_v4  ;;  %2824 = vmatprep.mubr.bf16.mxu1 %v6841_v27  ;;  %v5145_v24 = vld [vmem:[%s8101_s4] sm:$0xf]  ;;  %v1635_v31 = vmax.f32 %v1376_v35, 0.0 }
 0x2df   : > { %v1379_v9 = vpop.f32.mrf.mxu0  ;;  %v6865_v51 = vrot.slane %v5145_v24, %v8200_v15  ;;  %2825 = vmatmul.mubr.bf16.gmra.mxu1 %v6845_v50  ;;  %v6868_v47 = vpop.f32.mrf.mxu1  ;;  %v8410_v27 = vld [vmem:[#allocation7_spill] sm:$0xff]  ;;  %v6876_v7 = vrot.slane %v5145_v24, %v8412_v54  ;;  %v1634_v50 = vmax.f32 %v1374_v32, 0.0 }
 0x2e0   : > { %v1380_v40 = vadd.f32 %v1379_v9, %v5554_v1  ;;  %v4295_v4 = vrot.slane %v6854_v5, %v8410_v27  ;;  %v1636_v1 = vmax.f32 %v1378_v60, 0.0 }
 0x2e1   : > { %v2879_v17 = vpop.f32.mrf.mxu0  ;;  %3118 = vmatmul.mubr.bf16.gmra.mxu0 %v8409_v25  ;;  %v2588_v15 = vpop.f32.mrf.mxu1 }
 0x2e2   : > { %v1637_v9 = vmax.f32 %v1380_v40, 0.0  ;;  %3127 = vmatprep.mubr.bf16.mxu0 %v8411_v20  ;;  %v2880_v11 = vadd.f32 %v2879_v17, %v6865_v51  ;;  %v6883_v27 = vpack.c.bf16 %v4295_v4, %v4295_v4  ;;  %v6885_v35 = vpack.c.bf16 %v1636_v1, %v1634_v50  ;;  %v8417_v1 = vld [vmem:[#allocation46_spill] sm:$0xff] }
 0x2e3   : > { %v2881_v45 = vpop.f32.mrf.mxu0  ;;  %v6881_v25 = vpop.f32.mrf.mxu1 }
 0x2e4   : > { %v6879_v46 = vpack.c.bf16 %v1637_v9, %v1635_v31  ;;  %8414 = vst [vmem:[#allocation7_spill] sm:$0xff] %v6883_v27  ;;  %8415 = vst [vmem:[#allocation45_spill] sm:$0xff] %v6885_v35  ;;  %v2882_v20 = vadd.f32 %v2881_v45, %v6876_v7  ;;  %v3520_v32 = vmax.f32 %v2880_v11, 0.0  ;;  %v8416_v31 = vld [vmem:[#allocation8_spill] sm:$0xff] }
 0x2e5   : > { %v2883_v16 = vpop.f32.mrf.mxu0  ;;  %v2592_v54 = vpop.f32.mrf.mxu1  ;;  %v4291_v4 = vrot.slane %v6854_v5, %v8416_v31 }
 0x2e6   : > { %8413 = vst [vmem:[#allocation44_spill] sm:$0xff] %v6879_v46  ;;  %v2884_v60 = vadd.f32 %v2883_v16, %v6865_v51  ;;  %2834 = vmatprep.mubr.bf16.mxu1 %v6879_v46  ;;  %v3521_v45 = vmax.f32 %v2882_v20, 0.0 }
 0x2e7   : > { %v2885_v40 = vpop.f32.mrf.mxu0  ;;  %2835 = vmatmul.mubr.bf16.gmra.mxu1 %v6885_v35  ;;  %v2596_v9 = vpop.f32.mrf.mxu1  ;;  %v6900_v37 = vpack.c.bf16 %v4291_v4, %v4291_v4  ;;  %v2589_v4 = vadd.f32 %v2588_v15, %v5996_v48 }
 0x2e8   : > { %v3524_v24 = vmax.f32 %v2884_v60, 0.0  ;;  %v2886_v17 = vadd.f32 %v2885_v40, %v6876_v7  ;;  %4354 = vmatprep.mubr.bf16.mxu1 %v6883_v27  ;;  %v4312_v60 = vld [vmem:[#allocation2] sm:$0x1]  ;;  %v2593_v27 = vadd.f32 %v2592_v54, %v5996_v48 }
 0x2e9   : > { %v2889_v50 = vpop.f32.mrf.mxu0  ;;  %3128 = vmatmul.mubr.bf16.gmra.mxu0 %v8417_v1  ;;  %v2598_v11 = vpop.f32.mrf.mxu1  ;;  %4315 = vperm.xlu0 %5010, %v4312_v60   ;;  %8420 = vst [vmem:[#allocation48_spill] sm:$0xff] %v6900_v37 }
 0x2ea   : > { %v6896_v16 = vpack.c.bf16 %v3524_v24, %v3520_v32  ;;  %v3525_v46 = vmax.f32 %v2886_v17, 0.0  ;;  %3137 = vmatprep.mubr.bf16.mxu0 %v8419_v34  ;;  %v2890_v35 = vadd.f32 %v2889_v50, %v6865_v51  ;;  %v2599_v20 = vadd.f32 %v2598_v11, %v5996_v48 }
 0x2eb   : > { %v2891_v40 = vpop.f32.mrf.mxu0  ;;  %v2600_v31 = vpop.f32.mrf.mxu1  ;;  %v2597_v17 = vadd.f32 %v2596_v9, %v5988_v19 }
 0x2ec   : > { %8418 = vst [vmem:[#allocation46_spill] sm:$0xff] %v6896_v16  ;;  %v6902_v21 = vpack.c.bf16 %v3525_v46, %v3521_v45  ;;  %v2601_v32 = vadd.f32 %v2600_v31, %v5988_v19  ;;  %v2892_v34 = vadd.f32 %v2891_v40, %v6876_v7  ;;  %v3528_v45 = vmax.f32 %v2890_v35, 0.0  ;;  %v8422_v40 = vld [vmem:[#allocation47_spill] sm:$0xff] }
 0x2ed   : > { %v2893_v1 = vpop.f32.mrf.mxu0  ;;  %v2602_v60 = vpop.f32.mrf.mxu1  ;;  %v3831_v55 = vmax.f32 %v2599_v20, 0.0  ;;  %v3830_v35 = vmax.f32 %v2597_v17, 0.0 }
 0x2ee   : > { %8421 = vst [vmem:[#allocation111_spill] sm:$0xff] %v6902_v21  ;;  %v2894_v24 = vadd.f32 %v2893_v1, %v6865_v51  ;;  %v2603_v46 = vadd.f32 %v2602_v60, %v5996_v48  ;;  %v3834_v11 = vmax.f32 %v2601_v32, 0.0  ;;  %v3827_v1 = vmax.f32 %v2593_v27, 0.0 }
 0x2ef   : > { %v2895_v50 = vpop.f32.mrf.mxu0  ;;  %4355 = vmatmul.mubr.bf16.vlgmr.msra.gmra.mxu1 %v6900_v37  ;;  %v2606_v31 = vpop.f32.mrf.mxu1  ;;  %v3529_v3 = vmax.f32 %v2892_v34, 0.0  ;;  %v2591_v27 = vadd.f32 %v6881_v25, %v5988_v19 }
 0x2f0   : > { %v3532_v49 = vmax.f32 %v2894_v24, 0.0  ;;  %v2896_v54 = vadd.f32 %v2895_v50, %v6876_v7  ;;  %v3835_v9 = vmax.f32 %v2603_v46, 0.0  ;;  %v3823_v50 = vmax.f32 %v2589_v4, 0.0 }
 0x2f1   : > { %v2899_v63 = vpop.f32.mrf.mxu0  ;;  %3138 = vmatmul.mubr.bf16.gmra.mxu0 %v8422_v40  ;;  %v6918_v24 = vpop.f32.mrf.mxu1  ;;  %v2607_v32 = vadd.f32 %v2606_v31, %v5988_v19  ;;  %v4186_v20 = vpack.c.bf16 %v3834_v11, %v3830_v35  ;;  %v8427_v35 = vld [vmem:[#allocation49_spill] sm:$0xff] }
 0x2f2   : > { %v6915_v0 = vpack.c.bf16 %v3532_v49, %v3528_v45  ;;  %v3533_v15 = vmax.f32 %v2896_v54, 0.0  ;;  %3147 = vmatprep.mubr.bf16.mxu0 %v8424_v41  ;;  %8425 = vst [vmem:[#allocation50_spill] sm:$0xff] %v6918_v24  ;;  %v4187_v37 = vpack.c.bf16 %v3835_v9, %v3831_v55  ;;  %v2900_v61 = vadd.f32 %v2899_v63, %v6865_v51 }
 0x2f3   : > { %v2901_v60 = vpop.f32.mrf.mxu0  ;;  %v2610_v34 = vpop.f32.mrf.mxu1  ;;  %v2583_v41 = vadd.f32 %v6856_v36, %v5996_v48  ;;  %v4183_v4 = vpack.c.bf16 %v3827_v1, %v3823_v50  ;;  %v2587_v63 = vadd.f32 %v6868_v47, %v5988_v19  ;;  %v2579_v54 = vadd.f32 %v6838_v39, %v5996_v48  ;;  %v8429_v39 = vld [vmem:[#allocation51_spill] sm:$0xff] }
 0x2f4   : > { %8423 = vst [vmem:[#allocation47_spill] sm:$0xff] %v6915_v0  ;;  %v6924_v49 = vpack.c.bf16 %v3533_v15, %v3529_v3  ;;  %v2611_v17 = vadd.f32 %v2610_v34, %v5988_v19  ;;  %4486 = vmatprep.subr.bf16.mxu0 %v4187_v37  ;;  %v2902_v45 = vadd.f32 %v2901_v60, %v6876_v7  ;;  %v3838_v11 = vmax.f32 %v2607_v32, 0.0  ;;  %v8443_v0 = vld [vmem:[#allocation61_spill] sm:$0xff] }
 0x2f5   : > { %v2903_v46 = vpop.f32.mrf.mxu0  ;;  %v6933_v25 = vpop.f32.mrf.mxu1  ;;  %4487 = vmatpush1.bf16.xpose.msra.mxu0 %v4186_v20  ;;  %v3536_v31 = vmax.f32 %v2900_v61, 0.0  ;;  %v3826_v1 = vmax.f32 %v2591_v27, 0.0  ;;  %v3819_v47 = vmax.f32 %v2583_v41, 0.0  ;;  %v3822_v32 = vmax.f32 %v2587_v63, 0.0 }
 0x2f6   : > { %v2904_v55 = vadd.f32 %v2903_v46, %v6865_v51  ;;  %8426 = vst [vmem:[#allocation112_spill] sm:$0xff] %v6933_v25  ;;  %v3842_v36 = vmax.f32 %v2611_v17, 0.0  ;;  %4488 = vmatprep.subr.bf16.mxu0 %v4183_v4  ;;  %v3537_v50 = vmax.f32 %v2902_v45, 0.0  ;;  %v3815_v17 = vmax.f32 %v2579_v54, 0.0 }
 0x2f7   : > { %v2905_v3 = vpop.f32.mrf.mxu0  ;;  %v2616_v9 = vpop.f32.mrf.mxu1  ;;  %v2581_v41 = vadd.f32 %v6843_v23, %v5988_v19  ;;  %v2573_v63 = vadd.f32 %v6829_v12, %v5996_v48 }
 0x2f8   : > { %v3540_v37 = vmax.f32 %v2904_v55, 0.0  ;;  %v2906_v40 = vadd.f32 %v2905_v3, %v6876_v7  ;;  %v6939_v60 = vpack.c.bf16 %v3842_v36, %v3838_v11  ;;  %v2617_v27 = vadd.f32 %v2616_v9, %v5988_v19 }
 0x2f9   : > { %v2909_v15 = vpop.f32.mrf.mxu0  ;;  %3148 = vmatmul.mubr.bf16.gmra.mxu0 %v8427_v35  ;;  %v6944_v46 = vpop.f32.mrf.mxu1  ;;  %v4182_v55 = vpack.c.bf16 %v3826_v1, %v3822_v32  ;;  %v2569_v1 = vadd.f32 %v6818_v43, %v5996_v48 }
 0x2fa   : > { %8428 = vst [vmem:[#allocation49_spill] sm:$0xff] %v6939_v60  ;;  %v6941_v20 = vpack.c.bf16 %v3540_v37, %v3536_v31  ;;  %v3541_v34 = vmax.f32 %v2906_v40, 0.0  ;;  %3157 = vmatprep.mubr.bf16.mxu0 %v8429_v39  ;;  %8430 = vst [vmem:[#allocation51_spill] sm:$0xff] %v6944_v46  ;;  %v2910_v4 = vadd.f32 %v2909_v15, %v6865_v51  ;;  %v3846_v9 = vmax.f32 %v2617_v27, 0.0  ;;  %v8431_v39 = vld [vmem:[#allocation52_spill] sm:$0xff] }
 0x2fb   : > { %v6946_v61 = vpop.f32.mrf.mxu0  ;;  %v2620_v3 = vpop.f32.mrf.mxu1  ;;  %v4179_v31 = vpack.c.bf16 %v3819_v47, %v3815_v17  ;;  %v2577_v37 = vadd.f32 %v6834_v38, %v5988_v19  ;;  %v3811_v38 = vmax.f32 %v2573_v63, 0.0  ;;  %v2563_v63 = vadd.f32 %v6807_v26, %v5996_v48 }
 0x2fc   : > { %v6952_v45 = vpack.c.bf16 %v3541_v34, %v3537_v50  ;;  %v2621_v36 = vadd.f32 %v2620_v3, %v5988_v19  ;;  %v3544_v12 = vmax.f32 %v2910_v4, 0.0  ;;  %v3818_v50 = vmax.f32 %v2581_v41, 0.0 }
 0x2fd   : > { %v2913_v11 = vpop.f32.mrf.mxu0  ;;  %v6960_v40 = vpop.f32.mrf.mxu1  ;;  %4489 = vmatpush1.bf16.xpose.msra.mxu0 %v4182_v55  ;;  %v8433_v55 = vld [vmem:[#allocation53_spill] sm:$0xff]  ;;  %v3814_v3 = vmax.f32 %v2577_v37, 0.0  ;;  %v2571_v41 = vadd.f32 %v6822_v22, %v5988_v19  ;;  %v2559_v22 = vadd.f32 %v6794_v33, %v5996_v48 }
 0x2fe   : > { %v2914_v54 = vadd.f32 %v2913_v11, %v6865_v51  ;;  %v3850_v15 = vmax.f32 %v2621_v36, 0.0  ;;  %4490 = vmatprep.subr.bf16.mxu0 %v4179_v31  ;;  %v3807_v11 = vmax.f32 %v2569_v1, 0.0  ;;  %v2567_v1 = vadd.f32 %v6812_v53, %v5988_v19 }
 0x2ff   : > { %v6962_v23 = vpop.f32.mrf.mxu0  ;;  %v2626_v47 = vpop.f32.mrf.mxu1  ;;  %v4178_v36 = vpack.c.bf16 %v3818_v50, %v3814_v3  ;;  %v3810_v26 = vmax.f32 %v2571_v41, 0.0 }
 0x300   : > { %v3548_v35 = vmax.f32 %v2914_v54, 0.0  ;;  %v6969_v32 = vpack.c.bf16 %v3850_v15, %v3846_v9  ;;  %v2627_v4 = vadd.f32 %v2626_v47, %v5988_v19  ;;  %v4175_v15 = vpack.c.bf16 %v3811_v38, %v3807_v11  ;;  %v8434_v38 = vld [vmem:[#allocation54_spill] sm:$0xff] }
 0x301   : > { %v6966_v34 = vpop.f32.mrf.mxu0  ;;  %3158 = vmatmul.mubr.bf16.gmra.mxu0 %v8431_v39  ;;  %v2628_v43 = vpop.f32.mrf.mxu1  ;;  %v3806_v60 = vmax.f32 %v2567_v1, 0.0 }
 0x302   : > { %8432 = vst [vmem:[#allocation52_spill] sm:$0xff] %v6969_v32  ;;  %v6971_v17 = vpack.c.bf16 %v3548_v35, %v3544_v12  ;;  %3167 = vmatprep.mubr.bf16.mxu0 %v8433_v55  ;;  %v2629_v9 = vadd.f32 %v2628_v43, %v5996_v48  ;;  %v3854_v50 = vmax.f32 %v2627_v4, 0.0  ;;  %v3803_v43 = vmax.f32 %v2563_v63, 0.0 }
 0x303   : > { %v6974_v27 = vpop.f32.mrf.mxu0  ;;  %v2630_v31 = vpop.f32.mrf.mxu1 }
 0x304   : > { %v2631_v37 = vadd.f32 %v2630_v31, %v5988_v19  ;;  %v3855_v53 = vmax.f32 %v2629_v9, 0.0  ;;  %v8436_v31 = vld [vmem:[#allocation55_spill] sm:$0xff] }
 0x305   : > { %v6979_v54 = vpop.f32.mrf.mxu0  ;;  %v2632_v12 = vpop.f32.mrf.mxu1  ;;  %4491 = vmatpush1.bf16.xpose.msra.mxu0 %v4178_v36 }
 0x306   : > { %v3858_v47 = vmax.f32 %v2631_v37, 0.0  ;;  %v2633_v39 = vadd.f32 %v2632_v12, %v5996_v48  ;;  %4492 = vmatprep.subr.bf16.mxu0 %v4175_v15  ;;  %v3799_v37 = vmax.f32 %v2559_v22, 0.0  ;;  %v4174_v12 = vpack.c.bf16 %v3810_v26, %v3806_v60  ;;  %v8439_v26 = vld [vmem:[#allocation57_spill] sm:$0xff] }
 0x307   : > { %v6987_v35 = vpop.f32.mrf.mxu0  ;;  %v2636_v55 = vpop.f32.mrf.mxu1 }
 0x308   : > { %v6995_v11 = vpack.c.bf16 %v3858_v47, %v3854_v50  ;;  %v3859_v36 = vmax.f32 %v2633_v39, 0.0  ;;  %v2637_v41 = vadd.f32 %v2636_v55, %v5988_v19  ;;  %v4171_v9 = vpack.c.bf16 %v3803_v43, %v3799_v37 }
 0x309   : > { %v6992_v3 = vpop.f32.mrf.mxu0  ;;  %3168 = vmatmul.mubr.bf16.gmra.mxu0 %v8434_v38  ;;  %v6998_v33 = vpop.f32.mrf.mxu1 }
 0x30a   : > { %8435 = vst [vmem:[#allocation53_spill] sm:$0xff] %v6995_v11  ;;  %3177 = vmatprep.mubr.bf16.mxu0 %v8436_v31  ;;  %v7002_v15 = vpack.c.bf16 %v3859_v36, %v3855_v53  ;;  %v3862_v47 = vmax.f32 %v2637_v41, 0.0  ;;  %v8438_v53 = vld [vmem:[#allocation56_spill] sm:$0xff] }
 0x30b   : > { %v7000_v4 = vpop.f32.mrf.mxu0  ;;  %v2640_v42 = vpop.f32.mrf.mxu1 }
 0x30c   : > { %8437 = vst [vmem:[#allocation54_spill] sm:$0xff] %v7002_v15  ;;  %v2641_v63 = vadd.f32 %v2640_v42, %v5988_v19 }
 0x30d   : > { %v7005_v38 = vpop.f32.mrf.mxu0  ;;  %v7008_v50 = vpop.f32.mrf.mxu1  ;;  %4493 = vmatpush1.bf16.xpose.msra.mxu0 %v4174_v12 }
 0x30e   : > { %v3866_v39 = vmax.f32 %v2641_v63, 0.0  ;;  %4494 = vmatprep.subr.bf16.mxu0 %v4171_v9  ;;  %v8440_v9 = vld [vmem:[#allocation58_spill] sm:$0xff] }
 0x30f   : > { %v2935_v1 = vpop.f32.mrf.mxu0  ;;  %v7010_v31 = vpop.f32.mrf.mxu1 }
 0x310   : > { %v7015_v60 = vpack.c.bf16 %v3866_v39, %v3862_v47  ;;  %v8441_v47 = vld [vmem:[#allocation59_spill] sm:$0xff] }
 0x311   : > { %v7012_v22 = vpop.f32.mrf.mxu0  ;;  %3178 = vmatmul.mubr.bf16.gmra.mxu0 %v8438_v53  ;;  %v7018_v55 = vpop.f32.mrf.mxu1 }
 0x312   : > { %3187 = vmatprep.mubr.bf16.mxu0 %v8439_v26 }
 0x313   : > { %v2941_v42 = vpop.f32.mrf.mxu0  ;;  %v7020_v43 = vpop.f32.mrf.mxu1 }
 0x315   : > { %v2943_v36 = vpop.f32.mrf.mxu0  ;;  %v7022_v37 = vpop.f32.mrf.mxu1  ;;  %4495 = vmatpush1.bf16.xpose.msra.mxu0 %v6815_v57 }
 0x316   : > { %4496 = vmatprep.subr.bf16.mxu0 %v6797_v13 }
 0x317   : > { %v2945_v41 = vpop.f32.mrf.mxu0  ;;  %v7026_v12 = vpop.f32.mrf.mxu1 }
 0x318   : > { %v2946_v59 = vadd.f32 %v2945_v41, %v6876_v7 }
 0x319   : > { %v2949_v63 = vpop.f32.mrf.mxu0  ;;  %3188 = vmatmul.mubr.bf16.gmra.mxu0 %v8440_v9  ;;  %v7030_v39 = vpop.f32.mrf.mxu1 }
 0x31a   : > { %3197 = vmatprep.mubr.bf16.mxu0 %v8441_v47  ;;  %v2950_v9 = vadd.f32 %v2949_v63, %v6865_v51  ;;  %v2942_v47 = vadd.f32 %v2941_v42, %v6876_v7  ;;  %v8444_v63 = vsub.s32 3, %v8406_v18 }
 0x31b   : > { %v2951_v53 = vpop.f32.mrf.mxu0  ;;  %v7032_v26 = vpop.f32.mrf.mxu1 }
 0x31c   : > { %v2952_v57 = vadd.f32 %v2951_v53, %v6876_v7  ;;  %v8442_v53 = vld [vmem:[#allocation60_spill] sm:$0xff]  ;;  %v3569_v42 = vmax.f32 %v2942_v47, 0.0 }
 0x31d   : > { %v2953_v32 = vpop.f32.mrf.mxu0  ;;  %v7037_v13 = vpop.f32.mrf.mxu1  ;;  %4497 = vmatpush1.bf16.xpose.msra.mxu0 %v6791_v14 }
 0x31e   : > { %v2954_v58 = vadd.f32 %v2953_v32, %v6865_v51  ;;  %4498 = vmatprep.subr.bf16.mxu0 %v6775_v56  ;;  %v3573_v32 = vmax.f32 %v2946_v59, 0.0  ;;  %v3577_v21 = vmax.f32 %v2952_v57, 0.0  ;;  %v4303_v56 = vrot.slane %v6854_v5, %v8444_v63 }
 0x31f   : > { %v2955_v16 = vpop.f32.mrf.mxu0  ;;  %v7044_v24 = vpop.f32.mrf.mxu1  ;;  %v7063_v59 = vadd.f32 %v6966_v34, %v6865_v51  ;;  %v2944_v63 = vadd.f32 %v2943_v36, %v6865_v51 }
 0x320   : > { %v2956_v11 = vadd.f32 %v2955_v16, %v6876_v7  ;;  %v3580_v41 = vmax.f32 %v2954_v58, 0.0  ;;  %v7055_v16 = vadd.f32 %v6946_v61, %v6876_v7  ;;  %v7059_v58 = vadd.f32 %v6962_v23, %v6876_v7 }
 0x321   : > { %v2959_v25 = vpop.f32.mrf.mxu0  ;;  %3198 = vmatmul.mubr.bf16.gmra.mxu0 %v8442_v53  ;;  %v7048_v14 = vpop.f32.mrf.mxu1  ;;  %v7068_v5 = vpack.c.bf16 %v4303_v56, %v4303_v56  ;;  %v7072_v61 = vadd.f32 %v6974_v27, %v6876_v7  ;;  %v2936_v23 = vadd.f32 %v2935_v1, %v6876_v7  ;;  %v7082_v27 = vadd.f32 %v6979_v54, %v6865_v51 }
 0x322   : > { %v3581_v15 = vmax.f32 %v2956_v11, 0.0  ;;  %3207 = vmatprep.mubr.bf16.mxu0 %v8443_v0  ;;  %v3576_v11 = vmax.f32 %v2950_v9, 0.0  ;;  %v2960_v57 = vadd.f32 %v2959_v25, %v6865_v51  ;;  %v2940_v1 = vadd.f32 %v7012_v22, %v6865_v51 }
 0x323   : > { %v2961_v0 = vpop.f32.mrf.mxu0  ;;  %v7066_v18 = vpop.f32.mrf.mxu1  ;;  %4395 = vmatprep.mubr.bf16.mxu1 %v7068_v5 }
 0x324   : > { %v4061_v53 = vpack.c.bf16 %v3581_v15, %v3577_v21  ;;  %v4060_v34 = vpack.c.bf16 %v3580_v41, %v3576_v11  ;;  %v2962_v9 = vadd.f32 %v2961_v0, %v6876_v7  ;;  %v4057_v21 = vpack.c.bf16 %v3573_v32, %v3569_v42 }
 0x325   : > { %v2963_v46 = vpop.f32.mrf.mxu0  ;;  %v2672_v25 = vpop.f32.mrf.mxu1  ;;  %4499 = vmatpush1.bf16.xpose.msra.mxu0 %v6771_v2  ;;  %v3584_v41 = vmax.f32 %v2960_v57, 0.0  ;;  %v3572_v0 = vmax.f32 %v2944_v63, 0.0  ;;  %v2934_v63 = vadd.f32 %v7005_v38, %v6865_v51 }
 0x326   : > { %v2964_v47 = vadd.f32 %v2963_v46, %v6865_v51  ;;  %4363 = vmatprep.subr.bf16.mxu1 %v4061_v53  ;;  %4500 = vmatprep.subr.bf16.mxu0 %v6755_v44  ;;  %v2932_v46 = vadd.f32 %v7000_v4, %v6876_v7  ;;  %v3565_v44 = vmax.f32 %v2936_v23, 0.0  ;;  %v3585_v4 = vmax.f32 %v2962_v9, 0.0 }
 0x327   : > { %v2965_v36 = vpop.f32.mrf.mxu0  ;;  %4364 = vmatpush1.bf16.xpose.msra.mxu1 %v4060_v34  ;;  %v2676_v56 = vpop.f32.mrf.mxu1  ;;  %v2673_v15 = vadd.f32 %v2672_v25, %v5996_v48  ;;  %v2669_v25 = vadd.f32 %v7048_v14, %v5996_v48 }
 0x328   : > { %v3588_v32 = vmax.f32 %v2964_v47, 0.0  ;;  %v2966_v2 = vadd.f32 %v2965_v36, %v6876_v7  ;;  %4365 = vmatprep.subr.bf16.mxu1 %v4057_v21  ;;  %v7101_v21 = vadd.f32 %v6987_v35, %v6876_v7  ;;  %v3568_v36 = vmax.f32 %v2940_v1, 0.0 }
 0x329   : > { %v2969_v42 = vpop.f32.mrf.mxu0  ;;  %3208 = vmatmul.mubr.bf16.gmra.mxu0 %v6195_v10  ;;  %v2678_v34 = vpop.f32.mrf.mxu1  ;;  %v2930_v10 = vadd.f32 %v6992_v3, %v6865_v51  ;;  %v3561_v23 = vmax.f32 %v2932_v46, 0.0  ;;  %v2677_v3 = vadd.f32 %v2676_v56, %v5988_v19 }
 0x32a   : > { %v7095_v57 = vpack.c.bf16 %v3588_v32, %v3584_v41  ;;  %v3589_v53 = vmax.f32 %v2966_v2, 0.0  ;;  %3217 = vmatprep.mubr.bf16.mxu0 %v6228_v62  ;;  %v2970_v9 = vadd.f32 %v2969_v42, %v6865_v51  ;;  %v4056_v32 = vpack.c.bf16 %v3572_v0, %v3568_v36 }
 0x32b   : > { %v2971_v54 = vpop.f32.mrf.mxu0  ;;  %v2680_v41 = vpop.f32.mrf.mxu1  ;;  %v2679_v35 = vadd.f32 %v2678_v34, %v5996_v48  ;;  %v4053_v11 = vpack.c.bf16 %v3565_v44, %v3561_v23  ;;  %v3557_v42 = vmax.f32 %v7101_v21, 0.0  ;;  %v3564_v0 = vmax.f32 %v2934_v63, 0.0 }
 0x32c   : > { %v7108_v62 = vpack.c.bf16 %v3589_v53, %v3585_v4  ;;  %v2681_v47 = vadd.f32 %v2680_v41, %v5988_v19  ;;  %v2972_v38 = vadd.f32 %v2971_v54, %v6876_v7  ;;  %v3592_v34 = vmax.f32 %v2970_v9, 0.0 }
 0x32d   : > { %v2973_v2 = vpop.f32.mrf.mxu0  ;;  %v2682_v46 = vpop.f32.mrf.mxu1  ;;  %4501 = vmatpush1.bf16.xpose.msra.mxu0 %v6751_v52  ;;  %v3560_v23 = vmax.f32 %v2930_v10, 0.0  ;;  %v3891_v52 = vmax.f32 %v2673_v15, 0.0  ;;  %v3895_v21 = vmax.f32 %v2679_v35, 0.0  ;;  %v3894_v9 = vmax.f32 %v2677_v3, 0.0 }
 0x32e   : > { %v2974_v1 = vadd.f32 %v2973_v2, %v6865_v51  ;;  %v2683_v53 = vadd.f32 %v2682_v46, %v5996_v48  ;;  %v3898_v44 = vmax.f32 %v2681_v47, 0.0 }
 0x32f   : > { %v2975_v4 = vpop.f32.mrf.mxu0  ;;  %4366 = vmatpush1.bf16.xpose.msra.mxu1 %v4056_v32  ;;  %v2686_v56 = vpop.f32.mrf.mxu1  ;;  %v3593_v32 = vmax.f32 %v2972_v38, 0.0  ;;  %v4052_v46 = vpack.c.bf16 %v3564_v0, %v3560_v23 }
 0x330   : > { %v3596_v54 = vmax.f32 %v2974_v1, 0.0  ;;  %v2976_v36 = vadd.f32 %v2975_v4, %v6876_v7  ;;  %4367 = vmatprep.subr.bf16.mxu1 %v4053_v11  ;;  %v3899_v63 = vmax.f32 %v2683_v53, 0.0  ;;  %v3887_v11 = vmax.f32 %v2669_v25, 0.0 }
 0x331   : > { %v2979_v41 = vpop.f32.mrf.mxu0  ;;  %3218 = vmatmul.mubr.bf16.gmra.mxu0 %v6232_v29  ;;  %v2688_v1 = vpop.f32.mrf.mxu1  ;;  %v2687_v10 = vadd.f32 %v2686_v56, %v5988_v19  ;;  %v2671_v29 = vadd.f32 %v7066_v18, %v5988_v19  ;;  %v4218_v15 = vpack.c.bf16 %v3898_v44, %v3894_v9  ;;  %v8445_v18 = vmax.f32 %v7072_v61, 0.0 }
 0x332   : > { %v7123_v2 = vpack.c.bf16 %v3596_v54, %v3592_v34  ;;  %v3597_v14 = vmax.f32 %v2976_v36, 0.0  ;;  %3227 = vmatprep.mubr.bf16.mxu0 %v6256_v6  ;;  %v4219_v47 = vpack.c.bf16 %v3899_v63, %v3895_v21  ;;  %v2980_v22 = vadd.f32 %v2979_v41, %v6865_v51 }
 0x333   : > { %v2981_v4 = vpop.f32.mrf.mxu0  ;;  %v2690_v38 = vpop.f32.mrf.mxu1  ;;  %v2663_v6 = vadd.f32 %v7037_v13, %v5996_v48  ;;  %v4215_v3 = vpack.c.bf16 %v3891_v52, %v3887_v11  ;;  %v2689_v0 = vadd.f32 %v2688_v1, %v5996_v48  ;;  %v4049_v36 = vpack.c.bf16 %v3557_v42, %v8445_v18 }
 0x334   : > { %v7130_v35 = vpack.c.bf16 %v3597_v14, %v3593_v32  ;;  %4502 = vmatprep.subr.bf16.mxu0 %v4219_v47  ;;  %v2691_v25 = vadd.f32 %v2690_v38, %v5988_v19  ;;  %v2982_v34 = vadd.f32 %v2981_v4, %v6876_v7  ;;  %v2667_v44 = vadd.f32 %v7044_v24, %v5988_v19 }
 0x335   : > { %v2983_v53 = vpop.f32.mrf.mxu0  ;;  %4503 = vmatpush2.bf16.xpose.msra.mxu0 %v4218_v15  ;;  %v2692_v56 = vpop.f32.mrf.mxu1  ;;  %v2659_v13 = vadd.f32 %v7030_v39, %v5996_v48  ;;  %v3902_v41 = vmax.f32 %v2687_v10, 0.0  ;;  %v3600_v63 = vmax.f32 %v2980_v22, 0.0  ;;  %v3890_v42 = vmax.f32 %v2671_v29, 0.0 }
 0x336   : > { %v2984_v54 = vadd.f32 %v2983_v53, %v6865_v51  ;;  %4504 = vmatprep.subr.bf16.mxu0 %v4215_v3  ;;  %v3906_v52 = vmax.f32 %v2691_v25, 0.0  ;;  %v2693_v21 = vadd.f32 %v2692_v56, %v5996_v48  ;;  %v3883_v9 = vmax.f32 %v2663_v6, 0.0 }
 0x337   : > { %v2985_v23 = vpop.f32.mrf.mxu0  ;;  %4368 = vmatpush1.bf16.xpose.msra.mxu1 %v4052_v46  ;;  %v2696_v14 = vpop.f32.mrf.mxu1  ;;  %v3903_v1 = vmax.f32 %v2689_v0, 0.0  ;;  %v3601_v4 = vmax.f32 %v2982_v34, 0.0  ;;  %v3886_v22 = vmax.f32 %v2667_v44, 0.0  ;;  %v8446_v15 = vmax.f32 %v7063_v59, 0.0 }
 0x338   : > { %v3604_v32 = vmax.f32 %v2984_v54, 0.0  ;;  %v2986_v61 = vadd.f32 %v2985_v23, %v6876_v7  ;;  %4369 = vmatprep.subr.bf16.mxu1 %v4049_v36  ;;  %v7147_v46 = vpack.c.bf16 %v3906_v52, %v3902_v41  ;;  %v3907_v39 = vmax.f32 %v2693_v21, 0.0 }
 0x339   : > { %v2989_v24 = vpop.f32.mrf.mxu0  ;;  %3228 = vmatmul.mubr.bf16.gmra.mxu0 %v6261_v30  ;;  %v2698_v10 = vpop.f32.mrf.mxu1  ;;  %v8447_v29 = vmax.f32 %v7082_v27, 0.0  ;;  %v3879_v30 = vmax.f32 %v2659_v13, 0.0  ;;  %v2697_v3 = vadd.f32 %v2696_v14, %v5988_v19  ;;  %v2661_v25 = vadd.f32 %v7032_v26, %v5988_v19 }
 0x33a   : > { %v7149_v11 = vpack.c.bf16 %v3604_v32, %v3600_v63  ;;  %v3605_v47 = vmax.f32 %v2986_v61, 0.0  ;;  %3237 = vmatprep.mubr.bf16.mxu0 %v6285_v8  ;;  %v7158_v6 = vpack.c.bf16 %v3907_v39, %v3903_v1  ;;  %v2990_v0 = vadd.f32 %v2989_v24, %v6865_v51 }
 0x33b   : > { %v4048_v38 = vpack.c.bf16 %v8447_v29, %v8446_v15  ;;  %v7156_v53 = vpop.f32.mrf.mxu0  ;;  %v4214_v8 = vpack.c.bf16 %v3890_v42, %v3886_v22  ;;  %v2700_v54 = vpop.f32.mrf.mxu1  ;;  %v2653_v27 = vadd.f32 %v7022_v37, %v5996_v48  ;;  %v4211_v18 = vpack.c.bf16 %v3883_v9, %v3879_v30 }
 0x33c   : > { %v7164_v34 = vpack.c.bf16 %v3605_v47, %v3601_v4  ;;  %v2699_v36 = vadd.f32 %v2698_v10, %v5996_v48  ;;  %v2701_v44 = vadd.f32 %v2700_v54, %v5988_v19  ;;  %v8448_v23 = vmax.f32 %v7055_v16, 0.0  ;;  %v8450_v4 = vld [vmem:[#allocation62_spill] sm:$0xff] }
 0x33d   : > { %v2993_v59 = vpop.f32.mrf.mxu0  ;;  %v8449_v13 = vmax.f32 %v7059_v58, 0.0  ;;  %v2657_v41 = vadd.f32 %v7026_v12, %v5988_v19  ;;  %4505 = vmatpush2.bf16.xpose.msra.mxu0 %v4214_v8  ;;  %v2702_v52 = vpop.f32.mrf.mxu1  ;;  %v2649_v37 = vadd.f32 %v7018_v55, %v5996_v48  ;;  %v3910_v63 = vmax.f32 %v2697_v3, 0.0 }
 0x33e   : > { %v2994_v56 = vadd.f32 %v2993_v59, %v6865_v51  ;;  %4506 = vmatprep.subr.bf16.mxu0 %v4211_v18  ;;  %v3914_v32 = vmax.f32 %v2701_v44, 0.0  ;;  %v2703_v61 = vadd.f32 %v2702_v52, %v5996_v48  ;;  %v3608_v16 = vmax.f32 %v2990_v0, 0.0 }
 0x33f   : > { %v4045_v26 = vpack.c.bf16 %v8449_v13, %v8448_v23  ;;  %v7177_v21 = vpop.f32.mrf.mxu0  ;;  %4370 = vmatpush1.bf16.xpose.msra.mxu1 %v4048_v38  ;;  %v3882_v58 = vmax.f32 %v2661_v25, 0.0  ;;  %v2706_v14 = vpop.f32.mrf.mxu1  ;;  %v3875_v12 = vmax.f32 %v2653_v27, 0.0  ;;  %v3911_v9 = vmax.f32 %v2699_v36, 0.0 }
 0x340   : > { %v3612_v42 = vmax.f32 %v2994_v56, 0.0  ;;  %v7185_v1 = vpack.c.bf16 %v3914_v32, %v3910_v63  ;;  %v3915_v39 = vmax.f32 %v2703_v61, 0.0  ;;  %v3878_v47 = vmax.f32 %v2657_v41, 0.0  ;;  %v8452_v63 = vld [vmem:[#allocation64_spill] sm:$0xff] }
 0x341   : > { %4371 = vmatprep.subr.bf16.mxu1 %v4045_v26  ;;  %v7182_v24 = vpop.f32.mrf.mxu0  ;;  %3238 = vmatmul.mubr.bf16.gmra.mxu0 %v6290_v28  ;;  %v2708_v22 = vpop.f32.mrf.mxu1  ;;  %v3871_v15 = vmax.f32 %v2649_v37, 0.0  ;;  %v2707_v38 = vadd.f32 %v2706_v14, %v5988_v19  ;;  %v2651_v28 = vadd.f32 %v7020_v43, %v5988_v19  ;;  %v2643_v25 = vadd.f32 %v7008_v50, %v5996_v48 }
 0x342   : > { %v7187_v55 = vpack.c.bf16 %v3612_v42, %v3608_v16  ;;  %3247 = vmatprep.mubr.bf16.mxu0 %v8450_v4  ;;  %v7192_v29 = vpack.c.bf16 %v3915_v39, %v3911_v9  ;;  %v4210_v30 = vpack.c.bf16 %v3882_v58, %v3878_v47  ;;  %v2709_v54 = vadd.f32 %v2708_v22, %v5996_v48 }
 0x343   : > { %v7190_v10 = vpop.f32.mrf.mxu0  ;;  %v2710_v3 = vpop.f32.mrf.mxu1  ;;  %v4207_v8 = vpack.c.bf16 %v3875_v12, %v3871_v15  ;;  %v2647_v27 = vadd.f32 %v7010_v31, %v5988_v19  ;;  %v2639_v43 = vadd.f32 %v6998_v33, %v5996_v48  ;;  %v3918_v44 = vmax.f32 %v2707_v38, 0.0  ;;  %v8451_v31 = vld [vmem:[#allocation63_spill] sm:$0xff] }
 0x344   : > { %v2711_v59 = vadd.f32 %v2710_v3, %v5988_v19  ;;  %v3874_v23 = vmax.f32 %v2651_v28, 0.0  ;;  %v3867_v41 = vmax.f32 %v2643_v25, 0.0  ;;  %v3919_v52 = vmax.f32 %v2709_v54, 0.0  ;;  %v8453_v25 = vld [vmem:[#allocation65_spill] sm:$0xff] }
 0x345   : > { %v7197_v0 = vpop.f32.mrf.mxu0  ;;  %4507 = vmatpush2.bf16.xpose.msra.mxu0 %v4210_v30  ;;  %v2712_v18 = vpop.f32.mrf.mxu1  ;;  %v3870_v33 = vmax.f32 %v2647_v27, 0.0  ;;  %v3863_v16 = vmax.f32 %v2639_v43, 0.0  ;;  %v8454_v27 = vld [vmem:[#allocation66_spill] sm:$0xff] }
 0x346   : > { %4508 = vmatprep.subr.bf16.mxu0 %v4207_v8  ;;  %v3922_v50 = vmax.f32 %v2711_v59, 0.0  ;;  %v2713_v56 = vadd.f32 %v2712_v18, %v5996_v48 }
 0x347   : > { %v7205_v36 = vpop.f32.mrf.mxu0  ;;  %4372 = vmatpush1.bf16.xpose.msra.mxu1 %v6971_v17  ;;  %v2716_v13 = vpop.f32.mrf.mxu1  ;;  %v4206_v58 = vpack.c.bf16 %v3874_v23, %v3870_v33  ;;  %v4203_v9 = vpack.c.bf16 %v3867_v41, %v3863_v16  ;;  %v8455_v41 = vld [vmem:[#allocation51_spill] sm:$0xff]  ;;  %v8457_v33 = vld [vmem:[#allocation54_spill] sm:$0xff] }
 0x348   : > { %4373 = vmatprep.subr.bf16.mxu1 %v6952_v45  ;;  %v7215_v37 = vpack.c.bf16 %v3922_v50, %v3918_v44  ;;  %v3923_v17 = vmax.f32 %v2713_v56, 0.0  ;;  %v2717_v45 = vadd.f32 %v2716_v13, %v5988_v19 }
 0x349   : > { %v7212_v26 = vpop.f32.mrf.mxu0  ;;  %3248 = vmatmul.mubr.bf16.gmra.mxu0 %v8451_v31  ;;  %v2718_v32 = vpop.f32.mrf.mxu1 }
 0x34a   : > { %3257 = vmatprep.mubr.bf16.mxu0 %v8452_v63  ;;  %v7220_v42 = vpack.c.bf16 %v3923_v17, %v3919_v52  ;;  %v2719_v39 = vadd.f32 %v2718_v32, %v5996_v48  ;;  %v3926_v15 = vmax.f32 %v2717_v45, 0.0  ;;  %v2619_v52 = vadd.f32 %v8455_v41, %v5996_v48  ;;  %v8456_v63 = vld [vmem:[#allocation47_spill] sm:$0xff] }
 0x34b   : > { %v7218_v61 = vpop.f32.mrf.mxu0  ;;  %v2720_v14 = vpop.f32.mrf.mxu1  ;;  %v8458_v45 = vld [vmem:[#allocation111_spill] sm:$0xff] }
 0x34c   : > { %v2721_v4 = vadd.f32 %v2720_v14, %v5988_v19  ;;  %v3927_v8 = vmax.f32 %v2719_v39, 0.0  ;;  %v8459_v39 = vld [vmem:[#allocation67_spill] sm:$0xff] }
 0x34d   : > { %v7223_v12 = vpop.f32.mrf.mxu0  ;;  %4509 = vmatpush2.bf16.xpose.msra.mxu0 %v4206_v58  ;;  %v2722_v47 = vpop.f32.mrf.mxu1 }
 0x34e   : > { %4510 = vmatprep.subr.bf16.mxu0 %v4203_v9  ;;  %v3930_v38 = vmax.f32 %v2721_v4, 0.0  ;;  %v2723_v28 = vadd.f32 %v2722_v47, %v5996_v48 }
 0x34f   : > { %v7227_v22 = vpop.f32.mrf.mxu0  ;;  %4374 = vmatpush1.bf16.xpose.msra.mxu1 %v6941_v20  ;;  %v2726_v30 = vpop.f32.mrf.mxu1 }
 0x350   : > { %4375 = vmatprep.subr.bf16.mxu1 %v6924_v49  ;;  %v7235_v54 = vpack.c.bf16 %v3930_v38, %v3926_v15  ;;  %v3931_v59 = vmax.f32 %v2723_v28, 0.0  ;;  %v2727_v44 = vadd.f32 %v2726_v30, %v5988_v19  ;;  %v2623_v49 = vadd.f32 %v6960_v40, %v5996_v48  ;;  %v8460_v15 = vld [vmem:[#allocation112_spill] sm:$0xff] }
 0x351   : > { %v7232_v3 = vpop.f32.mrf.mxu0  ;;  %3258 = vmatmul.mubr.bf16.gmra.mxu0 %v8453_v25  ;;  %v2728_v18 = vpop.f32.mrf.mxu1  ;;  %v2613_v38 = vadd.f32 %v8460_v15, %v5996_v48  ;;  %v8461_v28 = vld [vmem:[#allocation68_spill] sm:$0xff]  ;;  %v3847_v25 = vmax.f32 %v2619_v52, 0.0 }
 0x352   : > { %3267 = vmatprep.mubr.bf16.mxu0 %v8454_v27  ;;  %v7238_v43 = vpack.c.bf16 %v3931_v59, %v3927_v8  ;;  %v2729_v23 = vadd.f32 %v2728_v18, %v5996_v48  ;;  %v3934_v32 = vmax.f32 %v2727_v44, 0.0  ;;  %v3851_v14 = vmax.f32 %v2623_v49, 0.0  ;;  %v8462_v18 = vld [vmem:[#allocation50_spill] sm:$0xff] }
 0x353   : > { %v3021_v20 = vpop.f32.mrf.mxu0  ;;  %v2730_v50 = vpop.f32.mrf.mxu1  ;;  %v2609_v44 = vadd.f32 %v8462_v18, %v5996_v48  ;;  %v3843_v41 = vmax.f32 %v2613_v38, 0.0 }
 0x354   : > { %v2731_v13 = vadd.f32 %v2730_v50, %v5988_v19 }
 0x355   : > { %v7243_v56 = vpop.f32.mrf.mxu0  ;;  %4511 = vmatpush2.bf16.xpose.msra.mxu0 %v7015_v60  ;;  %v2732_v31 = vpop.f32.mrf.mxu1  ;;  %v3935_v60 = vmax.f32 %v2729_v23, 0.0  ;;  %v4195_v23 = vpack.c.bf16 %v3851_v14, %v3847_v25  ;;  %v8465_v25 = vld [vmem:[#allocation69_spill] sm:$0xff] }
 0x356   : > { %4512 = vmatprep.subr.bf16.mxu0 %v8457_v33  ;;  %v3938_v16 = vmax.f32 %v2731_v13, 0.0  ;;  %v2733_v40 = vadd.f32 %v2732_v31, %v5996_v48 }
 0x357   : > { %v3025_v17 = vpop.f32.mrf.mxu0  ;;  %4376 = vmatpush1.bf16.xpose.msra.mxu1 %v8456_v63  ;;  %v2736_v58 = vpop.f32.mrf.mxu1 }
 0x358   : > { %4377 = vmatprep.subr.bf16.mxu1 %v8458_v45  ;;  %v7255_v4 = vpack.c.bf16 %v3938_v16, %v3934_v32  ;;  %v3939_v47 = vmax.f32 %v2733_v40, 0.0  ;;  %v2737_v27 = vadd.f32 %v2736_v58, %v5988_v19  ;;  %v3026_v63 = vadd.f32 %v3025_v17, %v6876_v7  ;;  %v8463_v32 = vld [vmem:[#allocation53_spill] sm:$0xff]  ;;  %v8464_v58 = vld [vmem:[#allocation46_spill] sm:$0xff] }
 0x359   : > { %v3029_v9 = vpop.f32.mrf.mxu0  ;;  %3268 = vmatmul.mubr.bf16.gmra.mxu0 %v8459_v39  ;;  %v2738_v30 = vpop.f32.mrf.mxu1  ;;  %v3022_v17 = vadd.f32 %v3021_v20, %v6876_v7 }
 0x35a   : > { %3277 = vmatprep.mubr.bf16.mxu0 %v8461_v28  ;;  %v7260_v59 = vpack.c.bf16 %v3939_v47, %v3935_v60  ;;  %v2739_v13 = vadd.f32 %v2738_v30, %v5996_v48  ;;  %v3030_v40 = vadd.f32 %v3029_v9, %v6865_v51  ;;  %v3942_v14 = vmax.f32 %v2737_v27, 0.0 }
 0x35b   : > { %v3031_v8 = vpop.f32.mrf.mxu0  ;;  %v2740_v50 = vpop.f32.mrf.mxu1  ;;  %v3839_v47 = vmax.f32 %v2609_v44, 0.0 }
 0x35c   : > { %v2741_v31 = vadd.f32 %v2740_v50, %v5988_v19  ;;  %v3032_v52 = vadd.f32 %v3031_v8, %v6876_v7  ;;  %v3943_v8 = vmax.f32 %v2739_v13, 0.0  ;;  %v3637_v50 = vmax.f32 %v3026_v63, 0.0 }
 0x35d   : > { %v3033_v49 = vpop.f32.mrf.mxu0  ;;  %4513 = vmatpush2.bf16.xpose.msra.mxu0 %v8463_v32  ;;  %v2742_v16 = vpop.f32.mrf.mxu1  ;;  %v3640_v44 = vmax.f32 %v3030_v40, 0.0  ;;  %v4191_v20 = vpack.c.bf16 %v3843_v41, %v3839_v47  ;;  %v3633_v13 = vmax.f32 %v3022_v17, 0.0  ;;  %v8467_v17 = vld [vmem:[#allocation52_spill] sm:$0xff] }
 0x35e   : > { %v3034_v33 = vadd.f32 %v3033_v49, %v6865_v51  ;;  %4514 = vmatprep.subr.bf16.mxu0 %v4195_v23  ;;  %v3946_v39 = vmax.f32 %v2741_v31, 0.0  ;;  %v2743_v60 = vadd.f32 %v2742_v16, %v5996_v48  ;;  %v3641_v49 = vmax.f32 %v3032_v52, 0.0  ;;  %v8466_v23 = vld [vmem:[#allocation70_spill] sm:$0xff] }
 0x35f   : > { %v3035_v45 = vpop.f32.mrf.mxu0  ;;  %4378 = vmatpush1.bf16.xpose.msra.mxu1 %v8464_v58  ;;  %v2746_v38 = vpop.f32.mrf.mxu1  ;;  %v3024_v52 = vadd.f32 %v7243_v56, %v6865_v51 }
 0x360   : > { %v3036_v15 = vadd.f32 %v3035_v45, %v6876_v7  ;;  %v3644_v28 = vmax.f32 %v3034_v33, 0.0  ;;  %v7277_v9 = vpack.c.bf16 %v3946_v39, %v3942_v14  ;;  %v3947_v18 = vmax.f32 %v2743_v60, 0.0 }
 0x361   : > { %v3039_v30 = vpop.f32.mrf.mxu0  ;;  %3278 = vmatmul.mubr.bf16.gmra.mxu0 %v8465_v25  ;;  %v2748_v31 = vpop.f32.mrf.mxu1  ;;  %v2747_v33 = vadd.f32 %v2746_v38, %v5988_v19  ;;  %v3016_v45 = vadd.f32 %v7227_v22, %v6876_v7  ;;  %v4089_v22 = vpack.c.bf16 %v3637_v50, %v3633_v13 }
 0x362   : > { %v3645_v27 = vmax.f32 %v3036_v15, 0.0  ;;  %3287 = vmatprep.mubr.bf16.mxu0 %v8466_v23  ;;  %v7280_v16 = vpack.c.bf16 %v3947_v18, %v3943_v8  ;;  %v3040_v58 = vadd.f32 %v3039_v30, %v6865_v51  ;;  %v4092_v39 = vpack.c.bf16 %v3644_v28, %v3640_v44 }
 0x363   : > { %v3041_v32 = vpop.f32.mrf.mxu0  ;;  %v2750_v63 = vpop.f32.mrf.mxu1  ;;  %v2749_v40 = vadd.f32 %v2748_v31, %v5996_v48  ;;  %v3020_v30 = vadd.f32 %v7232_v3, %v6865_v51  ;;  %v3950_v56 = vmax.f32 %v2747_v33, 0.0  ;;  %v3012_v18 = vadd.f32 %v7218_v61, %v6876_v7  ;;  %v8469_v61 = vld [vmem:[#allocation74_spill] sm:$0xff] }
 0x364   : > { %v4093_v14 = vpack.c.bf16 %v3645_v27, %v3641_v49  ;;  %v2751_v41 = vadd.f32 %v2750_v63, %v5988_v19  ;;  %v3042_v47 = vadd.f32 %v3041_v32, %v6876_v7  ;;  %v3648_v49 = vmax.f32 %v3040_v58, 0.0  ;;  %v8468_v32 = vld [vmem:[#allocation71_spill] sm:$0xff] }
 0x365   : > { %v3043_v60 = vpop.f32.mrf.mxu0  ;;  %4515 = vmatpush2.bf16.xpose.msra.mxu0 %v8467_v17  ;;  %v2752_v38 = vpop.f32.mrf.mxu1  ;;  %v3636_v31 = vmax.f32 %v3024_v52, 0.0  ;;  %v3951_v3 = vmax.f32 %v2749_v40, 0.0  ;;  %v3629_v33 = vmax.f32 %v3016_v45, 0.0  ;;  %v3014_v45 = vadd.f32 %v7223_v12, %v6865_v51 }
 0x366   : > { %v3044_v15 = vadd.f32 %v3043_v60, %v6865_v51  ;;  %4379 = vmatprep.subr.bf16.mxu1 %v4093_v14  ;;  %4516 = vmatprep.subr.bf16.mxu0 %v4191_v20  ;;  %v3954_v28 = vmax.f32 %v2751_v41, 0.0  ;;  %v2753_v8 = vadd.f32 %v2752_v38, %v5996_v48  ;;  %v3649_v14 = vmax.f32 %v3042_v47, 0.0 }
 0x367   : > { %v3045_v25 = vpop.f32.mrf.mxu0  ;;  %4380 = vmatpush2.bf16.xpose.msra.mxu1 %v4092_v39  ;;  %v2756_v23 = vpop.f32.mrf.mxu1  ;;  %v3632_v60 = vmax.f32 %v3020_v30, 0.0  ;;  %v3010_v12 = vadd.f32 %v7212_v26, %v6865_v51 }
 0x368   : > { %v3652_v27 = vmax.f32 %v3044_v15, 0.0  ;;  %v3046_v50 = vadd.f32 %v3045_v25, %v6876_v7  ;;  %4381 = vmatprep.subr.bf16.mxu1 %v4089_v22  ;;  %v7300_v13 = vpack.c.bf16 %v3954_v28, %v3950_v56  ;;  %v3955_v20 = vmax.f32 %v2753_v8, 0.0 }
 0x369   : > { %v3049_v44 = vpop.f32.mrf.mxu0  ;;  %3288 = vmatmul.mubr.bf16.gmra.mxu0 %v8468_v32  ;;  %v2758_v58 = vpop.f32.mrf.mxu1  ;;  %v2757_v52 = vadd.f32 %v2756_v23, %v5988_v19  ;;  %v3625_v22 = vmax.f32 %v3012_v18, 0.0  ;;  %v4088_v47 = vpack.c.bf16 %v3636_v31, %v3632_v60  ;;  %v3006_v28 = vadd.f32 %v7205_v36, %v6876_v7 }
 0x36a   : > { %v7302_v63 = vpack.c.bf16 %v3652_v27, %v3648_v49  ;;  %v3653_v39 = vmax.f32 %v3046_v50, 0.0  ;;  %3297 = vmatprep.mubr.bf16.mxu0 %v8469_v61  ;;  %v7305_v15 = vpack.c.bf16 %v3955_v20, %v3951_v3  ;;  %v3050_v40 = vadd.f32 %v3049_v44, %v6865_v51  ;;  %v8470_v27 = vld [vmem:[#allocation49_spill] sm:$0xff] }
 0x36b   : > { %v3051_v41 = vpop.f32.mrf.mxu0  ;;  %v2760_v17 = vpop.f32.mrf.mxu1  ;;  %v2759_v56 = vadd.f32 %v2758_v58, %v5996_v48  ;;  %v4085_v49 = vpack.c.bf16 %v3629_v33, %v3625_v22  ;;  %v3958_v31 = vmax.f32 %v2757_v52, 0.0  ;;  %v3002_v36 = vadd.f32 %v7190_v10, %v6876_v7  ;;  %v8471_v58 = vld [vmem:[#allocation75_spill] sm:$0xff]  ;;  %v8472_v10 = vld [vmem:[#allocation78_spill] sm:$0xff] }
 0x36c   : > { %v7309_v38 = vpack.c.bf16 %v3653_v39, %v3649_v14  ;;  %v2761_v30 = vadd.f32 %v2760_v17, %v5988_v19  ;;  %v3052_v8 = vadd.f32 %v3051_v41, %v6876_v7  ;;  %v3656_v3 = vmax.f32 %v3050_v40, 0.0 }
 0x36d   : > { %v3053_v25 = vpop.f32.mrf.mxu0  ;;  %4517 = vmatpush2.bf16.xpose.msra.mxu0 %v8470_v27  ;;  %v2762_v50 = vpop.f32.mrf.mxu1  ;;  %v3628_v39 = vmax.f32 %v3014_v45, 0.0  ;;  %v3959_v26 = vmax.f32 %v2759_v56, 0.0  ;;  %v3621_v52 = vmax.f32 %v3006_v28, 0.0  ;;  %v3004_v28 = vadd.f32 %v7197_v0, %v6865_v51 }
 0x36e   : > { %v3054_v18 = vadd.f32 %v3053_v25, %v6865_v51  ;;  %v3962_v44 = vmax.f32 %v2761_v30, 0.0  ;;  %v2763_v32 = vadd.f32 %v2762_v50, %v5996_v48  ;;  %v3657_v22 = vmax.f32 %v3052_v8, 0.0 }
 0x36f   : > { %v3055_v23 = vpop.f32.mrf.mxu0  ;;  %4382 = vmatpush2.bf16.xpose.msra.mxu1 %v4088_v47  ;;  %v2766_v33 = vpop.f32.mrf.mxu1  ;;  %v3624_v25 = vmax.f32 %v3010_v12, 0.0  ;;  %v2996_v12 = vadd.f32 %v7177_v21, %v6876_v7 }
 0x370   : > { %v3660_v20 = vmax.f32 %v3054_v18, 0.0  ;;  %v3056_v14 = vadd.f32 %v3055_v23, %v6876_v7  ;;  %4383 = vmatprep.subr.bf16.mxu1 %v4085_v49  ;;  %v7327_v60 = vpack.c.bf16 %v3962_v44, %v3958_v31  ;;  %v3963_v41 = vmax.f32 %v2763_v32, 0.0 }
 0x371   : > { %v3059_v61 = vpop.f32.mrf.mxu0  ;;  %3298 = vmatmul.mubr.bf16.gmra.mxu0 %v8471_v58  ;;  %v2768_v40 = vpop.f32.mrf.mxu1  ;;  %v2767_v45 = vadd.f32 %v2766_v33, %v5988_v19  ;;  %v3617_v49 = vmax.f32 %v3002_v36, 0.0  ;;  %v4084_v8 = vpack.c.bf16 %v3628_v39, %v3624_v25  ;;  %v2992_v58 = vadd.f32 %v7156_v53, %v6876_v7  ;;  %v8475_v53 = vld [vmem:[#allocation82_spill] sm:$0xff] }
 0x372   : > { %v7329_v17 = vpack.c.bf16 %v3660_v20, %v3656_v3  ;;  %v3661_v47 = vmax.f32 %v3056_v14, 0.0  ;;  %3307 = vmatprep.mubr.bf16.mxu0 %v8472_v10  ;;  %v4251_v18 = vpack.c.bf16 %v3963_v41, %v3959_v26  ;;  %v3060_v27 = vadd.f32 %v3059_v61, %v6865_v51  ;;  %v8473_v10 = vld [vmem:[#allocation79_spill] sm:$0xff] }
 0x373   : > { %v3061_v30 = vpop.f32.mrf.mxu0  ;;  %v2770_v56 = vpop.f32.mrf.mxu1  ;;  %v2769_v31 = vadd.f32 %v2768_v40, %v5996_v48  ;;  %v4081_v3 = vpack.c.bf16 %v3621_v52, %v3617_v49  ;;  %v3000_v14 = vadd.f32 %v7182_v24, %v6865_v51  ;;  %v3966_v33 = vmax.f32 %v2767_v45, 0.0 }
 0x374   : > { %v7334_v50 = vpack.c.bf16 %v3661_v47, %v3657_v22  ;;  %v2771_v44 = vadd.f32 %v2770_v56, %v5988_v19  ;;  %4568 = vmatprep.subr.bf16.mxu0 %v4251_v18  ;;  %v3062_v32 = vadd.f32 %v3061_v30, %v6876_v7  ;;  %v3664_v26 = vmax.f32 %v3060_v27, 0.0 }
 0x375   : > { %v3063_v23 = vpop.f32.mrf.mxu0  ;;  %v2772_v20 = vpop.f32.mrf.mxu1  ;;  %v3620_v52 = vmax.f32 %v3004_v28, 0.0  ;;  %v3967_v24 = vmax.f32 %v2769_v31, 0.0  ;;  %v3613_v30 = vmax.f32 %v2996_v12, 0.0  ;;  %v3616_v56 = vmax.f32 %v3000_v14, 0.0 }
 0x376   : > { %v3064_v36 = vadd.f32 %v3063_v23, %v6865_v51  ;;  %v3970_v39 = vmax.f32 %v2771_v44, 0.0  ;;  %v2773_v61 = vadd.f32 %v2772_v20, %v5996_v48  ;;  %v3665_v18 = vmax.f32 %v3062_v32, 0.0 }
 0x377   : > { %v3065_v0 = vpop.f32.mrf.mxu0  ;;  %4384 = vmatpush2.bf16.xpose.msra.mxu1 %v4084_v8  ;;  %v2776_v22 = vpop.f32.mrf.mxu1  ;;  %v3609_v44 = vmax.f32 %v2992_v58, 0.0  ;;  %v4080_v12 = vpack.c.bf16 %v3620_v52, %v3616_v56 }
 0x378   : > { %v3668_v21 = vmax.f32 %v3064_v36, 0.0  ;;  %v3066_v41 = vadd.f32 %v3065_v0, %v6876_v7  ;;  %4385 = vmatprep.subr.bf16.mxu1 %v4081_v3  ;;  %v7351_v40 = vpack.c.bf16 %v3970_v39, %v3966_v33  ;;  %v3971_v25 = vmax.f32 %v2773_v61, 0.0 }
 0x379   : > { %v3069_v47 = vpop.f32.mrf.mxu0  ;;  %3308 = vmatmul.mubr.bf16.gmra.mxu0 %v8473_v10  ;;  %v2778_v27 = vpop.f32.mrf.mxu1  ;;  %v2777_v28 = vadd.f32 %v2776_v22, %v5988_v19  ;;  %v4077_v39 = vpack.c.bf16 %v3613_v30, %v3609_v44 }
 0x37a   : > { %8474 = vst [vmem:[#allocation55_spill] sm:$0xff] %v7351_v40  ;;  %v7353_v45 = vpack.c.bf16 %v3668_v21, %v3664_v26  ;;  %v3669_v49 = vmax.f32 %v3066_v41, 0.0  ;;  %3317 = vmatprep.mubr.bf16.mxu0 %v8475_v53  ;;  %v7356_v23 = vpack.c.bf16 %v3971_v25, %v3967_v24  ;;  %v3070_v31 = vadd.f32 %v3069_v47, %v6865_v51  ;;  %v8477_v25 = vld [vmem:[#allocation83_spill] sm:$0xff] }
 0x37b   : > { %v3071_v8 = vpop.f32.mrf.mxu0  ;;  %v2780_v36 = vpop.f32.mrf.mxu1  ;;  %v2779_v20 = vadd.f32 %v2778_v27, %v5996_v48  ;;  %v3974_v58 = vmax.f32 %v2777_v28, 0.0 }
 0x37c   : > { %8476 = vst [vmem:[#allocation56_spill] sm:$0xff] %v7356_v23  ;;  %v7360_v3 = vpack.c.bf16 %v3669_v49, %v3665_v18  ;;  %v2781_v0 = vadd.f32 %v2780_v36, %v5988_v19  ;;  %v3072_v33 = vadd.f32 %v3071_v8, %v6876_v7  ;;  %v3672_v22 = vmax.f32 %v3070_v31, 0.0  ;;  %v8479_v8 = vld [vmem:[#allocation85_spill] sm:$0xff] }
 0x37d   : > { %v3073_v32 = vpop.f32.mrf.mxu0  ;;  %v2782_v61 = vpop.f32.mrf.mxu1  ;;  %v3975_v18 = vmax.f32 %v2779_v20, 0.0 }
 0x37e   : > { %v3074_v14 = vadd.f32 %v3073_v32, %v6865_v51  ;;  %v3978_v21 = vmax.f32 %v2781_v0, 0.0  ;;  %v2783_v41 = vadd.f32 %v2782_v61, %v5996_v48  ;;  %v3673_v53 = vmax.f32 %v3072_v33, 0.0 }
 0x37f   : > { %v3075_v26 = vpop.f32.mrf.mxu0  ;;  %4386 = vmatpush2.bf16.xpose.msra.mxu1 %v4080_v12  ;;  %v2786_v10 = vpop.f32.mrf.mxu1 }
 0x380   : > { %v3676_v47 = vmax.f32 %v3074_v14, 0.0  ;;  %v3076_v52 = vadd.f32 %v3075_v26, %v6876_v7  ;;  %4387 = vmatprep.subr.bf16.mxu1 %v4077_v39  ;;  %v7369_v49 = vpack.c.bf16 %v3978_v21, %v3974_v58  ;;  %v3979_v30 = vmax.f32 %v2783_v41, 0.0 }
 0x381   : > { %v3079_v24 = vpop.f32.mrf.mxu0  ;;  %3318 = vmatmul.mubr.bf16.gmra.mxu0 %v8477_v25  ;;  %v2788_v28 = vpop.f32.mrf.mxu1  ;;  %v2787_v36 = vadd.f32 %v2786_v10, %v5988_v19 }
 0x382   : > { %8478 = vst [vmem:[#allocation57_spill] sm:$0xff] %v7369_v49  ;;  %v7371_v27 = vpack.c.bf16 %v3676_v47, %v3672_v22  ;;  %v3677_v56 = vmax.f32 %v3076_v52, 0.0  ;;  %3327 = vmatprep.mubr.bf16.mxu0 %v8479_v8  ;;  %v7374_v31 = vpack.c.bf16 %v3979_v30, %v3975_v18  ;;  %v3080_v12 = vadd.f32 %v3079_v24, %v6865_v51  ;;  %v8481_v18 = vld [vmem:[#allocation86_spill] sm:$0xff]  ;;  %v8496_v49 = vld [vmem:[#allocation92_spill] sm:$0xff] }
 0x383   : > { %v3081_v44 = vpop.f32.mrf.mxu0  ;;  %v2790_v32 = vpop.f32.mrf.mxu1  ;;  %v2789_v14 = vadd.f32 %v2788_v28, %v5996_v48  ;;  %v3982_v21 = vmax.f32 %v2787_v36, 0.0 }
 0x384   : > { %8480 = vst [vmem:[#allocation58_spill] sm:$0xff] %v7374_v31  ;;  %v7378_v0 = vpack.c.bf16 %v3677_v56, %v3673_v53  ;;  %v2791_v33 = vadd.f32 %v2790_v32, %v5988_v19  ;;  %v3082_v39 = vadd.f32 %v3081_v44, %v6876_v7  ;;  %v3680_v47 = vmax.f32 %v3080_v12, 0.0  ;;  %v8483_v44 = vld [vmem:[#allocation11_spill] sm:$0xff] }
 0x385   : > { %v3083_v20 = vpop.f32.mrf.mxu0  ;;  %v2792_v26 = vpop.f32.mrf.mxu1  ;;  %v3983_v30 = vmax.f32 %v2789_v14, 0.0 }
 0x386   : > { %v3084_v61 = vadd.f32 %v3083_v20, %v6865_v51  ;;  %v3986_v41 = vmax.f32 %v2791_v33, 0.0  ;;  %v2793_v22 = vadd.f32 %v2792_v26, %v5996_v48  ;;  %v3681_v8 = vmax.f32 %v3082_v39, 0.0 }
 0x387   : > { %v3085_v58 = vpop.f32.mrf.mxu0  ;;  %4388 = vmatpush2.bf16.xpose.msra.mxu1 %v7187_v55  ;;  %v2796_v24 = vpop.f32.mrf.mxu1 }
 0x388   : > { %v3684_v52 = vmax.f32 %v3084_v61, 0.0  ;;  %v3086_v10 = vadd.f32 %v3085_v58, %v6876_v7  ;;  %4389 = vmatprep.subr.bf16.mxu1 %v7164_v34  ;;  %v7389_v53 = vpack.c.bf16 %v3986_v41, %v3982_v21  ;;  %v3987_v56 = vmax.f32 %v2793_v22, 0.0 }
 0x389   : > { %v3089_v25 = vpop.f32.mrf.mxu0  ;;  %3328 = vmatmul.mubr.bf16.gmra.mxu0 %v8481_v18  ;;  %v2798_v36 = vpop.f32.mrf.mxu1  ;;  %v2797_v34 = vadd.f32 %v2796_v24, %v5988_v19 }
 0x38a   : > { %8482 = vst [vmem:[#allocation59_spill] sm:$0xff] %v7389_v53  ;;  %v7391_v55 = vpack.c.bf16 %v3684_v52, %v3680_v47  ;;  %v3685_v28 = vmax.f32 %v3086_v10, 0.0  ;;  %3337 = vmatprep.mubr.bf16.mxu0 %v8483_v44  ;;  %v7394_v32 = vpack.c.bf16 %v3987_v56, %v3983_v30  ;;  %v3090_v20 = vadd.f32 %v3089_v25, %v6865_v51  ;;  %v8503_v53 = vld [vmem:[#allocation94_spill] sm:$0xff] }
 0x38b   : > { %v3091_v12 = vpop.f32.mrf.mxu0  ;;  %v2800_v33 = vpop.f32.mrf.mxu1  ;;  %v2799_v26 = vadd.f32 %v2798_v36, %v5996_v48  ;;  %v3990_v47 = vmax.f32 %v2797_v34, 0.0 }
 0x38c   : > { %8484 = vst [vmem:[#allocation60_spill] sm:$0xff] %v7394_v32  ;;  %v7398_v61 = vpack.c.bf16 %v3685_v28, %v3681_v8  ;;  %v2801_v39 = vadd.f32 %v2800_v33, %v5988_v19  ;;  %v3092_v58 = vadd.f32 %v3091_v12, %v6876_v7  ;;  %v3688_v24 = vmax.f32 %v3090_v20, 0.0  ;;  %v8485_v8 = vld [vmem:[#allocation88_spill] sm:$0xff]  ;;  %v8487_v33 = vld [vmem:[#allocation89_spill] sm:$0xff] }
 0x38d   : > { %v3093_v14 = vpop.f32.mrf.mxu0  ;;  %v2802_v41 = vpop.f32.mrf.mxu1  ;;  %v3991_v28 = vmax.f32 %v2799_v26, 0.0 }
 0x38e   : > { %v3094_v21 = vadd.f32 %v3093_v14, %v6865_v51  ;;  %v3994_v52 = vmax.f32 %v2801_v39, 0.0  ;;  %v2803_v10 = vadd.f32 %v2802_v41, %v5996_v48  ;;  %v3689_v12 = vmax.f32 %v3092_v58, 0.0 }
 0x38f   : > { %v3095_v22 = vpop.f32.mrf.mxu0  ;;  %4390 = vmatpush2.bf16.xpose.msra.mxu1 %v7149_v11  ;;  %v2806_v30 = vpop.f32.mrf.mxu1 }
 0x390   : > { %v3692_v25 = vmax.f32 %v3094_v21, 0.0  ;;  %v3096_v18 = vadd.f32 %v3095_v22, %v6876_v7  ;;  %4391 = vmatprep.subr.bf16.mxu1 %v7130_v35  ;;  %v7409_v44 = vpack.c.bf16 %v3994_v52, %v3990_v47  ;;  %v3995_v36 = vmax.f32 %v2803_v10, 0.0 }
 0x391   : > { %v3099_v56 = vpop.f32.mrf.mxu0  ;;  %3338 = vmatmul.mubr.bf16.gmra.mxu0 %v8485_v8  ;;  %v2808_v20 = vpop.f32.mrf.mxu1  ;;  %v2807_v35 = vadd.f32 %v2806_v30, %v5988_v19 }
 0x392   : > { %8486 = vst [vmem:[#allocation61_spill] sm:$0xff] %v7409_v44  ;;  %v7411_v11 = vpack.c.bf16 %v3692_v25, %v3688_v24  ;;  %v3693_v34 = vmax.f32 %v3096_v18, 0.0  ;;  %3347 = vmatprep.mubr.bf16.mxu0 %v8487_v33  ;;  %v7414_v39 = vpack.c.bf16 %v3995_v36, %v3991_v28  ;;  %v3100_v21 = vadd.f32 %v3099_v56, %v6865_v51  ;;  %v8489_v33 = vld [vmem:[#allocation90_spill] sm:$0xff] }
 0x393   : > { %v3101_v14 = vpop.f32.mrf.mxu0  ;;  %v2810_v26 = vpop.f32.mrf.mxu1  ;;  %v2809_v47 = vadd.f32 %v2808_v20, %v5996_v48  ;;  %v3998_v18 = vmax.f32 %v2807_v35, 0.0 }
 0x394   : > { %8488 = vst [vmem:[#allocation62_spill] sm:$0xff] %v7414_v39  ;;  %v7418_v41 = vpack.c.bf16 %v3693_v34, %v3689_v12  ;;  %v2811_v58 = vadd.f32 %v2810_v26, %v5988_v19  ;;  %v3102_v52 = vadd.f32 %v3101_v14, %v6876_v7  ;;  %v3696_v8 = vmax.f32 %v3100_v21, 0.0 }
 0x395   : > { %v3103_v22 = vpop.f32.mrf.mxu0  ;;  %v2812_v24 = vpop.f32.mrf.mxu1  ;;  %v3999_v20 = vmax.f32 %v2809_v47, 0.0 }
 0x396   : > { %v3104_v10 = vadd.f32 %v3103_v22, %v6865_v51  ;;  %v4002_v30 = vmax.f32 %v2811_v58, 0.0  ;;  %v2813_v56 = vadd.f32 %v2812_v24, %v5996_v48  ;;  %v3697_v22 = vmax.f32 %v3102_v52, 0.0  ;;  %v8491_v58 = vld [vmem:[#allocation15_spill] sm:$0xff] }
 0x397   : > { %v3105_v25 = vpop.f32.mrf.mxu0  ;;  %4392 = vmatpush2.bf16.xpose.msra.mxu1 %v7123_v2  ;;  %v2816_v12 = vpop.f32.mrf.mxu1 }
 0x398   : > { %v3700_v28 = vmax.f32 %v3104_v10, 0.0  ;;  %v3106_v36 = vadd.f32 %v3105_v25, %v6876_v7  ;;  %4393 = vmatprep.subr.bf16.mxu1 %v7108_v62  ;;  %v7429_v14 = vpack.c.bf16 %v4002_v30, %v3998_v18  ;;  %v4003_v26 = vmax.f32 %v2813_v56, 0.0 }
 0x399   : > { %v3109_v34 = vpop.f32.mrf.mxu0  ;;  %3348 = vmatmul.mubr.bf16.gmra.mxu0 %v8489_v33  ;;  %v2818_v21 = vpop.f32.mrf.mxu1  ;;  %v2817_v62 = vadd.f32 %v2816_v12, %v5988_v19 }
 0x39a   : > { %8490 = vst [vmem:[#allocation63_spill] sm:$0xff] %v7429_v14  ;;  %v7431_v2 = vpack.c.bf16 %v3700_v28, %v3696_v8  ;;  %v3701_v35 = vmax.f32 %v3106_v36, 0.0  ;;  %3357 = vmatprep.mubr.bf16.mxu0 %v8491_v58  ;;  %v7434_v24 = vpack.c.bf16 %v4003_v26, %v3999_v20  ;;  %v3110_v25 = vadd.f32 %v3109_v34, %v6865_v51  ;;  %v5146_v28 = vld [vmem:[%s8102_s5] sm:$0xf]  ;;  %v8493_v36 = vld [vmem:[#allocation6_spill] sm:$0xff] }
 0x39b   : > { %v3111_v10 = vpop.f32.mrf.mxu0  ;;  %v2820_v47 = vpop.f32.mrf.mxu1  ;;  %v2819_v30 = vadd.f32 %v2818_v21, %v5996_v48  ;;  %v8494_v12 = vsub.s32 2, %v8493_v36  ;;  %v4006_v26 = vmax.f32 %v2817_v62, 0.0 }
 0x39c   : > { %8492 = vst [vmem:[#allocation64_spill] sm:$0xff] %v7434_v24  ;;  %v7438_v40 = vpack.c.bf16 %v3701_v35, %v3697_v22  ;;  %v2821_v52 = vadd.f32 %v2820_v47, %v5988_v19  ;;  %v3112_v56 = vadd.f32 %v3111_v10, %v6876_v7  ;;  %v3704_v58 = vmax.f32 %v3110_v25, 0.0  ;;  %v8495_v47 = vld [vmem:[#allocation17_spill] sm:$0xff] }
 0x39d   : > { %v3113_v18 = vpop.f32.mrf.mxu0  ;;  %v4299_v33 = vrot.slane %v5146_v28, %v8494_v12  ;;  %v2822_v34 = vpop.f32.mrf.mxu1  ;;  %v4007_v36 = vmax.f32 %v2819_v30, 0.0 }
 0x39e   : > { %v3114_v8 = vadd.f32 %v3113_v18, %v6865_v51  ;;  %v4010_v22 = vmax.f32 %v2821_v52, 0.0  ;;  %v2823_v35 = vadd.f32 %v2822_v34, %v5996_v48  ;;  %v3705_v31 = vmax.f32 %v3112_v56, 0.0  ;;  %v8498_v52 = vld [vmem:[#allocation93_spill] sm:$0xff] }
 0x39f   : > { %v3115_v20 = vpop.f32.mrf.mxu0  ;;  %4394 = vmatpush2.bf16.xpose.msra.mxu1 %v7095_v57  ;;  %v2826_v18 = vpop.f32.mrf.mxu1  ;;  %v7459_v25 = vpack.c.bf16 %v4299_v33, %v4299_v33 }
 0x3a0   : > { %v3708_v21 = vmax.f32 %v3114_v8, 0.0  ;;  %v3116_v10 = vadd.f32 %v3115_v20, %v6876_v7  ;;  %4404 = vmatprep.subr.bf16.mxu1 %v8495_v47  ;;  %v7454_v28 = vpack.c.bf16 %v4010_v22, %v4006_v26  ;;  %v4011_v12 = vmax.f32 %v2823_v35, 0.0 }
 0x3a1   : > { %v3119_v23 = vpop.f32.mrf.mxu0  ;;  %3358 = vmatmul.mubr.bf16.gmra.mxu0 %v8496_v49  ;;  %8499 = vst [vmem:[#allocation66_spill] sm:$0xff] %v7459_v25  ;;  %v2828_v8 = vpop.f32.mrf.mxu1  ;;  %v2827_v47 = vadd.f32 %v2826_v18, %v5988_v19  ;;  %v8501_v18 = vld [vmem:[#allocation7_spill] sm:$0xff] }
 0x3a2   : > { %8497 = vst [vmem:[#allocation65_spill] sm:$0xff] %v7454_v28  ;;  %v7456_v57 = vpack.c.bf16 %v3708_v21, %v3704_v58  ;;  %v3709_v62 = vmax.f32 %v3116_v10, 0.0  ;;  %3367 = vmatprep.mubr.bf16.mxu0 %v8498_v52  ;;  %v7461_v20 = vpack.c.bf16 %v4011_v12, %v4007_v36  ;;  %v3120_v49 = vadd.f32 %v3119_v23, %v6865_v51  ;;  %v8500_v10 = vld [vmem:[#allocation16_spill] sm:$0xff]  ;;  %v8549_v28 = vld [vmem:[#allocation34_spill] sm:$0xff] }
 0x3a3   : > { %v3121_v34 = vpop.f32.mrf.mxu0  ;;  %v2830_v26 = vpop.f32.mrf.mxu1  ;;  %v2829_v56 = vadd.f32 %v2828_v8, %v5996_v48  ;;  %v4014_v23 = vmax.f32 %v2827_v47, 0.0 }
 0x3a4   : > { %v7465_v30 = vpack.c.bf16 %v3709_v62, %v3705_v31  ;;  %v2831_v35 = vadd.f32 %v2830_v26, %v5988_v19  ;;  %v3122_v58 = vadd.f32 %v3121_v34, %v6876_v7  ;;  %v3712_v62 = vmax.f32 %v3120_v49, 0.0  ;;  %v8502_v26 = vld [vmem:[#allocation14_spill] sm:$0xff] }
 0x3a5   : > { %v3123_v22 = vpop.f32.mrf.mxu0  ;;  %v2832_v36 = vpop.f32.mrf.mxu1 }
 0x3a6   : > { %v3124_v33 = vadd.f32 %v3123_v22, %v6865_v51  ;;  %4396 = vmatmul.mubr.bf16.vlgmr.msra.gmra.mxu1 %v7459_v25  ;;  %v4018_v31 = vmax.f32 %v2831_v35, 0.0  ;;  %v2833_v12 = vadd.f32 %v2832_v36, %v5996_v48  ;;  %v4015_v25 = vmax.f32 %v2829_v56, 0.0  ;;  %v8505_v35 = vld [vmem:[#allocation19_spill] sm:$0xff] }
 0x3a7   : > { %v3125_v21 = vpop.f32.mrf.mxu0  ;;  %4405 = vmatpush1.bf16.xpose.msra.mxu1 %v8500_v10  ;;  %4436 = vmatprep.mubr.bf16.mxu1 %v8501_v18  ;;  %v2836_v34 = vpop.f32.mrf.mxu1  ;;  %v3713_v44 = vmax.f32 %v3122_v58, 0.0 }
 0x3a8   : > { %v3716_v52 = vmax.f32 %v3124_v33, 0.0  ;;  %v3126_v8 = vadd.f32 %v3125_v21, %v6876_v7  ;;  %4406 = vmatprep.subr.bf16.mxu1 %v8502_v26  ;;  %v7478_v32 = vpack.c.bf16 %v4018_v31, %v4014_v23  ;;  %v4019_v10 = vmax.f32 %v2833_v12, 0.0 }
 0x3a9   : > { %v3129_v22 = vpop.f32.mrf.mxu0  ;;  %3368 = vmatmul.mubr.bf16.gmra.mxu0 %v8503_v53  ;;  %v2838_v49 = vpop.f32.mrf.mxu1  ;;  %v2837_v21 = vadd.f32 %v2836_v34, %v5988_v19 }
 0x3aa   : > { %v7480_v39 = vpack.c.bf16 %v3716_v52, %v3712_v62  ;;  %v3717_v47 = vmax.f32 %v3126_v8, 0.0  ;;  %3377 = vmatprep.mubr.bf16.mxu0 %v8505_v35  ;;  %v7483_v36 = vpack.c.bf16 %v4019_v10, %v4015_v25  ;;  %v3130_v26 = vadd.f32 %v3129_v22, %v6865_v51  ;;  %v8507_v25 = vld [vmem:[#allocation91_spill] sm:$0xff]  ;;  %v8508_v35 = vld [vmem:[#allocation13_spill] sm:$0xff] }
 0x3ab   : > { %v3131_v33 = vpop.f32.mrf.mxu0  ;;  %v2840_v14 = vpop.f32.mrf.mxu1  ;;  %v2839_v23 = vadd.f32 %v2838_v49, %v5996_v48  ;;  %v4022_v8 = vmax.f32 %v2837_v21, 0.0 }
 0x3ac   : > { %8504 = vst [vmem:[#allocation51_spill] sm:$0xff] %v7480_v39  ;;  %v7487_v53 = vpack.c.bf16 %v3717_v47, %v3713_v44  ;;  %v2841_v58 = vadd.f32 %v2840_v14, %v5988_v19  ;;  %v3132_v31 = vadd.f32 %v3131_v33, %v6876_v7  ;;  %v3720_v10 = vmax.f32 %v3130_v26, 0.0  ;;  %v8509_v14 = vld [vmem:[#allocation96_spill] sm:$0xff] }
 0x3ad   : > { %v3133_v56 = vpop.f32.mrf.mxu0  ;;  %v2842_v62 = vpop.f32.mrf.mxu1  ;;  %v4023_v33 = vmax.f32 %v2839_v23, 0.0 }
 0x3ae   : > { %8506 = vst [vmem:[#allocation47_spill] sm:$0xff] %v7487_v53  ;;  %v3134_v12 = vadd.f32 %v3133_v56, %v6865_v51  ;;  %v4026_v34 = vmax.f32 %v2841_v58, 0.0  ;;  %v2843_v22 = vadd.f32 %v2842_v62, %v5996_v48  ;;  %v8511_v48 = vld [vmem:[#allocation97_spill] sm:$0xff] }
 0x3af   : > { %v3135_v52 = vpop.f32.mrf.mxu0  ;;  %4407 = vmatpush1.bf16.xpose.msra.mxu1 %v8507_v25  ;;  %v7497_v49 = vpop.f32.mrf.mxu1  ;;  %v3721_v25 = vmax.f32 %v3132_v31, 0.0 }
 0x3b0   : > { %v3724_v44 = vmax.f32 %v3134_v12, 0.0  ;;  %v3136_v47 = vadd.f32 %v3135_v52, %v6876_v7  ;;  %4408 = vmatprep.subr.bf16.mxu1 %v8508_v35  ;;  %v7500_v56 = vpack.c.bf16 %v4026_v34, %v4022_v8  ;;  %v4027_v39 = vmax.f32 %v2843_v22, 0.0 }
 0x3b1   : > { %v3139_v19 = vpop.f32.mrf.mxu0  ;;  %3378 = vmatmul.mubr.bf16.gmra.mxu0 %v8509_v14  ;;  %v7505_v26 = vpop.f32.mrf.mxu1 }
 0x3b2   : > { %v7502_v21 = vpack.c.bf16 %v3724_v44, %v3720_v10  ;;  %v3725_v58 = vmax.f32 %v3136_v47, 0.0  ;;  %3387 = vmatprep.mubr.bf16.mxu0 %v8511_v48  ;;  %v7507_v62 = vpack.c.bf16 %v4027_v39, %v4023_v33  ;;  %v3140_v52 = vadd.f32 %v3139_v19, %v6865_v51  ;;  %v8513_v10 = vld [vmem:[#allocation12_spill] sm:$0xff]  ;;  %v8514_v39 = vld [vmem:[#allocation10_spill] sm:$0xff] }
 0x3b3   : > { %v3141_v12 = vpop.f32.mrf.mxu0  ;;  %v4360_v14 = vpop.f32.mrf.mxu1  ;;  %v8515_v19 = vld [vmem:[#allocation98_spill] sm:$0xff] }
 0x3b4   : > { %8510 = vst [vmem:[#allocation54_spill] sm:$0xff] %v7502_v21  ;;  %v7510_v35 = vpack.c.bf16 %v3725_v58, %v3721_v25  ;;  %v3142_v8 = vadd.f32 %v3141_v12, %v6876_v7  ;;  %v3728_v44 = vmax.f32 %v3140_v52, 0.0  ;;  %v8517_v12 = vld [vmem:[#allocation99_spill] sm:$0xff]  ;;  %v8523_v21 = vld [vmem:[#allocation101_spill] sm:$0xff] }
 0x3b5   : > { %v3143_v23 = vpop.f32.mrf.mxu0  ;;  %v4361_v34 = vpop.f32.mrf.mxu1 }
 0x3b6   : > { %8512 = vst [vmem:[#allocation111_spill] sm:$0xff] %v7510_v35  ;;  %v3144_v31 = vadd.f32 %v3143_v23, %v6865_v51  ;;  %v3729_v25 = vmax.f32 %v3142_v8, 0.0 }
 0x3b7   : > { %v3145_v22 = vpop.f32.mrf.mxu0  ;;  %4409 = vmatpush1.bf16.xpose.msra.mxu1 %v8513_v10 }
 0x3b8   : > { %v3732_v47 = vmax.f32 %v3144_v31, 0.0  ;;  %v3146_v48 = vadd.f32 %v3145_v22, %v6876_v7  ;;  %4410 = vmatprep.subr.bf16.mxu1 %v8514_v39  ;;  %v8519_v39 = vld [vmem:[#allocation87_spill] sm:$0xff] }
 0x3b9   : > { %v3149_v33 = vpop.f32.mrf.mxu0  ;;  %3388 = vmatmul.mubr.bf16.gmra.mxu0 %v8515_v19 }
 0x3ba   : > { %v7518_v58 = vpack.c.bf16 %v3732_v47, %v3728_v44  ;;  %v3733_v14 = vmax.f32 %v3146_v48, 0.0  ;;  %3397 = vmatprep.mubr.bf16.mxu0 %v8517_v12  ;;  %v3150_v34 = vadd.f32 %v3149_v33, %v6865_v51  ;;  %v8520_v47 = vld [vmem:[#allocation9_spill] sm:$0xff]  ;;  %v8521_v12 = vld [vmem:[#allocation100_spill] sm:$0xff] }
 0x3bb   : > { %v3151_v23 = vpop.f32.mrf.mxu0 }
 0x3bc   : > { %8516 = vst [vmem:[#allocation67_spill] sm:$0xff] %v7518_v58  ;;  %v7522_v53 = vpack.c.bf16 %v3733_v14, %v3729_v25  ;;  %v3152_v31 = vadd.f32 %v3151_v23, %v6876_v7  ;;  %v3736_v19 = vmax.f32 %v3150_v34, 0.0  ;;  %v8529_v58 = vld [vmem:[#allocation103_spill] sm:$0xff] }
 0x3bd   : > { %v3153_v52 = vpop.f32.mrf.mxu0 }
 0x3be   : > { %8518 = vst [vmem:[#allocation112_spill] sm:$0xff] %v7522_v53  ;;  %v3154_v22 = vadd.f32 %v3153_v52, %v6865_v51  ;;  %v3737_v33 = vmax.f32 %v3152_v31, 0.0 }
 0x3bf   : > { %v3155_v10 = vpop.f32.mrf.mxu0  ;;  %4411 = vmatpush1.bf16.xpose.msra.mxu1 %v8519_v39 }
 0x3c0   : > { %v3740_v8 = vmax.f32 %v3154_v22, 0.0  ;;  %v3156_v44 = vadd.f32 %v3155_v10, %v6876_v7  ;;  %4412 = vmatprep.subr.bf16.mxu1 %v8520_v47  ;;  %v8525_v47 = vld [vmem:[#allocation84_spill] sm:$0xff] }
 0x3c1   : > { %v3159_v48 = vpop.f32.mrf.mxu0  ;;  %3398 = vmatmul.mubr.bf16.gmra.mxu0 %v8521_v12 }
 0x3c2   : > { %v7530_v25 = vpack.c.bf16 %v3740_v8, %v3736_v19  ;;  %v3741_v14 = vmax.f32 %v3156_v44, 0.0  ;;  %3407 = vmatprep.mubr.bf16.mxu0 %v8523_v21  ;;  %v3160_v52 = vadd.f32 %v3159_v48, %v6865_v51  ;;  %v8526_v8 = vld [vmem:[#allocation81_spill] sm:$0xff]  ;;  %v8527_v44 = vld [vmem:[#allocation102_spill] sm:$0xff] }
 0x3c3   : > { %v3161_v23 = vpop.f32.mrf.mxu0 }
 0x3c4   : > { %8522 = vst [vmem:[#allocation68_spill] sm:$0xff] %v7530_v25  ;;  %v7534_v35 = vpack.c.bf16 %v3741_v14, %v3737_v33  ;;  %v3162_v22 = vadd.f32 %v3161_v23, %v6876_v7  ;;  %v3744_v12 = vmax.f32 %v3160_v52, 0.0  ;;  %v8535_v25 = vld [vmem:[#allocation105_spill] sm:$0xff] }
 0x3c5   : > { %v3163_v34 = vpop.f32.mrf.mxu0 }
 0x3c6   : > { %8524 = vst [vmem:[#allocation50_spill] sm:$0xff] %v7534_v35  ;;  %v3164_v10 = vadd.f32 %v3163_v34, %v6865_v51  ;;  %v3745_v48 = vmax.f32 %v3162_v22, 0.0 }
 0x3c7   : > { %v3165_v39 = vpop.f32.mrf.mxu0  ;;  %4413 = vmatpush1.bf16.xpose.msra.mxu1 %v8525_v47 }
 0x3c8   : > { %v3748_v31 = vmax.f32 %v3164_v10, 0.0  ;;  %v3166_v19 = vadd.f32 %v3165_v39, %v6876_v7  ;;  %4414 = vmatprep.subr.bf16.mxu1 %v8526_v8  ;;  %v8531_v8 = vld [vmem:[#allocation80_spill] sm:$0xff] }
 0x3c9   : > { %v3169_v21 = vpop.f32.mrf.mxu0  ;;  %3408 = vmatmul.mubr.bf16.gmra.mxu0 %v8527_v44 }
 0x3ca   : > { %v7542_v33 = vpack.c.bf16 %v3748_v31, %v3744_v12  ;;  %v3749_v14 = vmax.f32 %v3166_v19, 0.0  ;;  %3417 = vmatprep.mubr.bf16.mxu0 %v8529_v58  ;;  %v3170_v34 = vadd.f32 %v3169_v21, %v6865_v51  ;;  %v8532_v31 = vld [vmem:[#allocation77_spill] sm:$0xff]  ;;  %v8533_v19 = vld [vmem:[#allocation104_spill] sm:$0xff] }
 0x3cb   : > { %v3171_v23 = vpop.f32.mrf.mxu0 }
 0x3cc   : > { %8528 = vst [vmem:[#allocation53_spill] sm:$0xff] %v7542_v33  ;;  %v7546_v53 = vpack.c.bf16 %v3749_v14, %v3745_v48  ;;  %v3172_v10 = vadd.f32 %v3171_v23, %v6876_v7  ;;  %v3752_v44 = vmax.f32 %v3170_v34, 0.0  ;;  %v8540_v33 = vld [vmem:[#allocation107_spill] sm:$0xff] }
 0x3cd   : > { %v3173_v52 = vpop.f32.mrf.mxu0 }
 0x3ce   : > { %8530 = vst [vmem:[#allocation46_spill] sm:$0xff] %v7546_v53  ;;  %v3174_v39 = vadd.f32 %v3173_v52, %v6865_v51  ;;  %v3753_v21 = vmax.f32 %v3172_v10, 0.0 }
 0x3cf   : > { %v3175_v47 = vpop.f32.mrf.mxu0  ;;  %4415 = vmatpush1.bf16.xpose.msra.mxu1 %v8531_v8 }
 0x3d0   : > { %v3756_v22 = vmax.f32 %v3174_v39, 0.0  ;;  %v3176_v12 = vadd.f32 %v3175_v47, %v6876_v7  ;;  %4416 = vmatprep.subr.bf16.mxu1 %v8532_v31  ;;  %v8537_v31 = vld [vmem:[#allocation76_spill] sm:$0xff] }
 0x3d1   : > { %v3179_v58 = vpop.f32.mrf.mxu0  ;;  %3418 = vmatmul.mubr.bf16.gmra.mxu0 %v8533_v19 }
 0x3d2   : > { %v7554_v48 = vpack.c.bf16 %v3756_v22, %v3752_v44  ;;  %v3757_v14 = vmax.f32 %v3176_v12, 0.0  ;;  %3427 = vmatprep.mubr.bf16.mxu0 %v8535_v25  ;;  %v3180_v52 = vadd.f32 %v3179_v58, %v6865_v51  ;;  %v8538_v22 = vld [vmem:[#allocation73_spill] sm:$0xff]  ;;  %v8539_v12 = vld [vmem:[#allocation106_spill] sm:$0xff] }
 0x3d3   : > { %v3181_v23 = vpop.f32.mrf.mxu0 }
 0x3d4   : > { %8534 = vst [vmem:[#allocation69_spill] sm:$0xff] %v7554_v48  ;;  %v7558_v35 = vpack.c.bf16 %v3757_v14, %v3753_v21  ;;  %v3182_v39 = vadd.f32 %v3181_v23, %v6876_v7  ;;  %v3760_v19 = vmax.f32 %v3180_v52, 0.0  ;;  %v8544_v48 = vld [vmem:[#allocation109_spill] sm:$0xff] }
 0x3d5   : > { %v3183_v34 = vpop.f32.mrf.mxu0 }
 0x3d6   : > { %8536 = vst [vmem:[#allocation70_spill] sm:$0xff] %v7558_v35  ;;  %v3184_v47 = vadd.f32 %v3183_v34, %v6865_v51  ;;  %v3761_v58 = vmax.f32 %v3182_v39, 0.0 }
 0x3d7   : > { %v3185_v8 = vpop.f32.mrf.mxu0  ;;  %4417 = vmatpush1.bf16.xpose.msra.mxu1 %v8537_v31 }
 0x3d8   : > { %v3764_v10 = vmax.f32 %v3184_v47, 0.0  ;;  %v3186_v44 = vadd.f32 %v3185_v8, %v6876_v7  ;;  %4418 = vmatprep.subr.bf16.mxu1 %v8538_v22  ;;  %v8541_v22 = vld [vmem:[#allocation72_spill] sm:$0xff] }
 0x3d9   : > { %v3189_v25 = vpop.f32.mrf.mxu0  ;;  %3428 = vmatmul.mubr.bf16.gmra.mxu0 %v8539_v12 }
 0x3da   : > { %v7566_v21 = vpack.c.bf16 %v3764_v10, %v3760_v19  ;;  %v3765_v14 = vmax.f32 %v3186_v44, 0.0  ;;  %3437 = vmatprep.mubr.bf16.mxu0 %v8540_v33  ;;  %v3190_v34 = vadd.f32 %v3189_v25, %v6865_v51  ;;  %v8542_v10 = vld [vmem:[#allocation33_spill] sm:$0xff]  ;;  %v8543_v44 = vld [vmem:[#allocation108_spill] sm:$0xff] }
 0x3db   : > { %v3191_v23 = vpop.f32.mrf.mxu0 }
 0x3dc   : > { %v7570_v53 = vpack.c.bf16 %v3765_v14, %v3761_v58  ;;  %v3192_v47 = vadd.f32 %v3191_v23, %v6876_v7  ;;  %v3768_v12 = vmax.f32 %v3190_v34, 0.0 }
 0x3dd   : > { %v3193_v52 = vpop.f32.mrf.mxu0 }
 0x3de   : > { %v3194_v8 = vadd.f32 %v3193_v52, %v6865_v51  ;;  %v3769_v25 = vmax.f32 %v3192_v47, 0.0 }
 0x3df   : > { %v3195_v31 = vpop.f32.mrf.mxu0  ;;  %4419 = vmatpush1.bf16.xpose.msra.mxu1 %v8541_v22 }
 0x3e0   : > { %v3772_v39 = vmax.f32 %v3194_v8, 0.0  ;;  %v3196_v19 = vadd.f32 %v3195_v31, %v6876_v7  ;;  %4420 = vmatprep.subr.bf16.mxu1 %v8542_v10  ;;  %v8545_v10 = vld [vmem:[#allocation32_spill] sm:$0xff] }
 0x3e1   : > { %v3199_v33 = vpop.f32.mrf.mxu0  ;;  %3438 = vmatmul.mubr.bf16.gmra.mxu0 %v8543_v44 }
 0x3e2   : > { %v7578_v58 = vpack.c.bf16 %v3772_v39, %v3768_v12  ;;  %v3773_v14 = vmax.f32 %v3196_v19, 0.0  ;;  %3447 = vmatprep.mubr.bf16.mxu0 %v8544_v48  ;;  %v3200_v52 = vadd.f32 %v3199_v33, %v6865_v51  ;;  %v8546_v39 = vld [vmem:[#allocation31_spill] sm:$0xff]  ;;  %v8547_v19 = vld [vmem:[#allocation110_spill] sm:$0xff] }
 0x3e3   : > { %v3201_v23 = vpop.f32.mrf.mxu0 }
 0x3e4   : > { %v7582_v24 = vpack.c.bf16 %v3773_v14, %v3769_v25  ;;  %v3202_v8 = vadd.f32 %v3201_v23, %v6876_v7  ;;  %v3776_v44 = vmax.f32 %v3200_v52, 0.0 }
 0x3e5   : > { %v3203_v34 = vpop.f32.mrf.mxu0 }
 0x3e6   : > { %v3204_v31 = vadd.f32 %v3203_v34, %v6865_v51  ;;  %v3777_v33 = vmax.f32 %v3202_v8, 0.0 }
 0x3e7   : > { %v3205_v22 = vpop.f32.mrf.mxu0  ;;  %4421 = vmatpush2.bf16.xpose.msra.mxu1 %v8545_v10 }
 0x3e8   : > { %v3780_v47 = vmax.f32 %v3204_v31, 0.0  ;;  %v3206_v12 = vadd.f32 %v3205_v22, %v6876_v7  ;;  %4422 = vmatprep.subr.bf16.mxu1 %v8546_v39  ;;  %v8551_v39 = vld [vmem:[#allocation30_spill] sm:$0xff] }
 0x3e9   : > { %v3209_v48 = vpop.f32.mrf.mxu0  ;;  %3448 = vmatmul.mubr.bf16.gmra.mxu0 %v8547_v19 }
 0x3ea   : > { %v7590_v25 = vpack.c.bf16 %v3780_v47, %v3776_v44  ;;  %v3781_v14 = vmax.f32 %v3206_v12, 0.0  ;;  %3457 = vmatprep.mubr.bf16.mxu0 %v8549_v28  ;;  %v3210_v34 = vadd.f32 %v3209_v48, %v6865_v51  ;;  %v8552_v47 = vld [vmem:[#allocation29_spill] sm:$0xff]  ;;  %v8553_v12 = vld [vmem:[#allocation35_spill] sm:$0xff] }
 0x3eb   : > { %v3211_v23 = vpop.f32.mrf.mxu0 }
 0x3ec   : > { %8548 = vst [vmem:[#allocation52_spill] sm:$0xff] %v7590_v25  ;;  %v7594_v35 = vpack.c.bf16 %v3781_v14, %v3777_v33  ;;  %v3212_v31 = vadd.f32 %v3211_v23, %v6876_v7  ;;  %v3784_v19 = vmax.f32 %v3210_v34, 0.0  ;;  %v8555_v25 = vld [vmem:[#allocation36_spill] sm:$0xff] }
 0x3ed   : > { %v3213_v52 = vpop.f32.mrf.mxu0 }
 0x3ee   : > { %8550 = vst [vmem:[#allocation71_spill] sm:$0xff] %v7594_v35  ;;  %v3214_v22 = vadd.f32 %v3213_v52, %v6865_v51  ;;  %v3785_v48 = vmax.f32 %v3212_v31, 0.0 }
 0x3ef   : > { %v3215_v10 = vpop.f32.mrf.mxu0  ;;  %4423 = vmatpush2.bf16.xpose.msra.mxu1 %v8551_v39 }
 0x3f0   : > { %v3788_v8 = vmax.f32 %v3214_v22, 0.0  ;;  %v3216_v44 = vadd.f32 %v3215_v10, %v6876_v7  ;;  %4424 = vmatprep.subr.bf16.mxu1 %v8552_v47  ;;  %v8557_v47 = vld [vmem:[#allocation28_spill] sm:$0xff] }
 0x3f1   : > { %v3219_v28 = vpop.f32.mrf.mxu0  ;;  %3458 = vmatmul.mubr.bf16.gmra.mxu0 %v8553_v12 }
 0x3f2   : > { %v7602_v33 = vpack.c.bf16 %v3788_v8, %v3784_v19  ;;  %v3789_v14 = vmax.f32 %v3216_v44, 0.0  ;;  %3467 = vmatprep.mubr.bf16.mxu0 %v8555_v25  ;;  %v3220_v52 = vadd.f32 %v3219_v28, %v6865_v51  ;;  %v8558_v8 = vld [vmem:[#allocation27_spill] sm:$0xff]  ;;  %v8559_v44 = vld [vmem:[#allocation37_spill] sm:$0xff] }
 0x3f3   : > { %v3221_v23 = vpop.f32.mrf.mxu0 }
 0x3f4   : > { %8554 = vst [vmem:[#allocation74_spill] sm:$0xff] %v7602_v33  ;;  %v7606_v35 = vpack.c.bf16 %v3789_v14, %v3785_v48  ;;  %v3222_v22 = vadd.f32 %v3221_v23, %v6876_v7  ;;  %v3792_v12 = vmax.f32 %v3220_v52, 0.0  ;;  %v8561_v33 = vld [vmem:[#allocation38_spill] sm:$0xff] }
 0x3f5   : > { %v3223_v34 = vpop.f32.mrf.mxu0 }
 0x3f6   : > { %8556 = vst [vmem:[#allocation49_spill] sm:$0xff] %v7606_v35  ;;  %v3224_v10 = vadd.f32 %v3223_v34, %v6865_v51  ;;  %v3793_v28 = vmax.f32 %v3222_v22, 0.0 }
 0x3f7   : > { %v3225_v39 = vpop.f32.mrf.mxu0  ;;  %4425 = vmatpush2.bf16.xpose.msra.mxu1 %v8557_v47 }
 0x3f8   : > { %v3796_v31 = vmax.f32 %v3224_v10, 0.0  ;;  %v3226_v19 = vadd.f32 %v3225_v39, %v6876_v7  ;;  %4426 = vmatprep.subr.bf16.mxu1 %v8558_v8  ;;  %v8563_v8 = vld [vmem:[#allocation26_spill] sm:$0xff] }
 0x3f9   : > { %v3229_v25 = vpop.f32.mrf.mxu0  ;;  %3468 = vmatmul.mubr.bf16.gmra.mxu0 %v8559_v44 }
 0x3fa   : > { %v7614_v48 = vpack.c.bf16 %v3796_v31, %v3792_v12  ;;  %v3797_v14 = vmax.f32 %v3226_v19, 0.0  ;;  %3477 = vmatprep.mubr.bf16.mxu0 %v8561_v33  ;;  %v3230_v34 = vadd.f32 %v3229_v25, %v6865_v51  ;;  %v8564_v31 = vld [vmem:[#allocation25_spill] sm:$0xff]  ;;  %v8565_v19 = vld [vmem:[#allocation39_spill] sm:$0xff] }
 0x3fb   : > { %v3231_v23 = vpop.f32.mrf.mxu0 }
 0x3fc   : > { %8560 = vst [vmem:[#allocation75_spill] sm:$0xff] %v7614_v48  ;;  %v7618_v35 = vpack.c.bf16 %v3797_v14, %v3793_v28  ;;  %v3232_v10 = vadd.f32 %v3231_v23, %v6876_v7  ;;  %v3800_v44 = vmax.f32 %v3230_v34, 0.0  ;;  %v8567_v48 = vld [vmem:[#allocation40_spill] sm:$0xff] }
 0x3fd   : > { %v3233_v52 = vpop.f32.mrf.mxu0 }
 0x3fe   : > { %8562 = vst [vmem:[#allocation78_spill] sm:$0xff] %v7618_v35  ;;  %v3234_v39 = vadd.f32 %v3233_v52, %v6865_v51  ;;  %v3801_v25 = vmax.f32 %v3232_v10, 0.0 }
 0x3ff   : > { %v3235_v47 = vpop.f32.mrf.mxu0  ;;  %4427 = vmatpush2.bf16.xpose.msra.mxu1 %v8563_v8 }
 0x400   : > { %v3804_v22 = vmax.f32 %v3234_v39, 0.0  ;;  %v3236_v12 = vadd.f32 %v3235_v47, %v6876_v7  ;;  %4428 = vmatprep.subr.bf16.mxu1 %v8564_v31  ;;  %v8569_v31 = vld [vmem:[#allocation24_spill] sm:$0xff] }
 0x401   : > { %v3239_v33 = vpop.f32.mrf.mxu0  ;;  %3478 = vmatmul.mubr.bf16.gmra.mxu0 %v8565_v19 }
 0x402   : > { %v7626_v28 = vpack.c.bf16 %v3804_v22, %v3800_v44  ;;  %v3805_v14 = vmax.f32 %v3236_v12, 0.0  ;;  %3487 = vmatprep.mubr.bf16.mxu0 %v8567_v48  ;;  %v3240_v52 = vadd.f32 %v3239_v33, %v6865_v51  ;;  %v8570_v22 = vld [vmem:[#allocation23_spill] sm:$0xff]  ;;  %v8571_v12 = vld [vmem:[#allocation41_spill] sm:$0xff] }
 0x403   : > { %v3241_v23 = vpop.f32.mrf.mxu0 }
 0x404   : > { %8566 = vst [vmem:[#allocation79_spill] sm:$0xff] %v7626_v28  ;;  %v7630_v35 = vpack.c.bf16 %v3805_v14, %v3801_v25  ;;  %v3242_v39 = vadd.f32 %v3241_v23, %v6876_v7  ;;  %v3808_v19 = vmax.f32 %v3240_v52, 0.0  ;;  %v8573_v28 = vld [vmem:[#allocation42_spill] sm:$0xff] }
 0x405   : > { %v3243_v34 = vpop.f32.mrf.mxu0 }
 0x406   : > { %8568 = vst [vmem:[#allocation82_spill] sm:$0xff] %v7630_v35  ;;  %v3244_v47 = vadd.f32 %v3243_v34, %v6865_v51  ;;  %v3809_v33 = vmax.f32 %v3242_v39, 0.0  ;;  %v8579_v35 = vld [vmem:[#allocation44_spill] sm:$0xff] }
 0x407   : > { %v3245_v8 = vpop.f32.mrf.mxu0  ;;  %4429 = vmatpush2.bf16.xpose.msra.mxu1 %v8569_v31 }
 0x408   : > { %v3812_v10 = vmax.f32 %v3244_v47, 0.0  ;;  %v3246_v44 = vadd.f32 %v3245_v8, %v6876_v7  ;;  %4430 = vmatprep.subr.bf16.mxu1 %v8570_v22  ;;  %v8575_v22 = vld [vmem:[#allocation22_spill] sm:$0xff] }
 0x409   : > { %v3249_v48 = vpop.f32.mrf.mxu0  ;;  %3488 = vmatmul.mubr.bf16.gmra.mxu0 %v8571_v12 }
 0x40a   : > { %v7638_v25 = vpack.c.bf16 %v3812_v10, %v3808_v19  ;;  %v3813_v14 = vmax.f32 %v3246_v44, 0.0  ;;  %3497 = vmatprep.mubr.bf16.mxu0 %v8573_v28  ;;  %v3250_v34 = vadd.f32 %v3249_v48, %v6865_v51  ;;  %v8576_v19 = vld [vmem:[#allocation21_spill] sm:$0xff]  ;;  %v8577_v44 = vld [vmem:[#allocation43_spill] sm:$0xff] }
 0x40b   : > { %v7641_v23 = vpop.f32.mrf.mxu0 }
 0x40c   : > { %8572 = vst [vmem:[#allocation83_spill] sm:$0xff] %v7638_v25  ;;  %v7644_v31 = vpack.c.bf16 %v3813_v14, %v3809_v33  ;;  %v3816_v12 = vmax.f32 %v3250_v34, 0.0  ;;  %v8580_v34 = vld [vmem:[#allocation20_spill] sm:$0xff] }
 0x40d   : > { %v3253_v52 = vpop.f32.mrf.mxu0 }
 0x40e   : > { %8574 = vst [vmem:[#allocation85_spill] sm:$0xff] %v7644_v31  ;;  %v3254_v47 = vadd.f32 %v3253_v52, %v6865_v51 }
 0x40f   : > { %v7647_v8 = vpop.f32.mrf.mxu0  ;;  %4431 = vmatpush2.bf16.xpose.msra.mxu1 %v8575_v22 }
 0x410   : > { %v3820_v39 = vmax.f32 %v3254_v47, 0.0  ;;  %4432 = vmatprep.subr.bf16.mxu1 %v8576_v19 }
 0x411   : > { %v3259_v10 = vpop.f32.mrf.mxu0  ;;  %3498 = vmatmul.mubr.bf16.gmra.mxu0 %v8577_v44  ;;  %v8581_v44 = vld [vmem:[#allocation18_spill] sm:$0xff] }
 0x412   : > { %v7652_v28 = vpack.c.bf16 %v3820_v39, %v3816_v12  ;;  %3507 = vmatprep.mubr.bf16.mxu0 %v8579_v35  ;;  %v3260_v33 = vadd.f32 %v3259_v10, %v6865_v51  ;;  %v8582_v35 = vld [vmem:[#allocation45_spill] sm:$0xff] }
 0x413   : > { %v3261_v48 = vpop.f32.mrf.mxu0 }
 0x414   : > { %8578 = vst [vmem:[#allocation86_spill] sm:$0xff] %v7652_v28  ;;  %v3262_v52 = vadd.f32 %v3261_v48, %v6876_v7  ;;  %v3824_v47 = vmax.f32 %v3260_v33, 0.0 }
 0x415   : > { %v3263_v14 = vpop.f32.mrf.mxu0 }
 0x416   : > { %v3264_v25 = vadd.f32 %v3263_v14, %v6865_v51  ;;  %v3825_v39 = vmax.f32 %v3262_v52, 0.0 }
 0x417   : > { %v3265_v22 = vpop.f32.mrf.mxu0  ;;  %4433 = vmatpush2.bf16.xpose.msra.mxu1 %v8580_v34 }
 0x418   : > { %v3828_v19 = vmax.f32 %v3264_v25, 0.0  ;;  %v3266_v31 = vadd.f32 %v3265_v22, %v6876_v7  ;;  %4434 = vmatprep.subr.bf16.mxu1 %v8581_v44  ;;  %v8583_v22 = vld [vmem:[#allocation95_spill] sm:$0xff]  ;;  %v8584_v44 = vld [vmem:[#allocation48_spill] sm:$0xff] }
 0x419   : > { %v7661_v12 = vpop.f32.mrf.mxu0  ;;  %3508 = vmatmul.mubr.bf16.gmra.mxu0 %v8582_v35 }
 0x41a   : > { %v7664_v10 = vpack.c.bf16 %v3828_v19, %v3824_v47  ;;  %v3829_v28 = vmax.f32 %v3266_v31, 0.0  ;;  %4518 = vmatprep.mubr.bf16.mxu0 %v8501_v18 }
 0x41b   : > { %v7667_v48 = vpop.f32.mrf.mxu0 }
 0x41c   : > { %v7669_v14 = vpack.c.bf16 %v3829_v28, %v3825_v39 }
 0x41d   : > { %v7671_v33 = vpop.f32.mrf.mxu0 }
 0x41f   : > { %v7673_v25 = vpop.f32.mrf.mxu0  ;;  %4435 = vmatpush2.bf16.xpose.msra.mxu1 %v8583_v22 }
 0x420   : > { %4445 = vmatprep.subr.bf16.mxu1 %v7465_v30 }
 0x421   : > { %v3279_v34 = vpop.f32.mrf.mxu0  ;;  %4519 = vmatmul.mubr.bf16.vlgmr.msra.gmra.mxu0 %v8584_v44 }
 0x422   : > { %4569 = vmatpush1.bf16.xpose.msra.mxu0 %v7327_v60  ;;  %4600 = vmatprep.mubr.bf16.mxu0 %v8501_v18  ;;  %v3280_v28 = vadd.f32 %v3279_v34, %v6865_v51 }
 0x423   : > { %v3281_v31 = vpop.f32.mrf.mxu0  ;;  %4570 = vmatprep.subr.bf16.mxu0 %v7305_v15 }
 0x424   : > { %v3282_v47 = vadd.f32 %v3281_v31, %v6876_v7  ;;  %v3840_v60 = vmax.f32 %v3280_v28, 0.0 }
 0x425   : > { %v3283_v52 = vpop.f32.mrf.mxu0 }
 0x426   : > { %v3284_v19 = vadd.f32 %v3283_v52, %v6865_v51  ;;  %4437 = vmatmul.mubr.bf16.vlgmr.msra.gmra.mxu1 %v8584_v44  ;;  %v3841_v39 = vmax.f32 %v3282_v47, 0.0 }
 0x427   : > { %v3285_v30 = vpop.f32.mrf.mxu0  ;;  %4446 = vmatpush1.bf16.xpose.msra.mxu1 %v7456_v57  ;;  %4477 = vmatprep.mubr.bf16.mxu1 %v7068_v5 }
 0x428   : > { %v3844_v35 = vmax.f32 %v3284_v19, 0.0  ;;  %v3286_v18 = vadd.f32 %v3285_v30, %v6876_v7  ;;  %4447 = vmatprep.subr.bf16.mxu1 %v7438_v40 }
 0x429   : > { %v3289_v15 = vpop.f32.mrf.mxu0 }
 0x42a   : > { %v7689_v22 = vpack.c.bf16 %v3844_v35, %v3840_v60  ;;  %v3845_v34 = vmax.f32 %v3286_v18, 0.0  ;;  %4571 = vmatpush1.bf16.xpose.msra.mxu0 %v7300_v13  ;;  %v3290_v57 = vadd.f32 %v3289_v15, %v6865_v51 }
 0x42b   : > { %4572 = vmatprep.subr.bf16.mxu0 %v7280_v16  ;;  %v3291_v31 = vpop.f32.mrf.mxu0 }
 0x42c   : > { %v7693_v52 = vpack.c.bf16 %v3845_v34, %v3841_v39  ;;  %v3292_v19 = vadd.f32 %v3291_v31, %v6876_v7  ;;  %v3848_v47 = vmax.f32 %v3290_v57, 0.0 }
 0x42d   : > { %v3293_v28 = vpop.f32.mrf.mxu0 }
 0x42e   : > { %v3294_v30 = vadd.f32 %v3293_v28, %v6865_v51  ;;  %v3849_v13 = vmax.f32 %v3292_v19, 0.0 }
 0x42f   : > { %v3295_v40 = vpop.f32.mrf.mxu0  ;;  %4448 = vmatpush1.bf16.xpose.msra.mxu1 %v7431_v2 }
 0x430   : > { %v3852_v60 = vmax.f32 %v3294_v30, 0.0  ;;  %v3296_v35 = vadd.f32 %v3295_v40, %v6876_v7  ;;  %4449 = vmatprep.subr.bf16.mxu1 %v7418_v41 }
 0x431   : > { %v3299_v16 = vpop.f32.mrf.mxu0 }
 0x432   : > { %v7701_v18 = vpack.c.bf16 %v3852_v60, %v3848_v47  ;;  %v3853_v39 = vmax.f32 %v3296_v35, 0.0  ;;  %4573 = vmatpush1.bf16.xpose.msra.mxu0 %v7277_v9  ;;  %v3300_v2 = vadd.f32 %v3299_v16, %v6865_v51 }
 0x433   : > { %4574 = vmatprep.subr.bf16.mxu0 %v7260_v59  ;;  %v3301_v15 = vpop.f32.mrf.mxu0 }
 0x434   : > { %v7705_v34 = vpack.c.bf16 %v3853_v39, %v3849_v13  ;;  %v3302_v57 = vadd.f32 %v3301_v15, %v6876_v7  ;;  %v3856_v19 = vmax.f32 %v3300_v2, 0.0 }
 0x435   : > { %v3303_v31 = vpop.f32.mrf.mxu0 }
 0x436   : > { %v3304_v28 = vadd.f32 %v3303_v31, %v6865_v51  ;;  %v3857_v9 = vmax.f32 %v3302_v57, 0.0 }
 0x437   : > { %v3305_v41 = vpop.f32.mrf.mxu0  ;;  %4450 = vmatpush1.bf16.xpose.msra.mxu1 %v7411_v11 }
 0x438   : > { %v3860_v30 = vmax.f32 %v3304_v28, 0.0  ;;  %v3306_v40 = vadd.f32 %v3305_v41, %v6876_v7  ;;  %4451 = vmatprep.subr.bf16.mxu1 %v7398_v61 }
 0x439   : > { %v3309_v59 = vpop.f32.mrf.mxu0 }
 0x43a   : > { %v7713_v47 = vpack.c.bf16 %v3860_v30, %v3856_v19  ;;  %v3861_v60 = vmax.f32 %v3306_v40, 0.0  ;;  %4575 = vmatpush1.bf16.xpose.msra.mxu0 %v7255_v4  ;;  %v3310_v11 = vadd.f32 %v3309_v59, %v6865_v51 }
 0x43b   : > { %4576 = vmatprep.subr.bf16.mxu0 %v7238_v43  ;;  %v3311_v35 = vpop.f32.mrf.mxu0 }
 0x43c   : > { %v7717_v16 = vpack.c.bf16 %v3861_v60, %v3857_v9  ;;  %v3312_v39 = vadd.f32 %v3311_v35, %v6876_v7  ;;  %v3864_v2 = vmax.f32 %v3310_v11, 0.0 }
 0x43d   : > { %v3313_v13 = vpop.f32.mrf.mxu0 }
 0x43e   : > { %v3314_v15 = vadd.f32 %v3313_v13, %v6865_v51  ;;  %v3865_v4 = vmax.f32 %v3312_v39, 0.0 }
 0x43f   : > { %v3315_v61 = vpop.f32.mrf.mxu0  ;;  %4452 = vmatpush1.bf16.xpose.msra.mxu1 %v7391_v55 }
 0x440   : > { %v3868_v31 = vmax.f32 %v3314_v15, 0.0  ;;  %v3316_v57 = vadd.f32 %v3315_v61, %v6876_v7  ;;  %4453 = vmatprep.subr.bf16.mxu1 %v7378_v0 }
 0x441   : > { %v3319_v43 = vpop.f32.mrf.mxu0 }
 0x442   : > { %v7725_v28 = vpack.c.bf16 %v3868_v31, %v3864_v2  ;;  %v3869_v41 = vmax.f32 %v3316_v57, 0.0  ;;  %4577 = vmatpush1.bf16.xpose.msra.mxu0 %v7235_v54  ;;  %v3320_v55 = vadd.f32 %v3319_v43, %v6865_v51 }
 0x443   : > { %4578 = vmatprep.subr.bf16.mxu0 %v7220_v42  ;;  %v3321_v19 = vpop.f32.mrf.mxu0 }
 0x444   : > { %v7729_v30 = vpack.c.bf16 %v3869_v41, %v3865_v4  ;;  %v3322_v59 = vadd.f32 %v3321_v19, %v6876_v7  ;;  %v3872_v60 = vmax.f32 %v3320_v55, 0.0 }
 0x445   : > { %v3323_v40 = vpop.f32.mrf.mxu0 }
 0x446   : > { %v3324_v9 = vadd.f32 %v3323_v40, %v6865_v51  ;;  %v3873_v54 = vmax.f32 %v3322_v59, 0.0 }
 0x447   : > { %v3325_v0 = vpop.f32.mrf.mxu0  ;;  %4454 = vmatpush1.bf16.xpose.msra.mxu1 %v7371_v27 }
 0x448   : > { %v3876_v35 = vmax.f32 %v3324_v9, 0.0  ;;  %v3326_v11 = vadd.f32 %v3325_v0, %v6876_v7  ;;  %4455 = vmatprep.subr.bf16.mxu1 %v7360_v3 }
 0x449   : > { %v3329_v42 = vpop.f32.mrf.mxu0 }
 0x44a   : > { %v7737_v13 = vpack.c.bf16 %v3876_v35, %v3872_v60  ;;  %v3877_v39 = vmax.f32 %v3326_v11, 0.0  ;;  %4579 = vmatpush1.bf16.xpose.msra.mxu0 %v7215_v37  ;;  %v3330_v27 = vadd.f32 %v3329_v42, %v6865_v51 }
 0x44b   : > { %4580 = vmatprep.subr.bf16.mxu0 %v7192_v29  ;;  %v3331_v15 = vpop.f32.mrf.mxu0 }
 0x44c   : > { %v7741_v61 = vpack.c.bf16 %v3877_v39, %v3873_v54  ;;  %v3332_v31 = vadd.f32 %v3331_v15, %v6876_v7  ;;  %v3880_v43 = vmax.f32 %v3330_v27, 0.0 }
 0x44d   : > { %v3333_v2 = vpop.f32.mrf.mxu0 }
 0x44e   : > { %v3334_v57 = vadd.f32 %v3333_v2, %v6865_v51  ;;  %v3881_v37 = vmax.f32 %v3332_v31, 0.0  ;;  %v4316_v2 = vpop.permute.xlu0 %4315 }
 0x44f   : > { %v3335_v3 = vpop.f32.mrf.mxu0  ;;  %4456 = vmatpush1.bf16.xpose.msra.mxu1 %v7353_v45 }
 0x450   : > { %v3884_v4 = vmax.f32 %v3334_v57, 0.0  ;;  %v3336_v41 = vadd.f32 %v3335_v3, %v6876_v7  ;;  %4457 = vmatprep.subr.bf16.mxu1 %v7334_v50  ;;  %v8585_v57 = vld [vmem:[#allocation8_spill] sm:$0xff] }
 0x451   : > { %v3339_v29 = vpop.f32.mrf.mxu0  ;;  %v7778_v3 = vrot.slane %v4316_v2, %v8585_v57 }
 0x452   : > { %v7749_v19 = vpack.c.bf16 %v3884_v4, %v3880_v43  ;;  %v3885_v55 = vmax.f32 %v3336_v41, 0.0  ;;  %4581 = vmatpush1.bf16.xpose.msra.mxu0 %v7185_v1  ;;  %v3340_v45 = vadd.f32 %v3339_v29, %v6865_v51 }
 0x453   : > { %4582 = vmatprep.subr.bf16.mxu0 %v7158_v6  ;;  %v3341_v40 = vpop.f32.mrf.mxu0  ;;  %v4357_v4 = vadd.f32 %v7497_v49, %v7778_v3 }
 0x454   : > { %v7753_v59 = vpack.c.bf16 %v3885_v55, %v3881_v37  ;;  %v3342_v0 = vadd.f32 %v3341_v40, %v6876_v7  ;;  %v3888_v35 = vmax.f32 %v3340_v45, 0.0 }
 0x455   : > { %v3343_v9 = vpop.f32.mrf.mxu0 }
 0x456   : > { %v3344_v60 = vadd.f32 %v3343_v9, %v6865_v51  ;;  %v3889_v1 = vmax.f32 %v3342_v0, 0.0 }
 0x457   : > { %v3345_v50 = vpop.f32.mrf.mxu0  ;;  %4458 = vmatpush1.bf16.xpose.msra.mxu1 %v7329_v17 }
 0x458   : > { %v3892_v11 = vmax.f32 %v3344_v60, 0.0  ;;  %v3346_v42 = vadd.f32 %v3345_v50, %v6876_v7  ;;  %4459 = vmatprep.subr.bf16.mxu1 %v7309_v38 }
 0x459   : > { %v7761_v6 = vpop.f32.mrf.mxu0 }
 0x45a   : > { %v7763_v54 = vpack.c.bf16 %v3892_v11, %v3888_v35  ;;  %v3893_v39 = vmax.f32 %v3346_v42, 0.0  ;;  %4583 = vmatpush1.bf16.xpose.msra.mxu0 %v7147_v46 }
 0x45b   : > { %v7766_v15 = vpop.f32.mrf.mxu0  ;;  %4584 = vmatprep.subr.bf16.mxu0 %v7507_v62 }
 0x45c   : > { %v7769_v27 = vpack.c.bf16 %v3893_v39, %v3889_v1 }
 0x45d   : > { %v7771_v17 = vpop.f32.mrf.mxu0 }
 0x45f   : > { %v7773_v31 = vpop.f32.mrf.mxu0  ;;  %4460 = vmatpush1.bf16.xpose.msra.mxu1 %v7302_v63 }
 0x460   : > { %4461 = vmatprep.subr.bf16.mxu1 %v7582_v24 }
 0x461   : > { %v3359_v38 = vpop.f32.mrf.mxu0 }
 0x462   : > { %4585 = vmatpush2.bf16.xpose.msra.mxu0 %v7500_v56  ;;  %v3360_v62 = vadd.f32 %v3359_v38, %v6865_v51  ;;  %v4359_v56 = vadd.f32 %v7505_v26, %v7778_v3 }
 0x463   : > { %v3361_v46 = vpop.f32.mrf.mxu0  ;;  %4586 = vmatprep.subr.bf16.mxu0 %v7483_v36 }
 0x464   : > { %v3362_v41 = vadd.f32 %v3361_v46, %v6876_v7  ;;  %v3904_v55 = vmax.f32 %v3360_v62, 0.0 }
 0x465   : > { %v3363_v43 = vpop.f32.mrf.mxu0 }
 0x466   : > { %v3364_v63 = vadd.f32 %v3363_v43, %v6865_v51  ;;  %v4397_v24 = vpop.f32.mrf.mxu1  ;;  %v3905_v60 = vmax.f32 %v3362_v41, 0.0 }
 0x467   : > { %v3365_v29 = vpop.f32.mrf.mxu0  ;;  %4462 = vmatpush2.bf16.xpose.msra.mxu1 %v7578_v58  ;;  %v4398_v37 = vadd.f32 %v4397_v24, %v4357_v4  ;;  %v8586_v4 = vld [vmem:[#allocation70_spill] sm:$0xff] }
 0x468   : > { %v3908_v36 = vmax.f32 %v3364_v63, 0.0  ;;  %v3366_v40 = vadd.f32 %v3365_v29, %v6876_v7  ;;  %4463 = vmatprep.subr.bf16.mxu1 %v7570_v53  ;;  %v4399_v45 = vpop.f32.mrf.mxu1 }
 0x469   : > { %v3369_v49 = vpop.f32.mrf.mxu0  ;;  %v4650_v9 = vsub.f32 0.0, %v4398_v37  ;;  %v4400_v0 = vadd.f32 %v4399_v45, %v4359_v56  ;;  %v8587_v37 = vld [vmem:[#allocation65_spill] sm:$0xff]  ;;  %v8588_v56 = vld [vmem:[#allocation64_spill] sm:$0xff] }
 0x46a   : > { %v7792_v50 = vpack.c.bf16 %v3908_v36, %v3904_v55  ;;  %v3909_v35 = vmax.f32 %v3366_v40, 0.0  ;;  %4587 = vmatpush2.bf16.xpose.msra.mxu0 %v7478_v32  ;;  %v4401_v58 = vpop.f32.mrf.mxu1  ;;  %v3370_v53 = vadd.f32 %v3369_v49, %v6865_v51 }
 0x46b   : > { %4588 = vmatprep.subr.bf16.mxu0 %v7461_v20  ;;  %v3371_v26 = vpop.f32.mrf.mxu0  ;;  %v4658_v11 = vmul.f32 1.442695, %v4650_v9  ;;  %v4651_v42 = vsub.f32 0.0, %v4400_v0  ;;  %v8589_v0 = vld [vmem:[#allocation69_spill] sm:$0xff] }
 0x46c   : > { %v7796_v1 = vpack.c.bf16 %v3909_v35, %v3905_v60  ;;  %v4402_v39 = vpop.f32.mrf.mxu1  ;;  %v3372_v57 = vadd.f32 %v3371_v26, %v6876_v7  ;;  %v3912_v32 = vmax.f32 %v3370_v53, 0.0  ;;  %v8590_v26 = vld [vmem:[#allocation46_spill] sm:$0xff] }
 0x46d   : > { %v3373_v2 = vpop.f32.mrf.mxu0  ;;  %5113 = vpow2.f32 %v4658_v11  ;;  %v4660_v38 = vmul.f32 1.442695, %v4651_v42 }
 0x46e   : > { %v3374_v46 = vadd.f32 %v3373_v2, %v6865_v51  ;;  %v3913_v63 = vmax.f32 %v3372_v57, 0.0  ;;  %v8592_v57 = vld [vmem:[#allocation62_spill] sm:$0xff] }
 0x46f   : > { %v3375_v62 = vpop.f32.mrf.mxu0  ;;  %4464 = vmatpush2.bf16.xpose.msra.mxu1 %v7566_v21  ;;  %5115 = vpow2.f32 %v4660_v38  ;;  %v8591_v38 = vld [vmem:[#allocation63_spill] sm:$0xff] }
 0x470   : > { %v3916_v20 = vmax.f32 %v3374_v46, 0.0  ;;  %v3376_v43 = vadd.f32 %v3375_v62, %v6876_v7  ;;  %4465 = vmatprep.subr.bf16.mxu1 %v8586_v4 }
 0x471   : > { %v3379_v41 = vpop.f32.mrf.mxu0 }
 0x472   : > { %v7804_v24 = vpack.c.bf16 %v3916_v20, %v3912_v32  ;;  %v3917_v29 = vmax.f32 %v3376_v43, 0.0  ;;  %4589 = vmatpush2.bf16.xpose.msra.mxu0 %v8587_v37  ;;  %v3380_v21 = vadd.f32 %v3379_v41, %v6865_v51 }
 0x473   : > { %4590 = vmatprep.subr.bf16.mxu0 %v8588_v56  ;;  %v3381_v55 = vpop.f32.mrf.mxu0  ;;  %v8593_v56 = vld [vmem:[#allocation53_spill] sm:$0xff] }
 0x474   : > { %v7808_v36 = vpack.c.bf16 %v3917_v29, %v3913_v63  ;;  %v3382_v45 = vadd.f32 %v3381_v55, %v6876_v7  ;;  %v3920_v60 = vmax.f32 %v3380_v21, 0.0 }
 0x475   : > { %v3383_v40 = vpop.f32.mrf.mxu0 }
 0x476   : > { %v3384_v49 = vadd.f32 %v3383_v40, %v6865_v51  ;;  %v3921_v53 = vmax.f32 %v3382_v45, 0.0  ;;  %v8594_v45 = vld [vmem:[#allocation50_spill] sm:$0xff] }
 0x477   : > { %v3385_v9 = vpop.f32.mrf.mxu0  ;;  %4466 = vmatpush2.bf16.xpose.msra.mxu1 %v8589_v0 }
 0x478   : > { %v3924_v35 = vmax.f32 %v3384_v49, 0.0  ;;  %v3386_v58 = vadd.f32 %v3385_v9, %v6876_v7  ;;  %4467 = vmatprep.subr.bf16.mxu1 %v8590_v26 }
 0x479   : > { %v3389_v11 = vpop.f32.mrf.mxu0 }
 0x47a   : > { %v5114_v42 = vpop.eup %5113  ;;  %v7816_v39 = vpack.c.bf16 %v3924_v35, %v3920_v60  ;;  %v3925_v2 = vmax.f32 %v3386_v58, 0.0  ;;  %4591 = vmatpush2.bf16.xpose.msra.mxu0 %v8591_v38  ;;  %v3390_v43 = vadd.f32 %v3389_v11, %v6865_v51  ;;  %v8595_v35 = vld [vmem:[#allocation61_spill] sm:$0xff]  ;;  %v8596_v58 = vld [vmem:[#allocation60_spill] sm:$0xff] }
 0x47b   : > { %4592 = vmatprep.subr.bf16.mxu0 %v8592_v57  ;;  %v3391_v46 = vpop.f32.mrf.mxu0  ;;  %v4674_v62 = vadd.f32 1.0, %v5114_v42 }
 0x47c   : > { %v5116_v32 = vpop.eup %5115  ;;  %v7820_v20 = vpack.c.bf16 %v3925_v2, %v3921_v53  ;;  %v3392_v63 = vadd.f32 %v3391_v46, %v6876_v7  ;;  %v3928_v55 = vmax.f32 %v3390_v43, 0.0  ;;  %v8597_v46 = vld [vmem:[#allocation68_spill] sm:$0xff] }
 0x47d   : > { %v3393_v4 = vpop.f32.mrf.mxu0  ;;  %v4675_v41 = vadd.f32 1.0, %v5116_v32  ;;  %5117 = vrcp.f32 %v4674_v62 }
 0x47e   : > { %v3394_v29 = vadd.f32 %v3393_v4, %v6865_v51  ;;  %v3929_v9 = vmax.f32 %v3392_v63, 0.0  ;;  %v8598_v4 = vld [vmem:[#allocation112_spill] sm:$0xff] }
 0x47f   : > { %v3395_v37 = vpop.f32.mrf.mxu0  ;;  %4468 = vmatpush2.bf16.xpose.msra.mxu1 %v8593_v56  ;;  %5119 = vrcp.f32 %v4675_v41  ;;  %v8599_v56 = vld [vmem:[#allocation59_spill] sm:$0xff] }
 0x480   : > { %v3932_v21 = vmax.f32 %v3394_v29, 0.0  ;;  %v3396_v40 = vadd.f32 %v3395_v37, %v6876_v7  ;;  %4469 = vmatprep.subr.bf16.mxu1 %v8594_v45 }
 0x481   : > { %v3399_v49 = vpop.f32.mrf.mxu0 }
 0x482   : > { %v7828_v0 = vpack.c.bf16 %v3932_v21, %v3928_v55  ;;  %v3933_v60 = vmax.f32 %v3396_v40, 0.0  ;;  %4593 = vmatpush2.bf16.xpose.msra.mxu0 %v8595_v35  ;;  %v3400_v42 = vadd.f32 %v3399_v49, %v6865_v51  ;;  %v8601_v21 = vld [vmem:[#allocation58_spill] sm:$0xff] }
 0x483   : > { %4594 = vmatprep.subr.bf16.mxu0 %v8596_v58  ;;  %v3401_v26 = vpop.f32.mrf.mxu0 }
 0x484   : > { %v7832_v11 = vpack.c.bf16 %v3933_v60, %v3929_v9  ;;  %v3402_v2 = vadd.f32 %v3401_v26, %v6876_v7  ;;  %v3936_v62 = vmax.f32 %v3400_v42, 0.0 }
 0x485   : > { %v3403_v53 = vpop.f32.mrf.mxu0 }
 0x486   : > { %v3404_v38 = vadd.f32 %v3403_v53, %v6865_v51  ;;  %v3937_v63 = vmax.f32 %v3402_v2, 0.0  ;;  %v8603_v53 = vld [vmem:[#allocation67_spill] sm:$0xff] }
 0x487   : > { %v3405_v57 = vpop.f32.mrf.mxu0  ;;  %4470 = vmatpush2.bf16.xpose.msra.mxu1 %v8597_v46  ;;  %v8604_v46 = vld [vmem:[#allocation111_spill] sm:$0xff] }
 0x488   : > { %v3940_v32 = vmax.f32 %v3404_v38, 0.0  ;;  %v3406_v43 = vadd.f32 %v3405_v57, %v6876_v7  ;;  %4471 = vmatprep.subr.bf16.mxu1 %v8598_v4 }
 0x489   : > { %v3409_v41 = vpop.f32.mrf.mxu0 }
 0x48a   : > { %v7840_v29 = vpack.c.bf16 %v3940_v32, %v3936_v62  ;;  %v3941_v37 = vmax.f32 %v3406_v43, 0.0  ;;  %4595 = vmatpush2.bf16.xpose.msra.mxu0 %v8599_v56  ;;  %v7843_v55 = vpop.eup %5117  ;;  %v3410_v9 = vadd.f32 %v3409_v41, %v6865_v51  ;;  %v8605_v41 = vld [vmem:[#allocation57_spill] sm:$0xff] }
 0x48b   : > { %8600 = vst [vmem:[#allocation11_spill] sm:$0xff] %v7843_v55  ;;  %4596 = vmatprep.subr.bf16.mxu0 %v8601_v21  ;;  %v3411_v40 = vpop.f32.mrf.mxu0 }
 0x48c   : > { %v7846_v45 = vpop.eup %5119  ;;  %v7848_v49 = vpack.c.bf16 %v3941_v37, %v3937_v63  ;;  %v3412_v58 = vadd.f32 %v3411_v40, %v6876_v7  ;;  %v3944_v2 = vmax.f32 %v3410_v9, 0.0  ;;  %v8606_v63 = vld [vmem:[#allocation56_spill] sm:$0xff]  ;;  %v3276_v9 = vadd.f32 %v7673_v25, %v6876_v7 }
 0x48d   : > { %8602 = vst [vmem:[#allocation88_spill] sm:$0xff] %v7846_v45  ;;  %v3413_v60 = vpop.f32.mrf.mxu0 }
 0x48e   : > { %v3414_v26 = vadd.f32 %v3413_v60, %v6865_v51  ;;  %v3945_v32 = vmax.f32 %v3412_v58, 0.0 }
 0x48f   : > { %v3415_v42 = vpop.f32.mrf.mxu0  ;;  %4472 = vmatpush2.bf16.xpose.msra.mxu1 %v8603_v53  ;;  %v3272_v53 = vadd.f32 %v7667_v48, %v6876_v7  ;;  %v3274_v48 = vadd.f32 %v7671_v33, %v6865_v51 }
 0x490   : > { %v3948_v38 = vmax.f32 %v3414_v26, 0.0  ;;  %v3416_v57 = vadd.f32 %v3415_v42, %v6876_v7  ;;  %4473 = vmatprep.subr.bf16.mxu1 %v8604_v46  ;;  %v8607_v42 = vld [vmem:[#allocation54_spill] sm:$0xff]  ;;  %v8608_v46 = vld [vmem:[#allocation47_spill] sm:$0xff] }
 0x491   : > { %v3419_v62 = vpop.f32.mrf.mxu0 }
 0x492   : > { %v7858_v43 = vpack.c.bf16 %v3948_v38, %v3944_v2  ;;  %v3949_v4 = vmax.f32 %v3416_v57, 0.0  ;;  %4597 = vmatpush2.bf16.xpose.msra.mxu0 %v8605_v41  ;;  %v3420_v21 = vadd.f32 %v3419_v62, %v6865_v51 }
 0x493   : > { %4598 = vmatprep.subr.bf16.mxu0 %v8606_v63  ;;  %v3421_v37 = vpop.f32.mrf.mxu0  ;;  %v8609_v63 = vld [vmem:[#allocation55_spill] sm:$0xff] }
 0x494   : > { %v7862_v56 = vpack.c.bf16 %v3949_v4, %v3945_v32  ;;  %v3422_v60 = vadd.f32 %v3421_v37, %v6876_v7  ;;  %v3952_v2 = vmax.f32 %v3420_v21, 0.0  ;;  %v3837_v32 = vmax.f32 %v3276_v9, 0.0 }
 0x495   : > { %v3423_v40 = vpop.f32.mrf.mxu0  ;;  %v3270_v9 = vadd.f32 %v7661_v12, %v6865_v51 }
 0x496   : > { %v3424_v58 = vadd.f32 %v3423_v40, %v6865_v51  ;;  %v3953_v25 = vmax.f32 %v3422_v60, 0.0  ;;  %v3833_v40 = vmax.f32 %v3272_v53, 0.0 }
 0x497   : > { %v3425_v26 = vpop.f32.mrf.mxu0  ;;  %4474 = vmatpush2.bf16.xpose.msra.mxu1 %v8607_v42  ;;  %v3832_v53 = vmax.f32 %v3270_v9, 0.0 }
 0x498   : > { %v3956_v38 = vmax.f32 %v3424_v58, 0.0  ;;  %v3426_v57 = vadd.f32 %v3425_v26, %v6876_v7  ;;  %4475 = vmatprep.subr.bf16.mxu1 %v8608_v46  ;;  %v4189_v58 = vpack.c.bf16 %v3837_v32, %v3833_v40  ;;  %v8610_v26 = vld [vmem:[#allocation51_spill] sm:$0xff]  ;;  %v3256_v32 = vadd.f32 %v7647_v8, %v6876_v7 }
 0x499   : > { %v7874_v62 = vpop.f32.mrf.mxu0 }
 0x49a   : > { %v7876_v4 = vpack.c.bf16 %v3956_v38, %v3952_v2  ;;  %v3957_v41 = vmax.f32 %v3426_v57, 0.0  ;;  %4599 = vmatpush2.bf16.xpose.msra.mxu0 %v8609_v63  ;;  %v3836_v2 = vmax.f32 %v3274_v48, 0.0  ;;  %v8611_v63 = vld [vmem:[#allocation66_spill] sm:$0xff] }
 0x49b   : > { %v7879_v37 = vpop.f32.mrf.mxu0 }
 0x49c   : > { %v7881_v42 = vpack.c.bf16 %v3957_v41, %v3953_v25  ;;  %v4188_v33 = vpack.c.bf16 %v3836_v2, %v3832_v53 }
 0x49d   : > { %v7885_v21 = vpop.f32.mrf.mxu0 }
 0x49f   : > { %v7889_v60 = vpop.f32.mrf.mxu0  ;;  %4476 = vmatpush2.bf16.xpose.msra.mxu1 %v8610_v26  ;;  %v3821_v26 = vmax.f32 %v3256_v32, 0.0 }
 0x4a0   : > { %4527 = vmatprep.subr.bf16.mxu1 %v4189_v58 }
 0x4a1   : > { %v3439_v38 = vpop.f32.mrf.mxu0  ;;  %4601 = vmatmul.mubr.bf16.vlgmr.msra.gmra.mxu0 %v8584_v44  ;;  %v3252_v44 = vadd.f32 %v7641_v23, %v6876_v7 }
 0x4a2   : > { %v3440_v46 = vadd.f32 %v3439_v38, %v6865_v51 }
 0x4a3   : > { %v3441_v57 = vpop.f32.mrf.mxu0 }
 0x4a4   : > { %v3442_v12 = vadd.f32 %v3441_v57, %v6876_v7  ;;  %v3968_v48 = vmax.f32 %v3440_v46, 0.0 }
 0x4a5   : > { %v3443_v25 = vpop.f32.mrf.mxu0 }
 0x4a6   : > { %v3444_v41 = vadd.f32 %v3443_v25, %v6865_v51  ;;  %4478 = vmatmul.mubr.bf16.vlgmr.msra.gmra.mxu1 %v8611_v63  ;;  %v3969_v2 = vmax.f32 %v3442_v12, 0.0  ;;  %v3817_v25 = vmax.f32 %v3252_v44, 0.0 }
 0x4a7   : > { %v3445_v40 = vpop.f32.mrf.mxu0  ;;  %4528 = vmatpush1.bf16.xpose.msra.mxu1 %v4188_v33  ;;  %4559 = vmatprep.mubr.bf16.mxu1 %v7068_v5 }
 0x4a8   : > { %v3972_v58 = vmax.f32 %v3444_v41, 0.0  ;;  %v3446_v9 = vadd.f32 %v3445_v40, %v6876_v7  ;;  %4529 = vmatprep.subr.bf16.mxu1 %v7669_v14  ;;  %v4181_v41 = vpack.c.bf16 %v3821_v26, %v3817_v25 }
 0x4a9   : > { %v3449_v8 = vpop.f32.mrf.mxu0 }
 0x4aa   : > { %v7904_v38 = vpack.c.bf16 %v3972_v58, %v3968_v48  ;;  %v3973_v53 = vmax.f32 %v3446_v9, 0.0  ;;  %v3450_v35 = vadd.f32 %v3449_v8, %v6865_v51 }
 0x4ab   : > { %v3451_v57 = vpop.f32.mrf.mxu0 }
 0x4ac   : > { %8612 = vst [vmem:[#allocation89_spill] sm:$0xff] %v7904_v38  ;;  %v7906_v33 = vpack.c.bf16 %v3973_v53, %v3969_v2  ;;  %v3452_v23 = vadd.f32 %v3451_v57, %v6876_v7  ;;  %v3976_v14 = vmax.f32 %v3450_v35, 0.0  ;;  %v8616_v57 = vld [vmem:[#allocation86_spill] sm:$0xff] }
 0x4ad   : > { %v3453_v45 = vpop.f32.mrf.mxu0 }
 0x4ae   : > { %8613 = vst [vmem:[#allocation90_spill] sm:$0xff] %v7906_v33  ;;  %v3454_v46 = vadd.f32 %v3453_v45, %v6865_v51  ;;  %v3977_v44 = vmax.f32 %v3452_v23, 0.0 }
 0x4af   : > { %v3455_v40 = vpop.f32.mrf.mxu0  ;;  %4530 = vmatpush1.bf16.xpose.msra.mxu1 %v7664_v10 }
 0x4b0   : > { %v3980_v32 = vmax.f32 %v3454_v46, 0.0  ;;  %v3456_v12 = vadd.f32 %v3455_v40, %v6876_v7  ;;  %4531 = vmatprep.subr.bf16.mxu1 %v4181_v41  ;;  %v8617_v41 = vld [vmem:[#allocation85_spill] sm:$0xff] }
 0x4b1   : > { %v3459_v48 = vpop.f32.mrf.mxu0 }
 0x4b2   : > { %v7913_v58 = vpack.c.bf16 %v3980_v32, %v3976_v14  ;;  %v3981_v9 = vmax.f32 %v3456_v12, 0.0  ;;  %v3460_v53 = vadd.f32 %v3459_v48, %v6865_v51 }
 0x4b3   : > { %v3461_v8 = vpop.f32.mrf.mxu0 }
 0x4b4   : > { %8614 = vst [vmem:[#allocation15_spill] sm:$0xff] %v7913_v58  ;;  %v7915_v2 = vpack.c.bf16 %v3981_v9, %v3977_v44  ;;  %v3462_v26 = vadd.f32 %v3461_v8, %v6876_v7  ;;  %v3984_v25 = vmax.f32 %v3460_v53, 0.0 }
 0x4b5   : > { %v3463_v45 = vpop.f32.mrf.mxu0 }
 0x4b6   : > { %8615 = vst [vmem:[#allocation17_spill] sm:$0xff] %v7915_v2  ;;  %v3464_v10 = vadd.f32 %v3463_v45, %v6865_v51  ;;  %v3985_v14 = vmax.f32 %v3462_v26, 0.0 }
 0x4b7   : > { %v3465_v35 = vpop.f32.mrf.mxu0  ;;  %4532 = vmatpush1.bf16.xpose.msra.mxu1 %v8616_v57  ;;  %v8620_v57 = vld [vmem:[#allocation83_spill] sm:$0xff] }
 0x4b8   : > { %v3988_v46 = vmax.f32 %v3464_v10, 0.0  ;;  %v3466_v23 = vadd.f32 %v3465_v35, %v6876_v7  ;;  %4533 = vmatprep.subr.bf16.mxu1 %v8617_v41 }
 0x4b9   : > { %v3469_v40 = vpop.f32.mrf.mxu0 }
 0x4ba   : > { %v7923_v32 = vpack.c.bf16 %v3988_v46, %v3984_v25  ;;  %v3989_v12 = vmax.f32 %v3466_v23, 0.0  ;;  %v3470_v9 = vadd.f32 %v3469_v40, %v6865_v51  ;;  %v8621_v25 = vld [vmem:[#allocation82_spill] sm:$0xff] }
 0x4bb   : > { %v3471_v48 = vpop.f32.mrf.mxu0 }
 0x4bc   : > { %8618 = vst [vmem:[#allocation92_spill] sm:$0xff] %v7923_v32  ;;  %v7925_v44 = vpack.c.bf16 %v3989_v12, %v3985_v14  ;;  %v3472_v45 = vadd.f32 %v3471_v48, %v6876_v7  ;;  %v3992_v35 = vmax.f32 %v3470_v9, 0.0 }
 0x4bd   : > { %v3473_v8 = vpop.f32.mrf.mxu0 }
 0x4be   : > { %8619 = vst [vmem:[#allocation93_spill] sm:$0xff] %v7925_v44  ;;  %v3474_v53 = vadd.f32 %v3473_v8, %v6865_v51  ;;  %v3993_v23 = vmax.f32 %v3472_v45, 0.0 }
 0x4bf   : > { %v3475_v10 = vpop.f32.mrf.mxu0  ;;  %4534 = vmatpush1.bf16.xpose.msra.mxu1 %v8620_v57  ;;  %v8622_v57 = vld [vmem:[#allocation79_spill] sm:$0xff] }
 0x4c0   : > { %v3996_v41 = vmax.f32 %v3474_v53, 0.0  ;;  %v3476_v26 = vadd.f32 %v3475_v10, %v6876_v7  ;;  %4535 = vmatprep.subr.bf16.mxu1 %v8621_v25 }
 0x4c1   : > { %v3479_v46 = vpop.f32.mrf.mxu0 }
 0x4c2   : > { %v7933_v14 = vpack.c.bf16 %v3996_v41, %v3992_v35  ;;  %v3997_v12 = vmax.f32 %v3476_v26, 0.0  ;;  %v3480_v48 = vadd.f32 %v3479_v46, %v6865_v51  ;;  %v8623_v35 = vld [vmem:[#allocation78_spill] sm:$0xff] }
 0x4c3   : > { %v3481_v40 = vpop.f32.mrf.mxu0 }
 0x4c4   : > { %v7935_v38 = vpack.c.bf16 %v3997_v12, %v3993_v23  ;;  %v3482_v33 = vadd.f32 %v3481_v40, %v6876_v7  ;;  %v4000_v10 = vmax.f32 %v3480_v48, 0.0 }
 0x4c5   : > { %v3483_v8 = vpop.f32.mrf.mxu0 }
 0x4c6   : > { %v3484_v9 = vadd.f32 %v3483_v8, %v6865_v51  ;;  %v4001_v26 = vmax.f32 %v3482_v33, 0.0 }
 0x4c7   : > { %v3485_v53 = vpop.f32.mrf.mxu0  ;;  %4536 = vmatpush1.bf16.xpose.msra.mxu1 %v8622_v57  ;;  %v8624_v57 = vld [vmem:[#allocation75_spill] sm:$0xff] }
 0x4c8   : > { %v4004_v25 = vmax.f32 %v3484_v9, 0.0  ;;  %v3486_v45 = vadd.f32 %v3485_v53, %v6876_v7  ;;  %4537 = vmatprep.subr.bf16.mxu1 %v8623_v35 }
 0x4c9   : > { %v3489_v41 = vpop.f32.mrf.mxu0 }
 0x4ca   : > { %v7943_v23 = vpack.c.bf16 %v4004_v25, %v4000_v10  ;;  %v4005_v12 = vmax.f32 %v3486_v45, 0.0  ;;  %v3490_v40 = vadd.f32 %v3489_v41, %v6865_v51  ;;  %v8625_v10 = vld [vmem:[#allocation49_spill] sm:$0xff] }
 0x4cb   : > { %v3491_v46 = vpop.f32.mrf.mxu0 }
 0x4cc   : > { %v7945_v58 = vpack.c.bf16 %v4005_v12, %v4001_v26  ;;  %v3492_v2 = vadd.f32 %v3491_v46, %v6876_v7  ;;  %v4008_v53 = vmax.f32 %v3490_v40, 0.0 }
 0x4cd   : > { %v3493_v8 = vpop.f32.mrf.mxu0 }
 0x4ce   : > { %v3494_v48 = vadd.f32 %v3493_v8, %v6865_v51  ;;  %v4009_v45 = vmax.f32 %v3492_v2, 0.0  ;;  %v3352_v2 = vadd.f32 %v7766_v15, %v6876_v7  ;;  %v3350_v15 = vadd.f32 %v7761_v6, %v6865_v51 }
 0x4cf   : > { %v3495_v9 = vpop.f32.mrf.mxu0  ;;  %4538 = vmatpush1.bf16.xpose.msra.mxu1 %v8624_v57  ;;  %v3356_v57 = vadd.f32 %v7773_v31, %v6876_v7  ;;  %v3436_v6 = vadd.f32 %v7889_v60, %v6876_v7 }
 0x4d0   : > { %v4012_v35 = vmax.f32 %v3494_v48, 0.0  ;;  %v3496_v33 = vadd.f32 %v3495_v9, %v6876_v7  ;;  %4539 = vmatprep.subr.bf16.mxu1 %v8625_v10  ;;  %v8626_v10 = vld [vmem:[#allocation74_spill] sm:$0xff] }
 0x4d1   : > { %v3499_v25 = vpop.f32.mrf.mxu0 }
 0x4d2   : > { %v7953_v26 = vpack.c.bf16 %v4012_v35, %v4008_v53  ;;  %v4013_v12 = vmax.f32 %v3496_v33, 0.0  ;;  %v3500_v46 = vadd.f32 %v3499_v25, %v6865_v51  ;;  %v3901_v25 = vmax.f32 %v3356_v57, 0.0 }
 0x4d3   : > { %v3501_v41 = vpop.f32.mrf.mxu0 }
 0x4d4   : > { %v7955_v55 = vpack.c.bf16 %v4013_v12, %v4009_v45  ;;  %v3502_v40 = vadd.f32 %v3501_v41, %v6876_v7  ;;  %v4016_v53 = vmax.f32 %v3500_v46, 0.0  ;;  %v8627_v45 = vld [vmem:[#allocation71_spill] sm:$0xff]  ;;  %v3897_v41 = vmax.f32 %v3352_v2, 0.0  ;;  %v8628_v46 = vld [vmem:[#allocation52_spill] sm:$0xff] }
 0x4d5   : > { %v3503_v8 = vpop.f32.mrf.mxu0 }
 0x4d6   : > { %v3504_v48 = vadd.f32 %v3503_v8, %v6865_v51  ;;  %v4017_v12 = vmax.f32 %v3502_v40, 0.0  ;;  %v3354_v8 = vadd.f32 %v7771_v17, %v6865_v51 }
 0x4d7   : > { %v3505_v9 = vpop.f32.mrf.mxu0  ;;  %4540 = vmatpush1.bf16.xpose.msra.mxu1 %v8626_v10  ;;  %v4221_v10 = vpack.c.bf16 %v3901_v25, %v3897_v41 }
 0x4d8   : > { %v4020_v35 = vmax.f32 %v3504_v48, 0.0  ;;  %v3506_v33 = vadd.f32 %v3505_v9, %v6876_v7  ;;  %4541 = vmatprep.subr.bf16.mxu1 %v8627_v45  ;;  %v3900_v48 = vmax.f32 %v3354_v8, 0.0  ;;  %v3896_v9 = vmax.f32 %v3350_v15, 0.0 }
 0x4da   : > { %v7967_v32 = vpack.c.bf16 %v4020_v35, %v4016_v53  ;;  %v4021_v31 = vmax.f32 %v3506_v33, 0.0  ;;  %v4220_v57 = vpack.c.bf16 %v3900_v48, %v3896_v9  ;;  %v8630_v9 = vld [vmem:[#allocation6_spill] sm:$0xff] }
 0x4dc   : > { %v7969_v44 = vpack.c.bf16 %v4021_v31, %v4017_v12 }
 0x4df   : > { %4542 = vmatpush1.bf16.xpose.msra.mxu1 %v8628_v46 }
 0x4e0   : > { %4543 = vmatprep.subr.bf16.mxu1 %v4221_v10 }
 0x4e6   : > { %v7976_v40 = vpop.f32.mrf.mxu1 }
 0x4e7   : > { %4544 = vmatpush2.bf16.xpose.msra.mxu1 %v4220_v57 }
 0x4e8   : > { %4545 = vmatprep.subr.bf16.mxu1 %v7769_v27  ;;  %v7979_v2 = vpop.f32.mrf.mxu1 }
 0x4ea   : > { %v4442_v53 = vpop.f32.mrf.mxu1 }
 0x4eb   : > { %v8633_v53 = vld [vmem:[#allocation88_spill] sm:$0xff] }
 0x4ec   : > { %v4443_v35 = vpop.f32.mrf.mxu1 }
 0x4ef   : > { %4546 = vmatpush2.bf16.xpose.msra.mxu1 %v7763_v54 }
 0x4f0   : > { %4547 = vmatprep.subr.bf16.mxu1 %v7753_v59 }
 0x4f7   : > { %4548 = vmatpush2.bf16.xpose.msra.mxu1 %v7749_v19  ;;  %v3509_v19 = vpop.f32.mrf.mxu0 }
 0x4f8   : > { %4549 = vmatprep.subr.bf16.mxu1 %v7741_v61  ;;  %v3432_v61 = vadd.f32 %v7879_v37, %v6876_v7 }
 0x4ff   : > { %4550 = vmatpush2.bf16.xpose.msra.mxu1 %v7737_v13  ;;  %v3961_v13 = vmax.f32 %v3432_v61, 0.0 }
 0x500   : > { %4551 = vmatprep.subr.bf16.mxu1 %v7729_v30  ;;  %v3965_v30 = vmax.f32 %v3436_v6, 0.0 }
 0x507   : > { %4552 = vmatpush2.bf16.xpose.msra.mxu1 %v7725_v28  ;;  %v3511_v28 = vpop.f32.mrf.mxu0 }
 0x508   : > { %4553 = vmatprep.subr.bf16.mxu1 %v7717_v16  ;;  %v3434_v16 = vadd.f32 %v7885_v21, %v6865_v51 }
 0x509   : > { %v3513_v59 = vpop.f32.mrf.mxu0 }
 0x50b   : > { %v3515_v27 = vpop.f32.mrf.mxu0 }
 0x50f   : > { %4554 = vmatpush2.bf16.xpose.msra.mxu1 %v7713_v47  ;;  %v4253_v47 = vpack.c.bf16 %v3965_v30, %v3961_v13  ;;  %v8636_v30 = vld [vmem:[#allocation15_spill] sm:$0xff]  ;;  %v8637_v13 = vld [vmem:[#allocation90_spill] sm:$0xff] }
 0x510   : > { %4555 = vmatprep.subr.bf16.mxu1 %v7705_v34  ;;  %v3430_v34 = vadd.f32 %v7874_v62, %v6865_v51 }
 0x512   : > { %v3960_v54 = vmax.f32 %v3430_v34, 0.0 }
 0x517   : > { %4556 = vmatpush2.bf16.xpose.msra.mxu1 %v7701_v18  ;;  %v3964_v18 = vmax.f32 %v3434_v16, 0.0 }
 0x518   : > { %4557 = vmatprep.subr.bf16.mxu1 %v7693_v52  ;;  %v8003_v52 = vpop.f32.mrf.mxu0 }
 0x519   : > { %v4252_v17 = vpack.c.bf16 %v3964_v18, %v3960_v54  ;;  %v4521_v16 = vadd.f32 %v8003_v52, %v7778_v3 }
 0x51a   : > { %v8007_v37 = vpop.f32.mrf.mxu0 }
 0x51c   : > { %v4524_v62 = vpop.f32.mrf.mxu0 }
 0x51e   : > { %v4525_v21 = vpop.f32.mrf.mxu0 }
 0x51f   : > { %4558 = vmatpush2.bf16.xpose.msra.mxu1 %v7689_v22  ;;  %v3512_v22 = vadd.f32 %v3511_v28, %v6876_v7  ;;  %v8638_v28 = vld [vmem:[#allocation89_spill] sm:$0xff] }
 0x520   : > { %4609 = vmatprep.subr.bf16.mxu1 %v4253_v47  ;;  %v4523_v47 = vadd.f32 %v8007_v37, %v7778_v3 }
 0x526   : > { %4560 = vmatmul.mubr.bf16.vlgmr.msra.gmra.mxu1 %v8611_v63 }
 0x527   : > { %4610 = vmatpush1.bf16.xpose.msra.mxu1 %v4252_v17  ;;  %4641 = vmatprep.mubr.bf16.mxu1 %v7068_v5  ;;  %v3516_v5 = vadd.f32 %v3515_v27, %v6876_v7  ;;  %v4441_v7 = vadd.f32 %v7979_v2, %v7778_v3 }
 0x528   : > { %4611 = vmatprep.subr.bf16.mxu1 %v7881_v42 }
 0x52f   : > { %4612 = vmatpush1.bf16.xpose.msra.mxu1 %v7876_v4 }
 0x530   : > { %4613 = vmatprep.subr.bf16.mxu1 %v7862_v56 }
 0x537   : > { %4614 = vmatpush1.bf16.xpose.msra.mxu1 %v7858_v43 }
 0x538   : > { %4615 = vmatprep.subr.bf16.mxu1 %v7848_v49  ;;  %v4029_v49 = vmax.f32 %v3516_v5, 0.0 }
 0x53f   : > { %4616 = vmatpush1.bf16.xpose.msra.mxu1 %v7840_v29  ;;  %v4025_v29 = vmax.f32 %v3512_v22, 0.0 }
 0x540   : > { %4617 = vmatprep.subr.bf16.mxu1 %v7832_v11  ;;  %v3514_v11 = vadd.f32 %v3513_v59, %v6865_v51 }
 0x541   : > { %v4285_v43 = vpack.c.bf16 %v4029_v49, %v4025_v29 }
 0x547   : > { %4618 = vmatpush1.bf16.xpose.msra.mxu1 %v7828_v0  ;;  %v3510_v0 = vadd.f32 %v3509_v19, %v6865_v51  ;;  %v8635_v19 = vld [vmem:[#allocation17_spill] sm:$0xff] }
 0x548   : > { %4619 = vmatprep.subr.bf16.mxu1 %v7820_v20 }
 0x54f   : > { %4620 = vmatpush1.bf16.xpose.msra.mxu1 %v7816_v39  ;;  %v4028_v39 = vmax.f32 %v3514_v11, 0.0 }
 0x550   : > { %4621 = vmatprep.subr.bf16.mxu1 %v7808_v36  ;;  %v4024_v36 = vmax.f32 %v3510_v0, 0.0 }
 0x552   : > { %v4284_v20 = vpack.c.bf16 %v4028_v39, %v4024_v36 }
 0x557   : > { %4622 = vmatpush1.bf16.xpose.msra.mxu1 %v7804_v24  ;;  %v4439_v24 = vadd.f32 %v7976_v40, %v7778_v3 }
 0x558   : > { %4623 = vmatprep.subr.bf16.mxu1 %v7796_v1 }
 0x55f   : > { %4624 = vmatpush1.bf16.xpose.msra.mxu1 %v7792_v50 }
 0x560   : > { %4625 = vmatprep.subr.bf16.mxu1 %v4285_v43 }
 0x561   : > { %v4602_v8 = vpop.f32.mrf.mxu0 }
 0x562   : > { %v4603_v0 = vadd.f32 %v4602_v8, %v7778_v3 }
 0x563   : > { %v4604_v10 = vpop.f32.mrf.mxu0 }
 0x564   : > { %v4605_v36 = vadd.f32 %v4604_v10, %v7778_v3 }
 0x565   : > { %v4606_v15 = vpop.f32.mrf.mxu0 }
 0x566   : > { %v4479_v56 = vpop.f32.mrf.mxu1 }
 0x567   : > { %v4480_v1 = vadd.f32 %v4479_v56, %v4439_v24  ;;  %4626 = vmatpush2.bf16.xpose.msra.mxu1 %v4284_v20 }
 0x568   : > { %v4481_v4 = vpop.f32.mrf.mxu1  ;;  %4627 = vmatprep.subr.bf16.mxu1 %v7969_v44 }
 0x569   : > { %v4652_v42 = vsub.f32 0.0, %v4480_v1  ;;  %v4482_v51 = vadd.f32 %v4481_v4, %v4441_v7 }
 0x56a   : > { %v4483_v60 = vpop.f32.mrf.mxu1 }
 0x56b   : > { %v4662_v50 = vmul.f32 1.442695, %v4652_v42  ;;  %v4653_v33 = vsub.f32 0.0, %v4482_v51 }
 0x56c   : > { %v4484_v45 = vpop.f32.mrf.mxu1 }
 0x56d   : > { %5121 = vpow2.f32 %v4662_v50  ;;  %v4664_v25 = vmul.f32 1.442695, %v4653_v33 }
 0x56f   : > { %5123 = vpow2.f32 %v4664_v25  ;;  %4628 = vmatpush2.bf16.xpose.msra.mxu1 %v7967_v32  ;;  %v5210_v32 = vmov 1966171168  }
 0x570   : > { %4629 = vmatprep.subr.bf16.mxu1 %v7955_v55  ;;  %v4703_v46 = vunpack.c.l.s4 %v5210_v32  ;;  %v4607_v55 = vpop.f32.mrf.mxu0 }
 0x577   : > { %4630 = vmatpush2.bf16.xpose.msra.mxu1 %v7953_v26  ;;  %v4704_v26 = vunpack.c.0.s8 %v4703_v46 }
 0x578   : > { %4631 = vmatprep.subr.bf16.mxu1 %v7945_v58  ;;  %v8629_v58 = vld [vmem:[#allocation93_spill] sm:$0xff] }
 0x579   : > { %v8040_v57 = vsub.s32 %v4704_v26, %v8630_v9 }
 0x57a   : > { %v5122_v12 = vpop.eup %5121 }
 0x57b   : > { %v4676_v31 = vadd.f32 1.0, %v5122_v12 }
 0x57c   : > { %v5124_v44 = vpop.eup %5123 }
 0x57d   : > { %v4677_v41 = vadd.f32 1.0, %v5124_v44  ;;  %5125 = vrcp.f32 %v4676_v31 }
 0x57f   : > { %5127 = vrcp.f32 %v4677_v41  ;;  %4632 = vmatpush2.bf16.xpose.msra.mxu1 %v7943_v23  ;;  %v8631_v23 = vld [vmem:[#allocation92_spill] sm:$0xff] }
 0x580   : > { %4633 = vmatprep.subr.bf16.mxu1 %v7935_v38  ;;  %v8632_v38 = vld [vmem:[#allocation11_spill] sm:$0xff] }
 0x581   : > { %v8634_v35 = vcombine.low %v8632_v38, %v8633_v53 }
 0x583   : > { %v4708_v6 = vrot.slane %v8634_v35, %v8040_v57 }
 0x587   : > { %4634 = vmatpush2.bf16.xpose.msra.mxu1 %v7933_v14 }
 0x588   : > { %4635 = vmatprep.subr.bf16.mxu1 %v8629_v58 }
 0x58a   : > { %v5126_v48 = vpop.eup %5125 }
 0x58c   : > { %v5128_v40 = vpop.eup %5127 }
 0x58d   : > { %v4699_v2 = vcombine.low %v5126_v48, %v5128_v40 }
 0x58f   : > { %4636 = vmatpush2.bf16.xpose.msra.mxu1 %v8631_v23  ;;  %v4715_v61 = vrot.slane %v4699_v2, %v8040_v57 }
 0x590   : > { %4637 = vmatprep.subr.bf16.mxu1 %v8635_v19 }
 0x591   : > { %v4730_v14 = vcombine.low %v4708_v6, %v4715_v61 }
 0x593   : > { %v4738_v10 = vrot.slane %v4730_v14, %v8040_v57 }
 0x597   : > { %4638 = vmatpush2.bf16.xpose.msra.mxu1 %v8636_v30 }
 0x598   : > { %4639 = vmatprep.subr.bf16.mxu1 %v8637_v13 }
 0x59f   : > { %4640 = vmatpush2.bf16.xpose.msra.mxu1 %v8638_v28 }
 0x5a6   : > { %4642 = vmatmul.mubr.bf16.vlgmr.msra.gmra.mxu1 %v8611_v63 }
 0x5e6   : > { %v4561_v34 = vpop.f32.mrf.mxu1 }
 0x5e7   : > { %v4562_v59 = vadd.f32 %v4561_v34, %v4521_v16 }
 0x5e8   : > { %v4563_v18 = vpop.f32.mrf.mxu1 }
 0x5e9   : > { %v4654_v54 = vsub.f32 0.0, %v4562_v59  ;;  %v4564_v27 = vadd.f32 %v4563_v18, %v4523_v47 }
 0x5ea   : > { %v4565_v17 = vpop.f32.mrf.mxu1 }
 0x5eb   : > { %v4666_v62 = vmul.f32 1.442695, %v4654_v54  ;;  %v4655_v21 = vsub.f32 0.0, %v4564_v27 }
 0x5ec   : > { %v4566_v5 = vpop.f32.mrf.mxu1 }
 0x5ed   : > { %5129 = vpow2.f32 %v4666_v62  ;;  %v4668_v22 = vmul.f32 1.442695, %v4655_v21 }
 0x5ef   : > { %5131 = vpow2.f32 %v4668_v22 }
 0x5fa   : > { %v5130_v49 = vpop.eup %5129 }
 0x5fb   : > { %v4678_v63 = vadd.f32 1.0, %v5130_v49 }
 0x5fc   : > { %v5132_v29 = vpop.eup %5131 }
 0x5fd   : > { %5133 = vrcp.f32 %v4678_v63  ;;  %v4679_v52 = vadd.f32 1.0, %v5132_v29 }
 0x5ff   : > { %5135 = vrcp.f32 %v4679_v52 }
 0x60a   : > { %v5134_v11 = vpop.eup %5133 }
 0x60c   : > { %v5136_v37 = vpop.eup %5135 }
 0x60d   : > { %v4700_v43 = vcombine.low %v5134_v11, %v5136_v37 }
 0x60f   : > { %v4722_v44 = vrot.slane %v4700_v43, %v8040_v57 }
 0x666   : > { %v4643_v39 = vpop.f32.mrf.mxu1 }
 0x667   : > { %v4644_v20 = vadd.f32 %v4643_v39, %v4603_v0 }
 0x668   : > { %v4645_v24 = vpop.f32.mrf.mxu1 }
 0x669   : > { %v4656_v56 = vsub.f32 0.0, %v4644_v20  ;;  %v4646_v7 = vadd.f32 %v4645_v24, %v4605_v36 }
 0x66a   : > { %v4647_v1 = vpop.f32.mrf.mxu1 }
 0x66b   : > { %v4670_v4 = vmul.f32 1.442695, %v4656_v56  ;;  %v4657_v42 = vsub.f32 0.0, %v4646_v7 }
 0x66c   : > { %v4648_v51 = vpop.f32.mrf.mxu1 }
 0x66d   : > { %5137 = vpow2.f32 %v4670_v4  ;;  %v4672_v60 = vmul.f32 1.442695, %v4657_v42 }
 0x66f   : > { %5139 = vpow2.f32 %v4672_v60 }
 0x67a   : > { %v5138_v50 = vpop.eup %5137 }
 0x67b   : > { %v4680_v33 = vadd.f32 1.0, %v5138_v50 }
 0x67c   : > { %v5140_v45 = vpop.eup %5139 }
 0x67d   : > { %v4681_v25 = vadd.f32 1.0, %v5140_v45  ;;  %5141 = vrcp.f32 %v4680_v33 }
 0x67f   : > { %5143 = vrcp.f32 %v4681_v25 }
 0x68a   : > { %v5142_v3 = vpop.eup %5141 }
 0x68c   : > { %v5144_v12 = vpop.eup %5143 }
 0x68d   : > { %v4701_v31 = vcombine.low %v5142_v3, %v5144_v12 }
 0x68f   : > { %v4729_v41 = vrot.slane %v4701_v31, %v8040_v57 }
 0x691   : > { %v4731_v8 = vcombine.low %v4722_v44, %v4729_v41 }
 0x693   : > { %v4745_v15 = vrot.slane %v4731_v8, %v8040_v57 }
 0x695   : > { %v4746_v32 = vcombine.low %v4738_v10, %v4745_v15 }
 0x697   : > { %4748 = vst [vmem:[%s274_s30] sm:$0xff] %v4746_v32 }
 0x698   : > { %5160 = shalt.err (!%p5157_p3)
}
 0x699   : > { %s5161_s20 = scalar_lea.hbm %s4762_s15, 128  ;;  %s5165_s23 = scalar_lea.hbm %s8104_s7, 256 }
 0x69a   : > { %p5162_p4 = scmp.ne.s32.totalorder %s4762_s15, %s5161_s20  ;;  %p5166_p9 = scmp.lt.s32.totalorder %s4762_s15, %s8104_s7 }
 0x69b   : > { %p5167_p10 = scmp.lt.s32.totalorder %s5165_s23, %s5161_s20 }
 0x69c   : > { %p5163_p7 = pnand %p5162_p4, %p5290_p5 }
 0x69d   : > { %p5168_p11 = por %p5167_p10, %p5166_p9 }
 0x69e   : > { %p5164_p8 = pneg %p5163_p7 }
 0x6a0   : > { %p5169_p12 = pnand %p5168_p11, %p5164_p8 }
 0x6a2   : > { %5172 = shalt.err (!%p5169_p12)
}
 0x6a3   : > { %4969 = dma.vmem_to_hbm [thread:$0]  (%p5290_p5), %s4765_s6, 128, %s4762_s15, %s4750_s16  }
 0x6a4 PF: > { %p4975_p13 = scmp.ge.s32.totalorder %s5207_s29, 2  ;;  %s4776_s30 = sand.u32 1, %s5195_s26  }
 0x6a5   : > { %s4777_s10 = scalar_lea.sflag [#allocation4], %s4776_s30 }
 0x6a6   : > { %p4972_p0 = pnand %p4975_p13, %p5294_p6 }
 0x6a8   : > { %p4973_p1 = pneg %p4972_p0 }
 0x6aa   : > { %5190 = dma.done.wait (%p4973_p1), %s4777_s10, 128  }
 0x6ab   : > { %5192 = vsyncadd (%p4973_p1), %s4777_s10, 4294967168  ;;  %p19_p2 = scmp.ge.s32.totalorder %s5278_s8, 4   ;;  %s8639_s26 = smov %s5199_s27 }
 0x6ac   : > { %s8640_s27 = smov %s5203_s28  ;;  %s8641_s28 = smov %s5288_s11 }
 0x6ad   : > { %s8642_s29 = smov %s5278_s8  ;;  %21 = sbr.rel (!%p19_p2) target bundleno = 6 (0x6), region = 83 }
 0x6b2   :  { %4782 = vsyncpa [#allocation4], 1 }
 0x6b3   :  { %4784 = vsyncpa [#allocation4 + $0x1], 1 }

</bundles_post_ra>
